<compile_context>
chip_gen: v5e
topology: v5e:2x2
jax: 0.10.0
libtpu: 0.0.40
codegen_flags: <defaults>
</compile_context>

<pallas_src>
from functools import partial

import jax
import jax.numpy as jnp
from jax import lax
from jax.experimental import pallas as pl
from jax.experimental.pallas import tpu as pltpu


_VMEM_LIMIT = 48 * 1024 * 1024  # cap below v7x's 64 MiB physical VMEM


def _pick_tile(n, target, align=8):
    """Largest t <= target with n % t == 0 and (t % align == 0 or t == n)."""
    for t in range(min(n, target), 0, -1):
        if n % t == 0 and (t % align == 0 or t == n):
            return t
    return n


# ----------------------------------------------------------------------------
# Kernel 1: conv1 (1x1) + conv_f folded with conv4
# ----------------------------------------------------------------------------
def _head_kernel(x_ref, w1_ref, b1_ref, wf4_ref, bf4_ref, c1_ref, cf4_ref):
    c1 = jnp.dot(x_ref[...], w1_ref[...],
                 preferred_element_type=jnp.float32) + b1_ref[...]
    c1_ref[...] = c1.astype(c1_ref.dtype)
    cf4 = jnp.dot(c1, wf4_ref[...],
                  preferred_element_type=jnp.float32) + bf4_ref[...]
    cf4_ref[...] = cf4.astype(cf4_ref.dtype)


def head_conv1_convf4(x2d, w1, b1, wf4, bf4, *, tile_m=1024):
    M, nin = x2d.shape
    f = w1.shape[1]
    nf = wf4.shape[1]
    tm = _pick_tile(M, tile_m)
    return pl.pallas_call(
        _head_kernel,
        out_shape=(jax.ShapeDtypeStruct((M, f), jnp.float32),
                   jax.ShapeDtypeStruct((M, nf), jnp.float32)),
        grid_spec=pltpu.PrefetchScalarGridSpec(
            num_scalar_prefetch=0,
            grid=(M // tm,),
            in_specs=[
                pl.BlockSpec((tm, nin), lambda i: (i, 0)),
                pl.BlockSpec((nin, f), lambda i: (0, 0)),
                pl.BlockSpec((1, f), lambda i: (0, 0)),
                pl.BlockSpec((f, nf), lambda i: (0, 0)),
                pl.BlockSpec((1, nf), lambda i: (0, 0)),
            ],
            out_specs=[
                pl.BlockSpec((tm, f), lambda i: (i, 0)),
                pl.BlockSpec((tm, nf), lambda i: (i, 0)),
            ],
        ),
        compiler_params=pltpu.CompilerParams(
            dimension_semantics=("parallel",),
            vmem_limit_bytes=_VMEM_LIMIT),
    )(x2d, w1, b1.reshape(1, f), wf4, bf4.reshape(1, nf))


# ----------------------------------------------------------------------------
# Kernel 2: conv2 (3x3 s2) + max-pool 7x7/3 + conv3(+conv4 fold) + W-upsample
# ----------------------------------------------------------------------------
def _mid_kernel(c1p_ref, w2_ref, b2_ref, w34_ref, b34_ref, ww_ref,
                o_ref, c1_sc, colp_sc, pad_sc, *, oh2, ow2, ph, pw, f):
    nf = b34_ref.shape[1]

    # conv2: 3x3 stride-2 VALID via 9 shifted matmuls on the phase-split input.
    def conv2_row(i, carry):
        acc = jnp.zeros((ow2, f), jnp.float32) + b2_ref[...]
        for dh in range(3):
            for dw in range(3):
                phase = (dh % 2) * 2 + (dw % 2)
                j0 = dw // 2
                sl = c1p_ref[0, phase, i + dh // 2, j0:j0 + ow2, :]
                acc = acc + jnp.dot(sl, w2_ref[dh * 3 + dw],
                                    preferred_element_type=jnp.float32)
        c1_sc[i] = acc
        return carry

    if oh2 <= 32:
        # Static unroll: no dynamic addressing, better LLO scheduling.
        for i in range(oh2):
            conv2_row(i, 0)
    else:
        # Rolled loop keeps code size bounded for large images.
        lax.fori_loop(0, oh2, conv2_row, 0)

    # separable 7x7 / stride-3 max pool: width windows then height windows.
    for j in range(pw):
        win = c1_sc[:, 3 * j:3 * j + 7, :]            # (oh2, 7, f)
        colp_sc[j] = jnp.max(win, axis=1)             # (oh2, f)

    pad_sc[...] = jnp.zeros(pad_sc.shape, pad_sc.dtype)
    for p in range(ph):
        win = colp_sc[:, 3 * p:3 * p + 7, :]          # (pw, 7, f)
        pad_sc[p + 1, 1:pw + 1, :] = jnp.max(win, axis=1)

    # conv3 (3x3, pad 1) with conv4 folded in + width half of bilinear upsample.
    for p in range(ph):
        acc = jnp.zeros((pw, nf), jnp.float32) + b34_ref[...]
        for dh in range(3):
            for dw in range(3):
                sl = pad_sc[p + dh, dw:dw + pw, :]    # (pw, f)
                acc = acc + jnp.dot(sl, w34_ref[dh * 3 + dw],
                                    preferred_element_type=jnp.float32)
        o_ref[0, p, :, :] = jnp.dot(ww_ref[...], acc,
                                    preferred_element_type=jnp.float32)


def mid_conv2_pool_conv3_upw(c1p, w2, b2, w34, b34, ww, *, oh2, ow2, ph, pw):
    B, _, H2, W2, f = c1p.shape
    nf = w34.shape[2]
    W = ww.shape[0]
    kern = partial(_mid_kernel, oh2=oh2, ow2=ow2, ph=ph, pw=pw, f=f)
    # TODO(synk): spatially tile this kernel for very large H*W (block is per-batch).
    return pl.pallas_call(
        kern,
        out_shape=jax.ShapeDtypeStruct((B, ph, W, nf), jnp.float32),
        grid_spec=pltpu.PrefetchScalarGridSpec(
            num_scalar_prefetch=0,
            grid=(B,),
            in_specs=[
                pl.BlockSpec((1, 4, H2, W2, f), lambda b: (b, 0, 0, 0, 0)),
                pl.BlockSpec((9, f, f), lambda b: (0, 0, 0)),
                pl.BlockSpec((1, f), lambda b: (0, 0)),
                pl.BlockSpec((9, f, nf), lambda b: (0, 0, 0)),
                pl.BlockSpec((1, nf), lambda b: (0, 0)),
                pl.BlockSpec((W, pw), lambda b: (0, 0)),
            ],
            out_specs=pl.BlockSpec((1, ph, W, nf), lambda b: (b, 0, 0, 0)),
            scratch_shapes=[
                pltpu.VMEM((oh2, ow2, f), jnp.float32),
                pltpu.VMEM((pw, oh2, f), jnp.float32),
                pltpu.VMEM((ph + 2, pw + 2, f), jnp.float32),
            ],
        ),
        compiler_params=pltpu.CompilerParams(
            dimension_semantics=("parallel",),
            vmem_limit_bytes=_VMEM_LIMIT),
    )(c1p, w2, b2.reshape(1, f), w34, b34.reshape(1, nf), ww)


# ----------------------------------------------------------------------------
# Kernel 3: height upsample + bias + sigmoid + gating (lane-dense W*nf slabs)
# ----------------------------------------------------------------------------
def _tail_kernel(wh_ref, c3w4_ref, cf4_ref, b4_ref, x_ref, o_ref):
    up = jnp.dot(wh_ref[...], c3w4_ref[0], preferred_element_type=jnp.float32)
    c4 = up + cf4_ref[0] + b4_ref[...]
    o_ref[0] = (x_ref[0] * jax.nn.sigmoid(c4)).astype(o_ref.dtype)


def tail_upsample_gate(wh, c3w4, cf4, b4t, x3d, *, tile_h=64):
    H, ph = wh.shape
    B = x3d.shape[0]
    WNF = x3d.shape[2]
    th = _pick_tile(H, tile_h)
    return pl.pallas_call(
        _tail_kernel,
        out_shape=jax.ShapeDtypeStruct((B, H, WNF), jnp.float32),
        grid_spec=pltpu.PrefetchScalarGridSpec(
            num_scalar_prefetch=0,
            grid=(B, H // th),
            in_specs=[
                pl.BlockSpec((th, ph), lambda b, t: (t, 0)),
                pl.BlockSpec((1, ph, WNF), lambda b, t: (b, 0, 0)),
                pl.BlockSpec((1, th, WNF), lambda b, t: (b, t, 0)),
                pl.BlockSpec((1, WNF), lambda b, t: (0, 0)),
                pl.BlockSpec((1, th, WNF), lambda b, t: (b, t, 0)),
            ],
            out_specs=pl.BlockSpec((1, th, WNF), lambda b, t: (b, t, 0)),
        ),
        compiler_params=pltpu.CompilerParams(
            dimension_semantics=("parallel", "parallel"),
            vmem_limit_bytes=_VMEM_LIMIT),
    )(wh, c3w4, cf4, b4t, x3d)


# ----------------------------------------------------------------------------
# Glue (reshapes, phase split, separable bilinear weights, weight folding)
# ----------------------------------------------------------------------------
def bilinear_matrix(in_size, out_size):
    """(out, in) 1-D weights reproducing F.interpolate(bilinear, align_corners=False)."""
    scale = in_size / out_size
    o = jnp.arange(out_size, dtype=jnp.float32)
    src = jnp.clip((o + 0.5) * scale - 0.5, 0.0, None)
    i0 = jnp.clip(jnp.floor(src).astype(jnp.int32), 0, in_size - 1)
    i1 = jnp.minimum(i0 + 1, in_size - 1)
    w1 = src - i0.astype(jnp.float32)
    w0 = 1.0 - w1
    m = jnp.zeros((out_size, in_size), jnp.float32)
    m = m.at[jnp.arange(out_size), i0].add(w0)
    m = m.at[jnp.arange(out_size), i1].add(w1)
    return m


def esa_forward_nhwc(x, params):
    B, H, W, nf = x.shape
    f = params["w1"].shape[1]
    assert H % 2 == 0 and W % 2 == 0, "stride-2 phase split assumes even H, W"
    # TODO(synk): support odd H/W by padding one row/col before the phase split.

    oh2, ow2 = (H - 3) // 2 + 1, (W - 3) // 2 + 1
    ph, pw = (oh2 - 7) // 3 + 1, (ow2 - 7) // 3 + 1

    # Fold conv4 into conv_f and conv3 (all linear, no nonlinearity in between):
    #   cf@w4 == c1_@(wf@w4) + bf@w4 ,  c3@w4 == v_max conv (w3@w4) + b3@w4
    wf4 = params["wf"] @ params["w4"]
    bf4 = params["bf"] @ params["w4"]
    w34 = params["w3"].reshape(9, f, f) @ params["w4"]     # (9, f, nf)
    b34 = params["b3"] @ params["w4"]                      # (nf,)

    # 1) conv1 + conv_f(+conv4 fold), tiled & pipelined over B*H*W rows.
    c1_flat, cf4_flat = head_conv1_convf4(
        x.reshape(B * H * W, nf), params["w1"], params["b1"], wf4, bf4)

    # stride-2 phase split of c1_ so conv2 becomes 9 unit-stride shifted matmuls.
    c1p = (c1_flat.reshape(B, H // 2, 2, W // 2, 2, f)
           .transpose(0, 2, 4, 1, 3, 5)
           .reshape(B, 4, H // 2, W // 2, f))

    # separable bilinear weights (align_corners=False): no H*W x h*w Kron matrix.
    wh = bilinear_matrix(ph, H)   # (H, ph)
    ww = bilinear_matrix(pw, W)   # (W, pw)

    # 2) conv2 + 7x7/3 max-pool + conv3(@w4 folded) + width upsample.
    c3w4 = mid_conv2_pool_conv3_upw(
        c1p, params["w2"].reshape(9, f, f), params["b2"],
        w34, b34, ww, oh2=oh2, ow2=ow2, ph=ph, pw=pw)      # (B, ph, W, nf)

    # 3) height upsample + bias + sigmoid + gating on lane-dense (rows, W*nf).
    b4t = jnp.tile(params["b4"], W).reshape(1, W * nf)
    out = tail_upsample_gate(
        wh,
        c3w4.reshape(B, ph, W * nf),
        cf4_flat.reshape(B, H, W * nf),
        b4t,
        x.reshape(B, H, W * nf))
    return out.reshape(B, H, W, nf)


def esa_forward_nchw(x_nchw, params):
    x = jnp.transpose(x_nchw, (0, 2, 3, 1))
    y = esa_forward_nhwc(x, params)
    return jnp.transpose(y, (0, 3, 1, 2))


# ----------------------------------------------------------------------------
# Pure-JAX reference (for correctness checking)
# ----------------------------------------------------------------------------
def _bilinear_ref(x, out_h, out_w):
    B, H, W, C = x.shape

    def coords(out, inp):
        o = jnp.arange(out, dtype=jnp.float32)
        src = jnp.clip((o + 0.5) * (inp / out) - 0.5, 0.0, None)
        i0 = jnp.clip(jnp.floor(src).astype(jnp.int32), 0, inp - 1)
        i1 = jnp.minimum(i0 + 1, inp - 1)
        w1 = src - i0.astype(jnp.float32)
        return i0, i1, w1

    h0, h1, lh = coords(out_h, H)
    w0, w1, lw = coords(out_w, W)
    lw_ = lw[None, None, :, None]
    lh_ = lh[None, :, None, None]
    top = x[:, h0][:, :, w0] * (1 - lw_) + x[:, h0][:, :, w1] * lw_
    bot = x[:, h1][:, :, w0] * (1 - lw_) + x[:, h1][:, :, w1] * lw_
    return top * (1 - lh_) + bot * lh_


def esa_reference_nhwc(x, params):
    dn = ("NHWC", "HWIO", "NHWC")

    def conv1x1(v, w, b):
        return jnp.einsum("bhwc,cd->bhwd", v, w) + b

    c1_ = conv1x1(x, params["w1"], params["b1"])
    c1 = jax.lax.conv_general_dilated(c1_, params["w2"], (2, 2), "VALID",
                                      dimension_numbers=dn) + params["b2"]
    v_max = jax.lax.reduce_window(c1, -jnp.inf, jax.lax.max,
                                  (1, 7, 7, 1), (1, 3, 3, 1), "VALID")
    c3 = jax.lax.conv_general_dilated(v_max, params["w3"], (1, 1),
                                      ((1, 1), (1, 1)),
                                      dimension_numbers=dn) + params["b3"]
    c3u = _bilinear_ref(c3, x.shape[1], x.shape[2])
    cf = conv1x1(c1_, params["wf"], params["bf"])
    c4 = conv1x1(c3u + cf, params["w4"], params["b4"])
    return x * jax.nn.sigmoid(c4)


# ----------------------------------------------------------------------------
# Deterministic parameter construction (synthetic, not a checkpoint load)
# ----------------------------------------------------------------------------
def make_params(key, n_feats, f):
    ks = jax.random.split(key, 10)
    s = 0.1
    return {
        "w1": s * jax.random.normal(ks[0], (n_feats, f), jnp.float32),
        "b1": s * jax.random.normal(ks[1], (f,), jnp.float32),
        "w2": s * jax.random.normal(ks[2], (3, 3, f, f), jnp.float32),
        "b2": s * jax.random.normal(ks[3], (f,), jnp.float32),
        "w3": s * jax.random.normal(ks[4], (3, 3, f, f), jnp.float32),
        "b3": s * jax.random.normal(ks[5], (f,), jnp.float32),
        "wf": s * jax.random.normal(ks[6], (f, f), jnp.float32),
        "bf": s * jax.random.normal(ks[7], (f,), jnp.float32),
        "w4": s * jax.random.normal(ks[8], (f, n_feats), jnp.float32),
        "b4": s * jax.random.normal(ks[9], (n_feats,), jnp.float32),
    }


if __name__ == "__main__":
    key = jax.random.PRNGKey(0)
    k_x, k_p = jax.random.split(key)

    B, n_feats, H, W = 2, 16, 32, 32   # H=W=32 so the bilinear path is non-trivial
    f = 8                              # esa_channels

    x_nchw = jax.random.normal(k_x, (B, n_feats, H, W), jnp.float32)
    params = make_params(k_p, n_feats, f)

    fwd = jax.jit(esa_forward_nchw)
    out = jax.block_until_ready(fwd(x_nchw, params))

    # sanity check against a pure-JAX reference of the same forward pass
    x_nhwc = jnp.transpose(x_nchw, (0, 2, 3, 1))
    ref = jnp.transpose(esa_reference_nhwc(x_nhwc, params), (0, 3, 1, 2))
    assert out.shape == x_nchw.shape
    err = float(jnp.max(jnp.abs(out - ref)))
    assert jnp.allclose(out, ref, atol=1e-4, rtol=1e-4), err

    print("KERNEL_OK")
</pallas_src>

<mosaic_0001>
module attributes {stable_mosaic.version = 11 : i64} {
  func.func @_head_kernel(%arg0: i32, %arg1: memref<1024x16xf32, #tpu.memory_space<vmem>>, %arg2: memref<16x8xf32, #tpu.memory_space<vmem>>, %arg3: memref<1x8xf32, #tpu.memory_space<vmem>>, %arg4: memref<8x16xf32, #tpu.memory_space<vmem>>, %arg5: memref<1x16xf32, #tpu.memory_space<vmem>>, %arg6: memref<1024x8xf32, #tpu.memory_space<vmem>>, %arg7: memref<1024x16xf32, #tpu.memory_space<vmem>>) attributes {dimension_semantics = [#tpu.dimension_semantics<parallel>], iteration_bounds = array<i64: 2>, scalar_prefetch = 0 : i64, scratch_operands = 0 : i64, tpu.core_type = #tpu.core_type<tc>, window_params = [{transform_indices = @transform_0, window_bounds = array<i64: 1024, 16>}, {pipeline_mode = #tpu.pipeline_mode<synchronous>, transform_indices = @transform_1, window_bounds = array<i64: 16, 8>}, {pipeline_mode = #tpu.pipeline_mode<synchronous>, transform_indices = @transform_2, window_bounds = array<i64: 1, 8>}, {pipeline_mode = #tpu.pipeline_mode<synchronous>, transform_indices = @transform_3, window_bounds = array<i64: 8, 16>}, {pipeline_mode = #tpu.pipeline_mode<synchronous>, transform_indices = @transform_4, window_bounds = array<i64: 1, 16>}, {transform_indices = @transform_5, window_bounds = array<i64: 1024, 8>}, {transform_indices = @transform_6, window_bounds = array<i64: 1024, 16>}]} {
    %c0 = arith.constant 0 : index
    %c0_0 = arith.constant 0 : index
    %0 = vector.load %arg1[%c0, %c0_0] : memref<1024x16xf32, #tpu.memory_space<vmem>>, vector<1024x16xf32>
    %c0_1 = arith.constant 0 : index
    %c0_2 = arith.constant 0 : index
    %1 = vector.load %arg2[%c0_1, %c0_2] : memref<16x8xf32, #tpu.memory_space<vmem>>, vector<16x8xf32>
    %cst = arith.constant dense<0.000000e+00> : vector<1024x8xf32>
    %2 = tpu.matmul %0, %1, %cst {dimension_numbers = #tpu.dot_dimension_numbers<[1], [0], [0], [1], [0, 0, 1, 1], [], []>} : vector<1024x16xf32>, vector<16x8xf32>, vector<1024x8xf32> -> vector<1024x8xf32>
    %c0_3 = arith.constant 0 : index
    %c0_4 = arith.constant 0 : index
    %3 = vector.load %arg3[%c0_3, %c0_4] : memref<1x8xf32, #tpu.memory_space<vmem>>, vector<1x8xf32>
    %4 = vector.broadcast %3 : vector<1x8xf32> to vector<1024x8xf32>
    %5 = arith.addf %2, %4 : vector<1024x8xf32>
    %c0_5 = arith.constant 0 : index
    %c0_6 = arith.constant 0 : index
    %6 = vector.load %arg6[%c0_5, %c0_6] : memref<1024x8xf32, #tpu.memory_space<vmem>>, vector<1024x8xf32>
    tpu.vector_store %arg6[%c0_5, %c0_6], %5 {strides = array<i32>} : memref<1024x8xf32, #tpu.memory_space<vmem>>, vector<1024x8xf32>,
    %c0_7 = arith.constant 0 : index
    %c0_8 = arith.constant 0 : index
    %7 = vector.load %arg4[%c0_7, %c0_8] : memref<8x16xf32, #tpu.memory_space<vmem>>, vector<8x16xf32>
    %cst_9 = arith.constant dense<0.000000e+00> : vector<1024x16xf32>
    %8 = tpu.matmul %5, %7, %cst_9 {dimension_numbers = #tpu.dot_dimension_numbers<[1], [0], [0], [1], [0, 0, 1, 1], [], []>} : vector<1024x8xf32>, vector<8x16xf32>, vector<1024x16xf32> -> vector<1024x16xf32>
    %c0_10 = arith.constant 0 : index
    %c0_11 = arith.constant 0 : index
    %9 = vector.load %arg5[%c0_10, %c0_11] : memref<1x16xf32, #tpu.memory_space<vmem>>, vector<1x16xf32>
    %10 = vector.broadcast %9 : vector<1x16xf32> to vector<1024x16xf32>
    %11 = arith.addf %8, %10 : vector<1024x16xf32>
    %c0_12 = arith.constant 0 : index
    %c0_13 = arith.constant 0 : index
    %12 = vector.load %arg7[%c0_12, %c0_13] : memref<1024x16xf32, #tpu.memory_space<vmem>>, vector<1024x16xf32>
    tpu.vector_store %arg7[%c0_12, %c0_13], %11 {strides = array<i32>} : memref<1024x16xf32, #tpu.memory_space<vmem>>, vector<1024x16xf32>,
    return
  }
  func.func @transform_0(%arg0: i32) -> (i32, i32) {
    %c0_i32 = arith.constant 0 : i32
    %c0_i32_0 = arith.constant 0 : i32
    return %arg0, %c0_i32 : i32, i32
  }
  func.func @transform_1(%arg0: i32) -> (i32, i32) {
    %c0_i32 = arith.constant 0 : i32
    %c0_i32_0 = arith.constant 0 : i32
    %c0_i32_1 = arith.constant 0 : i32
    return %c0_i32, %c0_i32_0 : i32, i32
  }
  func.func @transform_2(%arg0: i32) -> (i32, i32) {
    %c0_i32 = arith.constant 0 : i32
    %c0_i32_0 = arith.constant 0 : i32
    %c0_i32_1 = arith.constant 0 : i32
    return %c0_i32, %c0_i32_0 : i32, i32
  }
  func.func @transform_3(%arg0: i32) -> (i32, i32) {
    %c0_i32 = arith.constant 0 : i32
    %c0_i32_0 = arith.constant 0 : i32
    %c0_i32_1 = arith.constant 0 : i32
    return %c0_i32, %c0_i32_0 : i32, i32
  }
  func.func @transform_4(%arg0: i32) -> (i32, i32) {
    %c0_i32 = arith.constant 0 : i32
    %c0_i32_0 = arith.constant 0 : i32
    %c0_i32_1 = arith.constant 0 : i32
    return %c0_i32, %c0_i32_0 : i32, i32
  }
  func.func @transform_5(%arg0: i32) -> (i32, i32) {
    %c0_i32 = arith.constant 0 : i32
    %c0_i32_0 = arith.constant 0 : i32
    return %arg0, %c0_i32 : i32, i32
  }
  func.func @transform_6(%arg0: i32) -> (i32, i32) {
    %c0_i32 = arith.constant 0 : i32
    %c0_i32_0 = arith.constant 0 : i32
    return %arg0, %c0_i32 : i32, i32
  }
}

module attributes {stable_mosaic.version = 11 : i64} {
  func.func @_mid_kernel(%arg0: i32, %arg1: memref<1x4x16x16x8xf32, #tpu.memory_space<vmem>>, %arg2: memref<9x8x8xf32, #tpu.memory_space<vmem>>, %arg3: memref<1x8xf32, #tpu.memory_space<vmem>>, %arg4: memref<9x8x16xf32, #tpu.memory_space<vmem>>, %arg5: memref<1x16xf32, #tpu.memory_space<vmem>>, %arg6: memref<32x3xf32, #tpu.memory_space<vmem>>, %arg7: memref<1x3x32x16xf32, #tpu.memory_space<vmem>>, %arg8: memref<15x15x8xf32, #tpu.memory_space<vmem>>, %arg9: memref<3x15x8xf32, #tpu.memory_space<vmem>>, %arg10: memref<5x5x8xf32, #tpu.memory_space<vmem>>) attributes {dimension_semantics = [#tpu.dimension_semantics<parallel>], iteration_bounds = array<i64: 2>, scalar_prefetch = 0 : i64, scratch_operands = 3 : i64, tpu.core_type = #tpu.core_type<tc>, window_params = [{transform_indices = @transform_0, window_bounds = array<i64: 1, 4, 16, 16, 8>}, {pipeline_mode = #tpu.pipeline_mode<synchronous>, transform_indices = @transform_1, window_bounds = array<i64: 9, 8, 8>}, {pipeline_mode = #tpu.pipeline_mode<synchronous>, transform_indices = @transform_2, window_bounds = array<i64: 1, 8>}, {pipeline_mode = #tpu.pipeline_mode<synchronous>, transform_indices = @transform_3, window_bounds = array<i64: 9, 8, 16>}, {pipeline_mode = #tpu.pipeline_mode<synchronous>, transform_indices = @transform_4, window_bounds = array<i64: 1, 16>}, {pipeline_mode = #tpu.pipeline_mode<synchronous>, transform_indices = @transform_5, window_bounds = array<i64: 32, 3>}, {transform_indices = @transform_6, window_bounds = array<i64: 1, 3, 32, 16>}]} {
    %cst = arith.constant 0.000000e+00 : f32
    %0 = vector.broadcast %cst : f32 to vector<15x8xf32>
    %c0 = arith.constant 0 : index
    %c0_0 = arith.constant 0 : index
    %1 = vector.load %arg3[%c0, %c0_0] : memref<1x8xf32, #tpu.memory_space<vmem>>, vector<1x8xf32>
    %2 = vector.broadcast %1 : vector<1x8xf32> to vector<15x8xf32>
    %3 = arith.addf %0, %2 : vector<15x8xf32>
    %c0_1 = arith.constant 0 : index
    %c0_2 = arith.constant 0 : index
    %c0_3 = arith.constant 0 : index
    %c0_4 = arith.constant 0 : index
    %c0_5 = arith.constant 0 : index
    %4 = vector.load %arg1[%c0_1, %c0_2, %c0_3, %c0_4, %c0_5] : memref<1x4x16x16x8xf32, #tpu.memory_space<vmem>>, vector<1x1x1x15x8xf32>
    %5 = vector.shape_cast %4 : vector<1x1x1x15x8xf32> to vector<15x8xf32>
    %c0_6 = arith.constant 0 : index
    %c0_7 = arith.constant 0 : index
    %c0_8 = arith.constant 0 : index
    %6 = vector.load %arg2[%c0_6, %c0_7, %c0_8] : memref<9x8x8xf32, #tpu.memory_space<vmem>>, vector<1x8x8xf32>
    %7 = vector.shape_cast %6 : vector<1x8x8xf32> to vector<8x8xf32>
    %cst_9 = arith.constant dense<0.000000e+00> : vector<15x8xf32>
    %8 = tpu.matmul %5, %7, %cst_9 {dimension_numbers = #tpu.dot_dimension_numbers<[1], [0], [0], [1], [0, 0, 1, 1], [], []>} : vector<15x8xf32>, vector<8x8xf32>, vector<15x8xf32> -> vector<15x8xf32>
    %9 = arith.addf %3, %8 : vector<15x8xf32>
    %c0_10 = arith.constant 0 : index
    %c1 = arith.constant 1 : index
    %c0_11 = arith.constant 0 : index
    %c0_12 = arith.constant 0 : index
    %c0_13 = arith.constant 0 : index
    %10 = vector.load %arg1[%c0_10, %c1, %c0_11, %c0_12, %c0_13] : memref<1x4x16x16x8xf32, #tpu.memory_space<vmem>>, vector<1x1x1x15x8xf32>
    %11 = vector.shape_cast %10 : vector<1x1x1x15x8xf32> to vector<15x8xf32>
    %c1_14 = arith.constant 1 : index
    %c0_15 = arith.constant 0 : index
    %c0_16 = arith.constant 0 : index
    %12 = vector.load %arg2[%c1_14, %c0_15, %c0_16] : memref<9x8x8xf32, #tpu.memory_space<vmem>>, vector<1x8x8xf32>
    %13 = vector.shape_cast %12 : vector<1x8x8xf32> to vector<8x8xf32>
    %cst_17 = arith.constant dense<0.000000e+00> : vector<15x8xf32>
    %14 = tpu.matmul %11, %13, %cst_17 {dimension_numbers = #tpu.dot_dimension_numbers<[1], [0], [0], [1], [0, 0, 1, 1], [], []>} : vector<15x8xf32>, vector<8x8xf32>, vector<15x8xf32> -> vector<15x8xf32>
    %15 = arith.addf %9, %14 : vector<15x8xf32>
    %c0_18 = arith.constant 0 : index
    %c0_19 = arith.constant 0 : index
    %c0_20 = arith.constant 0 : index
    %c1_21 = arith.constant 1 : index
    %c0_22 = arith.constant 0 : index
    %16 = vector.load %arg1[%c0_18, %c0_19, %c0_20, %c1_21, %c0_22] : memref<1x4x16x16x8xf32, #tpu.memory_space<vmem>>, vector<1x1x1x15x8xf32>
    %17 = vector.shape_cast %16 : vector<1x1x1x15x8xf32> to vector<15x8xf32>
    %c2 = arith.constant 2 : index
    %c0_23 = arith.constant 0 : index
    %c0_24 = arith.constant 0 : index
    %18 = vector.load %arg2[%c2, %c0_23, %c0_24] : memref<9x8x8xf32, #tpu.memory_space<vmem>>, vector<1x8x8xf32>
    %19 = vector.shape_cast %18 : vector<1x8x8xf32> to vector<8x8xf32>
    %cst_25 = arith.constant dense<0.000000e+00> : vector<15x8xf32>
    %20 = tpu.matmul %17, %19, %cst_25 {dimension_numbers = #tpu.dot_dimension_numbers<[1], [0], [0], [1], [0, 0, 1, 1], [], []>} : vector<15x8xf32>, vector<8x8xf32>, vector<15x8xf32> -> vector<15x8xf32>
    %21 = arith.addf %15, %20 : vector<15x8xf32>
    %c0_26 = arith.constant 0 : index
    %c2_27 = arith.constant 2 : index
    %c0_28 = arith.constant 0 : index
    %c0_29 = arith.constant 0 : index
    %c0_30 = arith.constant 0 : index
    %22 = vector.load %arg1[%c0_26, %c2_27, %c0_28, %c0_29, %c0_30] : memref<1x4x16x16x8xf32, #tpu.memory_space<vmem>>, vector<1x1x1x15x8xf32>
    %23 = vector.shape_cast %22 : vector<1x1x1x15x8xf32> to vector<15x8xf32>
    %c3 = arith.constant 3 : index
    %c0_31 = arith.constant 0 : index
    %c0_32 = arith.constant 0 : index
    %24 = vector.load %arg2[%c3, %c0_31, %c0_32] : memref<9x8x8xf32, #tpu.memory_space<vmem>>, vector<1x8x8xf32>
    %25 = vector.shape_cast %24 : vector<1x8x8xf32> to vector<8x8xf32>
    %cst_33 = arith.constant dense<0.000000e+00> : vector<15x8xf32>
    %26 = tpu.matmul %23, %25, %cst_33 {dimension_numbers = #tpu.dot_dimension_numbers<[1], [0], [0], [1], [0, 0, 1, 1], [], []>} : vector<15x8xf32>, vector<8x8xf32>, vector<15x8xf32> -> vector<15x8xf32>
    %27 = arith.addf %21, %26 : vector<15x8xf32>
    %c0_34 = arith.constant 0 : index
    %c3_35 = arith.constant 3 : index
    %c0_36 = arith.constant 0 : index
    %c0_37 = arith.constant 0 : index
    %c0_38 = arith.constant 0 : index
    %28 = vector.load %arg1[%c0_34, %c3_35, %c0_36, %c0_37, %c0_38] : memref<1x4x16x16x8xf32, #tpu.memory_space<vmem>>, vector<1x1x1x15x8xf32>
    %29 = vector.shape_cast %28 : vector<1x1x1x15x8xf32> to vector<15x8xf32>
    %c4 = arith.constant 4 : index
    %c0_39 = arith.constant 0 : index
    %c0_40 = arith.constant 0 : index
    %30 = vector.load %arg2[%c4, %c0_39, %c0_40] : memref<9x8x8xf32, #tpu.memory_space<vmem>>, vector<1x8x8xf32>
    %31 = vector.shape_cast %30 : vector<1x8x8xf32> to vector<8x8xf32>
    %cst_41 = arith.constant dense<0.000000e+00> : vector<15x8xf32>
    %32 = tpu.matmul %29, %31, %cst_41 {dimension_numbers = #tpu.dot_dimension_numbers<[1], [0], [0], [1], [0, 0, 1, 1], [], []>} : vector<15x8xf32>, vector<8x8xf32>, vector<15x8xf32> -> vector<15x8xf32>
    %33 = arith.addf %27, %32 : vector<15x8xf32>
    %c0_42 = arith.constant 0 : index
    %c2_43 = arith.constant 2 : index
    %c0_44 = arith.constant 0 : index
    %c1_45 = arith.constant 1 : index
    %c0_46 = arith.constant 0 : index
    %34 = vector.load %arg1[%c0_42, %c2_43, %c0_44, %c1_45, %c0_46] : memref<1x4x16x16x8xf32, #tpu.memory_space<vmem>>, vector<1x1x1x15x8xf32>
    %35 = vector.shape_cast %34 : vector<1x1x1x15x8xf32> to vector<15x8xf32>
    %c5 = arith.constant 5 : index
    %c0_47 = arith.constant 0 : index
    %c0_48 = arith.constant 0 : index
    %36 = vector.load %arg2[%c5, %c0_47, %c0_48] : memref<9x8x8xf32, #tpu.memory_space<vmem>>, vector<1x8x8xf32>
    %37 = vector.shape_cast %36 : vector<1x8x8xf32> to vector<8x8xf32>
    %cst_49 = arith.constant dense<0.000000e+00> : vector<15x8xf32>
    %38 = tpu.matmul %35, %37, %cst_49 {dimension_numbers = #tpu.dot_dimension_numbers<[1], [0], [0], [1], [0, 0, 1, 1], [], []>} : vector<15x8xf32>, vector<8x8xf32>, vector<15x8xf32> -> vector<15x8xf32>
    %39 = arith.addf %33, %38 : vector<15x8xf32>
    %c0_50 = arith.constant 0 : index
    %c0_51 = arith.constant 0 : index
    %c1_52 = arith.constant 1 : index
    %c0_53 = arith.constant 0 : index
    %c0_54 = arith.constant 0 : index
    %40 = vector.load %arg1[%c0_50, %c0_51, %c1_52, %c0_53, %c0_54] : memref<1x4x16x16x8xf32, #tpu.memory_space<vmem>>, vector<1x1x1x15x8xf32>
    %41 = vector.shape_cast %40 : vector<1x1x1x15x8xf32> to vector<15x8xf32>
    %c6 = arith.constant 6 : index
    %c0_55 = arith.constant 0 : index
    %c0_56 = arith.constant 0 : index
    %42 = vector.load %arg2[%c6, %c0_55, %c0_56] : memref<9x8x8xf32, #tpu.memory_space<vmem>>, vector<1x8x8xf32>
    %43 = vector.shape_cast %42 : vector<1x8x8xf32> to vector<8x8xf32>
    %cst_57 = arith.constant dense<0.000000e+00> : vector<15x8xf32>
    %44 = tpu.matmul %41, %43, %cst_57 {dimension_numbers = #tpu.dot_dimension_numbers<[1], [0], [0], [1], [0, 0, 1, 1], [], []>} : vector<15x8xf32>, vector<8x8xf32>, vector<15x8xf32> -> vector<15x8xf32>
    %45 = arith.addf %39, %44 : vector<15x8xf32>
    %c0_58 = arith.constant 0 : index
    %c1_59 = arith.constant 1 : index
    %c1_60 = arith.constant 1 : index
    %c0_61 = arith.constant 0 : index
    %c0_62 = arith.constant 0 : index
    %46 = vector.load %arg1[%c0_58, %c1_59, %c1_60, %c0_61, %c0_62] : memref<1x4x16x16x8xf32, #tpu.memory_space<vmem>>, vector<1x1x1x15x8xf32>
    %47 = vector.shape_cast %46 : vector<1x1x1x15x8xf32> to vector<15x8xf32>
    %c7 = arith.constant 7 : index
    %c0_63 = arith.constant 0 : index
    %c0_64 = arith.constant 0 : index
    %48 = vector.load %arg2[%c7, %c0_63, %c0_64] : memref<9x8x8xf32, #tpu.memory_space<vmem>>, vector<1x8x8xf32>
    %49 = vector.shape_cast %48 : vector<1x8x8xf32> to vector<8x8xf32>
    %cst_65 = arith.constant dense<0.000000e+00> : vector<15x8xf32>
    %50 = tpu.matmul %47, %49, %cst_65 {dimension_numbers = #tpu.dot_dimension_numbers<[1], [0], [0], [1], [0, 0, 1, 1], [], []>} : vector<15x8xf32>, vector<8x8xf32>, vector<15x8xf32> -> vector<15x8xf32>
    %51 = arith.addf %45, %50 : vector<15x8xf32>
    %c0_66 = arith.constant 0 : index
    %c0_67 = arith.constant 0 : index
    %c1_68 = arith.constant 1 : index
    %c1_69 = arith.constant 1 : index
    %c0_70 = arith.constant 0 : index
    %52 = vector.load %arg1[%c0_66, %c0_67, %c1_68, %c1_69, %c0_70] : memref<1x4x16x16x8xf32, #tpu.memory_space<vmem>>, vector<1x1x1x15x8xf32>
    %53 = vector.shape_cast %52 : vector<1x1x1x15x8xf32> to vector<15x8xf32>
    %c8 = arith.constant 8 : index
    %c0_71 = arith.constant 0 : index
    %c0_72 = arith.constant 0 : index
    %54 = vector.load %arg2[%c8, %c0_71, %c0_72] : memref<9x8x8xf32, #tpu.memory_space<vmem>>, vector<1x8x8xf32>
    %55 = vector.shape_cast %54 : vector<1x8x8xf32> to vector<8x8xf32>
    %cst_73 = arith.constant dense<0.000000e+00> : vector<15x8xf32>
    %56 = tpu.matmul %53, %55, %cst_73 {dimension_numbers = #tpu.dot_dimension_numbers<[1], [0], [0], [1], [0, 0, 1, 1], [], []>} : vector<15x8xf32>, vector<8x8xf32>, vector<15x8xf32> -> vector<15x8xf32>
    %57 = arith.addf %51, %56 : vector<15x8xf32>
    %c0_74 = arith.constant 0 : index
    %c0_75 = arith.constant 0 : index
    %c0_76 = arith.constant 0 : index
    %58 = vector.load %arg8[%c0_74, %c0_75, %c0_76] : memref<15x15x8xf32, #tpu.memory_space<vmem>>, vector<1x15x8xf32>
    %59 = vector.shape_cast %58 : vector<1x15x8xf32> to vector<15x8xf32>
    %60 = vector.shape_cast %57 : vector<15x8xf32> to vector<1x15x8xf32>
    tpu.vector_store %arg8[%c0_74, %c0_75, %c0_76], %60 {strides = array<i32>} : memref<15x15x8xf32, #tpu.memory_space<vmem>>, vector<1x15x8xf32>,
    %cst_77 = arith.constant 0.000000e+00 : f32
    %61 = vector.broadcast %cst_77 : f32 to vector<15x8xf32>
    %c0_78 = arith.constant 0 : index
    %c0_79 = arith.constant 0 : index
    %62 = vector.load %arg3[%c0_78, %c0_79] : memref<1x8xf32, #tpu.memory_space<vmem>>, vector<1x8xf32>
    %63 = vector.broadcast %62 : vector<1x8xf32> to vector<15x8xf32>
    %64 = arith.addf %61, %63 : vector<15x8xf32>
    %c0_80 = arith.constant 0 : index
    %c0_81 = arith.constant 0 : index
    %c1_82 = arith.constant 1 : index
    %c0_83 = arith.constant 0 : index
    %c0_84 = arith.constant 0 : index
    %65 = vector.load %arg1[%c0_80, %c0_81, %c1_82, %c0_83, %c0_84] : memref<1x4x16x16x8xf32, #tpu.memory_space<vmem>>, vector<1x1x1x15x8xf32>
    %66 = vector.shape_cast %65 : vector<1x1x1x15x8xf32> to vector<15x8xf32>
    %c0_85 = arith.constant 0 : index
    %c0_86 = arith.constant 0 : index
    %c0_87 = arith.constant 0 : index
    %67 = vector.load %arg2[%c0_85, %c0_86, %c0_87] : memref<9x8x8xf32, #tpu.memory_space<vmem>>, vector<1x8x8xf32>
    %68 = vector.shape_cast %67 : vector<1x8x8xf32> to vector<8x8xf32>
    %cst_88 = arith.constant dense<0.000000e+00> : vector<15x8xf32>
    %69 = tpu.matmul %66, %68, %cst_88 {dimension_numbers = #tpu.dot_dimension_numbers<[1], [0], [0], [1], [0, 0, 1, 1], [], []>} : vector<15x8xf32>, vector<8x8xf32>, vector<15x8xf32> -> vector<15x8xf32>
    %70 = arith.addf %64, %69 : vector<15x8xf32>
    %c0_89 = arith.constant 0 : index
    %c1_90 = arith.constant 1 : index
    %c1_91 = arith.constant 1 : index
    %c0_92 = arith.constant 0 : index
    %c0_93 = arith.constant 0 : index
    %71 = vector.load %arg1[%c0_89, %c1_90, %c1_91, %c0_92, %c0_93] : memref<1x4x16x16x8xf32, #tpu.memory_space<vmem>>, vector<1x1x1x15x8xf32>
    %72 = vector.shape_cast %71 : vector<1x1x1x15x8xf32> to vector<15x8xf32>
    %c1_94 = arith.constant 1 : index
    %c0_95 = arith.constant 0 : index
    %c0_96 = arith.constant 0 : index
    %73 = vector.load %arg2[%c1_94, %c0_95, %c0_96] : memref<9x8x8xf32, #tpu.memory_space<vmem>>, vector<1x8x8xf32>
    %74 = vector.shape_cast %73 : vector<1x8x8xf32> to vector<8x8xf32>
    %cst_97 = arith.constant dense<0.000000e+00> : vector<15x8xf32>
    %75 = tpu.matmul %72, %74, %cst_97 {dimension_numbers = #tpu.dot_dimension_numbers<[1], [0], [0], [1], [0, 0, 1, 1], [], []>} : vector<15x8xf32>, vector<8x8xf32>, vector<15x8xf32> -> vector<15x8xf32>
    %76 = arith.addf %70, %75 : vector<15x8xf32>
    %c0_98 = arith.constant 0 : index
    %c0_99 = arith.constant 0 : index
    %c1_100 = arith.constant 1 : index
    %c1_101 = arith.constant 1 : index
    %c0_102 = arith.constant 0 : index
    %77 = vector.load %arg1[%c0_98, %c0_99, %c1_100, %c1_101, %c0_102] : memref<1x4x16x16x8xf32, #tpu.memory_space<vmem>>, vector<1x1x1x15x8xf32>
    %78 = vector.shape_cast %77 : vector<1x1x1x15x8xf32> to vector<15x8xf32>
    %c2_103 = arith.constant 2 : index
    %c0_104 = arith.constant 0 : index
    %c0_105 = arith.constant 0 : index
    %79 = vector.load %arg2[%c2_103, %c0_104, %c0_105] : memref<9x8x8xf32, #tpu.memory_space<vmem>>, vector<1x8x8xf32>
    %80 = vector.shape_cast %79 : vector<1x8x8xf32> to vector<8x8xf32>
    %cst_106 = arith.constant dense<0.000000e+00> : vector<15x8xf32>
    %81 = tpu.matmul %78, %80, %cst_106 {dimension_numbers = #tpu.dot_dimension_numbers<[1], [0], [0], [1], [0, 0, 1, 1], [], []>} : vector<15x8xf32>, vector<8x8xf32>, vector<15x8xf32> -> vector<15x8xf32>
    %82 = arith.addf %76, %81 : vector<15x8xf32>
    %c0_107 = arith.constant 0 : index
    %c2_108 = arith.constant 2 : index
    %c1_109 = arith.constant 1 : index
    %c0_110 = arith.constant 0 : index
    %c0_111 = arith.constant 0 : index
    %83 = vector.load %arg1[%c0_107, %c2_108, %c1_109, %c0_110, %c0_111] : memref<1x4x16x16x8xf32, #tpu.memory_space<vmem>>, vector<1x1x1x15x8xf32>
    %84 = vector.shape_cast %83 : vector<1x1x1x15x8xf32> to vector<15x8xf32>
    %c3_112 = arith.constant 3 : index
    %c0_113 = arith.constant 0 : index
    %c0_114 = arith.constant 0 : index
    %85 = vector.load %arg2[%c3_112, %c0_113, %c0_114] : memref<9x8x8xf32, #tpu.memory_space<vmem>>, vector<1x8x8xf32>
    %86 = vector.shape_cast %85 : vector<1x8x8xf32> to vector<8x8xf32>
    %cst_115 = arith.constant dense<0.000000e+00> : vector<15x8xf32>
    %87 = tpu.matmul %84, %86, %cst_115 {dimension_numbers = #tpu.dot_dimension_numbers<[1], [0], [0], [1], [0, 0, 1, 1], [], []>} : vector<15x8xf32>, vector<8x8xf32>, vector<15x8xf32> -> vector<15x8xf32>
    %88 = arith.addf %82, %87 : vector<15x8xf32>
    %c0_116 = arith.constant 0 : index
    %c3_117 = arith.constant 3 : index
    %c1_118 = arith.constant 1 : index
    %c0_119 = arith.constant 0 : index
    %c0_120 = arith.constant 0 : index
    %89 = vector.load %arg1[%c0_116, %c3_117, %c1_118, %c0_119, %c0_120] : memref<1x4x16x16x8xf32, #tpu.memory_space<vmem>>, vector<1x1x1x15x8xf32>
    %90 = vector.shape_cast %89 : vector<1x1x1x15x8xf32> to vector<15x8xf32>
    %c4_121 = arith.constant 4 : index
    %c0_122 = arith.constant 0 : index
    %c0_123 = arith.constant 0 : index
    %91 = vector.load %arg2[%c4_121, %c0_122, %c0_123] : memref<9x8x8xf32, #tpu.memory_space<vmem>>, vector<1x8x8xf32>
    %92 = vector.shape_cast %91 : vector<1x8x8xf32> to vector<8x8xf32>
    %cst_124 = arith.constant dense<0.000000e+00> : vector<15x8xf32>
    %93 = tpu.matmul %90, %92, %cst_124 {dimension_numbers = #tpu.dot_dimension_numbers<[1], [0], [0], [1], [0, 0, 1, 1], [], []>} : vector<15x8xf32>, vector<8x8xf32>, vector<15x8xf32> -> vector<15x8xf32>
    %94 = arith.addf %88, %93 : vector<15x8xf32>
    %c0_125 = arith.constant 0 : index
    %c2_126 = arith.constant 2 : index
    %c1_127 = arith.constant 1 : index
    %c1_128 = arith.constant 1 : index
    %c0_129 = arith.constant 0 : index
    %95 = vector.load %arg1[%c0_125, %c2_126, %c1_127, %c1_128, %c0_129] : memref<1x4x16x16x8xf32, #tpu.memory_space<vmem>>, vector<1x1x1x15x8xf32>
    %96 = vector.shape_cast %95 : vector<1x1x1x15x8xf32> to vector<15x8xf32>
    %c5_130 = arith.constant 5 : index
    %c0_131 = arith.constant 0 : index
    %c0_132 = arith.constant 0 : index
    %97 = vector.load %arg2[%c5_130, %c0_131, %c0_132] : memref<9x8x8xf32, #tpu.memory_space<vmem>>, vector<1x8x8xf32>
    %98 = vector.shape_cast %97 : vector<1x8x8xf32> to vector<8x8xf32>
    %cst_133 = arith.constant dense<0.000000e+00> : vector<15x8xf32>
    %99 = tpu.matmul %96, %98, %cst_133 {dimension_numbers = #tpu.dot_dimension_numbers<[1], [0], [0], [1], [0, 0, 1, 1], [], []>} : vector<15x8xf32>, vector<8x8xf32>, vector<15x8xf32> -> vector<15x8xf32>
    %100 = arith.addf %94, %99 : vector<15x8xf32>
    %c0_134 = arith.constant 0 : index
    %c0_135 = arith.constant 0 : index
    %c2_136 = arith.constant 2 : index
    %c0_137 = arith.constant 0 : index
    %c0_138 = arith.constant 0 : index
    %101 = vector.load %arg1[%c0_134, %c0_135, %c2_136, %c0_137, %c0_138] : memref<1x4x16x16x8xf32, #tpu.memory_space<vmem>>, vector<1x1x1x15x8xf32>
    %102 = vector.shape_cast %101 : vector<1x1x1x15x8xf32> to vector<15x8xf32>
    %c6_139 = arith.constant 6 : index
    %c0_140 = arith.constant 0 : index
    %c0_141 = arith.constant 0 : index
    %103 = vector.load %arg2[%c6_139, %c0_140, %c0_141] : memref<9x8x8xf32, #tpu.memory_space<vmem>>, vector<1x8x8xf32>
    %104 = vector.shape_cast %103 : vector<1x8x8xf32> to vector<8x8xf32>
    %cst_142 = arith.constant dense<0.000000e+00> : vector<15x8xf32>
    %105 = tpu.matmul %102, %104, %cst_142 {dimension_numbers = #tpu.dot_dimension_numbers<[1], [0], [0], [1], [0, 0, 1, 1], [], []>} : vector<15x8xf32>, vector<8x8xf32>, vector<15x8xf32> -> vector<15x8xf32>
    %106 = arith.addf %100, %105 : vector<15x8xf32>
    %c0_143 = arith.constant 0 : index
    %c1_144 = arith.constant 1 : index
    %c2_145 = arith.constant 2 : index
    %c0_146 = arith.constant 0 : index
    %c0_147 = arith.constant 0 : index
    %107 = vector.load %arg1[%c0_143, %c1_144, %c2_145, %c0_146, %c0_147] : memref<1x4x16x16x8xf32, #tpu.memory_space<vmem>>, vector<1x1x1x15x8xf32>
    %108 = vector.shape_cast %107 : vector<1x1x1x15x8xf32> to vector<15x8xf32>
    %c7_148 = arith.constant 7 : index
    %c0_149 = arith.constant 0 : index
    %c0_150 = arith.constant 0 : index
    %109 = vector.load %arg2[%c7_148, %c0_149, %c0_150] : memref<9x8x8xf32, #tpu.memory_space<vmem>>, vector<1x8x8xf32>
    %110 = vector.shape_cast %109 : vector<1x8x8xf32> to vector<8x8xf32>
    %cst_151 = arith.constant dense<0.000000e+00> : vector<15x8xf32>
    %111 = tpu.matmul %108, %110, %cst_151 {dimension_numbers = #tpu.dot_dimension_numbers<[1], [0], [0], [1], [0, 0, 1, 1], [], []>} : vector<15x8xf32>, vector<8x8xf32>, vector<15x8xf32> -> vector<15x8xf32>
    %112 = arith.addf %106, %111 : vector<15x8xf32>
    %c0_152 = arith.constant 0 : index
    %c0_153 = arith.constant 0 : index
    %c2_154 = arith.constant 2 : index
    %c1_155 = arith.constant 1 : index
    %c0_156 = arith.constant 0 : index
    %113 = vector.load %arg1[%c0_152, %c0_153, %c2_154, %c1_155, %c0_156] : memref<1x4x16x16x8xf32, #tpu.memory_space<vmem>>, vector<1x1x1x15x8xf32>
    %114 = vector.shape_cast %113 : vector<1x1x1x15x8xf32> to vector<15x8xf32>
    %c8_157 = arith.constant 8 : index
    %c0_158 = arith.constant 0 : index
    %c0_159 = arith.constant 0 : index
    %115 = vector.load %arg2[%c8_157, %c0_158, %c0_159] : memref<9x8x8xf32, #tpu.memory_space<vmem>>, vector<1x8x8xf32>
    %116 = vector.shape_cast %115 : vector<1x8x8xf32> to vector<8x8xf32>
    %cst_160 = arith.constant dense<0.000000e+00> : vector<15x8xf32>
    %117 = tpu.matmul %114, %116, %cst_160 {dimension_numbers = #tpu.dot_dimension_numbers<[1], [0], [0], [1], [0, 0, 1, 1], [], []>} : vector<15x8xf32>, vector<8x8xf32>, vector<15x8xf32> -> vector<15x8xf32>
    %118 = arith.addf %112, %117 : vector<15x8xf32>
    %c1_161 = arith.constant 1 : index
    %c0_162 = arith.constant 0 : index
    %c0_163 = arith.constant 0 : index
    %119 = vector.load %arg8[%c1_161, %c0_162, %c0_163] : memref<15x15x8xf32, #tpu.memory_space<vmem>>, vector<1x15x8xf32>
    %120 = vector.shape_cast %119 : vector<1x15x8xf32> to vector<15x8xf32>
    %121 = vector.shape_cast %118 : vector<15x8xf32> to vector<1x15x8xf32>
    tpu.vector_store %arg8[%c1_161, %c0_162, %c0_163], %121 {strides = array<i32>} : memref<15x15x8xf32, #tpu.memory_space<vmem>>, vector<1x15x8xf32>,
    %cst_164 = arith.constant 0.000000e+00 : f32
    %122 = vector.broadcast %cst_164 : f32 to vector<15x8xf32>
    %c0_165 = arith.constant 0 : index
    %c0_166 = arith.constant 0 : index
    %123 = vector.load %arg3[%c0_165, %c0_166] : memref<1x8xf32, #tpu.memory_space<vmem>>, vector<1x8xf32>
    %124 = vector.broadcast %123 : vector<1x8xf32> to vector<15x8xf32>
    %125 = arith.addf %122, %124 : vector<15x8xf32>
    %c0_167 = arith.constant 0 : index
    %c0_168 = arith.constant 0 : index
    %c2_169 = arith.constant 2 : index
    %c0_170 = arith.constant 0 : index
    %c0_171 = arith.constant 0 : index
    %126 = vector.load %arg1[%c0_167, %c0_168, %c2_169, %c0_170, %c0_171] : memref<1x4x16x16x8xf32, #tpu.memory_space<vmem>>, vector<1x1x1x15x8xf32>
    %127 = vector.shape_cast %126 : vector<1x1x1x15x8xf32> to vector<15x8xf32>
    %c0_172 = arith.constant 0 : index
    %c0_173 = arith.constant 0 : index
    %c0_174 = arith.constant 0 : index
    %128 = vector.load %arg2[%c0_172, %c0_173, %c0_174] : memref<9x8x8xf32, #tpu.memory_space<vmem>>, vector<1x8x8xf32>
    %129 = vector.shape_cast %128 : vector<1x8x8xf32> to vector<8x8xf32>
    %cst_175 = arith.constant dense<0.000000e+00> : vector<15x8xf32>
    %130 = tpu.matmul %127, %129, %cst_175 {dimension_numbers = #tpu.dot_dimension_numbers<[1], [0], [0], [1], [0, 0, 1, 1], [], []>} : vector<15x8xf32>, vector<8x8xf32>, vector<15x8xf32> -> vector<15x8xf32>
    %131 = arith.addf %125, %130 : vector<15x8xf32>
    %c0_176 = arith.constant 0 : index
    %c1_177 = arith.constant 1 : index
    %c2_178 = arith.constant 2 : index
    %c0_179 = arith.constant 0 : index
    %c0_180 = arith.constant 0 : index
    %132 = vector.load %arg1[%c0_176, %c1_177, %c2_178, %c0_179, %c0_180] : memref<1x4x16x16x8xf32, #tpu.memory_space<vmem>>, vector<1x1x1x15x8xf32>
    %133 = vector.shape_cast %132 : vector<1x1x1x15x8xf32> to vector<15x8xf32>
    %c1_181 = arith.constant 1 : index
    %c0_182 = arith.constant 0 : index
    %c0_183 = arith.constant 0 : index
    %134 = vector.load %arg2[%c1_181, %c0_182, %c0_183] : memref<9x8x8xf32, #tpu.memory_space<vmem>>, vector<1x8x8xf32>
    %135 = vector.shape_cast %134 : vector<1x8x8xf32> to vector<8x8xf32>
    %cst_184 = arith.constant dense<0.000000e+00> : vector<15x8xf32>
    %136 = tpu.matmul %133, %135, %cst_184 {dimension_numbers = #tpu.dot_dimension_numbers<[1], [0], [0], [1], [0, 0, 1, 1], [], []>} : vector<15x8xf32>, vector<8x8xf32>, vector<15x8xf32> -> vector<15x8xf32>
    %137 = arith.addf %131, %136 : vector<15x8xf32>
    %c0_185 = arith.constant 0 : index
    %c0_186 = arith.constant 0 : index
    %c2_187 = arith.constant 2 : index
    %c1_188 = arith.constant 1 : index
    %c0_189 = arith.constant 0 : index
    %138 = vector.load %arg1[%c0_185, %c0_186, %c2_187, %c1_188, %c0_189] : memref<1x4x16x16x8xf32, #tpu.memory_space<vmem>>, vector<1x1x1x15x8xf32>
    %139 = vector.shape_cast %138 : vector<1x1x1x15x8xf32> to vector<15x8xf32>
    %c2_190 = arith.constant 2 : index
    %c0_191 = arith.constant 0 : index
    %c0_192 = arith.constant 0 : index
    %140 = vector.load %arg2[%c2_190, %c0_191, %c0_192] : memref<9x8x8xf32, #tpu.memory_space<vmem>>, vector<1x8x8xf32>
    %141 = vector.shape_cast %140 : vector<1x8x8xf32> to vector<8x8xf32>
    %cst_193 = arith.constant dense<0.000000e+00> : vector<15x8xf32>
    %142 = tpu.matmul %139, %141, %cst_193 {dimension_numbers = #tpu.dot_dimension_numbers<[1], [0], [0], [1], [0, 0, 1, 1], [], []>} : vector<15x8xf32>, vector<8x8xf32>, vector<15x8xf32> -> vector<15x8xf32>
    %143 = arith.addf %137, %142 : vector<15x8xf32>
    %c0_194 = arith.constant 0 : index
    %c2_195 = arith.constant 2 : index
    %c2_196 = arith.constant 2 : index
    %c0_197 = arith.constant 0 : index
    %c0_198 = arith.constant 0 : index
    %144 = vector.load %arg1[%c0_194, %c2_195, %c2_196, %c0_197, %c0_198] : memref<1x4x16x16x8xf32, #tpu.memory_space<vmem>>, vector<1x1x1x15x8xf32>
    %145 = vector.shape_cast %144 : vector<1x1x1x15x8xf32> to vector<15x8xf32>
    %c3_199 = arith.constant 3 : index
    %c0_200 = arith.constant 0 : index
    %c0_201 = arith.constant 0 : index
    %146 = vector.load %arg2[%c3_199, %c0_200, %c0_201] : memref<9x8x8xf32, #tpu.memory_space<vmem>>, vector<1x8x8xf32>
    %147 = vector.shape_cast %146 : vector<1x8x8xf32> to vector<8x8xf32>
    %cst_202 = arith.constant dense<0.000000e+00> : vector<15x8xf32>
    %148 = tpu.matmul %145, %147, %cst_202 {dimension_numbers = #tpu.dot_dimension_numbers<[1], [0], [0], [1], [0, 0, 1, 1], [], []>} : vector<15x8xf32>, vector<8x8xf32>, vector<15x8xf32> -> vector<15x8xf32>
    %149 = arith.addf %143, %148 : vector<15x8xf32>
    %c0_203 = arith.constant 0 : index
    %c3_204 = arith.constant 3 : index
    %c2_205 = arith.constant 2 : index
    %c0_206 = arith.constant 0 : index
    %c0_207 = arith.constant 0 : index
    %150 = vector.load %arg1[%c0_203, %c3_204, %c2_205, %c0_206, %c0_207] : memref<1x4x16x16x8xf32, #tpu.memory_space<vmem>>, vector<1x1x1x15x8xf32>
    %151 = vector.shape_cast %150 : vector<1x1x1x15x8xf32> to vector<15x8xf32>
    %c4_208 = arith.constant 4 : index
    %c0_209 = arith.constant 0 : index
    %c0_210 = arith.constant 0 : index
    %152 = vector.load %arg2[%c4_208, %c0_209, %c0_210] : memref<9x8x8xf32, #tpu.memory_space<vmem>>, vector<1x8x8xf32>
    %153 = vector.shape_cast %152 : vector<1x8x8xf32> to vector<8x8xf32>
    %cst_211 = arith.constant dense<0.000000e+00> : vector<15x8xf32>
    %154 = tpu.matmul %151, %153, %cst_211 {dimension_numbers = #tpu.dot_dimension_numbers<[1], [0], [0], [1], [0, 0, 1, 1], [], []>} : vector<15x8xf32>, vector<8x8xf32>, vector<15x8xf32> -> vector<15x8xf32>
    %155 = arith.addf %149, %154 : vector<15x8xf32>
    %c0_212 = arith.constant 0 : index
    %c2_213 = arith.constant 2 : index
    %c2_214 = arith.constant 2 : index
    %c1_215 = arith.constant 1 : index
    %c0_216 = arith.constant 0 : index
    %156 = vector.load %arg1[%c0_212, %c2_213, %c2_214, %c1_215, %c0_216] : memref<1x4x16x16x8xf32, #tpu.memory_space<vmem>>, vector<1x1x1x15x8xf32>
    %157 = vector.shape_cast %156 : vector<1x1x1x15x8xf32> to vector<15x8xf32>
    %c5_217 = arith.constant 5 : index
    %c0_218 = arith.constant 0 : index
    %c0_219 = arith.constant 0 : index
    %158 = vector.load %arg2[%c5_217, %c0_218, %c0_219] : memref<9x8x8xf32, #tpu.memory_space<vmem>>, vector<1x8x8xf32>
    %159 = vector.shape_cast %158 : vector<1x8x8xf32> to vector<8x8xf32>
    %cst_220 = arith.constant dense<0.000000e+00> : vector<15x8xf32>
    %160 = tpu.matmul %157, %159, %cst_220 {dimension_numbers = #tpu.dot_dimension_numbers<[1], [0], [0], [1], [0, 0, 1, 1], [], []>} : vector<15x8xf32>, vector<8x8xf32>, vector<15x8xf32> -> vector<15x8xf32>
    %161 = arith.addf %155, %160 : vector<15x8xf32>
    %c0_221 = arith.constant 0 : index
    %c0_222 = arith.constant 0 : index
    %c3_223 = arith.constant 3 : index
    %c0_224 = arith.constant 0 : index
    %c0_225 = arith.constant 0 : index
    %162 = vector.load %arg1[%c0_221, %c0_222, %c3_223, %c0_224, %c0_225] : memref<1x4x16x16x8xf32, #tpu.memory_space<vmem>>, vector<1x1x1x15x8xf32>
    %163 = vector.shape_cast %162 : vector<1x1x1x15x8xf32> to vector<15x8xf32>
    %c6_226 = arith.constant 6 : index
    %c0_227 = arith.constant 0 : index
    %c0_228 = arith.constant 0 : index
    %164 = vector.load %arg2[%c6_226, %c0_227, %c0_228] : memref<9x8x8xf32, #tpu.memory_space<vmem>>, vector<1x8x8xf32>
    %165 = vector.shape_cast %164 : vector<1x8x8xf32> to vector<8x8xf32>
    %cst_229 = arith.constant dense<0.000000e+00> : vector<15x8xf32>
    %166 = tpu.matmul %163, %165, %cst_229 {dimension_numbers = #tpu.dot_dimension_numbers<[1], [0], [0], [1], [0, 0, 1, 1], [], []>} : vector<15x8xf32>, vector<8x8xf32>, vector<15x8xf32> -> vector<15x8xf32>
    %167 = arith.addf %161, %166 : vector<15x8xf32>
    %c0_230 = arith.constant 0 : index
    %c1_231 = arith.constant 1 : index
    %c3_232 = arith.constant 3 : index
    %c0_233 = arith.constant 0 : index
    %c0_234 = arith.constant 0 : index
    %168 = vector.load %arg1[%c0_230, %c1_231, %c3_232, %c0_233, %c0_234] : memref<1x4x16x16x8xf32, #tpu.memory_space<vmem>>, vector<1x1x1x15x8xf32>
    %169 = vector.shape_cast %168 : vector<1x1x1x15x8xf32> to vector<15x8xf32>
    %c7_235 = arith.constant 7 : index
    %c0_236 = arith.constant 0 : index
    %c0_237 = arith.constant 0 : index
    %170 = vector.load %arg2[%c7_235, %c0_236, %c0_237] : memref<9x8x8xf32, #tpu.memory_space<vmem>>, vector<1x8x8xf32>
    %171 = vector.shape_cast %170 : vector<1x8x8xf32> to vector<8x8xf32>
    %cst_238 = arith.constant dense<0.000000e+00> : vector<15x8xf32>
    %172 = tpu.matmul %169, %171, %cst_238 {dimension_numbers = #tpu.dot_dimension_numbers<[1], [0], [0], [1], [0, 0, 1, 1], [], []>} : vector<15x8xf32>, vector<8x8xf32>, vector<15x8xf32> -> vector<15x8xf32>
    %173 = arith.addf %167, %172 : vector<15x8xf32>
    %c0_239 = arith.constant 0 : index
    %c0_240 = arith.constant 0 : index
    %c3_241 = arith.constant 3 : index
    %c1_242 = arith.constant 1 : index
    %c0_243 = arith.constant 0 : index
    %174 = vector.load %arg1[%c0_239, %c0_240, %c3_241, %c1_242, %c0_243] : memref<1x4x16x16x8xf32, #tpu.memory_space<vmem>>, vector<1x1x1x15x8xf32>
    %175 = vector.shape_cast %174 : vector<1x1x1x15x8xf32> to vector<15x8xf32>
    %c8_244 = arith.constant 8 : index
    %c0_245 = arith.constant 0 : index
    %c0_246 = arith.constant 0 : index
    %176 = vector.load %arg2[%c8_244, %c0_245, %c0_246] : memref<9x8x8xf32, #tpu.memory_space<vmem>>, vector<1x8x8xf32>
    %177 = vector.shape_cast %176 : vector<1x8x8xf32> to vector<8x8xf32>
    %cst_247 = arith.constant dense<0.000000e+00> : vector<15x8xf32>
    %178 = tpu.matmul %175, %177, %cst_247 {dimension_numbers = #tpu.dot_dimension_numbers<[1], [0], [0], [1], [0, 0, 1, 1], [], []>} : vector<15x8xf32>, vector<8x8xf32>, vector<15x8xf32> -> vector<15x8xf32>
    %179 = arith.addf %173, %178 : vector<15x8xf32>
    %c2_248 = arith.constant 2 : index
    %c0_249 = arith.constant 0 : index
    %c0_250 = arith.constant 0 : index
    %180 = vector.load %arg8[%c2_248, %c0_249, %c0_250] : memref<15x15x8xf32, #tpu.memory_space<vmem>>, vector<1x15x8xf32>
    %181 = vector.shape_cast %180 : vector<1x15x8xf32> to vector<15x8xf32>
    %182 = vector.shape_cast %179 : vector<15x8xf32> to vector<1x15x8xf32>
    tpu.vector_store %arg8[%c2_248, %c0_249, %c0_250], %182 {strides = array<i32>} : memref<15x15x8xf32, #tpu.memory_space<vmem>>, vector<1x15x8xf32>,
    %cst_251 = arith.constant 0.000000e+00 : f32
    %183 = vector.broadcast %cst_251 : f32 to vector<15x8xf32>
    %c0_252 = arith.constant 0 : index
    %c0_253 = arith.constant 0 : index
    %184 = vector.load %arg3[%c0_252, %c0_253] : memref<1x8xf32, #tpu.memory_space<vmem>>, vector<1x8xf32>
    %185 = vector.broadcast %184 : vector<1x8xf32> to vector<15x8xf32>
    %186 = arith.addf %183, %185 : vector<15x8xf32>
    %c0_254 = arith.constant 0 : index
    %c0_255 = arith.constant 0 : index
    %c3_256 = arith.constant 3 : index
    %c0_257 = arith.constant 0 : index
    %c0_258 = arith.constant 0 : index
    %187 = vector.load %arg1[%c0_254, %c0_255, %c3_256, %c0_257, %c0_258] : memref<1x4x16x16x8xf32, #tpu.memory_space<vmem>>, vector<1x1x1x15x8xf32>
    %188 = vector.shape_cast %187 : vector<1x1x1x15x8xf32> to vector<15x8xf32>
    %c0_259 = arith.constant 0 : index
    %c0_260 = arith.constant 0 : index
    %c0_261 = arith.constant 0 : index
    %189 = vector.load %arg2[%c0_259, %c0_260, %c0_261] : memref<9x8x8xf32, #tpu.memory_space<vmem>>, vector<1x8x8xf32>
    %190 = vector.shape_cast %189 : vector<1x8x8xf32> to vector<8x8xf32>
    %cst_262 = arith.constant dense<0.000000e+00> : vector<15x8xf32>
    %191 = tpu.matmul %188, %190, %cst_262 {dimension_numbers = #tpu.dot_dimension_numbers<[1], [0], [0], [1], [0, 0, 1, 1], [], []>} : vector<15x8xf32>, vector<8x8xf32>, vector<15x8xf32> -> vector<15x8xf32>
    %192 = arith.addf %186, %191 : vector<15x8xf32>
    %c0_263 = arith.constant 0 : index
    %c1_264 = arith.constant 1 : index
    %c3_265 = arith.constant 3 : index
    %c0_266 = arith.constant 0 : index
    %c0_267 = arith.constant 0 : index
    %193 = vector.load %arg1[%c0_263, %c1_264, %c3_265, %c0_266, %c0_267] : memref<1x4x16x16x8xf32, #tpu.memory_space<vmem>>, vector<1x1x1x15x8xf32>
    %194 = vector.shape_cast %193 : vector<1x1x1x15x8xf32> to vector<15x8xf32>
    %c1_268 = arith.constant 1 : index
    %c0_269 = arith.constant 0 : index
    %c0_270 = arith.constant 0 : index
    %195 = vector.load %arg2[%c1_268, %c0_269, %c0_270] : memref<9x8x8xf32, #tpu.memory_space<vmem>>, vector<1x8x8xf32>
    %196 = vector.shape_cast %195 : vector<1x8x8xf32> to vector<8x8xf32>
    %cst_271 = arith.constant dense<0.000000e+00> : vector<15x8xf32>
    %197 = tpu.matmul %194, %196, %cst_271 {dimension_numbers = #tpu.dot_dimension_numbers<[1], [0], [0], [1], [0, 0, 1, 1], [], []>} : vector<15x8xf32>, vector<8x8xf32>, vector<15x8xf32> -> vector<15x8xf32>
    %198 = arith.addf %192, %197 : vector<15x8xf32>
    %c0_272 = arith.constant 0 : index
    %c0_273 = arith.constant 0 : index
    %c3_274 = arith.constant 3 : index
    %c1_275 = arith.constant 1 : index
    %c0_276 = arith.constant 0 : index
    %199 = vector.load %arg1[%c0_272, %c0_273, %c3_274, %c1_275, %c0_276] : memref<1x4x16x16x8xf32, #tpu.memory_space<vmem>>, vector<1x1x1x15x8xf32>
    %200 = vector.shape_cast %199 : vector<1x1x1x15x8xf32> to vector<15x8xf32>
    %c2_277 = arith.constant 2 : index
    %c0_278 = arith.constant 0 : index
    %c0_279 = arith.constant 0 : index
    %201 = vector.load %arg2[%c2_277, %c0_278, %c0_279] : memref<9x8x8xf32, #tpu.memory_space<vmem>>, vector<1x8x8xf32>
    %202 = vector.shape_cast %201 : vector<1x8x8xf32> to vector<8x8xf32>
    %cst_280 = arith.constant dense<0.000000e+00> : vector<15x8xf32>
    %203 = tpu.matmul %200, %202, %cst_280 {dimension_numbers = #tpu.dot_dimension_numbers<[1], [0], [0], [1], [0, 0, 1, 1], [], []>} : vector<15x8xf32>, vector<8x8xf32>, vector<15x8xf32> -> vector<15x8xf32>
    %204 = arith.addf %198, %203 : vector<15x8xf32>
    %c0_281 = arith.constant 0 : index
    %c2_282 = arith.constant 2 : index
    %c3_283 = arith.constant 3 : index
    %c0_284 = arith.constant 0 : index
    %c0_285 = arith.constant 0 : index
    %205 = vector.load %arg1[%c0_281, %c2_282, %c3_283, %c0_284, %c0_285] : memref<1x4x16x16x8xf32, #tpu.memory_space<vmem>>, vector<1x1x1x15x8xf32>
    %206 = vector.shape_cast %205 : vector<1x1x1x15x8xf32> to vector<15x8xf32>
    %c3_286 = arith.constant 3 : index
    %c0_287 = arith.constant 0 : index
    %c0_288 = arith.constant 0 : index
    %207 = vector.load %arg2[%c3_286, %c0_287, %c0_288] : memref<9x8x8xf32, #tpu.memory_space<vmem>>, vector<1x8x8xf32>
    %208 = vector.shape_cast %207 : vector<1x8x8xf32> to vector<8x8xf32>
    %cst_289 = arith.constant dense<0.000000e+00> : vector<15x8xf32>
    %209 = tpu.matmul %206, %208, %cst_289 {dimension_numbers = #tpu.dot_dimension_numbers<[1], [0], [0], [1], [0, 0, 1, 1], [], []>} : vector<15x8xf32>, vector<8x8xf32>, vector<15x8xf32> -> vector<15x8xf32>
    %210 = arith.addf %204, %209 : vector<15x8xf32>
    %c0_290 = arith.constant 0 : index
    %c3_291 = arith.constant 3 : index
    %c3_292 = arith.constant 3 : index
    %c0_293 = arith.constant 0 : index
    %c0_294 = arith.constant 0 : index
    %211 = vector.load %arg1[%c0_290, %c3_291, %c3_292, %c0_293, %c0_294] : memref<1x4x16x16x8xf32, #tpu.memory_space<vmem>>, vector<1x1x1x15x8xf32>
    %212 = vector.shape_cast %211 : vector<1x1x1x15x8xf32> to vector<15x8xf32>
    %c4_295 = arith.constant 4 : index
    %c0_296 = arith.constant 0 : index
    %c0_297 = arith.constant 0 : index
    %213 = vector.load %arg2[%c4_295, %c0_296, %c0_297] : memref<9x8x8xf32, #tpu.memory_space<vmem>>, vector<1x8x8xf32>
    %214 = vector.shape_cast %213 : vector<1x8x8xf32> to vector<8x8xf32>
    %cst_298 = arith.constant dense<0.000000e+00> : vector<15x8xf32>
    %215 = tpu.matmul %212, %214, %cst_298 {dimension_numbers = #tpu.dot_dimension_numbers<[1], [0], [0], [1], [0, 0, 1, 1], [], []>} : vector<15x8xf32>, vector<8x8xf32>, vector<15x8xf32> -> vector<15x8xf32>
    %216 = arith.addf %210, %215 : vector<15x8xf32>
    %c0_299 = arith.constant 0 : index
    %c2_300 = arith.constant 2 : index
    %c3_301 = arith.constant 3 : index
    %c1_302 = arith.constant 1 : index
    %c0_303 = arith.constant 0 : index
    %217 = vector.load %arg1[%c0_299, %c2_300, %c3_301, %c1_302, %c0_303] : memref<1x4x16x16x8xf32, #tpu.memory_space<vmem>>, vector<1x1x1x15x8xf32>
    %218 = vector.shape_cast %217 : vector<1x1x1x15x8xf32> to vector<15x8xf32>
    %c5_304 = arith.constant 5 : index
    %c0_305 = arith.constant 0 : index
    %c0_306 = arith.constant 0 : index
    %219 = vector.load %arg2[%c5_304, %c0_305, %c0_306] : memref<9x8x8xf32, #tpu.memory_space<vmem>>, vector<1x8x8xf32>
    %220 = vector.shape_cast %219 : vector<1x8x8xf32> to vector<8x8xf32>
    %cst_307 = arith.constant dense<0.000000e+00> : vector<15x8xf32>
    %221 = tpu.matmul %218, %220, %cst_307 {dimension_numbers = #tpu.dot_dimension_numbers<[1], [0], [0], [1], [0, 0, 1, 1], [], []>} : vector<15x8xf32>, vector<8x8xf32>, vector<15x8xf32> -> vector<15x8xf32>
    %222 = arith.addf %216, %221 : vector<15x8xf32>
    %c0_308 = arith.constant 0 : index
    %c0_309 = arith.constant 0 : index
    %c4_310 = arith.constant 4 : index
    %c0_311 = arith.constant 0 : index
    %c0_312 = arith.constant 0 : index
    %223 = vector.load %arg1[%c0_308, %c0_309, %c4_310, %c0_311, %c0_312] : memref<1x4x16x16x8xf32, #tpu.memory_space<vmem>>, vector<1x1x1x15x8xf32>
    %224 = vector.shape_cast %223 : vector<1x1x1x15x8xf32> to vector<15x8xf32>
    %c6_313 = arith.constant 6 : index
    %c0_314 = arith.constant 0 : index
    %c0_315 = arith.constant 0 : index
    %225 = vector.load %arg2[%c6_313, %c0_314, %c0_315] : memref<9x8x8xf32, #tpu.memory_space<vmem>>, vector<1x8x8xf32>
    %226 = vector.shape_cast %225 : vector<1x8x8xf32> to vector<8x8xf32>
    %cst_316 = arith.constant dense<0.000000e+00> : vector<15x8xf32>
    %227 = tpu.matmul %224, %226, %cst_316 {dimension_numbers = #tpu.dot_dimension_numbers<[1], [0], [0], [1], [0, 0, 1, 1], [], []>} : vector<15x8xf32>, vector<8x8xf32>, vector<15x8xf32> -> vector<15x8xf32>
    %228 = arith.addf %222, %227 : vector<15x8xf32>
    %c0_317 = arith.constant 0 : index
    %c1_318 = arith.constant 1 : index
    %c4_319 = arith.constant 4 : index
    %c0_320 = arith.constant 0 : index
    %c0_321 = arith.constant 0 : index
    %229 = vector.load %arg1[%c0_317, %c1_318, %c4_319, %c0_320, %c0_321] : memref<1x4x16x16x8xf32, #tpu.memory_space<vmem>>, vector<1x1x1x15x8xf32>
    %230 = vector.shape_cast %229 : vector<1x1x1x15x8xf32> to vector<15x8xf32>
    %c7_322 = arith.constant 7 : index
    %c0_323 = arith.constant 0 : index
    %c0_324 = arith.constant 0 : index
    %231 = vector.load %arg2[%c7_322, %c0_323, %c0_324] : memref<9x8x8xf32, #tpu.memory_space<vmem>>, vector<1x8x8xf32>
    %232 = vector.shape_cast %231 : vector<1x8x8xf32> to vector<8x8xf32>
    %cst_325 = arith.constant dense<0.000000e+00> : vector<15x8xf32>
    %233 = tpu.matmul %230, %232, %cst_325 {dimension_numbers = #tpu.dot_dimension_numbers<[1], [0], [0], [1], [0, 0, 1, 1], [], []>} : vector<15x8xf32>, vector<8x8xf32>, vector<15x8xf32> -> vector<15x8xf32>
    %234 = arith.addf %228, %233 : vector<15x8xf32>
    %c0_326 = arith.constant 0 : index
    %c0_327 = arith.constant 0 : index
    %c4_328 = arith.constant 4 : index
    %c1_329 = arith.constant 1 : index
    %c0_330 = arith.constant 0 : index
    %235 = vector.load %arg1[%c0_326, %c0_327, %c4_328, %c1_329, %c0_330] : memref<1x4x16x16x8xf32, #tpu.memory_space<vmem>>, vector<1x1x1x15x8xf32>
    %236 = vector.shape_cast %235 : vector<1x1x1x15x8xf32> to vector<15x8xf32>
    %c8_331 = arith.constant 8 : index
    %c0_332 = arith.constant 0 : index
    %c0_333 = arith.constant 0 : index
    %237 = vector.load %arg2[%c8_331, %c0_332, %c0_333] : memref<9x8x8xf32, #tpu.memory_space<vmem>>, vector<1x8x8xf32>
    %238 = vector.shape_cast %237 : vector<1x8x8xf32> to vector<8x8xf32>
    %cst_334 = arith.constant dense<0.000000e+00> : vector<15x8xf32>
    %239 = tpu.matmul %236, %238, %cst_334 {dimension_numbers = #tpu.dot_dimension_numbers<[1], [0], [0], [1], [0, 0, 1, 1], [], []>} : vector<15x8xf32>, vector<8x8xf32>, vector<15x8xf32> -> vector<15x8xf32>
    %240 = arith.addf %234, %239 : vector<15x8xf32>
    %c3_335 = arith.constant 3 : index
    %c0_336 = arith.constant 0 : index
    %c0_337 = arith.constant 0 : index
    %241 = vector.load %arg8[%c3_335, %c0_336, %c0_337] : memref<15x15x8xf32, #tpu.memory_space<vmem>>, vector<1x15x8xf32>
    %242 = vector.shape_cast %241 : vector<1x15x8xf32> to vector<15x8xf32>
    %243 = vector.shape_cast %240 : vector<15x8xf32> to vector<1x15x8xf32>
    tpu.vector_store %arg8[%c3_335, %c0_336, %c0_337], %243 {strides = array<i32>} : memref<15x15x8xf32, #tpu.memory_space<vmem>>, vector<1x15x8xf32>,
    %cst_338 = arith.constant 0.000000e+00 : f32
    %244 = vector.broadcast %cst_338 : f32 to vector<15x8xf32>
    %c0_339 = arith.constant 0 : index
    %c0_340 = arith.constant 0 : index
    %245 = vector.load %arg3[%c0_339, %c0_340] : memref<1x8xf32, #tpu.memory_space<vmem>>, vector<1x8xf32>
    %246 = vector.broadcast %245 : vector<1x8xf32> to vector<15x8xf32>
    %247 = arith.addf %244, %246 : vector<15x8xf32>
    %c0_341 = arith.constant 0 : index
    %c0_342 = arith.constant 0 : index
    %c4_343 = arith.constant 4 : index
    %c0_344 = arith.constant 0 : index
    %c0_345 = arith.constant 0 : index
    %248 = vector.load %arg1[%c0_341, %c0_342, %c4_343, %c0_344, %c0_345] : memref<1x4x16x16x8xf32, #tpu.memory_space<vmem>>, vector<1x1x1x15x8xf32>
    %249 = vector.shape_cast %248 : vector<1x1x1x15x8xf32> to vector<15x8xf32>
    %c0_346 = arith.constant 0 : index
    %c0_347 = arith.constant 0 : index
    %c0_348 = arith.constant 0 : index
    %250 = vector.load %arg2[%c0_346, %c0_347, %c0_348] : memref<9x8x8xf32, #tpu.memory_space<vmem>>, vector<1x8x8xf32>
    %251 = vector.shape_cast %250 : vector<1x8x8xf32> to vector<8x8xf32>
    %cst_349 = arith.constant dense<0.000000e+00> : vector<15x8xf32>
    %252 = tpu.matmul %249, %251, %cst_349 {dimension_numbers = #tpu.dot_dimension_numbers<[1], [0], [0], [1], [0, 0, 1, 1], [], []>} : vector<15x8xf32>, vector<8x8xf32>, vector<15x8xf32> -> vector<15x8xf32>
    %253 = arith.addf %247, %252 : vector<15x8xf32>
    %c0_350 = arith.constant 0 : index
    %c1_351 = arith.constant 1 : index
    %c4_352 = arith.constant 4 : index
    %c0_353 = arith.constant 0 : index
    %c0_354 = arith.constant 0 : index
    %254 = vector.load %arg1[%c0_350, %c1_351, %c4_352, %c0_353, %c0_354] : memref<1x4x16x16x8xf32, #tpu.memory_space<vmem>>, vector<1x1x1x15x8xf32>
    %255 = vector.shape_cast %254 : vector<1x1x1x15x8xf32> to vector<15x8xf32>
    %c1_355 = arith.constant 1 : index
    %c0_356 = arith.constant 0 : index
    %c0_357 = arith.constant 0 : index
    %256 = vector.load %arg2[%c1_355, %c0_356, %c0_357] : memref<9x8x8xf32, #tpu.memory_space<vmem>>, vector<1x8x8xf32>
    %257 = vector.shape_cast %256 : vector<1x8x8xf32> to vector<8x8xf32>
    %cst_358 = arith.constant dense<0.000000e+00> : vector<15x8xf32>
    %258 = tpu.matmul %255, %257, %cst_358 {dimension_numbers = #tpu.dot_dimension_numbers<[1], [0], [0], [1], [0, 0, 1, 1], [], []>} : vector<15x8xf32>, vector<8x8xf32>, vector<15x8xf32> -> vector<15x8xf32>
    %259 = arith.addf %253, %258 : vector<15x8xf32>
    %c0_359 = arith.constant 0 : index
    %c0_360 = arith.constant 0 : index
    %c4_361 = arith.constant 4 : index
    %c1_362 = arith.constant 1 : index
    %c0_363 = arith.constant 0 : index
    %260 = vector.load %arg1[%c0_359, %c0_360, %c4_361, %c1_362, %c0_363] : memref<1x4x16x16x8xf32, #tpu.memory_space<vmem>>, vector<1x1x1x15x8xf32>
    %261 = vector.shape_cast %260 : vector<1x1x1x15x8xf32> to vector<15x8xf32>
    %c2_364 = arith.constant 2 : index
    %c0_365 = arith.constant 0 : index
    %c0_366 = arith.constant 0 : index
    %262 = vector.load %arg2[%c2_364, %c0_365, %c0_366] : memref<9x8x8xf32, #tpu.memory_space<vmem>>, vector<1x8x8xf32>
    %263 = vector.shape_cast %262 : vector<1x8x8xf32> to vector<8x8xf32>
    %cst_367 = arith.constant dense<0.000000e+00> : vector<15x8xf32>
    %264 = tpu.matmul %261, %263, %cst_367 {dimension_numbers = #tpu.dot_dimension_numbers<[1], [0], [0], [1], [0, 0, 1, 1], [], []>} : vector<15x8xf32>, vector<8x8xf32>, vector<15x8xf32> -> vector<15x8xf32>
    %265 = arith.addf %259, %264 : vector<15x8xf32>
    %c0_368 = arith.constant 0 : index
    %c2_369 = arith.constant 2 : index
    %c4_370 = arith.constant 4 : index
    %c0_371 = arith.constant 0 : index
    %c0_372 = arith.constant 0 : index
    %266 = vector.load %arg1[%c0_368, %c2_369, %c4_370, %c0_371, %c0_372] : memref<1x4x16x16x8xf32, #tpu.memory_space<vmem>>, vector<1x1x1x15x8xf32>
    %267 = vector.shape_cast %266 : vector<1x1x1x15x8xf32> to vector<15x8xf32>
    %c3_373 = arith.constant 3 : index
    %c0_374 = arith.constant 0 : index
    %c0_375 = arith.constant 0 : index
    %268 = vector.load %arg2[%c3_373, %c0_374, %c0_375] : memref<9x8x8xf32, #tpu.memory_space<vmem>>, vector<1x8x8xf32>
    %269 = vector.shape_cast %268 : vector<1x8x8xf32> to vector<8x8xf32>
    %cst_376 = arith.constant dense<0.000000e+00> : vector<15x8xf32>
    %270 = tpu.matmul %267, %269, %cst_376 {dimension_numbers = #tpu.dot_dimension_numbers<[1], [0], [0], [1], [0, 0, 1, 1], [], []>} : vector<15x8xf32>, vector<8x8xf32>, vector<15x8xf32> -> vector<15x8xf32>
    %271 = arith.addf %265, %270 : vector<15x8xf32>
    %c0_377 = arith.constant 0 : index
    %c3_378 = arith.constant 3 : index
    %c4_379 = arith.constant 4 : index
    %c0_380 = arith.constant 0 : index
    %c0_381 = arith.constant 0 : index
    %272 = vector.load %arg1[%c0_377, %c3_378, %c4_379, %c0_380, %c0_381] : memref<1x4x16x16x8xf32, #tpu.memory_space<vmem>>, vector<1x1x1x15x8xf32>
    %273 = vector.shape_cast %272 : vector<1x1x1x15x8xf32> to vector<15x8xf32>
    %c4_382 = arith.constant 4 : index
    %c0_383 = arith.constant 0 : index
    %c0_384 = arith.constant 0 : index
    %274 = vector.load %arg2[%c4_382, %c0_383, %c0_384] : memref<9x8x8xf32, #tpu.memory_space<vmem>>, vector<1x8x8xf32>
    %275 = vector.shape_cast %274 : vector<1x8x8xf32> to vector<8x8xf32>
    %cst_385 = arith.constant dense<0.000000e+00> : vector<15x8xf32>
    %276 = tpu.matmul %273, %275, %cst_385 {dimension_numbers = #tpu.dot_dimension_numbers<[1], [0], [0], [1], [0, 0, 1, 1], [], []>} : vector<15x8xf32>, vector<8x8xf32>, vector<15x8xf32> -> vector<15x8xf32>
    %277 = arith.addf %271, %276 : vector<15x8xf32>
    %c0_386 = arith.constant 0 : index
    %c2_387 = arith.constant 2 : index
    %c4_388 = arith.constant 4 : index
    %c1_389 = arith.constant 1 : index
    %c0_390 = arith.constant 0 : index
    %278 = vector.load %arg1[%c0_386, %c2_387, %c4_388, %c1_389, %c0_390] : memref<1x4x16x16x8xf32, #tpu.memory_space<vmem>>, vector<1x1x1x15x8xf32>
    %279 = vector.shape_cast %278 : vector<1x1x1x15x8xf32> to vector<15x8xf32>
    %c5_391 = arith.constant 5 : index
    %c0_392 = arith.constant 0 : index
    %c0_393 = arith.constant 0 : index
    %280 = vector.load %arg2[%c5_391, %c0_392, %c0_393] : memref<9x8x8xf32, #tpu.memory_space<vmem>>, vector<1x8x8xf32>
    %281 = vector.shape_cast %280 : vector<1x8x8xf32> to vector<8x8xf32>
    %cst_394 = arith.constant dense<0.000000e+00> : vector<15x8xf32>
    %282 = tpu.matmul %279, %281, %cst_394 {dimension_numbers = #tpu.dot_dimension_numbers<[1], [0], [0], [1], [0, 0, 1, 1], [], []>} : vector<15x8xf32>, vector<8x8xf32>, vector<15x8xf32> -> vector<15x8xf32>
    %283 = arith.addf %277, %282 : vector<15x8xf32>
    %c0_395 = arith.constant 0 : index
    %c0_396 = arith.constant 0 : index
    %c5_397 = arith.constant 5 : index
    %c0_398 = arith.constant 0 : index
    %c0_399 = arith.constant 0 : index
    %284 = vector.load %arg1[%c0_395, %c0_396, %c5_397, %c0_398, %c0_399] : memref<1x4x16x16x8xf32, #tpu.memory_space<vmem>>, vector<1x1x1x15x8xf32>
    %285 = vector.shape_cast %284 : vector<1x1x1x15x8xf32> to vector<15x8xf32>
    %c6_400 = arith.constant 6 : index
    %c0_401 = arith.constant 0 : index
    %c0_402 = arith.constant 0 : index
    %286 = vector.load %arg2[%c6_400, %c0_401, %c0_402] : memref<9x8x8xf32, #tpu.memory_space<vmem>>, vector<1x8x8xf32>
    %287 = vector.shape_cast %286 : vector<1x8x8xf32> to vector<8x8xf32>
    %cst_403 = arith.constant dense<0.000000e+00> : vector<15x8xf32>
    %288 = tpu.matmul %285, %287, %cst_403 {dimension_numbers = #tpu.dot_dimension_numbers<[1], [0], [0], [1], [0, 0, 1, 1], [], []>} : vector<15x8xf32>, vector<8x8xf32>, vector<15x8xf32> -> vector<15x8xf32>
    %289 = arith.addf %283, %288 : vector<15x8xf32>
    %c0_404 = arith.constant 0 : index
    %c1_405 = arith.constant 1 : index
    %c5_406 = arith.constant 5 : index
    %c0_407 = arith.constant 0 : index
    %c0_408 = arith.constant 0 : index
    %290 = vector.load %arg1[%c0_404, %c1_405, %c5_406, %c0_407, %c0_408] : memref<1x4x16x16x8xf32, #tpu.memory_space<vmem>>, vector<1x1x1x15x8xf32>
    %291 = vector.shape_cast %290 : vector<1x1x1x15x8xf32> to vector<15x8xf32>
    %c7_409 = arith.constant 7 : index
    %c0_410 = arith.constant 0 : index
    %c0_411 = arith.constant 0 : index
    %292 = vector.load %arg2[%c7_409, %c0_410, %c0_411] : memref<9x8x8xf32, #tpu.memory_space<vmem>>, vector<1x8x8xf32>
    %293 = vector.shape_cast %292 : vector<1x8x8xf32> to vector<8x8xf32>
    %cst_412 = arith.constant dense<0.000000e+00> : vector<15x8xf32>
    %294 = tpu.matmul %291, %293, %cst_412 {dimension_numbers = #tpu.dot_dimension_numbers<[1], [0], [0], [1], [0, 0, 1, 1], [], []>} : vector<15x8xf32>, vector<8x8xf32>, vector<15x8xf32> -> vector<15x8xf32>
    %295 = arith.addf %289, %294 : vector<15x8xf32>
    %c0_413 = arith.constant 0 : index
    %c0_414 = arith.constant 0 : index
    %c5_415 = arith.constant 5 : index
    %c1_416 = arith.constant 1 : index
    %c0_417 = arith.constant 0 : index
    %296 = vector.load %arg1[%c0_413, %c0_414, %c5_415, %c1_416, %c0_417] : memref<1x4x16x16x8xf32, #tpu.memory_space<vmem>>, vector<1x1x1x15x8xf32>
    %297 = vector.shape_cast %296 : vector<1x1x1x15x8xf32> to vector<15x8xf32>
    %c8_418 = arith.constant 8 : index
    %c0_419 = arith.constant 0 : index
    %c0_420 = arith.constant 0 : index
    %298 = vector.load %arg2[%c8_418, %c0_419, %c0_420] : memref<9x8x8xf32, #tpu.memory_space<vmem>>, vector<1x8x8xf32>
    %299 = vector.shape_cast %298 : vector<1x8x8xf32> to vector<8x8xf32>
    %cst_421 = arith.constant dense<0.000000e+00> : vector<15x8xf32>
    %300 = tpu.matmul %297, %299, %cst_421 {dimension_numbers = #tpu.dot_dimension_numbers<[1], [0], [0], [1], [0, 0, 1, 1], [], []>} : vector<15x8xf32>, vector<8x8xf32>, vector<15x8xf32> -> vector<15x8xf32>
    %301 = arith.addf %295, %300 : vector<15x8xf32>
    %c4_422 = arith.constant 4 : index
    %c0_423 = arith.constant 0 : index
    %c0_424 = arith.constant 0 : index
    %302 = vector.load %arg8[%c4_422, %c0_423, %c0_424] : memref<15x15x8xf32, #tpu.memory_space<vmem>>, vector<1x15x8xf32>
    %303 = vector.shape_cast %302 : vector<1x15x8xf32> to vector<15x8xf32>
    %304 = vector.shape_cast %301 : vector<15x8xf32> to vector<1x15x8xf32>
    tpu.vector_store %arg8[%c4_422, %c0_423, %c0_424], %304 {strides = array<i32>} : memref<15x15x8xf32, #tpu.memory_space<vmem>>, vector<1x15x8xf32>,
    %cst_425 = arith.constant 0.000000e+00 : f32
    %305 = vector.broadcast %cst_425 : f32 to vector<15x8xf32>
    %c0_426 = arith.constant 0 : index
    %c0_427 = arith.constant 0 : index
    %306 = vector.load %arg3[%c0_426, %c0_427] : memref<1x8xf32, #tpu.memory_space<vmem>>, vector<1x8xf32>
    %307 = vector.broadcast %306 : vector<1x8xf32> to vector<15x8xf32>
    %308 = arith.addf %305, %307 : vector<15x8xf32>
    %c0_428 = arith.constant 0 : index
    %c0_429 = arith.constant 0 : index
    %c5_430 = arith.constant 5 : index
    %c0_431 = arith.constant 0 : index
    %c0_432 = arith.constant 0 : index
    %309 = vector.load %arg1[%c0_428, %c0_429, %c5_430, %c0_431, %c0_432] : memref<1x4x16x16x8xf32, #tpu.memory_space<vmem>>, vector<1x1x1x15x8xf32>
    %310 = vector.shape_cast %309 : vector<1x1x1x15x8xf32> to vector<15x8xf32>
    %c0_433 = arith.constant 0 : index
    %c0_434 = arith.constant 0 : index
    %c0_435 = arith.constant 0 : index
    %311 = vector.load %arg2[%c0_433, %c0_434, %c0_435] : memref<9x8x8xf32, #tpu.memory_space<vmem>>, vector<1x8x8xf32>
    %312 = vector.shape_cast %311 : vector<1x8x8xf32> to vector<8x8xf32>
    %cst_436 = arith.constant dense<0.000000e+00> : vector<15x8xf32>
    %313 = tpu.matmul %310, %312, %cst_436 {dimension_numbers = #tpu.dot_dimension_numbers<[1], [0], [0], [1], [0, 0, 1, 1], [], []>} : vector<15x8xf32>, vector<8x8xf32>, vector<15x8xf32> -> vector<15x8xf32>
    %314 = arith.addf %308, %313 : vector<15x8xf32>
    %c0_437 = arith.constant 0 : index
    %c1_438 = arith.constant 1 : index
    %c5_439 = arith.constant 5 : index
    %c0_440 = arith.constant 0 : index
    %c0_441 = arith.constant 0 : index
    %315 = vector.load %arg1[%c0_437, %c1_438, %c5_439, %c0_440, %c0_441] : memref<1x4x16x16x8xf32, #tpu.memory_space<vmem>>, vector<1x1x1x15x8xf32>
    %316 = vector.shape_cast %315 : vector<1x1x1x15x8xf32> to vector<15x8xf32>
    %c1_442 = arith.constant 1 : index
    %c0_443 = arith.constant 0 : index
    %c0_444 = arith.constant 0 : index
    %317 = vector.load %arg2[%c1_442, %c0_443, %c0_444] : memref<9x8x8xf32, #tpu.memory_space<vmem>>, vector<1x8x8xf32>
    %318 = vector.shape_cast %317 : vector<1x8x8xf32> to vector<8x8xf32>
    %cst_445 = arith.constant dense<0.000000e+00> : vector<15x8xf32>
    %319 = tpu.matmul %316, %318, %cst_445 {dimension_numbers = #tpu.dot_dimension_numbers<[1], [0], [0], [1], [0, 0, 1, 1], [], []>} : vector<15x8xf32>, vector<8x8xf32>, vector<15x8xf32> -> vector<15x8xf32>
    %320 = arith.addf %314, %319 : vector<15x8xf32>
    %c0_446 = arith.constant 0 : index
    %c0_447 = arith.constant 0 : index
    %c5_448 = arith.constant 5 : index
    %c1_449 = arith.constant 1 : index
    %c0_450 = arith.constant 0 : index
    %321 = vector.load %arg1[%c0_446, %c0_447, %c5_448, %c1_449, %c0_450] : memref<1x4x16x16x8xf32, #tpu.memory_space<vmem>>, vector<1x1x1x15x8xf32>
    %322 = vector.shape_cast %321 : vector<1x1x1x15x8xf32> to vector<15x8xf32>
    %c2_451 = arith.constant 2 : index
    %c0_452 = arith.constant 0 : index
    %c0_453 = arith.constant 0 : index
    %323 = vector.load %arg2[%c2_451, %c0_452, %c0_453] : memref<9x8x8xf32, #tpu.memory_space<vmem>>, vector<1x8x8xf32>
    %324 = vector.shape_cast %323 : vector<1x8x8xf32> to vector<8x8xf32>
    %cst_454 = arith.constant dense<0.000000e+00> : vector<15x8xf32>
    %325 = tpu.matmul %322, %324, %cst_454 {dimension_numbers = #tpu.dot_dimension_numbers<[1], [0], [0], [1], [0, 0, 1, 1], [], []>} : vector<15x8xf32>, vector<8x8xf32>, vector<15x8xf32> -> vector<15x8xf32>
    %326 = arith.addf %320, %325 : vector<15x8xf32>
    %c0_455 = arith.constant 0 : index
    %c2_456 = arith.constant 2 : index
    %c5_457 = arith.constant 5 : index
    %c0_458 = arith.constant 0 : index
    %c0_459 = arith.constant 0 : index
    %327 = vector.load %arg1[%c0_455, %c2_456, %c5_457, %c0_458, %c0_459] : memref<1x4x16x16x8xf32, #tpu.memory_space<vmem>>, vector<1x1x1x15x8xf32>
    %328 = vector.shape_cast %327 : vector<1x1x1x15x8xf32> to vector<15x8xf32>
    %c3_460 = arith.constant 3 : index
    %c0_461 = arith.constant 0 : index
    %c0_462 = arith.constant 0 : index
    %329 = vector.load %arg2[%c3_460, %c0_461, %c0_462] : memref<9x8x8xf32, #tpu.memory_space<vmem>>, vector<1x8x8xf32>
    %330 = vector.shape_cast %329 : vector<1x8x8xf32> to vector<8x8xf32>
    %cst_463 = arith.constant dense<0.000000e+00> : vector<15x8xf32>
    %331 = tpu.matmul %328, %330, %cst_463 {dimension_numbers = #tpu.dot_dimension_numbers<[1], [0], [0], [1], [0, 0, 1, 1], [], []>} : vector<15x8xf32>, vector<8x8xf32>, vector<15x8xf32> -> vector<15x8xf32>
    %332 = arith.addf %326, %331 : vector<15x8xf32>
    %c0_464 = arith.constant 0 : index
    %c3_465 = arith.constant 3 : index
    %c5_466 = arith.constant 5 : index
    %c0_467 = arith.constant 0 : index
    %c0_468 = arith.constant 0 : index
    %333 = vector.load %arg1[%c0_464, %c3_465, %c5_466, %c0_467, %c0_468] : memref<1x4x16x16x8xf32, #tpu.memory_space<vmem>>, vector<1x1x1x15x8xf32>
    %334 = vector.shape_cast %333 : vector<1x1x1x15x8xf32> to vector<15x8xf32>
    %c4_469 = arith.constant 4 : index
    %c0_470 = arith.constant 0 : index
    %c0_471 = arith.constant 0 : index
    %335 = vector.load %arg2[%c4_469, %c0_470, %c0_471] : memref<9x8x8xf32, #tpu.memory_space<vmem>>, vector<1x8x8xf32>
    %336 = vector.shape_cast %335 : vector<1x8x8xf32> to vector<8x8xf32>
    %cst_472 = arith.constant dense<0.000000e+00> : vector<15x8xf32>
    %337 = tpu.matmul %334, %336, %cst_472 {dimension_numbers = #tpu.dot_dimension_numbers<[1], [0], [0], [1], [0, 0, 1, 1], [], []>} : vector<15x8xf32>, vector<8x8xf32>, vector<15x8xf32> -> vector<15x8xf32>
    %338 = arith.addf %332, %337 : vector<15x8xf32>
    %c0_473 = arith.constant 0 : index
    %c2_474 = arith.constant 2 : index
    %c5_475 = arith.constant 5 : index
    %c1_476 = arith.constant 1 : index
    %c0_477 = arith.constant 0 : index
    %339 = vector.load %arg1[%c0_473, %c2_474, %c5_475, %c1_476, %c0_477] : memref<1x4x16x16x8xf32, #tpu.memory_space<vmem>>, vector<1x1x1x15x8xf32>
    %340 = vector.shape_cast %339 : vector<1x1x1x15x8xf32> to vector<15x8xf32>
    %c5_478 = arith.constant 5 : index
    %c0_479 = arith.constant 0 : index
    %c0_480 = arith.constant 0 : index
    %341 = vector.load %arg2[%c5_478, %c0_479, %c0_480] : memref<9x8x8xf32, #tpu.memory_space<vmem>>, vector<1x8x8xf32>
    %342 = vector.shape_cast %341 : vector<1x8x8xf32> to vector<8x8xf32>
    %cst_481 = arith.constant dense<0.000000e+00> : vector<15x8xf32>
    %343 = tpu.matmul %340, %342, %cst_481 {dimension_numbers = #tpu.dot_dimension_numbers<[1], [0], [0], [1], [0, 0, 1, 1], [], []>} : vector<15x8xf32>, vector<8x8xf32>, vector<15x8xf32> -> vector<15x8xf32>
    %344 = arith.addf %338, %343 : vector<15x8xf32>
    %c0_482 = arith.constant 0 : index
    %c0_483 = arith.constant 0 : index
    %c6_484 = arith.constant 6 : index
    %c0_485 = arith.constant 0 : index
    %c0_486 = arith.constant 0 : index
    %345 = vector.load %arg1[%c0_482, %c0_483, %c6_484, %c0_485, %c0_486] : memref<1x4x16x16x8xf32, #tpu.memory_space<vmem>>, vector<1x1x1x15x8xf32>
    %346 = vector.shape_cast %345 : vector<1x1x1x15x8xf32> to vector<15x8xf32>
    %c6_487 = arith.constant 6 : index
    %c0_488 = arith.constant 0 : index
    %c0_489 = arith.constant 0 : index
    %347 = vector.load %arg2[%c6_487, %c0_488, %c0_489] : memref<9x8x8xf32, #tpu.memory_space<vmem>>, vector<1x8x8xf32>
    %348 = vector.shape_cast %347 : vector<1x8x8xf32> to vector<8x8xf32>
    %cst_490 = arith.constant dense<0.000000e+00> : vector<15x8xf32>
    %349 = tpu.matmul %346, %348, %cst_490 {dimension_numbers = #tpu.dot_dimension_numbers<[1], [0], [0], [1], [0, 0, 1, 1], [], []>} : vector<15x8xf32>, vector<8x8xf32>, vector<15x8xf32> -> vector<15x8xf32>
    %350 = arith.addf %344, %349 : vector<15x8xf32>
    %c0_491 = arith.constant 0 : index
    %c1_492 = arith.constant 1 : index
    %c6_493 = arith.constant 6 : index
    %c0_494 = arith.constant 0 : index
    %c0_495 = arith.constant 0 : index
    %351 = vector.load %arg1[%c0_491, %c1_492, %c6_493, %c0_494, %c0_495] : memref<1x4x16x16x8xf32, #tpu.memory_space<vmem>>, vector<1x1x1x15x8xf32>
    %352 = vector.shape_cast %351 : vector<1x1x1x15x8xf32> to vector<15x8xf32>
    %c7_496 = arith.constant 7 : index
    %c0_497 = arith.constant 0 : index
    %c0_498 = arith.constant 0 : index
    %353 = vector.load %arg2[%c7_496, %c0_497, %c0_498] : memref<9x8x8xf32, #tpu.memory_space<vmem>>, vector<1x8x8xf32>
    %354 = vector.shape_cast %353 : vector<1x8x8xf32> to vector<8x8xf32>
    %cst_499 = arith.constant dense<0.000000e+00> : vector<15x8xf32>
    %355 = tpu.matmul %352, %354, %cst_499 {dimension_numbers = #tpu.dot_dimension_numbers<[1], [0], [0], [1], [0, 0, 1, 1], [], []>} : vector<15x8xf32>, vector<8x8xf32>, vector<15x8xf32> -> vector<15x8xf32>
    %356 = arith.addf %350, %355 : vector<15x8xf32>
    %c0_500 = arith.constant 0 : index
    %c0_501 = arith.constant 0 : index
    %c6_502 = arith.constant 6 : index
    %c1_503 = arith.constant 1 : index
    %c0_504 = arith.constant 0 : index
    %357 = vector.load %arg1[%c0_500, %c0_501, %c6_502, %c1_503, %c0_504] : memref<1x4x16x16x8xf32, #tpu.memory_space<vmem>>, vector<1x1x1x15x8xf32>
    %358 = vector.shape_cast %357 : vector<1x1x1x15x8xf32> to vector<15x8xf32>
    %c8_505 = arith.constant 8 : index
    %c0_506 = arith.constant 0 : index
    %c0_507 = arith.constant 0 : index
    %359 = vector.load %arg2[%c8_505, %c0_506, %c0_507] : memref<9x8x8xf32, #tpu.memory_space<vmem>>, vector<1x8x8xf32>
    %360 = vector.shape_cast %359 : vector<1x8x8xf32> to vector<8x8xf32>
    %cst_508 = arith.constant dense<0.000000e+00> : vector<15x8xf32>
    %361 = tpu.matmul %358, %360, %cst_508 {dimension_numbers = #tpu.dot_dimension_numbers<[1], [0], [0], [1], [0, 0, 1, 1], [], []>} : vector<15x8xf32>, vector<8x8xf32>, vector<15x8xf32> -> vector<15x8xf32>
    %362 = arith.addf %356, %361 : vector<15x8xf32>
    %c5_509 = arith.constant 5 : index
    %c0_510 = arith.constant 0 : index
    %c0_511 = arith.constant 0 : index
    %363 = vector.load %arg8[%c5_509, %c0_510, %c0_511] : memref<15x15x8xf32, #tpu.memory_space<vmem>>, vector<1x15x8xf32>
    %364 = vector.shape_cast %363 : vector<1x15x8xf32> to vector<15x8xf32>
    %365 = vector.shape_cast %362 : vector<15x8xf32> to vector<1x15x8xf32>
    tpu.vector_store %arg8[%c5_509, %c0_510, %c0_511], %365 {strides = array<i32>} : memref<15x15x8xf32, #tpu.memory_space<vmem>>, vector<1x15x8xf32>,
    %cst_512 = arith.constant 0.000000e+00 : f32
    %366 = vector.broadcast %cst_512 : f32 to vector<15x8xf32>
    %c0_513 = arith.constant 0 : index
    %c0_514 = arith.constant 0 : index
    %367 = vector.load %arg3[%c0_513, %c0_514] : memref<1x8xf32, #tpu.memory_space<vmem>>, vector<1x8xf32>
    %368 = vector.broadcast %367 : vector<1x8xf32> to vector<15x8xf32>
    %369 = arith.addf %366, %368 : vector<15x8xf32>
    %c0_515 = arith.constant 0 : index
    %c0_516 = arith.constant 0 : index
    %c6_517 = arith.constant 6 : index
    %c0_518 = arith.constant 0 : index
    %c0_519 = arith.constant 0 : index
    %370 = vector.load %arg1[%c0_515, %c0_516, %c6_517, %c0_518, %c0_519] : memref<1x4x16x16x8xf32, #tpu.memory_space<vmem>>, vector<1x1x1x15x8xf32>
    %371 = vector.shape_cast %370 : vector<1x1x1x15x8xf32> to vector<15x8xf32>
    %c0_520 = arith.constant 0 : index
    %c0_521 = arith.constant 0 : index
    %c0_522 = arith.constant 0 : index
    %372 = vector.load %arg2[%c0_520, %c0_521, %c0_522] : memref<9x8x8xf32, #tpu.memory_space<vmem>>, vector<1x8x8xf32>
    %373 = vector.shape_cast %372 : vector<1x8x8xf32> to vector<8x8xf32>
    %cst_523 = arith.constant dense<0.000000e+00> : vector<15x8xf32>
    %374 = tpu.matmul %371, %373, %cst_523 {dimension_numbers = #tpu.dot_dimension_numbers<[1], [0], [0], [1], [0, 0, 1, 1], [], []>} : vector<15x8xf32>, vector<8x8xf32>, vector<15x8xf32> -> vector<15x8xf32>
    %375 = arith.addf %369, %374 : vector<15x8xf32>
    %c0_524 = arith.constant 0 : index
    %c1_525 = arith.constant 1 : index
    %c6_526 = arith.constant 6 : index
    %c0_527 = arith.constant 0 : index
    %c0_528 = arith.constant 0 : index
    %376 = vector.load %arg1[%c0_524, %c1_525, %c6_526, %c0_527, %c0_528] : memref<1x4x16x16x8xf32, #tpu.memory_space<vmem>>, vector<1x1x1x15x8xf32>
    %377 = vector.shape_cast %376 : vector<1x1x1x15x8xf32> to vector<15x8xf32>
    %c1_529 = arith.constant 1 : index
    %c0_530 = arith.constant 0 : index
    %c0_531 = arith.constant 0 : index
    %378 = vector.load %arg2[%c1_529, %c0_530, %c0_531] : memref<9x8x8xf32, #tpu.memory_space<vmem>>, vector<1x8x8xf32>
    %379 = vector.shape_cast %378 : vector<1x8x8xf32> to vector<8x8xf32>
    %cst_532 = arith.constant dense<0.000000e+00> : vector<15x8xf32>
    %380 = tpu.matmul %377, %379, %cst_532 {dimension_numbers = #tpu.dot_dimension_numbers<[1], [0], [0], [1], [0, 0, 1, 1], [], []>} : vector<15x8xf32>, vector<8x8xf32>, vector<15x8xf32> -> vector<15x8xf32>
    %381 = arith.addf %375, %380 : vector<15x8xf32>
    %c0_533 = arith.constant 0 : index
    %c0_534 = arith.constant 0 : index
    %c6_535 = arith.constant 6 : index
    %c1_536 = arith.constant 1 : index
    %c0_537 = arith.constant 0 : index
    %382 = vector.load %arg1[%c0_533, %c0_534, %c6_535, %c1_536, %c0_537] : memref<1x4x16x16x8xf32, #tpu.memory_space<vmem>>, vector<1x1x1x15x8xf32>
    %383 = vector.shape_cast %382 : vector<1x1x1x15x8xf32> to vector<15x8xf32>
    %c2_538 = arith.constant 2 : index
    %c0_539 = arith.constant 0 : index
    %c0_540 = arith.constant 0 : index
    %384 = vector.load %arg2[%c2_538, %c0_539, %c0_540] : memref<9x8x8xf32, #tpu.memory_space<vmem>>, vector<1x8x8xf32>
    %385 = vector.shape_cast %384 : vector<1x8x8xf32> to vector<8x8xf32>
    %cst_541 = arith.constant dense<0.000000e+00> : vector<15x8xf32>
    %386 = tpu.matmul %383, %385, %cst_541 {dimension_numbers = #tpu.dot_dimension_numbers<[1], [0], [0], [1], [0, 0, 1, 1], [], []>} : vector<15x8xf32>, vector<8x8xf32>, vector<15x8xf32> -> vector<15x8xf32>
    %387 = arith.addf %381, %386 : vector<15x8xf32>
    %c0_542 = arith.constant 0 : index
    %c2_543 = arith.constant 2 : index
    %c6_544 = arith.constant 6 : index
    %c0_545 = arith.constant 0 : index
    %c0_546 = arith.constant 0 : index
    %388 = vector.load %arg1[%c0_542, %c2_543, %c6_544, %c0_545, %c0_546] : memref<1x4x16x16x8xf32, #tpu.memory_space<vmem>>, vector<1x1x1x15x8xf32>
    %389 = vector.shape_cast %388 : vector<1x1x1x15x8xf32> to vector<15x8xf32>
    %c3_547 = arith.constant 3 : index
    %c0_548 = arith.constant 0 : index
    %c0_549 = arith.constant 0 : index
    %390 = vector.load %arg2[%c3_547, %c0_548, %c0_549] : memref<9x8x8xf32, #tpu.memory_space<vmem>>, vector<1x8x8xf32>
    %391 = vector.shape_cast %390 : vector<1x8x8xf32> to vector<8x8xf32>
    %cst_550 = arith.constant dense<0.000000e+00> : vector<15x8xf32>
    %392 = tpu.matmul %389, %391, %cst_550 {dimension_numbers = #tpu.dot_dimension_numbers<[1], [0], [0], [1], [0, 0, 1, 1], [], []>} : vector<15x8xf32>, vector<8x8xf32>, vector<15x8xf32> -> vector<15x8xf32>
    %393 = arith.addf %387, %392 : vector<15x8xf32>
    %c0_551 = arith.constant 0 : index
    %c3_552 = arith.constant 3 : index
    %c6_553 = arith.constant 6 : index
    %c0_554 = arith.constant 0 : index
    %c0_555 = arith.constant 0 : index
    %394 = vector.load %arg1[%c0_551, %c3_552, %c6_553, %c0_554, %c0_555] : memref<1x4x16x16x8xf32, #tpu.memory_space<vmem>>, vector<1x1x1x15x8xf32>
    %395 = vector.shape_cast %394 : vector<1x1x1x15x8xf32> to vector<15x8xf32>
    %c4_556 = arith.constant 4 : index
    %c0_557 = arith.constant 0 : index
    %c0_558 = arith.constant 0 : index
    %396 = vector.load %arg2[%c4_556, %c0_557, %c0_558] : memref<9x8x8xf32, #tpu.memory_space<vmem>>, vector<1x8x8xf32>
    %397 = vector.shape_cast %396 : vector<1x8x8xf32> to vector<8x8xf32>
    %cst_559 = arith.constant dense<0.000000e+00> : vector<15x8xf32>
    %398 = tpu.matmul %395, %397, %cst_559 {dimension_numbers = #tpu.dot_dimension_numbers<[1], [0], [0], [1], [0, 0, 1, 1], [], []>} : vector<15x8xf32>, vector<8x8xf32>, vector<15x8xf32> -> vector<15x8xf32>
    %399 = arith.addf %393, %398 : vector<15x8xf32>
    %c0_560 = arith.constant 0 : index
    %c2_561 = arith.constant 2 : index
    %c6_562 = arith.constant 6 : index
    %c1_563 = arith.constant 1 : index
    %c0_564 = arith.constant 0 : index
    %400 = vector.load %arg1[%c0_560, %c2_561, %c6_562, %c1_563, %c0_564] : memref<1x4x16x16x8xf32, #tpu.memory_space<vmem>>, vector<1x1x1x15x8xf32>
    %401 = vector.shape_cast %400 : vector<1x1x1x15x8xf32> to vector<15x8xf32>
    %c5_565 = arith.constant 5 : index
    %c0_566 = arith.constant 0 : index
    %c0_567 = arith.constant 0 : index
    %402 = vector.load %arg2[%c5_565, %c0_566, %c0_567] : memref<9x8x8xf32, #tpu.memory_space<vmem>>, vector<1x8x8xf32>
    %403 = vector.shape_cast %402 : vector<1x8x8xf32> to vector<8x8xf32>
    %cst_568 = arith.constant dense<0.000000e+00> : vector<15x8xf32>
    %404 = tpu.matmul %401, %403, %cst_568 {dimension_numbers = #tpu.dot_dimension_numbers<[1], [0], [0], [1], [0, 0, 1, 1], [], []>} : vector<15x8xf32>, vector<8x8xf32>, vector<15x8xf32> -> vector<15x8xf32>
    %405 = arith.addf %399, %404 : vector<15x8xf32>
    %c0_569 = arith.constant 0 : index
    %c0_570 = arith.constant 0 : index
    %c7_571 = arith.constant 7 : index
    %c0_572 = arith.constant 0 : index
    %c0_573 = arith.constant 0 : index
    %406 = vector.load %arg1[%c0_569, %c0_570, %c7_571, %c0_572, %c0_573] : memref<1x4x16x16x8xf32, #tpu.memory_space<vmem>>, vector<1x1x1x15x8xf32>
    %407 = vector.shape_cast %406 : vector<1x1x1x15x8xf32> to vector<15x8xf32>
    %c6_574 = arith.constant 6 : index
    %c0_575 = arith.constant 0 : index
    %c0_576 = arith.constant 0 : index
    %408 = vector.load %arg2[%c6_574, %c0_575, %c0_576] : memref<9x8x8xf32, #tpu.memory_space<vmem>>, vector<1x8x8xf32>
    %409 = vector.shape_cast %408 : vector<1x8x8xf32> to vector<8x8xf32>
    %cst_577 = arith.constant dense<0.000000e+00> : vector<15x8xf32>
    %410 = tpu.matmul %407, %409, %cst_577 {dimension_numbers = #tpu.dot_dimension_numbers<[1], [0], [0], [1], [0, 0, 1, 1], [], []>} : vector<15x8xf32>, vector<8x8xf32>, vector<15x8xf32> -> vector<15x8xf32>
    %411 = arith.addf %405, %410 : vector<15x8xf32>
    %c0_578 = arith.constant 0 : index
    %c1_579 = arith.constant 1 : index
    %c7_580 = arith.constant 7 : index
    %c0_581 = arith.constant 0 : index
    %c0_582 = arith.constant 0 : index
    %412 = vector.load %arg1[%c0_578, %c1_579, %c7_580, %c0_581, %c0_582] : memref<1x4x16x16x8xf32, #tpu.memory_space<vmem>>, vector<1x1x1x15x8xf32>
    %413 = vector.shape_cast %412 : vector<1x1x1x15x8xf32> to vector<15x8xf32>
    %c7_583 = arith.constant 7 : index
    %c0_584 = arith.constant 0 : index
    %c0_585 = arith.constant 0 : index
    %414 = vector.load %arg2[%c7_583, %c0_584, %c0_585] : memref<9x8x8xf32, #tpu.memory_space<vmem>>, vector<1x8x8xf32>
    %415 = vector.shape_cast %414 : vector<1x8x8xf32> to vector<8x8xf32>
    %cst_586 = arith.constant dense<0.000000e+00> : vector<15x8xf32>
    %416 = tpu.matmul %413, %415, %cst_586 {dimension_numbers = #tpu.dot_dimension_numbers<[1], [0], [0], [1], [0, 0, 1, 1], [], []>} : vector<15x8xf32>, vector<8x8xf32>, vector<15x8xf32> -> vector<15x8xf32>
    %417 = arith.addf %411, %416 : vector<15x8xf32>
    %c0_587 = arith.constant 0 : index
    %c0_588 = arith.constant 0 : index
    %c7_589 = arith.constant 7 : index
    %c1_590 = arith.constant 1 : index
    %c0_591 = arith.constant 0 : index
    %418 = vector.load %arg1[%c0_587, %c0_588, %c7_589, %c1_590, %c0_591] : memref<1x4x16x16x8xf32, #tpu.memory_space<vmem>>, vector<1x1x1x15x8xf32>
    %419 = vector.shape_cast %418 : vector<1x1x1x15x8xf32> to vector<15x8xf32>
    %c8_592 = arith.constant 8 : index
    %c0_593 = arith.constant 0 : index
    %c0_594 = arith.constant 0 : index
    %420 = vector.load %arg2[%c8_592, %c0_593, %c0_594] : memref<9x8x8xf32, #tpu.memory_space<vmem>>, vector<1x8x8xf32>
    %421 = vector.shape_cast %420 : vector<1x8x8xf32> to vector<8x8xf32>
    %cst_595 = arith.constant dense<0.000000e+00> : vector<15x8xf32>
    %422 = tpu.matmul %419, %421, %cst_595 {dimension_numbers = #tpu.dot_dimension_numbers<[1], [0], [0], [1], [0, 0, 1, 1], [], []>} : vector<15x8xf32>, vector<8x8xf32>, vector<15x8xf32> -> vector<15x8xf32>
    %423 = arith.addf %417, %422 : vector<15x8xf32>
    %c6_596 = arith.constant 6 : index
    %c0_597 = arith.constant 0 : index
    %c0_598 = arith.constant 0 : index
    %424 = vector.load %arg8[%c6_596, %c0_597, %c0_598] : memref<15x15x8xf32, #tpu.memory_space<vmem>>, vector<1x15x8xf32>
    %425 = vector.shape_cast %424 : vector<1x15x8xf32> to vector<15x8xf32>
    %426 = vector.shape_cast %423 : vector<15x8xf32> to vector<1x15x8xf32>
    tpu.vector_store %arg8[%c6_596, %c0_597, %c0_598], %426 {strides = array<i32>} : memref<15x15x8xf32, #tpu.memory_space<vmem>>, vector<1x15x8xf32>,
    %cst_599 = arith.constant 0.000000e+00 : f32
    %427 = vector.broadcast %cst_599 : f32 to vector<15x8xf32>
    %c0_600 = arith.constant 0 : index
    %c0_601 = arith.constant 0 : index
    %428 = vector.load %arg3[%c0_600, %c0_601] : memref<1x8xf32, #tpu.memory_space<vmem>>, vector<1x8xf32>
    %429 = vector.broadcast %428 : vector<1x8xf32> to vector<15x8xf32>
    %430 = arith.addf %427, %429 : vector<15x8xf32>
    %c0_602 = arith.constant 0 : index
    %c0_603 = arith.constant 0 : index
    %c7_604 = arith.constant 7 : index
    %c0_605 = arith.constant 0 : index
    %c0_606 = arith.constant 0 : index
    %431 = vector.load %arg1[%c0_602, %c0_603, %c7_604, %c0_605, %c0_606] : memref<1x4x16x16x8xf32, #tpu.memory_space<vmem>>, vector<1x1x1x15x8xf32>
    %432 = vector.shape_cast %431 : vector<1x1x1x15x8xf32> to vector<15x8xf32>
    %c0_607 = arith.constant 0 : index
    %c0_608 = arith.constant 0 : index
    %c0_609 = arith.constant 0 : index
    %433 = vector.load %arg2[%c0_607, %c0_608, %c0_609] : memref<9x8x8xf32, #tpu.memory_space<vmem>>, vector<1x8x8xf32>
    %434 = vector.shape_cast %433 : vector<1x8x8xf32> to vector<8x8xf32>
    %cst_610 = arith.constant dense<0.000000e+00> : vector<15x8xf32>
    %435 = tpu.matmul %432, %434, %cst_610 {dimension_numbers = #tpu.dot_dimension_numbers<[1], [0], [0], [1], [0, 0, 1, 1], [], []>} : vector<15x8xf32>, vector<8x8xf32>, vector<15x8xf32> -> vector<15x8xf32>
    %436 = arith.addf %430, %435 : vector<15x8xf32>
    %c0_611 = arith.constant 0 : index
    %c1_612 = arith.constant 1 : index
    %c7_613 = arith.constant 7 : index
    %c0_614 = arith.constant 0 : index
    %c0_615 = arith.constant 0 : index
    %437 = vector.load %arg1[%c0_611, %c1_612, %c7_613, %c0_614, %c0_615] : memref<1x4x16x16x8xf32, #tpu.memory_space<vmem>>, vector<1x1x1x15x8xf32>
    %438 = vector.shape_cast %437 : vector<1x1x1x15x8xf32> to vector<15x8xf32>
    %c1_616 = arith.constant 1 : index
    %c0_617 = arith.constant 0 : index
    %c0_618 = arith.constant 0 : index
    %439 = vector.load %arg2[%c1_616, %c0_617, %c0_618] : memref<9x8x8xf32, #tpu.memory_space<vmem>>, vector<1x8x8xf32>
    %440 = vector.shape_cast %439 : vector<1x8x8xf32> to vector<8x8xf32>
    %cst_619 = arith.constant dense<0.000000e+00> : vector<15x8xf32>
    %441 = tpu.matmul %438, %440, %cst_619 {dimension_numbers = #tpu.dot_dimension_numbers<[1], [0], [0], [1], [0, 0, 1, 1], [], []>} : vector<15x8xf32>, vector<8x8xf32>, vector<15x8xf32> -> vector<15x8xf32>
    %442 = arith.addf %436, %441 : vector<15x8xf32>
    %c0_620 = arith.constant 0 : index
    %c0_621 = arith.constant 0 : index
    %c7_622 = arith.constant 7 : index
    %c1_623 = arith.constant 1 : index
    %c0_624 = arith.constant 0 : index
    %443 = vector.load %arg1[%c0_620, %c0_621, %c7_622, %c1_623, %c0_624] : memref<1x4x16x16x8xf32, #tpu.memory_space<vmem>>, vector<1x1x1x15x8xf32>
    %444 = vector.shape_cast %443 : vector<1x1x1x15x8xf32> to vector<15x8xf32>
    %c2_625 = arith.constant 2 : index
    %c0_626 = arith.constant 0 : index
    %c0_627 = arith.constant 0 : index
    %445 = vector.load %arg2[%c2_625, %c0_626, %c0_627] : memref<9x8x8xf32, #tpu.memory_space<vmem>>, vector<1x8x8xf32>
    %446 = vector.shape_cast %445 : vector<1x8x8xf32> to vector<8x8xf32>
    %cst_628 = arith.constant dense<0.000000e+00> : vector<15x8xf32>
    %447 = tpu.matmul %444, %446, %cst_628 {dimension_numbers = #tpu.dot_dimension_numbers<[1], [0], [0], [1], [0, 0, 1, 1], [], []>} : vector<15x8xf32>, vector<8x8xf32>, vector<15x8xf32> -> vector<15x8xf32>
    %448 = arith.addf %442, %447 : vector<15x8xf32>
    %c0_629 = arith.constant 0 : index
    %c2_630 = arith.constant 2 : index
    %c7_631 = arith.constant 7 : index
    %c0_632 = arith.constant 0 : index
    %c0_633 = arith.constant 0 : index
    %449 = vector.load %arg1[%c0_629, %c2_630, %c7_631, %c0_632, %c0_633] : memref<1x4x16x16x8xf32, #tpu.memory_space<vmem>>, vector<1x1x1x15x8xf32>
    %450 = vector.shape_cast %449 : vector<1x1x1x15x8xf32> to vector<15x8xf32>
    %c3_634 = arith.constant 3 : index
    %c0_635 = arith.constant 0 : index
    %c0_636 = arith.constant 0 : index
    %451 = vector.load %arg2[%c3_634, %c0_635, %c0_636] : memref<9x8x8xf32, #tpu.memory_space<vmem>>, vector<1x8x8xf32>
    %452 = vector.shape_cast %451 : vector<1x8x8xf32> to vector<8x8xf32>
    %cst_637 = arith.constant dense<0.000000e+00> : vector<15x8xf32>
    %453 = tpu.matmul %450, %452, %cst_637 {dimension_numbers = #tpu.dot_dimension_numbers<[1], [0], [0], [1], [0, 0, 1, 1], [], []>} : vector<15x8xf32>, vector<8x8xf32>, vector<15x8xf32> -> vector<15x8xf32>
    %454 = arith.addf %448, %453 : vector<15x8xf32>
    %c0_638 = arith.constant 0 : index
    %c3_639 = arith.constant 3 : index
    %c7_640 = arith.constant 7 : index
    %c0_641 = arith.constant 0 : index
    %c0_642 = arith.constant 0 : index
    %455 = vector.load %arg1[%c0_638, %c3_639, %c7_640, %c0_641, %c0_642] : memref<1x4x16x16x8xf32, #tpu.memory_space<vmem>>, vector<1x1x1x15x8xf32>
    %456 = vector.shape_cast %455 : vector<1x1x1x15x8xf32> to vector<15x8xf32>
    %c4_643 = arith.constant 4 : index
    %c0_644 = arith.constant 0 : index
    %c0_645 = arith.constant 0 : index
    %457 = vector.load %arg2[%c4_643, %c0_644, %c0_645] : memref<9x8x8xf32, #tpu.memory_space<vmem>>, vector<1x8x8xf32>
    %458 = vector.shape_cast %457 : vector<1x8x8xf32> to vector<8x8xf32>
    %cst_646 = arith.constant dense<0.000000e+00> : vector<15x8xf32>
    %459 = tpu.matmul %456, %458, %cst_646 {dimension_numbers = #tpu.dot_dimension_numbers<[1], [0], [0], [1], [0, 0, 1, 1], [], []>} : vector<15x8xf32>, vector<8x8xf32>, vector<15x8xf32> -> vector<15x8xf32>
    %460 = arith.addf %454, %459 : vector<15x8xf32>
    %c0_647 = arith.constant 0 : index
    %c2_648 = arith.constant 2 : index
    %c7_649 = arith.constant 7 : index
    %c1_650 = arith.constant 1 : index
    %c0_651 = arith.constant 0 : index
    %461 = vector.load %arg1[%c0_647, %c2_648, %c7_649, %c1_650, %c0_651] : memref<1x4x16x16x8xf32, #tpu.memory_space<vmem>>, vector<1x1x1x15x8xf32>
    %462 = vector.shape_cast %461 : vector<1x1x1x15x8xf32> to vector<15x8xf32>
    %c5_652 = arith.constant 5 : index
    %c0_653 = arith.constant 0 : index
    %c0_654 = arith.constant 0 : index
    %463 = vector.load %arg2[%c5_652, %c0_653, %c0_654] : memref<9x8x8xf32, #tpu.memory_space<vmem>>, vector<1x8x8xf32>
    %464 = vector.shape_cast %463 : vector<1x8x8xf32> to vector<8x8xf32>
    %cst_655 = arith.constant dense<0.000000e+00> : vector<15x8xf32>
    %465 = tpu.matmul %462, %464, %cst_655 {dimension_numbers = #tpu.dot_dimension_numbers<[1], [0], [0], [1], [0, 0, 1, 1], [], []>} : vector<15x8xf32>, vector<8x8xf32>, vector<15x8xf32> -> vector<15x8xf32>
    %466 = arith.addf %460, %465 : vector<15x8xf32>
    %c0_656 = arith.constant 0 : index
    %c0_657 = arith.constant 0 : index
    %c8_658 = arith.constant 8 : index
    %c0_659 = arith.constant 0 : index
    %c0_660 = arith.constant 0 : index
    %467 = vector.load %arg1[%c0_656, %c0_657, %c8_658, %c0_659, %c0_660] : memref<1x4x16x16x8xf32, #tpu.memory_space<vmem>>, vector<1x1x1x15x8xf32>
    %468 = vector.shape_cast %467 : vector<1x1x1x15x8xf32> to vector<15x8xf32>
    %c6_661 = arith.constant 6 : index
    %c0_662 = arith.constant 0 : index
    %c0_663 = arith.constant 0 : index
    %469 = vector.load %arg2[%c6_661, %c0_662, %c0_663] : memref<9x8x8xf32, #tpu.memory_space<vmem>>, vector<1x8x8xf32>
    %470 = vector.shape_cast %469 : vector<1x8x8xf32> to vector<8x8xf32>
    %cst_664 = arith.constant dense<0.000000e+00> : vector<15x8xf32>
    %471 = tpu.matmul %468, %470, %cst_664 {dimension_numbers = #tpu.dot_dimension_numbers<[1], [0], [0], [1], [0, 0, 1, 1], [], []>} : vector<15x8xf32>, vector<8x8xf32>, vector<15x8xf32> -> vector<15x8xf32>
    %472 = arith.addf %466, %471 : vector<15x8xf32>
    %c0_665 = arith.constant 0 : index
    %c1_666 = arith.constant 1 : index
    %c8_667 = arith.constant 8 : index
    %c0_668 = arith.constant 0 : index
    %c0_669 = arith.constant 0 : index
    %473 = vector.load %arg1[%c0_665, %c1_666, %c8_667, %c0_668, %c0_669] : memref<1x4x16x16x8xf32, #tpu.memory_space<vmem>>, vector<1x1x1x15x8xf32>
    %474 = vector.shape_cast %473 : vector<1x1x1x15x8xf32> to vector<15x8xf32>
    %c7_670 = arith.constant 7 : index
    %c0_671 = arith.constant 0 : index
    %c0_672 = arith.constant 0 : index
    %475 = vector.load %arg2[%c7_670, %c0_671, %c0_672] : memref<9x8x8xf32, #tpu.memory_space<vmem>>, vector<1x8x8xf32>
    %476 = vector.shape_cast %475 : vector<1x8x8xf32> to vector<8x8xf32>
    %cst_673 = arith.constant dense<0.000000e+00> : vector<15x8xf32>
    %477 = tpu.matmul %474, %476, %cst_673 {dimension_numbers = #tpu.dot_dimension_numbers<[1], [0], [0], [1], [0, 0, 1, 1], [], []>} : vector<15x8xf32>, vector<8x8xf32>, vector<15x8xf32> -> vector<15x8xf32>
    %478 = arith.addf %472, %477 : vector<15x8xf32>
    %c0_674 = arith.constant 0 : index
    %c0_675 = arith.constant 0 : index
    %c8_676 = arith.constant 8 : index
    %c1_677 = arith.constant 1 : index
    %c0_678 = arith.constant 0 : index
    %479 = vector.load %arg1[%c0_674, %c0_675, %c8_676, %c1_677, %c0_678] : memref<1x4x16x16x8xf32, #tpu.memory_space<vmem>>, vector<1x1x1x15x8xf32>
    %480 = vector.shape_cast %479 : vector<1x1x1x15x8xf32> to vector<15x8xf32>
    %c8_679 = arith.constant 8 : index
    %c0_680 = arith.constant 0 : index
    %c0_681 = arith.constant 0 : index
    %481 = vector.load %arg2[%c8_679, %c0_680, %c0_681] : memref<9x8x8xf32, #tpu.memory_space<vmem>>, vector<1x8x8xf32>
    %482 = vector.shape_cast %481 : vector<1x8x8xf32> to vector<8x8xf32>
    %cst_682 = arith.constant dense<0.000000e+00> : vector<15x8xf32>
    %483 = tpu.matmul %480, %482, %cst_682 {dimension_numbers = #tpu.dot_dimension_numbers<[1], [0], [0], [1], [0, 0, 1, 1], [], []>} : vector<15x8xf32>, vector<8x8xf32>, vector<15x8xf32> -> vector<15x8xf32>
    %484 = arith.addf %478, %483 : vector<15x8xf32>
    %c7_683 = arith.constant 7 : index
    %c0_684 = arith.constant 0 : index
    %c0_685 = arith.constant 0 : index
    %485 = vector.load %arg8[%c7_683, %c0_684, %c0_685] : memref<15x15x8xf32, #tpu.memory_space<vmem>>, vector<1x15x8xf32>
    %486 = vector.shape_cast %485 : vector<1x15x8xf32> to vector<15x8xf32>
    %487 = vector.shape_cast %484 : vector<15x8xf32> to vector<1x15x8xf32>
    tpu.vector_store %arg8[%c7_683, %c0_684, %c0_685], %487 {strides = array<i32>} : memref<15x15x8xf32, #tpu.memory_space<vmem>>, vector<1x15x8xf32>,
    %cst_686 = arith.constant 0.000000e+00 : f32
    %488 = vector.broadcast %cst_686 : f32 to vector<15x8xf32>
    %c0_687 = arith.constant 0 : index
    %c0_688 = arith.constant 0 : index
    %489 = vector.load %arg3[%c0_687, %c0_688] : memref<1x8xf32, #tpu.memory_space<vmem>>, vector<1x8xf32>
    %490 = vector.broadcast %489 : vector<1x8xf32> to vector<15x8xf32>
    %491 = arith.addf %488, %490 : vector<15x8xf32>
    %c0_689 = arith.constant 0 : index
    %c0_690 = arith.constant 0 : index
    %c8_691 = arith.constant 8 : index
    %c0_692 = arith.constant 0 : index
    %c0_693 = arith.constant 0 : index
    %492 = vector.load %arg1[%c0_689, %c0_690, %c8_691, %c0_692, %c0_693] : memref<1x4x16x16x8xf32, #tpu.memory_space<vmem>>, vector<1x1x1x15x8xf32>
    %493 = vector.shape_cast %492 : vector<1x1x1x15x8xf32> to vector<15x8xf32>
    %c0_694 = arith.constant 0 : index
    %c0_695 = arith.constant 0 : index
    %c0_696 = arith.constant 0 : index
    %494 = vector.load %arg2[%c0_694, %c0_695, %c0_696] : memref<9x8x8xf32, #tpu.memory_space<vmem>>, vector<1x8x8xf32>
    %495 = vector.shape_cast %494 : vector<1x8x8xf32> to vector<8x8xf32>
    %cst_697 = arith.constant dense<0.000000e+00> : vector<15x8xf32>
    %496 = tpu.matmul %493, %495, %cst_697 {dimension_numbers = #tpu.dot_dimension_numbers<[1], [0], [0], [1], [0, 0, 1, 1], [], []>} : vector<15x8xf32>, vector<8x8xf32>, vector<15x8xf32> -> vector<15x8xf32>
    %497 = arith.addf %491, %496 : vector<15x8xf32>
    %c0_698 = arith.constant 0 : index
    %c1_699 = arith.constant 1 : index
    %c8_700 = arith.constant 8 : index
    %c0_701 = arith.constant 0 : index
    %c0_702 = arith.constant 0 : index
    %498 = vector.load %arg1[%c0_698, %c1_699, %c8_700, %c0_701, %c0_702] : memref<1x4x16x16x8xf32, #tpu.memory_space<vmem>>, vector<1x1x1x15x8xf32>
    %499 = vector.shape_cast %498 : vector<1x1x1x15x8xf32> to vector<15x8xf32>
    %c1_703 = arith.constant 1 : index
    %c0_704 = arith.constant 0 : index
    %c0_705 = arith.constant 0 : index
    %500 = vector.load %arg2[%c1_703, %c0_704, %c0_705] : memref<9x8x8xf32, #tpu.memory_space<vmem>>, vector<1x8x8xf32>
    %501 = vector.shape_cast %500 : vector<1x8x8xf32> to vector<8x8xf32>
    %cst_706 = arith.constant dense<0.000000e+00> : vector<15x8xf32>
    %502 = tpu.matmul %499, %501, %cst_706 {dimension_numbers = #tpu.dot_dimension_numbers<[1], [0], [0], [1], [0, 0, 1, 1], [], []>} : vector<15x8xf32>, vector<8x8xf32>, vector<15x8xf32> -> vector<15x8xf32>
    %503 = arith.addf %497, %502 : vector<15x8xf32>
    %c0_707 = arith.constant 0 : index
    %c0_708 = arith.constant 0 : index
    %c8_709 = arith.constant 8 : index
    %c1_710 = arith.constant 1 : index
    %c0_711 = arith.constant 0 : index
    %504 = vector.load %arg1[%c0_707, %c0_708, %c8_709, %c1_710, %c0_711] : memref<1x4x16x16x8xf32, #tpu.memory_space<vmem>>, vector<1x1x1x15x8xf32>
    %505 = vector.shape_cast %504 : vector<1x1x1x15x8xf32> to vector<15x8xf32>
    %c2_712 = arith.constant 2 : index
    %c0_713 = arith.constant 0 : index
    %c0_714 = arith.constant 0 : index
    %506 = vector.load %arg2[%c2_712, %c0_713, %c0_714] : memref<9x8x8xf32, #tpu.memory_space<vmem>>, vector<1x8x8xf32>
    %507 = vector.shape_cast %506 : vector<1x8x8xf32> to vector<8x8xf32>
    %cst_715 = arith.constant dense<0.000000e+00> : vector<15x8xf32>
    %508 = tpu.matmul %505, %507, %cst_715 {dimension_numbers = #tpu.dot_dimension_numbers<[1], [0], [0], [1], [0, 0, 1, 1], [], []>} : vector<15x8xf32>, vector<8x8xf32>, vector<15x8xf32> -> vector<15x8xf32>
    %509 = arith.addf %503, %508 : vector<15x8xf32>
    %c0_716 = arith.constant 0 : index
    %c2_717 = arith.constant 2 : index
    %c8_718 = arith.constant 8 : index
    %c0_719 = arith.constant 0 : index
    %c0_720 = arith.constant 0 : index
    %510 = vector.load %arg1[%c0_716, %c2_717, %c8_718, %c0_719, %c0_720] : memref<1x4x16x16x8xf32, #tpu.memory_space<vmem>>, vector<1x1x1x15x8xf32>
    %511 = vector.shape_cast %510 : vector<1x1x1x15x8xf32> to vector<15x8xf32>
    %c3_721 = arith.constant 3 : index
    %c0_722 = arith.constant 0 : index
    %c0_723 = arith.constant 0 : index
    %512 = vector.load %arg2[%c3_721, %c0_722, %c0_723] : memref<9x8x8xf32, #tpu.memory_space<vmem>>, vector<1x8x8xf32>
    %513 = vector.shape_cast %512 : vector<1x8x8xf32> to vector<8x8xf32>
    %cst_724 = arith.constant dense<0.000000e+00> : vector<15x8xf32>
    %514 = tpu.matmul %511, %513, %cst_724 {dimension_numbers = #tpu.dot_dimension_numbers<[1], [0], [0], [1], [0, 0, 1, 1], [], []>} : vector<15x8xf32>, vector<8x8xf32>, vector<15x8xf32> -> vector<15x8xf32>
    %515 = arith.addf %509, %514 : vector<15x8xf32>
    %c0_725 = arith.constant 0 : index
    %c3_726 = arith.constant 3 : index
    %c8_727 = arith.constant 8 : index
    %c0_728 = arith.constant 0 : index
    %c0_729 = arith.constant 0 : index
    %516 = vector.load %arg1[%c0_725, %c3_726, %c8_727, %c0_728, %c0_729] : memref<1x4x16x16x8xf32, #tpu.memory_space<vmem>>, vector<1x1x1x15x8xf32>
    %517 = vector.shape_cast %516 : vector<1x1x1x15x8xf32> to vector<15x8xf32>
    %c4_730 = arith.constant 4 : index
    %c0_731 = arith.constant 0 : index
    %c0_732 = arith.constant 0 : index
    %518 = vector.load %arg2[%c4_730, %c0_731, %c0_732] : memref<9x8x8xf32, #tpu.memory_space<vmem>>, vector<1x8x8xf32>
    %519 = vector.shape_cast %518 : vector<1x8x8xf32> to vector<8x8xf32>
    %cst_733 = arith.constant dense<0.000000e+00> : vector<15x8xf32>
    %520 = tpu.matmul %517, %519, %cst_733 {dimension_numbers = #tpu.dot_dimension_numbers<[1], [0], [0], [1], [0, 0, 1, 1], [], []>} : vector<15x8xf32>, vector<8x8xf32>, vector<15x8xf32> -> vector<15x8xf32>
    %521 = arith.addf %515, %520 : vector<15x8xf32>
    %c0_734 = arith.constant 0 : index
    %c2_735 = arith.constant 2 : index
    %c8_736 = arith.constant 8 : index
    %c1_737 = arith.constant 1 : index
    %c0_738 = arith.constant 0 : index
    %522 = vector.load %arg1[%c0_734, %c2_735, %c8_736, %c1_737, %c0_738] : memref<1x4x16x16x8xf32, #tpu.memory_space<vmem>>, vector<1x1x1x15x8xf32>
    %523 = vector.shape_cast %522 : vector<1x1x1x15x8xf32> to vector<15x8xf32>
    %c5_739 = arith.constant 5 : index
    %c0_740 = arith.constant 0 : index
    %c0_741 = arith.constant 0 : index
    %524 = vector.load %arg2[%c5_739, %c0_740, %c0_741] : memref<9x8x8xf32, #tpu.memory_space<vmem>>, vector<1x8x8xf32>
    %525 = vector.shape_cast %524 : vector<1x8x8xf32> to vector<8x8xf32>
    %cst_742 = arith.constant dense<0.000000e+00> : vector<15x8xf32>
    %526 = tpu.matmul %523, %525, %cst_742 {dimension_numbers = #tpu.dot_dimension_numbers<[1], [0], [0], [1], [0, 0, 1, 1], [], []>} : vector<15x8xf32>, vector<8x8xf32>, vector<15x8xf32> -> vector<15x8xf32>
    %527 = arith.addf %521, %526 : vector<15x8xf32>
    %c0_743 = arith.constant 0 : index
    %c0_744 = arith.constant 0 : index
    %c9 = arith.constant 9 : index
    %c0_745 = arith.constant 0 : index
    %c0_746 = arith.constant 0 : index
    %528 = vector.load %arg1[%c0_743, %c0_744, %c9, %c0_745, %c0_746] : memref<1x4x16x16x8xf32, #tpu.memory_space<vmem>>, vector<1x1x1x15x8xf32>
    %529 = vector.shape_cast %528 : vector<1x1x1x15x8xf32> to vector<15x8xf32>
    %c6_747 = arith.constant 6 : index
    %c0_748 = arith.constant 0 : index
    %c0_749 = arith.constant 0 : index
    %530 = vector.load %arg2[%c6_747, %c0_748, %c0_749] : memref<9x8x8xf32, #tpu.memory_space<vmem>>, vector<1x8x8xf32>
    %531 = vector.shape_cast %530 : vector<1x8x8xf32> to vector<8x8xf32>
    %cst_750 = arith.constant dense<0.000000e+00> : vector<15x8xf32>
    %532 = tpu.matmul %529, %531, %cst_750 {dimension_numbers = #tpu.dot_dimension_numbers<[1], [0], [0], [1], [0, 0, 1, 1], [], []>} : vector<15x8xf32>, vector<8x8xf32>, vector<15x8xf32> -> vector<15x8xf32>
    %533 = arith.addf %527, %532 : vector<15x8xf32>
    %c0_751 = arith.constant 0 : index
    %c1_752 = arith.constant 1 : index
    %c9_753 = arith.constant 9 : index
    %c0_754 = arith.constant 0 : index
    %c0_755 = arith.constant 0 : index
    %534 = vector.load %arg1[%c0_751, %c1_752, %c9_753, %c0_754, %c0_755] : memref<1x4x16x16x8xf32, #tpu.memory_space<vmem>>, vector<1x1x1x15x8xf32>
    %535 = vector.shape_cast %534 : vector<1x1x1x15x8xf32> to vector<15x8xf32>
    %c7_756 = arith.constant 7 : index
    %c0_757 = arith.constant 0 : index
    %c0_758 = arith.constant 0 : index
    %536 = vector.load %arg2[%c7_756, %c0_757, %c0_758] : memref<9x8x8xf32, #tpu.memory_space<vmem>>, vector<1x8x8xf32>
    %537 = vector.shape_cast %536 : vector<1x8x8xf32> to vector<8x8xf32>
    %cst_759 = arith.constant dense<0.000000e+00> : vector<15x8xf32>
    %538 = tpu.matmul %535, %537, %cst_759 {dimension_numbers = #tpu.dot_dimension_numbers<[1], [0], [0], [1], [0, 0, 1, 1], [], []>} : vector<15x8xf32>, vector<8x8xf32>, vector<15x8xf32> -> vector<15x8xf32>
    %539 = arith.addf %533, %538 : vector<15x8xf32>
    %c0_760 = arith.constant 0 : index
    %c0_761 = arith.constant 0 : index
    %c9_762 = arith.constant 9 : index
    %c1_763 = arith.constant 1 : index
    %c0_764 = arith.constant 0 : index
    %540 = vector.load %arg1[%c0_760, %c0_761, %c9_762, %c1_763, %c0_764] : memref<1x4x16x16x8xf32, #tpu.memory_space<vmem>>, vector<1x1x1x15x8xf32>
    %541 = vector.shape_cast %540 : vector<1x1x1x15x8xf32> to vector<15x8xf32>
    %c8_765 = arith.constant 8 : index
    %c0_766 = arith.constant 0 : index
    %c0_767 = arith.constant 0 : index
    %542 = vector.load %arg2[%c8_765, %c0_766, %c0_767] : memref<9x8x8xf32, #tpu.memory_space<vmem>>, vector<1x8x8xf32>
    %543 = vector.shape_cast %542 : vector<1x8x8xf32> to vector<8x8xf32>
    %cst_768 = arith.constant dense<0.000000e+00> : vector<15x8xf32>
    %544 = tpu.matmul %541, %543, %cst_768 {dimension_numbers = #tpu.dot_dimension_numbers<[1], [0], [0], [1], [0, 0, 1, 1], [], []>} : vector<15x8xf32>, vector<8x8xf32>, vector<15x8xf32> -> vector<15x8xf32>
    %545 = arith.addf %539, %544 : vector<15x8xf32>
    %c8_769 = arith.constant 8 : index
    %c0_770 = arith.constant 0 : index
    %c0_771 = arith.constant 0 : index
    %546 = vector.load %arg8[%c8_769, %c0_770, %c0_771] : memref<15x15x8xf32, #tpu.memory_space<vmem>>, vector<1x15x8xf32>
    %547 = vector.shape_cast %546 : vector<1x15x8xf32> to vector<15x8xf32>
    %548 = vector.shape_cast %545 : vector<15x8xf32> to vector<1x15x8xf32>
    tpu.vector_store %arg8[%c8_769, %c0_770, %c0_771], %548 {strides = array<i32>} : memref<15x15x8xf32, #tpu.memory_space<vmem>>, vector<1x15x8xf32>,
    %cst_772 = arith.constant 0.000000e+00 : f32
    %549 = vector.broadcast %cst_772 : f32 to vector<15x8xf32>
    %c0_773 = arith.constant 0 : index
    %c0_774 = arith.constant 0 : index
    %550 = vector.load %arg3[%c0_773, %c0_774] : memref<1x8xf32, #tpu.memory_space<vmem>>, vector<1x8xf32>
    %551 = vector.broadcast %550 : vector<1x8xf32> to vector<15x8xf32>
    %552 = arith.addf %549, %551 : vector<15x8xf32>
    %c0_775 = arith.constant 0 : index
    %c0_776 = arith.constant 0 : index
    %c9_777 = arith.constant 9 : index
    %c0_778 = arith.constant 0 : index
    %c0_779 = arith.constant 0 : index
    %553 = vector.load %arg1[%c0_775, %c0_776, %c9_777, %c0_778, %c0_779] : memref<1x4x16x16x8xf32, #tpu.memory_space<vmem>>, vector<1x1x1x15x8xf32>
    %554 = vector.shape_cast %553 : vector<1x1x1x15x8xf32> to vector<15x8xf32>
    %c0_780 = arith.constant 0 : index
    %c0_781 = arith.constant 0 : index
    %c0_782 = arith.constant 0 : index
    %555 = vector.load %arg2[%c0_780, %c0_781, %c0_782] : memref<9x8x8xf32, #tpu.memory_space<vmem>>, vector<1x8x8xf32>
    %556 = vector.shape_cast %555 : vector<1x8x8xf32> to vector<8x8xf32>
    %cst_783 = arith.constant dense<0.000000e+00> : vector<15x8xf32>
    %557 = tpu.matmul %554, %556, %cst_783 {dimension_numbers = #tpu.dot_dimension_numbers<[1], [0], [0], [1], [0, 0, 1, 1], [], []>} : vector<15x8xf32>, vector<8x8xf32>, vector<15x8xf32> -> vector<15x8xf32>
    %558 = arith.addf %552, %557 : vector<15x8xf32>
    %c0_784 = arith.constant 0 : index
    %c1_785 = arith.constant 1 : index
    %c9_786 = arith.constant 9 : index
    %c0_787 = arith.constant 0 : index
    %c0_788 = arith.constant 0 : index
    %559 = vector.load %arg1[%c0_784, %c1_785, %c9_786, %c0_787, %c0_788] : memref<1x4x16x16x8xf32, #tpu.memory_space<vmem>>, vector<1x1x1x15x8xf32>
    %560 = vector.shape_cast %559 : vector<1x1x1x15x8xf32> to vector<15x8xf32>
    %c1_789 = arith.constant 1 : index
    %c0_790 = arith.constant 0 : index
    %c0_791 = arith.constant 0 : index
    %561 = vector.load %arg2[%c1_789, %c0_790, %c0_791] : memref<9x8x8xf32, #tpu.memory_space<vmem>>, vector<1x8x8xf32>
    %562 = vector.shape_cast %561 : vector<1x8x8xf32> to vector<8x8xf32>
    %cst_792 = arith.constant dense<0.000000e+00> : vector<15x8xf32>
    %563 = tpu.matmul %560, %562, %cst_792 {dimension_numbers = #tpu.dot_dimension_numbers<[1], [0], [0], [1], [0, 0, 1, 1], [], []>} : vector<15x8xf32>, vector<8x8xf32>, vector<15x8xf32> -> vector<15x8xf32>
    %564 = arith.addf %558, %563 : vector<15x8xf32>
    %c0_793 = arith.constant 0 : index
    %c0_794 = arith.constant 0 : index
    %c9_795 = arith.constant 9 : index
    %c1_796 = arith.constant 1 : index
    %c0_797 = arith.constant 0 : index
    %565 = vector.load %arg1[%c0_793, %c0_794, %c9_795, %c1_796, %c0_797] : memref<1x4x16x16x8xf32, #tpu.memory_space<vmem>>, vector<1x1x1x15x8xf32>
    %566 = vector.shape_cast %565 : vector<1x1x1x15x8xf32> to vector<15x8xf32>
    %c2_798 = arith.constant 2 : index
    %c0_799 = arith.constant 0 : index
    %c0_800 = arith.constant 0 : index
    %567 = vector.load %arg2[%c2_798, %c0_799, %c0_800] : memref<9x8x8xf32, #tpu.memory_space<vmem>>, vector<1x8x8xf32>
    %568 = vector.shape_cast %567 : vector<1x8x8xf32> to vector<8x8xf32>
    %cst_801 = arith.constant dense<0.000000e+00> : vector<15x8xf32>
    %569 = tpu.matmul %566, %568, %cst_801 {dimension_numbers = #tpu.dot_dimension_numbers<[1], [0], [0], [1], [0, 0, 1, 1], [], []>} : vector<15x8xf32>, vector<8x8xf32>, vector<15x8xf32> -> vector<15x8xf32>
    %570 = arith.addf %564, %569 : vector<15x8xf32>
    %c0_802 = arith.constant 0 : index
    %c2_803 = arith.constant 2 : index
    %c9_804 = arith.constant 9 : index
    %c0_805 = arith.constant 0 : index
    %c0_806 = arith.constant 0 : index
    %571 = vector.load %arg1[%c0_802, %c2_803, %c9_804, %c0_805, %c0_806] : memref<1x4x16x16x8xf32, #tpu.memory_space<vmem>>, vector<1x1x1x15x8xf32>
    %572 = vector.shape_cast %571 : vector<1x1x1x15x8xf32> to vector<15x8xf32>
    %c3_807 = arith.constant 3 : index
    %c0_808 = arith.constant 0 : index
    %c0_809 = arith.constant 0 : index
    %573 = vector.load %arg2[%c3_807, %c0_808, %c0_809] : memref<9x8x8xf32, #tpu.memory_space<vmem>>, vector<1x8x8xf32>
    %574 = vector.shape_cast %573 : vector<1x8x8xf32> to vector<8x8xf32>
    %cst_810 = arith.constant dense<0.000000e+00> : vector<15x8xf32>
    %575 = tpu.matmul %572, %574, %cst_810 {dimension_numbers = #tpu.dot_dimension_numbers<[1], [0], [0], [1], [0, 0, 1, 1], [], []>} : vector<15x8xf32>, vector<8x8xf32>, vector<15x8xf32> -> vector<15x8xf32>
    %576 = arith.addf %570, %575 : vector<15x8xf32>
    %c0_811 = arith.constant 0 : index
    %c3_812 = arith.constant 3 : index
    %c9_813 = arith.constant 9 : index
    %c0_814 = arith.constant 0 : index
    %c0_815 = arith.constant 0 : index
    %577 = vector.load %arg1[%c0_811, %c3_812, %c9_813, %c0_814, %c0_815] : memref<1x4x16x16x8xf32, #tpu.memory_space<vmem>>, vector<1x1x1x15x8xf32>
    %578 = vector.shape_cast %577 : vector<1x1x1x15x8xf32> to vector<15x8xf32>
    %c4_816 = arith.constant 4 : index
    %c0_817 = arith.constant 0 : index
    %c0_818 = arith.constant 0 : index
    %579 = vector.load %arg2[%c4_816, %c0_817, %c0_818] : memref<9x8x8xf32, #tpu.memory_space<vmem>>, vector<1x8x8xf32>
    %580 = vector.shape_cast %579 : vector<1x8x8xf32> to vector<8x8xf32>
    %cst_819 = arith.constant dense<0.000000e+00> : vector<15x8xf32>
    %581 = tpu.matmul %578, %580, %cst_819 {dimension_numbers = #tpu.dot_dimension_numbers<[1], [0], [0], [1], [0, 0, 1, 1], [], []>} : vector<15x8xf32>, vector<8x8xf32>, vector<15x8xf32> -> vector<15x8xf32>
    %582 = arith.addf %576, %581 : vector<15x8xf32>
    %c0_820 = arith.constant 0 : index
    %c2_821 = arith.constant 2 : index
    %c9_822 = arith.constant 9 : index
    %c1_823 = arith.constant 1 : index
    %c0_824 = arith.constant 0 : index
    %583 = vector.load %arg1[%c0_820, %c2_821, %c9_822, %c1_823, %c0_824] : memref<1x4x16x16x8xf32, #tpu.memory_space<vmem>>, vector<1x1x1x15x8xf32>
    %584 = vector.shape_cast %583 : vector<1x1x1x15x8xf32> to vector<15x8xf32>
    %c5_825 = arith.constant 5 : index
    %c0_826 = arith.constant 0 : index
    %c0_827 = arith.constant 0 : index
    %585 = vector.load %arg2[%c5_825, %c0_826, %c0_827] : memref<9x8x8xf32, #tpu.memory_space<vmem>>, vector<1x8x8xf32>
    %586 = vector.shape_cast %585 : vector<1x8x8xf32> to vector<8x8xf32>
    %cst_828 = arith.constant dense<0.000000e+00> : vector<15x8xf32>
    %587 = tpu.matmul %584, %586, %cst_828 {dimension_numbers = #tpu.dot_dimension_numbers<[1], [0], [0], [1], [0, 0, 1, 1], [], []>} : vector<15x8xf32>, vector<8x8xf32>, vector<15x8xf32> -> vector<15x8xf32>
    %588 = arith.addf %582, %587 : vector<15x8xf32>
    %c0_829 = arith.constant 0 : index
    %c0_830 = arith.constant 0 : index
    %c10 = arith.constant 10 : index
    %c0_831 = arith.constant 0 : index
    %c0_832 = arith.constant 0 : index
    %589 = vector.load %arg1[%c0_829, %c0_830, %c10, %c0_831, %c0_832] : memref<1x4x16x16x8xf32, #tpu.memory_space<vmem>>, vector<1x1x1x15x8xf32>
    %590 = vector.shape_cast %589 : vector<1x1x1x15x8xf32> to vector<15x8xf32>
    %c6_833 = arith.constant 6 : index
    %c0_834 = arith.constant 0 : index
    %c0_835 = arith.constant 0 : index
    %591 = vector.load %arg2[%c6_833, %c0_834, %c0_835] : memref<9x8x8xf32, #tpu.memory_space<vmem>>, vector<1x8x8xf32>
    %592 = vector.shape_cast %591 : vector<1x8x8xf32> to vector<8x8xf32>
    %cst_836 = arith.constant dense<0.000000e+00> : vector<15x8xf32>
    %593 = tpu.matmul %590, %592, %cst_836 {dimension_numbers = #tpu.dot_dimension_numbers<[1], [0], [0], [1], [0, 0, 1, 1], [], []>} : vector<15x8xf32>, vector<8x8xf32>, vector<15x8xf32> -> vector<15x8xf32>
    %594 = arith.addf %588, %593 : vector<15x8xf32>
    %c0_837 = arith.constant 0 : index
    %c1_838 = arith.constant 1 : index
    %c10_839 = arith.constant 10 : index
    %c0_840 = arith.constant 0 : index
    %c0_841 = arith.constant 0 : index
    %595 = vector.load %arg1[%c0_837, %c1_838, %c10_839, %c0_840, %c0_841] : memref<1x4x16x16x8xf32, #tpu.memory_space<vmem>>, vector<1x1x1x15x8xf32>
    %596 = vector.shape_cast %595 : vector<1x1x1x15x8xf32> to vector<15x8xf32>
    %c7_842 = arith.constant 7 : index
    %c0_843 = arith.constant 0 : index
    %c0_844 = arith.constant 0 : index
    %597 = vector.load %arg2[%c7_842, %c0_843, %c0_844] : memref<9x8x8xf32, #tpu.memory_space<vmem>>, vector<1x8x8xf32>
    %598 = vector.shape_cast %597 : vector<1x8x8xf32> to vector<8x8xf32>
    %cst_845 = arith.constant dense<0.000000e+00> : vector<15x8xf32>
    %599 = tpu.matmul %596, %598, %cst_845 {dimension_numbers = #tpu.dot_dimension_numbers<[1], [0], [0], [1], [0, 0, 1, 1], [], []>} : vector<15x8xf32>, vector<8x8xf32>, vector<15x8xf32> -> vector<15x8xf32>
    %600 = arith.addf %594, %599 : vector<15x8xf32>
    %c0_846 = arith.constant 0 : index
    %c0_847 = arith.constant 0 : index
    %c10_848 = arith.constant 10 : index
    %c1_849 = arith.constant 1 : index
    %c0_850 = arith.constant 0 : index
    %601 = vector.load %arg1[%c0_846, %c0_847, %c10_848, %c1_849, %c0_850] : memref<1x4x16x16x8xf32, #tpu.memory_space<vmem>>, vector<1x1x1x15x8xf32>
    %602 = vector.shape_cast %601 : vector<1x1x1x15x8xf32> to vector<15x8xf32>
    %c8_851 = arith.constant 8 : index
    %c0_852 = arith.constant 0 : index
    %c0_853 = arith.constant 0 : index
    %603 = vector.load %arg2[%c8_851, %c0_852, %c0_853] : memref<9x8x8xf32, #tpu.memory_space<vmem>>, vector<1x8x8xf32>
    %604 = vector.shape_cast %603 : vector<1x8x8xf32> to vector<8x8xf32>
    %cst_854 = arith.constant dense<0.000000e+00> : vector<15x8xf32>
    %605 = tpu.matmul %602, %604, %cst_854 {dimension_numbers = #tpu.dot_dimension_numbers<[1], [0], [0], [1], [0, 0, 1, 1], [], []>} : vector<15x8xf32>, vector<8x8xf32>, vector<15x8xf32> -> vector<15x8xf32>
    %606 = arith.addf %600, %605 : vector<15x8xf32>
    %c9_855 = arith.constant 9 : index
    %c0_856 = arith.constant 0 : index
    %c0_857 = arith.constant 0 : index
    %607 = vector.load %arg8[%c9_855, %c0_856, %c0_857] : memref<15x15x8xf32, #tpu.memory_space<vmem>>, vector<1x15x8xf32>
    %608 = vector.shape_cast %607 : vector<1x15x8xf32> to vector<15x8xf32>
    %609 = vector.shape_cast %606 : vector<15x8xf32> to vector<1x15x8xf32>
    tpu.vector_store %arg8[%c9_855, %c0_856, %c0_857], %609 {strides = array<i32>} : memref<15x15x8xf32, #tpu.memory_space<vmem>>, vector<1x15x8xf32>,
    %cst_858 = arith.constant 0.000000e+00 : f32
    %610 = vector.broadcast %cst_858 : f32 to vector<15x8xf32>
    %c0_859 = arith.constant 0 : index
    %c0_860 = arith.constant 0 : index
    %611 = vector.load %arg3[%c0_859, %c0_860] : memref<1x8xf32, #tpu.memory_space<vmem>>, vector<1x8xf32>
    %612 = vector.broadcast %611 : vector<1x8xf32> to vector<15x8xf32>
    %613 = arith.addf %610, %612 : vector<15x8xf32>
    %c0_861 = arith.constant 0 : index
    %c0_862 = arith.constant 0 : index
    %c10_863 = arith.constant 10 : index
    %c0_864 = arith.constant 0 : index
    %c0_865 = arith.constant 0 : index
    %614 = vector.load %arg1[%c0_861, %c0_862, %c10_863, %c0_864, %c0_865] : memref<1x4x16x16x8xf32, #tpu.memory_space<vmem>>, vector<1x1x1x15x8xf32>
    %615 = vector.shape_cast %614 : vector<1x1x1x15x8xf32> to vector<15x8xf32>
    %c0_866 = arith.constant 0 : index
    %c0_867 = arith.constant 0 : index
    %c0_868 = arith.constant 0 : index
    %616 = vector.load %arg2[%c0_866, %c0_867, %c0_868] : memref<9x8x8xf32, #tpu.memory_space<vmem>>, vector<1x8x8xf32>
    %617 = vector.shape_cast %616 : vector<1x8x8xf32> to vector<8x8xf32>
    %cst_869 = arith.constant dense<0.000000e+00> : vector<15x8xf32>
    %618 = tpu.matmul %615, %617, %cst_869 {dimension_numbers = #tpu.dot_dimension_numbers<[1], [0], [0], [1], [0, 0, 1, 1], [], []>} : vector<15x8xf32>, vector<8x8xf32>, vector<15x8xf32> -> vector<15x8xf32>
    %619 = arith.addf %613, %618 : vector<15x8xf32>
    %c0_870 = arith.constant 0 : index
    %c1_871 = arith.constant 1 : index
    %c10_872 = arith.constant 10 : index
    %c0_873 = arith.constant 0 : index
    %c0_874 = arith.constant 0 : index
    %620 = vector.load %arg1[%c0_870, %c1_871, %c10_872, %c0_873, %c0_874] : memref<1x4x16x16x8xf32, #tpu.memory_space<vmem>>, vector<1x1x1x15x8xf32>
    %621 = vector.shape_cast %620 : vector<1x1x1x15x8xf32> to vector<15x8xf32>
    %c1_875 = arith.constant 1 : index
    %c0_876 = arith.constant 0 : index
    %c0_877 = arith.constant 0 : index
    %622 = vector.load %arg2[%c1_875, %c0_876, %c0_877] : memref<9x8x8xf32, #tpu.memory_space<vmem>>, vector<1x8x8xf32>
    %623 = vector.shape_cast %622 : vector<1x8x8xf32> to vector<8x8xf32>
    %cst_878 = arith.constant dense<0.000000e+00> : vector<15x8xf32>
    %624 = tpu.matmul %621, %623, %cst_878 {dimension_numbers = #tpu.dot_dimension_numbers<[1], [0], [0], [1], [0, 0, 1, 1], [], []>} : vector<15x8xf32>, vector<8x8xf32>, vector<15x8xf32> -> vector<15x8xf32>
    %625 = arith.addf %619, %624 : vector<15x8xf32>
    %c0_879 = arith.constant 0 : index
    %c0_880 = arith.constant 0 : index
    %c10_881 = arith.constant 10 : index
    %c1_882 = arith.constant 1 : index
    %c0_883 = arith.constant 0 : index
    %626 = vector.load %arg1[%c0_879, %c0_880, %c10_881, %c1_882, %c0_883] : memref<1x4x16x16x8xf32, #tpu.memory_space<vmem>>, vector<1x1x1x15x8xf32>
    %627 = vector.shape_cast %626 : vector<1x1x1x15x8xf32> to vector<15x8xf32>
    %c2_884 = arith.constant 2 : index
    %c0_885 = arith.constant 0 : index
    %c0_886 = arith.constant 0 : index
    %628 = vector.load %arg2[%c2_884, %c0_885, %c0_886] : memref<9x8x8xf32, #tpu.memory_space<vmem>>, vector<1x8x8xf32>
    %629 = vector.shape_cast %628 : vector<1x8x8xf32> to vector<8x8xf32>
    %cst_887 = arith.constant dense<0.000000e+00> : vector<15x8xf32>
    %630 = tpu.matmul %627, %629, %cst_887 {dimension_numbers = #tpu.dot_dimension_numbers<[1], [0], [0], [1], [0, 0, 1, 1], [], []>} : vector<15x8xf32>, vector<8x8xf32>, vector<15x8xf32> -> vector<15x8xf32>
    %631 = arith.addf %625, %630 : vector<15x8xf32>
    %c0_888 = arith.constant 0 : index
    %c2_889 = arith.constant 2 : index
    %c10_890 = arith.constant 10 : index
    %c0_891 = arith.constant 0 : index
    %c0_892 = arith.constant 0 : index
    %632 = vector.load %arg1[%c0_888, %c2_889, %c10_890, %c0_891, %c0_892] : memref<1x4x16x16x8xf32, #tpu.memory_space<vmem>>, vector<1x1x1x15x8xf32>
    %633 = vector.shape_cast %632 : vector<1x1x1x15x8xf32> to vector<15x8xf32>
    %c3_893 = arith.constant 3 : index
    %c0_894 = arith.constant 0 : index
    %c0_895 = arith.constant 0 : index
    %634 = vector.load %arg2[%c3_893, %c0_894, %c0_895] : memref<9x8x8xf32, #tpu.memory_space<vmem>>, vector<1x8x8xf32>
    %635 = vector.shape_cast %634 : vector<1x8x8xf32> to vector<8x8xf32>
    %cst_896 = arith.constant dense<0.000000e+00> : vector<15x8xf32>
    %636 = tpu.matmul %633, %635, %cst_896 {dimension_numbers = #tpu.dot_dimension_numbers<[1], [0], [0], [1], [0, 0, 1, 1], [], []>} : vector<15x8xf32>, vector<8x8xf32>, vector<15x8xf32> -> vector<15x8xf32>
    %637 = arith.addf %631, %636 : vector<15x8xf32>
    %c0_897 = arith.constant 0 : index
    %c3_898 = arith.constant 3 : index
    %c10_899 = arith.constant 10 : index
    %c0_900 = arith.constant 0 : index
    %c0_901 = arith.constant 0 : index
    %638 = vector.load %arg1[%c0_897, %c3_898, %c10_899, %c0_900, %c0_901] : memref<1x4x16x16x8xf32, #tpu.memory_space<vmem>>, vector<1x1x1x15x8xf32>
    %639 = vector.shape_cast %638 : vector<1x1x1x15x8xf32> to vector<15x8xf32>
    %c4_902 = arith.constant 4 : index
    %c0_903 = arith.constant 0 : index
    %c0_904 = arith.constant 0 : index
    %640 = vector.load %arg2[%c4_902, %c0_903, %c0_904] : memref<9x8x8xf32, #tpu.memory_space<vmem>>, vector<1x8x8xf32>
    %641 = vector.shape_cast %640 : vector<1x8x8xf32> to vector<8x8xf32>
    %cst_905 = arith.constant dense<0.000000e+00> : vector<15x8xf32>
    %642 = tpu.matmul %639, %641, %cst_905 {dimension_numbers = #tpu.dot_dimension_numbers<[1], [0], [0], [1], [0, 0, 1, 1], [], []>} : vector<15x8xf32>, vector<8x8xf32>, vector<15x8xf32> -> vector<15x8xf32>
    %643 = arith.addf %637, %642 : vector<15x8xf32>
    %c0_906 = arith.constant 0 : index
    %c2_907 = arith.constant 2 : index
    %c10_908 = arith.constant 10 : index
    %c1_909 = arith.constant 1 : index
    %c0_910 = arith.constant 0 : index
    %644 = vector.load %arg1[%c0_906, %c2_907, %c10_908, %c1_909, %c0_910] : memref<1x4x16x16x8xf32, #tpu.memory_space<vmem>>, vector<1x1x1x15x8xf32>
    %645 = vector.shape_cast %644 : vector<1x1x1x15x8xf32> to vector<15x8xf32>
    %c5_911 = arith.constant 5 : index
    %c0_912 = arith.constant 0 : index
    %c0_913 = arith.constant 0 : index
    %646 = vector.load %arg2[%c5_911, %c0_912, %c0_913] : memref<9x8x8xf32, #tpu.memory_space<vmem>>, vector<1x8x8xf32>
    %647 = vector.shape_cast %646 : vector<1x8x8xf32> to vector<8x8xf32>
    %cst_914 = arith.constant dense<0.000000e+00> : vector<15x8xf32>
    %648 = tpu.matmul %645, %647, %cst_914 {dimension_numbers = #tpu.dot_dimension_numbers<[1], [0], [0], [1], [0, 0, 1, 1], [], []>} : vector<15x8xf32>, vector<8x8xf32>, vector<15x8xf32> -> vector<15x8xf32>
    %649 = arith.addf %643, %648 : vector<15x8xf32>
    %c0_915 = arith.constant 0 : index
    %c0_916 = arith.constant 0 : index
    %c11 = arith.constant 11 : index
    %c0_917 = arith.constant 0 : index
    %c0_918 = arith.constant 0 : index
    %650 = vector.load %arg1[%c0_915, %c0_916, %c11, %c0_917, %c0_918] : memref<1x4x16x16x8xf32, #tpu.memory_space<vmem>>, vector<1x1x1x15x8xf32>
    %651 = vector.shape_cast %650 : vector<1x1x1x15x8xf32> to vector<15x8xf32>
    %c6_919 = arith.constant 6 : index
    %c0_920 = arith.constant 0 : index
    %c0_921 = arith.constant 0 : index
    %652 = vector.load %arg2[%c6_919, %c0_920, %c0_921] : memref<9x8x8xf32, #tpu.memory_space<vmem>>, vector<1x8x8xf32>
    %653 = vector.shape_cast %652 : vector<1x8x8xf32> to vector<8x8xf32>
    %cst_922 = arith.constant dense<0.000000e+00> : vector<15x8xf32>
    %654 = tpu.matmul %651, %653, %cst_922 {dimension_numbers = #tpu.dot_dimension_numbers<[1], [0], [0], [1], [0, 0, 1, 1], [], []>} : vector<15x8xf32>, vector<8x8xf32>, vector<15x8xf32> -> vector<15x8xf32>
    %655 = arith.addf %649, %654 : vector<15x8xf32>
    %c0_923 = arith.constant 0 : index
    %c1_924 = arith.constant 1 : index
    %c11_925 = arith.constant 11 : index
    %c0_926 = arith.constant 0 : index
    %c0_927 = arith.constant 0 : index
    %656 = vector.load %arg1[%c0_923, %c1_924, %c11_925, %c0_926, %c0_927] : memref<1x4x16x16x8xf32, #tpu.memory_space<vmem>>, vector<1x1x1x15x8xf32>
    %657 = vector.shape_cast %656 : vector<1x1x1x15x8xf32> to vector<15x8xf32>
    %c7_928 = arith.constant 7 : index
    %c0_929 = arith.constant 0 : index
    %c0_930 = arith.constant 0 : index
    %658 = vector.load %arg2[%c7_928, %c0_929, %c0_930] : memref<9x8x8xf32, #tpu.memory_space<vmem>>, vector<1x8x8xf32>
    %659 = vector.shape_cast %658 : vector<1x8x8xf32> to vector<8x8xf32>
    %cst_931 = arith.constant dense<0.000000e+00> : vector<15x8xf32>
    %660 = tpu.matmul %657, %659, %cst_931 {dimension_numbers = #tpu.dot_dimension_numbers<[1], [0], [0], [1], [0, 0, 1, 1], [], []>} : vector<15x8xf32>, vector<8x8xf32>, vector<15x8xf32> -> vector<15x8xf32>
    %661 = arith.addf %655, %660 : vector<15x8xf32>
    %c0_932 = arith.constant 0 : index
    %c0_933 = arith.constant 0 : index
    %c11_934 = arith.constant 11 : index
    %c1_935 = arith.constant 1 : index
    %c0_936 = arith.constant 0 : index
    %662 = vector.load %arg1[%c0_932, %c0_933, %c11_934, %c1_935, %c0_936] : memref<1x4x16x16x8xf32, #tpu.memory_space<vmem>>, vector<1x1x1x15x8xf32>
    %663 = vector.shape_cast %662 : vector<1x1x1x15x8xf32> to vector<15x8xf32>
    %c8_937 = arith.constant 8 : index
    %c0_938 = arith.constant 0 : index
    %c0_939 = arith.constant 0 : index
    %664 = vector.load %arg2[%c8_937, %c0_938, %c0_939] : memref<9x8x8xf32, #tpu.memory_space<vmem>>, vector<1x8x8xf32>
    %665 = vector.shape_cast %664 : vector<1x8x8xf32> to vector<8x8xf32>
    %cst_940 = arith.constant dense<0.000000e+00> : vector<15x8xf32>
    %666 = tpu.matmul %663, %665, %cst_940 {dimension_numbers = #tpu.dot_dimension_numbers<[1], [0], [0], [1], [0, 0, 1, 1], [], []>} : vector<15x8xf32>, vector<8x8xf32>, vector<15x8xf32> -> vector<15x8xf32>
    %667 = arith.addf %661, %666 : vector<15x8xf32>
    %c10_941 = arith.constant 10 : index
    %c0_942 = arith.constant 0 : index
    %c0_943 = arith.constant 0 : index
    %668 = vector.load %arg8[%c10_941, %c0_942, %c0_943] : memref<15x15x8xf32, #tpu.memory_space<vmem>>, vector<1x15x8xf32>
    %669 = vector.shape_cast %668 : vector<1x15x8xf32> to vector<15x8xf32>
    %670 = vector.shape_cast %667 : vector<15x8xf32> to vector<1x15x8xf32>
    tpu.vector_store %arg8[%c10_941, %c0_942, %c0_943], %670 {strides = array<i32>} : memref<15x15x8xf32, #tpu.memory_space<vmem>>, vector<1x15x8xf32>,
    %cst_944 = arith.constant 0.000000e+00 : f32
    %671 = vector.broadcast %cst_944 : f32 to vector<15x8xf32>
    %c0_945 = arith.constant 0 : index
    %c0_946 = arith.constant 0 : index
    %672 = vector.load %arg3[%c0_945, %c0_946] : memref<1x8xf32, #tpu.memory_space<vmem>>, vector<1x8xf32>
    %673 = vector.broadcast %672 : vector<1x8xf32> to vector<15x8xf32>
    %674 = arith.addf %671, %673 : vector<15x8xf32>
    %c0_947 = arith.constant 0 : index
    %c0_948 = arith.constant 0 : index
    %c11_949 = arith.constant 11 : index
    %c0_950 = arith.constant 0 : index
    %c0_951 = arith.constant 0 : index
    %675 = vector.load %arg1[%c0_947, %c0_948, %c11_949, %c0_950, %c0_951] : memref<1x4x16x16x8xf32, #tpu.memory_space<vmem>>, vector<1x1x1x15x8xf32>
    %676 = vector.shape_cast %675 : vector<1x1x1x15x8xf32> to vector<15x8xf32>
    %c0_952 = arith.constant 0 : index
    %c0_953 = arith.constant 0 : index
    %c0_954 = arith.constant 0 : index
    %677 = vector.load %arg2[%c0_952, %c0_953, %c0_954] : memref<9x8x8xf32, #tpu.memory_space<vmem>>, vector<1x8x8xf32>
    %678 = vector.shape_cast %677 : vector<1x8x8xf32> to vector<8x8xf32>
    %cst_955 = arith.constant dense<0.000000e+00> : vector<15x8xf32>
    %679 = tpu.matmul %676, %678, %cst_955 {dimension_numbers = #tpu.dot_dimension_numbers<[1], [0], [0], [1], [0, 0, 1, 1], [], []>} : vector<15x8xf32>, vector<8x8xf32>, vector<15x8xf32> -> vector<15x8xf32>
    %680 = arith.addf %674, %679 : vector<15x8xf32>
    %c0_956 = arith.constant 0 : index
    %c1_957 = arith.constant 1 : index
    %c11_958 = arith.constant 11 : index
    %c0_959 = arith.constant 0 : index
    %c0_960 = arith.constant 0 : index
    %681 = vector.load %arg1[%c0_956, %c1_957, %c11_958, %c0_959, %c0_960] : memref<1x4x16x16x8xf32, #tpu.memory_space<vmem>>, vector<1x1x1x15x8xf32>
    %682 = vector.shape_cast %681 : vector<1x1x1x15x8xf32> to vector<15x8xf32>
    %c1_961 = arith.constant 1 : index
    %c0_962 = arith.constant 0 : index
    %c0_963 = arith.constant 0 : index
    %683 = vector.load %arg2[%c1_961, %c0_962, %c0_963] : memref<9x8x8xf32, #tpu.memory_space<vmem>>, vector<1x8x8xf32>
    %684 = vector.shape_cast %683 : vector<1x8x8xf32> to vector<8x8xf32>
    %cst_964 = arith.constant dense<0.000000e+00> : vector<15x8xf32>
    %685 = tpu.matmul %682, %684, %cst_964 {dimension_numbers = #tpu.dot_dimension_numbers<[1], [0], [0], [1], [0, 0, 1, 1], [], []>} : vector<15x8xf32>, vector<8x8xf32>, vector<15x8xf32> -> vector<15x8xf32>
    %686 = arith.addf %680, %685 : vector<15x8xf32>
    %c0_965 = arith.constant 0 : index
    %c0_966 = arith.constant 0 : index
    %c11_967 = arith.constant 11 : index
    %c1_968 = arith.constant 1 : index
    %c0_969 = arith.constant 0 : index
    %687 = vector.load %arg1[%c0_965, %c0_966, %c11_967, %c1_968, %c0_969] : memref<1x4x16x16x8xf32, #tpu.memory_space<vmem>>, vector<1x1x1x15x8xf32>
    %688 = vector.shape_cast %687 : vector<1x1x1x15x8xf32> to vector<15x8xf32>
    %c2_970 = arith.constant 2 : index
    %c0_971 = arith.constant 0 : index
    %c0_972 = arith.constant 0 : index
    %689 = vector.load %arg2[%c2_970, %c0_971, %c0_972] : memref<9x8x8xf32, #tpu.memory_space<vmem>>, vector<1x8x8xf32>
    %690 = vector.shape_cast %689 : vector<1x8x8xf32> to vector<8x8xf32>
    %cst_973 = arith.constant dense<0.000000e+00> : vector<15x8xf32>
    %691 = tpu.matmul %688, %690, %cst_973 {dimension_numbers = #tpu.dot_dimension_numbers<[1], [0], [0], [1], [0, 0, 1, 1], [], []>} : vector<15x8xf32>, vector<8x8xf32>, vector<15x8xf32> -> vector<15x8xf32>
    %692 = arith.addf %686, %691 : vector<15x8xf32>
    %c0_974 = arith.constant 0 : index
    %c2_975 = arith.constant 2 : index
    %c11_976 = arith.constant 11 : index
    %c0_977 = arith.constant 0 : index
    %c0_978 = arith.constant 0 : index
    %693 = vector.load %arg1[%c0_974, %c2_975, %c11_976, %c0_977, %c0_978] : memref<1x4x16x16x8xf32, #tpu.memory_space<vmem>>, vector<1x1x1x15x8xf32>
    %694 = vector.shape_cast %693 : vector<1x1x1x15x8xf32> to vector<15x8xf32>
    %c3_979 = arith.constant 3 : index
    %c0_980 = arith.constant 0 : index
    %c0_981 = arith.constant 0 : index
    %695 = vector.load %arg2[%c3_979, %c0_980, %c0_981] : memref<9x8x8xf32, #tpu.memory_space<vmem>>, vector<1x8x8xf32>
    %696 = vector.shape_cast %695 : vector<1x8x8xf32> to vector<8x8xf32>
    %cst_982 = arith.constant dense<0.000000e+00> : vector<15x8xf32>
    %697 = tpu.matmul %694, %696, %cst_982 {dimension_numbers = #tpu.dot_dimension_numbers<[1], [0], [0], [1], [0, 0, 1, 1], [], []>} : vector<15x8xf32>, vector<8x8xf32>, vector<15x8xf32> -> vector<15x8xf32>
    %698 = arith.addf %692, %697 : vector<15x8xf32>
    %c0_983 = arith.constant 0 : index
    %c3_984 = arith.constant 3 : index
    %c11_985 = arith.constant 11 : index
    %c0_986 = arith.constant 0 : index
    %c0_987 = arith.constant 0 : index
    %699 = vector.load %arg1[%c0_983, %c3_984, %c11_985, %c0_986, %c0_987] : memref<1x4x16x16x8xf32, #tpu.memory_space<vmem>>, vector<1x1x1x15x8xf32>
    %700 = vector.shape_cast %699 : vector<1x1x1x15x8xf32> to vector<15x8xf32>
    %c4_988 = arith.constant 4 : index
    %c0_989 = arith.constant 0 : index
    %c0_990 = arith.constant 0 : index
    %701 = vector.load %arg2[%c4_988, %c0_989, %c0_990] : memref<9x8x8xf32, #tpu.memory_space<vmem>>, vector<1x8x8xf32>
    %702 = vector.shape_cast %701 : vector<1x8x8xf32> to vector<8x8xf32>
    %cst_991 = arith.constant dense<0.000000e+00> : vector<15x8xf32>
    %703 = tpu.matmul %700, %702, %cst_991 {dimension_numbers = #tpu.dot_dimension_numbers<[1], [0], [0], [1], [0, 0, 1, 1], [], []>} : vector<15x8xf32>, vector<8x8xf32>, vector<15x8xf32> -> vector<15x8xf32>
    %704 = arith.addf %698, %703 : vector<15x8xf32>
    %c0_992 = arith.constant 0 : index
    %c2_993 = arith.constant 2 : index
    %c11_994 = arith.constant 11 : index
    %c1_995 = arith.constant 1 : index
    %c0_996 = arith.constant 0 : index
    %705 = vector.load %arg1[%c0_992, %c2_993, %c11_994, %c1_995, %c0_996] : memref<1x4x16x16x8xf32, #tpu.memory_space<vmem>>, vector<1x1x1x15x8xf32>
    %706 = vector.shape_cast %705 : vector<1x1x1x15x8xf32> to vector<15x8xf32>
    %c5_997 = arith.constant 5 : index
    %c0_998 = arith.constant 0 : index
    %c0_999 = arith.constant 0 : index
    %707 = vector.load %arg2[%c5_997, %c0_998, %c0_999] : memref<9x8x8xf32, #tpu.memory_space<vmem>>, vector<1x8x8xf32>
    %708 = vector.shape_cast %707 : vector<1x8x8xf32> to vector<8x8xf32>
    %cst_1000 = arith.constant dense<0.000000e+00> : vector<15x8xf32>
    %709 = tpu.matmul %706, %708, %cst_1000 {dimension_numbers = #tpu.dot_dimension_numbers<[1], [0], [0], [1], [0, 0, 1, 1], [], []>} : vector<15x8xf32>, vector<8x8xf32>, vector<15x8xf32> -> vector<15x8xf32>
    %710 = arith.addf %704, %709 : vector<15x8xf32>
    %c0_1001 = arith.constant 0 : index
    %c0_1002 = arith.constant 0 : index
    %c12 = arith.constant 12 : index
    %c0_1003 = arith.constant 0 : index
    %c0_1004 = arith.constant 0 : index
    %711 = vector.load %arg1[%c0_1001, %c0_1002, %c12, %c0_1003, %c0_1004] : memref<1x4x16x16x8xf32, #tpu.memory_space<vmem>>, vector<1x1x1x15x8xf32>
    %712 = vector.shape_cast %711 : vector<1x1x1x15x8xf32> to vector<15x8xf32>
    %c6_1005 = arith.constant 6 : index
    %c0_1006 = arith.constant 0 : index
    %c0_1007 = arith.constant 0 : index
    %713 = vector.load %arg2[%c6_1005, %c0_1006, %c0_1007] : memref<9x8x8xf32, #tpu.memory_space<vmem>>, vector<1x8x8xf32>
    %714 = vector.shape_cast %713 : vector<1x8x8xf32> to vector<8x8xf32>
    %cst_1008 = arith.constant dense<0.000000e+00> : vector<15x8xf32>
    %715 = tpu.matmul %712, %714, %cst_1008 {dimension_numbers = #tpu.dot_dimension_numbers<[1], [0], [0], [1], [0, 0, 1, 1], [], []>} : vector<15x8xf32>, vector<8x8xf32>, vector<15x8xf32> -> vector<15x8xf32>
    %716 = arith.addf %710, %715 : vector<15x8xf32>
    %c0_1009 = arith.constant 0 : index
    %c1_1010 = arith.constant 1 : index
    %c12_1011 = arith.constant 12 : index
    %c0_1012 = arith.constant 0 : index
    %c0_1013 = arith.constant 0 : index
    %717 = vector.load %arg1[%c0_1009, %c1_1010, %c12_1011, %c0_1012, %c0_1013] : memref<1x4x16x16x8xf32, #tpu.memory_space<vmem>>, vector<1x1x1x15x8xf32>
    %718 = vector.shape_cast %717 : vector<1x1x1x15x8xf32> to vector<15x8xf32>
    %c7_1014 = arith.constant 7 : index
    %c0_1015 = arith.constant 0 : index
    %c0_1016 = arith.constant 0 : index
    %719 = vector.load %arg2[%c7_1014, %c0_1015, %c0_1016] : memref<9x8x8xf32, #tpu.memory_space<vmem>>, vector<1x8x8xf32>
    %720 = vector.shape_cast %719 : vector<1x8x8xf32> to vector<8x8xf32>
    %cst_1017 = arith.constant dense<0.000000e+00> : vector<15x8xf32>
    %721 = tpu.matmul %718, %720, %cst_1017 {dimension_numbers = #tpu.dot_dimension_numbers<[1], [0], [0], [1], [0, 0, 1, 1], [], []>} : vector<15x8xf32>, vector<8x8xf32>, vector<15x8xf32> -> vector<15x8xf32>
    %722 = arith.addf %716, %721 : vector<15x8xf32>
    %c0_1018 = arith.constant 0 : index
    %c0_1019 = arith.constant 0 : index
    %c12_1020 = arith.constant 12 : index
    %c1_1021 = arith.constant 1 : index
    %c0_1022 = arith.constant 0 : index
    %723 = vector.load %arg1[%c0_1018, %c0_1019, %c12_1020, %c1_1021, %c0_1022] : memref<1x4x16x16x8xf32, #tpu.memory_space<vmem>>, vector<1x1x1x15x8xf32>
    %724 = vector.shape_cast %723 : vector<1x1x1x15x8xf32> to vector<15x8xf32>
    %c8_1023 = arith.constant 8 : index
    %c0_1024 = arith.constant 0 : index
    %c0_1025 = arith.constant 0 : index
    %725 = vector.load %arg2[%c8_1023, %c0_1024, %c0_1025] : memref<9x8x8xf32, #tpu.memory_space<vmem>>, vector<1x8x8xf32>
    %726 = vector.shape_cast %725 : vector<1x8x8xf32> to vector<8x8xf32>
    %cst_1026 = arith.constant dense<0.000000e+00> : vector<15x8xf32>
    %727 = tpu.matmul %724, %726, %cst_1026 {dimension_numbers = #tpu.dot_dimension_numbers<[1], [0], [0], [1], [0, 0, 1, 1], [], []>} : vector<15x8xf32>, vector<8x8xf32>, vector<15x8xf32> -> vector<15x8xf32>
    %728 = arith.addf %722, %727 : vector<15x8xf32>
    %c11_1027 = arith.constant 11 : index
    %c0_1028 = arith.constant 0 : index
    %c0_1029 = arith.constant 0 : index
    %729 = vector.load %arg8[%c11_1027, %c0_1028, %c0_1029] : memref<15x15x8xf32, #tpu.memory_space<vmem>>, vector<1x15x8xf32>
    %730 = vector.shape_cast %729 : vector<1x15x8xf32> to vector<15x8xf32>
    %731 = vector.shape_cast %728 : vector<15x8xf32> to vector<1x15x8xf32>
    tpu.vector_store %arg8[%c11_1027, %c0_1028, %c0_1029], %731 {strides = array<i32>} : memref<15x15x8xf32, #tpu.memory_space<vmem>>, vector<1x15x8xf32>,
    %cst_1030 = arith.constant 0.000000e+00 : f32
    %732 = vector.broadcast %cst_1030 : f32 to vector<15x8xf32>
    %c0_1031 = arith.constant 0 : index
    %c0_1032 = arith.constant 0 : index
    %733 = vector.load %arg3[%c0_1031, %c0_1032] : memref<1x8xf32, #tpu.memory_space<vmem>>, vector<1x8xf32>
    %734 = vector.broadcast %733 : vector<1x8xf32> to vector<15x8xf32>
    %735 = arith.addf %732, %734 : vector<15x8xf32>
    %c0_1033 = arith.constant 0 : index
    %c0_1034 = arith.constant 0 : index
    %c12_1035 = arith.constant 12 : index
    %c0_1036 = arith.constant 0 : index
    %c0_1037 = arith.constant 0 : index
    %736 = vector.load %arg1[%c0_1033, %c0_1034, %c12_1035, %c0_1036, %c0_1037] : memref<1x4x16x16x8xf32, #tpu.memory_space<vmem>>, vector<1x1x1x15x8xf32>
    %737 = vector.shape_cast %736 : vector<1x1x1x15x8xf32> to vector<15x8xf32>
    %c0_1038 = arith.constant 0 : index
    %c0_1039 = arith.constant 0 : index
    %c0_1040 = arith.constant 0 : index
    %738 = vector.load %arg2[%c0_1038, %c0_1039, %c0_1040] : memref<9x8x8xf32, #tpu.memory_space<vmem>>, vector<1x8x8xf32>
    %739 = vector.shape_cast %738 : vector<1x8x8xf32> to vector<8x8xf32>
    %cst_1041 = arith.constant dense<0.000000e+00> : vector<15x8xf32>
    %740 = tpu.matmul %737, %739, %cst_1041 {dimension_numbers = #tpu.dot_dimension_numbers<[1], [0], [0], [1], [0, 0, 1, 1], [], []>} : vector<15x8xf32>, vector<8x8xf32>, vector<15x8xf32> -> vector<15x8xf32>
    %741 = arith.addf %735, %740 : vector<15x8xf32>
    %c0_1042 = arith.constant 0 : index
    %c1_1043 = arith.constant 1 : index
    %c12_1044 = arith.constant 12 : index
    %c0_1045 = arith.constant 0 : index
    %c0_1046 = arith.constant 0 : index
    %742 = vector.load %arg1[%c0_1042, %c1_1043, %c12_1044, %c0_1045, %c0_1046] : memref<1x4x16x16x8xf32, #tpu.memory_space<vmem>>, vector<1x1x1x15x8xf32>
    %743 = vector.shape_cast %742 : vector<1x1x1x15x8xf32> to vector<15x8xf32>
    %c1_1047 = arith.constant 1 : index
    %c0_1048 = arith.constant 0 : index
    %c0_1049 = arith.constant 0 : index
    %744 = vector.load %arg2[%c1_1047, %c0_1048, %c0_1049] : memref<9x8x8xf32, #tpu.memory_space<vmem>>, vector<1x8x8xf32>
    %745 = vector.shape_cast %744 : vector<1x8x8xf32> to vector<8x8xf32>
    %cst_1050 = arith.constant dense<0.000000e+00> : vector<15x8xf32>
    %746 = tpu.matmul %743, %745, %cst_1050 {dimension_numbers = #tpu.dot_dimension_numbers<[1], [0], [0], [1], [0, 0, 1, 1], [], []>} : vector<15x8xf32>, vector<8x8xf32>, vector<15x8xf32> -> vector<15x8xf32>
    %747 = arith.addf %741, %746 : vector<15x8xf32>
    %c0_1051 = arith.constant 0 : index
    %c0_1052 = arith.constant 0 : index
    %c12_1053 = arith.constant 12 : index
    %c1_1054 = arith.constant 1 : index
    %c0_1055 = arith.constant 0 : index
    %748 = vector.load %arg1[%c0_1051, %c0_1052, %c12_1053, %c1_1054, %c0_1055] : memref<1x4x16x16x8xf32, #tpu.memory_space<vmem>>, vector<1x1x1x15x8xf32>
    %749 = vector.shape_cast %748 : vector<1x1x1x15x8xf32> to vector<15x8xf32>
    %c2_1056 = arith.constant 2 : index
    %c0_1057 = arith.constant 0 : index
    %c0_1058 = arith.constant 0 : index
    %750 = vector.load %arg2[%c2_1056, %c0_1057, %c0_1058] : memref<9x8x8xf32, #tpu.memory_space<vmem>>, vector<1x8x8xf32>
    %751 = vector.shape_cast %750 : vector<1x8x8xf32> to vector<8x8xf32>
    %cst_1059 = arith.constant dense<0.000000e+00> : vector<15x8xf32>
    %752 = tpu.matmul %749, %751, %cst_1059 {dimension_numbers = #tpu.dot_dimension_numbers<[1], [0], [0], [1], [0, 0, 1, 1], [], []>} : vector<15x8xf32>, vector<8x8xf32>, vector<15x8xf32> -> vector<15x8xf32>
    %753 = arith.addf %747, %752 : vector<15x8xf32>
    %c0_1060 = arith.constant 0 : index
    %c2_1061 = arith.constant 2 : index
    %c12_1062 = arith.constant 12 : index
    %c0_1063 = arith.constant 0 : index
    %c0_1064 = arith.constant 0 : index
    %754 = vector.load %arg1[%c0_1060, %c2_1061, %c12_1062, %c0_1063, %c0_1064] : memref<1x4x16x16x8xf32, #tpu.memory_space<vmem>>, vector<1x1x1x15x8xf32>
    %755 = vector.shape_cast %754 : vector<1x1x1x15x8xf32> to vector<15x8xf32>
    %c3_1065 = arith.constant 3 : index
    %c0_1066 = arith.constant 0 : index
    %c0_1067 = arith.constant 0 : index
    %756 = vector.load %arg2[%c3_1065, %c0_1066, %c0_1067] : memref<9x8x8xf32, #tpu.memory_space<vmem>>, vector<1x8x8xf32>
    %757 = vector.shape_cast %756 : vector<1x8x8xf32> to vector<8x8xf32>
    %cst_1068 = arith.constant dense<0.000000e+00> : vector<15x8xf32>
    %758 = tpu.matmul %755, %757, %cst_1068 {dimension_numbers = #tpu.dot_dimension_numbers<[1], [0], [0], [1], [0, 0, 1, 1], [], []>} : vector<15x8xf32>, vector<8x8xf32>, vector<15x8xf32> -> vector<15x8xf32>
    %759 = arith.addf %753, %758 : vector<15x8xf32>
    %c0_1069 = arith.constant 0 : index
    %c3_1070 = arith.constant 3 : index
    %c12_1071 = arith.constant 12 : index
    %c0_1072 = arith.constant 0 : index
    %c0_1073 = arith.constant 0 : index
    %760 = vector.load %arg1[%c0_1069, %c3_1070, %c12_1071, %c0_1072, %c0_1073] : memref<1x4x16x16x8xf32, #tpu.memory_space<vmem>>, vector<1x1x1x15x8xf32>
    %761 = vector.shape_cast %760 : vector<1x1x1x15x8xf32> to vector<15x8xf32>
    %c4_1074 = arith.constant 4 : index
    %c0_1075 = arith.constant 0 : index
    %c0_1076 = arith.constant 0 : index
    %762 = vector.load %arg2[%c4_1074, %c0_1075, %c0_1076] : memref<9x8x8xf32, #tpu.memory_space<vmem>>, vector<1x8x8xf32>
    %763 = vector.shape_cast %762 : vector<1x8x8xf32> to vector<8x8xf32>
    %cst_1077 = arith.constant dense<0.000000e+00> : vector<15x8xf32>
    %764 = tpu.matmul %761, %763, %cst_1077 {dimension_numbers = #tpu.dot_dimension_numbers<[1], [0], [0], [1], [0, 0, 1, 1], [], []>} : vector<15x8xf32>, vector<8x8xf32>, vector<15x8xf32> -> vector<15x8xf32>
    %765 = arith.addf %759, %764 : vector<15x8xf32>
    %c0_1078 = arith.constant 0 : index
    %c2_1079 = arith.constant 2 : index
    %c12_1080 = arith.constant 12 : index
    %c1_1081 = arith.constant 1 : index
    %c0_1082 = arith.constant 0 : index
    %766 = vector.load %arg1[%c0_1078, %c2_1079, %c12_1080, %c1_1081, %c0_1082] : memref<1x4x16x16x8xf32, #tpu.memory_space<vmem>>, vector<1x1x1x15x8xf32>
    %767 = vector.shape_cast %766 : vector<1x1x1x15x8xf32> to vector<15x8xf32>
    %c5_1083 = arith.constant 5 : index
    %c0_1084 = arith.constant 0 : index
    %c0_1085 = arith.constant 0 : index
    %768 = vector.load %arg2[%c5_1083, %c0_1084, %c0_1085] : memref<9x8x8xf32, #tpu.memory_space<vmem>>, vector<1x8x8xf32>
    %769 = vector.shape_cast %768 : vector<1x8x8xf32> to vector<8x8xf32>
    %cst_1086 = arith.constant dense<0.000000e+00> : vector<15x8xf32>
    %770 = tpu.matmul %767, %769, %cst_1086 {dimension_numbers = #tpu.dot_dimension_numbers<[1], [0], [0], [1], [0, 0, 1, 1], [], []>} : vector<15x8xf32>, vector<8x8xf32>, vector<15x8xf32> -> vector<15x8xf32>
    %771 = arith.addf %765, %770 : vector<15x8xf32>
    %c0_1087 = arith.constant 0 : index
    %c0_1088 = arith.constant 0 : index
    %c13 = arith.constant 13 : index
    %c0_1089 = arith.constant 0 : index
    %c0_1090 = arith.constant 0 : index
    %772 = vector.load %arg1[%c0_1087, %c0_1088, %c13, %c0_1089, %c0_1090] : memref<1x4x16x16x8xf32, #tpu.memory_space<vmem>>, vector<1x1x1x15x8xf32>
    %773 = vector.shape_cast %772 : vector<1x1x1x15x8xf32> to vector<15x8xf32>
    %c6_1091 = arith.constant 6 : index
    %c0_1092 = arith.constant 0 : index
    %c0_1093 = arith.constant 0 : index
    %774 = vector.load %arg2[%c6_1091, %c0_1092, %c0_1093] : memref<9x8x8xf32, #tpu.memory_space<vmem>>, vector<1x8x8xf32>
    %775 = vector.shape_cast %774 : vector<1x8x8xf32> to vector<8x8xf32>
    %cst_1094 = arith.constant dense<0.000000e+00> : vector<15x8xf32>
    %776 = tpu.matmul %773, %775, %cst_1094 {dimension_numbers = #tpu.dot_dimension_numbers<[1], [0], [0], [1], [0, 0, 1, 1], [], []>} : vector<15x8xf32>, vector<8x8xf32>, vector<15x8xf32> -> vector<15x8xf32>
    %777 = arith.addf %771, %776 : vector<15x8xf32>
    %c0_1095 = arith.constant 0 : index
    %c1_1096 = arith.constant 1 : index
    %c13_1097 = arith.constant 13 : index
    %c0_1098 = arith.constant 0 : index
    %c0_1099 = arith.constant 0 : index
    %778 = vector.load %arg1[%c0_1095, %c1_1096, %c13_1097, %c0_1098, %c0_1099] : memref<1x4x16x16x8xf32, #tpu.memory_space<vmem>>, vector<1x1x1x15x8xf32>
    %779 = vector.shape_cast %778 : vector<1x1x1x15x8xf32> to vector<15x8xf32>
    %c7_1100 = arith.constant 7 : index
    %c0_1101 = arith.constant 0 : index
    %c0_1102 = arith.constant 0 : index
    %780 = vector.load %arg2[%c7_1100, %c0_1101, %c0_1102] : memref<9x8x8xf32, #tpu.memory_space<vmem>>, vector<1x8x8xf32>
    %781 = vector.shape_cast %780 : vector<1x8x8xf32> to vector<8x8xf32>
    %cst_1103 = arith.constant dense<0.000000e+00> : vector<15x8xf32>
    %782 = tpu.matmul %779, %781, %cst_1103 {dimension_numbers = #tpu.dot_dimension_numbers<[1], [0], [0], [1], [0, 0, 1, 1], [], []>} : vector<15x8xf32>, vector<8x8xf32>, vector<15x8xf32> -> vector<15x8xf32>
    %783 = arith.addf %777, %782 : vector<15x8xf32>
    %c0_1104 = arith.constant 0 : index
    %c0_1105 = arith.constant 0 : index
    %c13_1106 = arith.constant 13 : index
    %c1_1107 = arith.constant 1 : index
    %c0_1108 = arith.constant 0 : index
    %784 = vector.load %arg1[%c0_1104, %c0_1105, %c13_1106, %c1_1107, %c0_1108] : memref<1x4x16x16x8xf32, #tpu.memory_space<vmem>>, vector<1x1x1x15x8xf32>
    %785 = vector.shape_cast %784 : vector<1x1x1x15x8xf32> to vector<15x8xf32>
    %c8_1109 = arith.constant 8 : index
    %c0_1110 = arith.constant 0 : index
    %c0_1111 = arith.constant 0 : index
    %786 = vector.load %arg2[%c8_1109, %c0_1110, %c0_1111] : memref<9x8x8xf32, #tpu.memory_space<vmem>>, vector<1x8x8xf32>
    %787 = vector.shape_cast %786 : vector<1x8x8xf32> to vector<8x8xf32>
    %cst_1112 = arith.constant dense<0.000000e+00> : vector<15x8xf32>
    %788 = tpu.matmul %785, %787, %cst_1112 {dimension_numbers = #tpu.dot_dimension_numbers<[1], [0], [0], [1], [0, 0, 1, 1], [], []>} : vector<15x8xf32>, vector<8x8xf32>, vector<15x8xf32> -> vector<15x8xf32>
    %789 = arith.addf %783, %788 : vector<15x8xf32>
    %c12_1113 = arith.constant 12 : index
    %c0_1114 = arith.constant 0 : index
    %c0_1115 = arith.constant 0 : index
    %790 = vector.load %arg8[%c12_1113, %c0_1114, %c0_1115] : memref<15x15x8xf32, #tpu.memory_space<vmem>>, vector<1x15x8xf32>
    %791 = vector.shape_cast %790 : vector<1x15x8xf32> to vector<15x8xf32>
    %792 = vector.shape_cast %789 : vector<15x8xf32> to vector<1x15x8xf32>
    tpu.vector_store %arg8[%c12_1113, %c0_1114, %c0_1115], %792 {strides = array<i32>} : memref<15x15x8xf32, #tpu.memory_space<vmem>>, vector<1x15x8xf32>,
    %cst_1116 = arith.constant 0.000000e+00 : f32
    %793 = vector.broadcast %cst_1116 : f32 to vector<15x8xf32>
    %c0_1117 = arith.constant 0 : index
    %c0_1118 = arith.constant 0 : index
    %794 = vector.load %arg3[%c0_1117, %c0_1118] : memref<1x8xf32, #tpu.memory_space<vmem>>, vector<1x8xf32>
    %795 = vector.broadcast %794 : vector<1x8xf32> to vector<15x8xf32>
    %796 = arith.addf %793, %795 : vector<15x8xf32>
    %c0_1119 = arith.constant 0 : index
    %c0_1120 = arith.constant 0 : index
    %c13_1121 = arith.constant 13 : index
    %c0_1122 = arith.constant 0 : index
    %c0_1123 = arith.constant 0 : index
    %797 = vector.load %arg1[%c0_1119, %c0_1120, %c13_1121, %c0_1122, %c0_1123] : memref<1x4x16x16x8xf32, #tpu.memory_space<vmem>>, vector<1x1x1x15x8xf32>
    %798 = vector.shape_cast %797 : vector<1x1x1x15x8xf32> to vector<15x8xf32>
    %c0_1124 = arith.constant 0 : index
    %c0_1125 = arith.constant 0 : index
    %c0_1126 = arith.constant 0 : index
    %799 = vector.load %arg2[%c0_1124, %c0_1125, %c0_1126] : memref<9x8x8xf32, #tpu.memory_space<vmem>>, vector<1x8x8xf32>
    %800 = vector.shape_cast %799 : vector<1x8x8xf32> to vector<8x8xf32>
    %cst_1127 = arith.constant dense<0.000000e+00> : vector<15x8xf32>
    %801 = tpu.matmul %798, %800, %cst_1127 {dimension_numbers = #tpu.dot_dimension_numbers<[1], [0], [0], [1], [0, 0, 1, 1], [], []>} : vector<15x8xf32>, vector<8x8xf32>, vector<15x8xf32> -> vector<15x8xf32>
    %802 = arith.addf %796, %801 : vector<15x8xf32>
    %c0_1128 = arith.constant 0 : index
    %c1_1129 = arith.constant 1 : index
    %c13_1130 = arith.constant 13 : index
    %c0_1131 = arith.constant 0 : index
    %c0_1132 = arith.constant 0 : index
    %803 = vector.load %arg1[%c0_1128, %c1_1129, %c13_1130, %c0_1131, %c0_1132] : memref<1x4x16x16x8xf32, #tpu.memory_space<vmem>>, vector<1x1x1x15x8xf32>
    %804 = vector.shape_cast %803 : vector<1x1x1x15x8xf32> to vector<15x8xf32>
    %c1_1133 = arith.constant 1 : index
    %c0_1134 = arith.constant 0 : index
    %c0_1135 = arith.constant 0 : index
    %805 = vector.load %arg2[%c1_1133, %c0_1134, %c0_1135] : memref<9x8x8xf32, #tpu.memory_space<vmem>>, vector<1x8x8xf32>
    %806 = vector.shape_cast %805 : vector<1x8x8xf32> to vector<8x8xf32>
    %cst_1136 = arith.constant dense<0.000000e+00> : vector<15x8xf32>
    %807 = tpu.matmul %804, %806, %cst_1136 {dimension_numbers = #tpu.dot_dimension_numbers<[1], [0], [0], [1], [0, 0, 1, 1], [], []>} : vector<15x8xf32>, vector<8x8xf32>, vector<15x8xf32> -> vector<15x8xf32>
    %808 = arith.addf %802, %807 : vector<15x8xf32>
    %c0_1137 = arith.constant 0 : index
    %c0_1138 = arith.constant 0 : index
    %c13_1139 = arith.constant 13 : index
    %c1_1140 = arith.constant 1 : index
    %c0_1141 = arith.constant 0 : index
    %809 = vector.load %arg1[%c0_1137, %c0_1138, %c13_1139, %c1_1140, %c0_1141] : memref<1x4x16x16x8xf32, #tpu.memory_space<vmem>>, vector<1x1x1x15x8xf32>
    %810 = vector.shape_cast %809 : vector<1x1x1x15x8xf32> to vector<15x8xf32>
    %c2_1142 = arith.constant 2 : index
    %c0_1143 = arith.constant 0 : index
    %c0_1144 = arith.constant 0 : index
    %811 = vector.load %arg2[%c2_1142, %c0_1143, %c0_1144] : memref<9x8x8xf32, #tpu.memory_space<vmem>>, vector<1x8x8xf32>
    %812 = vector.shape_cast %811 : vector<1x8x8xf32> to vector<8x8xf32>
    %cst_1145 = arith.constant dense<0.000000e+00> : vector<15x8xf32>
    %813 = tpu.matmul %810, %812, %cst_1145 {dimension_numbers = #tpu.dot_dimension_numbers<[1], [0], [0], [1], [0, 0, 1, 1], [], []>} : vector<15x8xf32>, vector<8x8xf32>, vector<15x8xf32> -> vector<15x8xf32>
    %814 = arith.addf %808, %813 : vector<15x8xf32>
    %c0_1146 = arith.constant 0 : index
    %c2_1147 = arith.constant 2 : index
    %c13_1148 = arith.constant 13 : index
    %c0_1149 = arith.constant 0 : index
    %c0_1150 = arith.constant 0 : index
    %815 = vector.load %arg1[%c0_1146, %c2_1147, %c13_1148, %c0_1149, %c0_1150] : memref<1x4x16x16x8xf32, #tpu.memory_space<vmem>>, vector<1x1x1x15x8xf32>
    %816 = vector.shape_cast %815 : vector<1x1x1x15x8xf32> to vector<15x8xf32>
    %c3_1151 = arith.constant 3 : index
    %c0_1152 = arith.constant 0 : index
    %c0_1153 = arith.constant 0 : index
    %817 = vector.load %arg2[%c3_1151, %c0_1152, %c0_1153] : memref<9x8x8xf32, #tpu.memory_space<vmem>>, vector<1x8x8xf32>
    %818 = vector.shape_cast %817 : vector<1x8x8xf32> to vector<8x8xf32>
    %cst_1154 = arith.constant dense<0.000000e+00> : vector<15x8xf32>
    %819 = tpu.matmul %816, %818, %cst_1154 {dimension_numbers = #tpu.dot_dimension_numbers<[1], [0], [0], [1], [0, 0, 1, 1], [], []>} : vector<15x8xf32>, vector<8x8xf32>, vector<15x8xf32> -> vector<15x8xf32>
    %820 = arith.addf %814, %819 : vector<15x8xf32>
    %c0_1155 = arith.constant 0 : index
    %c3_1156 = arith.constant 3 : index
    %c13_1157 = arith.constant 13 : index
    %c0_1158 = arith.constant 0 : index
    %c0_1159 = arith.constant 0 : index
    %821 = vector.load %arg1[%c0_1155, %c3_1156, %c13_1157, %c0_1158, %c0_1159] : memref<1x4x16x16x8xf32, #tpu.memory_space<vmem>>, vector<1x1x1x15x8xf32>
    %822 = vector.shape_cast %821 : vector<1x1x1x15x8xf32> to vector<15x8xf32>
    %c4_1160 = arith.constant 4 : index
    %c0_1161 = arith.constant 0 : index
    %c0_1162 = arith.constant 0 : index
    %823 = vector.load %arg2[%c4_1160, %c0_1161, %c0_1162] : memref<9x8x8xf32, #tpu.memory_space<vmem>>, vector<1x8x8xf32>
    %824 = vector.shape_cast %823 : vector<1x8x8xf32> to vector<8x8xf32>
    %cst_1163 = arith.constant dense<0.000000e+00> : vector<15x8xf32>
    %825 = tpu.matmul %822, %824, %cst_1163 {dimension_numbers = #tpu.dot_dimension_numbers<[1], [0], [0], [1], [0, 0, 1, 1], [], []>} : vector<15x8xf32>, vector<8x8xf32>, vector<15x8xf32> -> vector<15x8xf32>
    %826 = arith.addf %820, %825 : vector<15x8xf32>
    %c0_1164 = arith.constant 0 : index
    %c2_1165 = arith.constant 2 : index
    %c13_1166 = arith.constant 13 : index
    %c1_1167 = arith.constant 1 : index
    %c0_1168 = arith.constant 0 : index
    %827 = vector.load %arg1[%c0_1164, %c2_1165, %c13_1166, %c1_1167, %c0_1168] : memref<1x4x16x16x8xf32, #tpu.memory_space<vmem>>, vector<1x1x1x15x8xf32>
    %828 = vector.shape_cast %827 : vector<1x1x1x15x8xf32> to vector<15x8xf32>
    %c5_1169 = arith.constant 5 : index
    %c0_1170 = arith.constant 0 : index
    %c0_1171 = arith.constant 0 : index
    %829 = vector.load %arg2[%c5_1169, %c0_1170, %c0_1171] : memref<9x8x8xf32, #tpu.memory_space<vmem>>, vector<1x8x8xf32>
    %830 = vector.shape_cast %829 : vector<1x8x8xf32> to vector<8x8xf32>
    %cst_1172 = arith.constant dense<0.000000e+00> : vector<15x8xf32>
    %831 = tpu.matmul %828, %830, %cst_1172 {dimension_numbers = #tpu.dot_dimension_numbers<[1], [0], [0], [1], [0, 0, 1, 1], [], []>} : vector<15x8xf32>, vector<8x8xf32>, vector<15x8xf32> -> vector<15x8xf32>
    %832 = arith.addf %826, %831 : vector<15x8xf32>
    %c0_1173 = arith.constant 0 : index
    %c0_1174 = arith.constant 0 : index
    %c14 = arith.constant 14 : index
    %c0_1175 = arith.constant 0 : index
    %c0_1176 = arith.constant 0 : index
    %833 = vector.load %arg1[%c0_1173, %c0_1174, %c14, %c0_1175, %c0_1176] : memref<1x4x16x16x8xf32, #tpu.memory_space<vmem>>, vector<1x1x1x15x8xf32>
    %834 = vector.shape_cast %833 : vector<1x1x1x15x8xf32> to vector<15x8xf32>
    %c6_1177 = arith.constant 6 : index
    %c0_1178 = arith.constant 0 : index
    %c0_1179 = arith.constant 0 : index
    %835 = vector.load %arg2[%c6_1177, %c0_1178, %c0_1179] : memref<9x8x8xf32, #tpu.memory_space<vmem>>, vector<1x8x8xf32>
    %836 = vector.shape_cast %835 : vector<1x8x8xf32> to vector<8x8xf32>
    %cst_1180 = arith.constant dense<0.000000e+00> : vector<15x8xf32>
    %837 = tpu.matmul %834, %836, %cst_1180 {dimension_numbers = #tpu.dot_dimension_numbers<[1], [0], [0], [1], [0, 0, 1, 1], [], []>} : vector<15x8xf32>, vector<8x8xf32>, vector<15x8xf32> -> vector<15x8xf32>
    %838 = arith.addf %832, %837 : vector<15x8xf32>
    %c0_1181 = arith.constant 0 : index
    %c1_1182 = arith.constant 1 : index
    %c14_1183 = arith.constant 14 : index
    %c0_1184 = arith.constant 0 : index
    %c0_1185 = arith.constant 0 : index
    %839 = vector.load %arg1[%c0_1181, %c1_1182, %c14_1183, %c0_1184, %c0_1185] : memref<1x4x16x16x8xf32, #tpu.memory_space<vmem>>, vector<1x1x1x15x8xf32>
    %840 = vector.shape_cast %839 : vector<1x1x1x15x8xf32> to vector<15x8xf32>
    %c7_1186 = arith.constant 7 : index
    %c0_1187 = arith.constant 0 : index
    %c0_1188 = arith.constant 0 : index
    %841 = vector.load %arg2[%c7_1186, %c0_1187, %c0_1188] : memref<9x8x8xf32, #tpu.memory_space<vmem>>, vector<1x8x8xf32>
    %842 = vector.shape_cast %841 : vector<1x8x8xf32> to vector<8x8xf32>
    %cst_1189 = arith.constant dense<0.000000e+00> : vector<15x8xf32>
    %843 = tpu.matmul %840, %842, %cst_1189 {dimension_numbers = #tpu.dot_dimension_numbers<[1], [0], [0], [1], [0, 0, 1, 1], [], []>} : vector<15x8xf32>, vector<8x8xf32>, vector<15x8xf32> -> vector<15x8xf32>
    %844 = arith.addf %838, %843 : vector<15x8xf32>
    %c0_1190 = arith.constant 0 : index
    %c0_1191 = arith.constant 0 : index
    %c14_1192 = arith.constant 14 : index
    %c1_1193 = arith.constant 1 : index
    %c0_1194 = arith.constant 0 : index
    %845 = vector.load %arg1[%c0_1190, %c0_1191, %c14_1192, %c1_1193, %c0_1194] : memref<1x4x16x16x8xf32, #tpu.memory_space<vmem>>, vector<1x1x1x15x8xf32>
    %846 = vector.shape_cast %845 : vector<1x1x1x15x8xf32> to vector<15x8xf32>
    %c8_1195 = arith.constant 8 : index
    %c0_1196 = arith.constant 0 : index
    %c0_1197 = arith.constant 0 : index
    %847 = vector.load %arg2[%c8_1195, %c0_1196, %c0_1197] : memref<9x8x8xf32, #tpu.memory_space<vmem>>, vector<1x8x8xf32>
    %848 = vector.shape_cast %847 : vector<1x8x8xf32> to vector<8x8xf32>
    %cst_1198 = arith.constant dense<0.000000e+00> : vector<15x8xf32>
    %849 = tpu.matmul %846, %848, %cst_1198 {dimension_numbers = #tpu.dot_dimension_numbers<[1], [0], [0], [1], [0, 0, 1, 1], [], []>} : vector<15x8xf32>, vector<8x8xf32>, vector<15x8xf32> -> vector<15x8xf32>
    %850 = arith.addf %844, %849 : vector<15x8xf32>
    %c13_1199 = arith.constant 13 : index
    %c0_1200 = arith.constant 0 : index
    %c0_1201 = arith.constant 0 : index
    %851 = vector.load %arg8[%c13_1199, %c0_1200, %c0_1201] : memref<15x15x8xf32, #tpu.memory_space<vmem>>, vector<1x15x8xf32>
    %852 = vector.shape_cast %851 : vector<1x15x8xf32> to vector<15x8xf32>
    %853 = vector.shape_cast %850 : vector<15x8xf32> to vector<1x15x8xf32>
    tpu.vector_store %arg8[%c13_1199, %c0_1200, %c0_1201], %853 {strides = array<i32>} : memref<15x15x8xf32, #tpu.memory_space<vmem>>, vector<1x15x8xf32>,
    %cst_1202 = arith.constant 0.000000e+00 : f32
    %854 = vector.broadcast %cst_1202 : f32 to vector<15x8xf32>
    %c0_1203 = arith.constant 0 : index
    %c0_1204 = arith.constant 0 : index
    %855 = vector.load %arg3[%c0_1203, %c0_1204] : memref<1x8xf32, #tpu.memory_space<vmem>>, vector<1x8xf32>
    %856 = vector.broadcast %855 : vector<1x8xf32> to vector<15x8xf32>
    %857 = arith.addf %854, %856 : vector<15x8xf32>
    %c0_1205 = arith.constant 0 : index
    %c0_1206 = arith.constant 0 : index
    %c14_1207 = arith.constant 14 : index
    %c0_1208 = arith.constant 0 : index
    %c0_1209 = arith.constant 0 : index
    %858 = vector.load %arg1[%c0_1205, %c0_1206, %c14_1207, %c0_1208, %c0_1209] : memref<1x4x16x16x8xf32, #tpu.memory_space<vmem>>, vector<1x1x1x15x8xf32>
    %859 = vector.shape_cast %858 : vector<1x1x1x15x8xf32> to vector<15x8xf32>
    %c0_1210 = arith.constant 0 : index
    %c0_1211 = arith.constant 0 : index
    %c0_1212 = arith.constant 0 : index
    %860 = vector.load %arg2[%c0_1210, %c0_1211, %c0_1212] : memref<9x8x8xf32, #tpu.memory_space<vmem>>, vector<1x8x8xf32>
    %861 = vector.shape_cast %860 : vector<1x8x8xf32> to vector<8x8xf32>
    %cst_1213 = arith.constant dense<0.000000e+00> : vector<15x8xf32>
    %862 = tpu.matmul %859, %861, %cst_1213 {dimension_numbers = #tpu.dot_dimension_numbers<[1], [0], [0], [1], [0, 0, 1, 1], [], []>} : vector<15x8xf32>, vector<8x8xf32>, vector<15x8xf32> -> vector<15x8xf32>
    %863 = arith.addf %857, %862 : vector<15x8xf32>
    %c0_1214 = arith.constant 0 : index
    %c1_1215 = arith.constant 1 : index
    %c14_1216 = arith.constant 14 : index
    %c0_1217 = arith.constant 0 : index
    %c0_1218 = arith.constant 0 : index
    %864 = vector.load %arg1[%c0_1214, %c1_1215, %c14_1216, %c0_1217, %c0_1218] : memref<1x4x16x16x8xf32, #tpu.memory_space<vmem>>, vector<1x1x1x15x8xf32>
    %865 = vector.shape_cast %864 : vector<1x1x1x15x8xf32> to vector<15x8xf32>
    %c1_1219 = arith.constant 1 : index
    %c0_1220 = arith.constant 0 : index
    %c0_1221 = arith.constant 0 : index
    %866 = vector.load %arg2[%c1_1219, %c0_1220, %c0_1221] : memref<9x8x8xf32, #tpu.memory_space<vmem>>, vector<1x8x8xf32>
    %867 = vector.shape_cast %866 : vector<1x8x8xf32> to vector<8x8xf32>
    %cst_1222 = arith.constant dense<0.000000e+00> : vector<15x8xf32>
    %868 = tpu.matmul %865, %867, %cst_1222 {dimension_numbers = #tpu.dot_dimension_numbers<[1], [0], [0], [1], [0, 0, 1, 1], [], []>} : vector<15x8xf32>, vector<8x8xf32>, vector<15x8xf32> -> vector<15x8xf32>
    %869 = arith.addf %863, %868 : vector<15x8xf32>
    %c0_1223 = arith.constant 0 : index
    %c0_1224 = arith.constant 0 : index
    %c14_1225 = arith.constant 14 : index
    %c1_1226 = arith.constant 1 : index
    %c0_1227 = arith.constant 0 : index
    %870 = vector.load %arg1[%c0_1223, %c0_1224, %c14_1225, %c1_1226, %c0_1227] : memref<1x4x16x16x8xf32, #tpu.memory_space<vmem>>, vector<1x1x1x15x8xf32>
    %871 = vector.shape_cast %870 : vector<1x1x1x15x8xf32> to vector<15x8xf32>
    %c2_1228 = arith.constant 2 : index
    %c0_1229 = arith.constant 0 : index
    %c0_1230 = arith.constant 0 : index
    %872 = vector.load %arg2[%c2_1228, %c0_1229, %c0_1230] : memref<9x8x8xf32, #tpu.memory_space<vmem>>, vector<1x8x8xf32>
    %873 = vector.shape_cast %872 : vector<1x8x8xf32> to vector<8x8xf32>
    %cst_1231 = arith.constant dense<0.000000e+00> : vector<15x8xf32>
    %874 = tpu.matmul %871, %873, %cst_1231 {dimension_numbers = #tpu.dot_dimension_numbers<[1], [0], [0], [1], [0, 0, 1, 1], [], []>} : vector<15x8xf32>, vector<8x8xf32>, vector<15x8xf32> -> vector<15x8xf32>
    %875 = arith.addf %869, %874 : vector<15x8xf32>
    %c0_1232 = arith.constant 0 : index
    %c2_1233 = arith.constant 2 : index
    %c14_1234 = arith.constant 14 : index
    %c0_1235 = arith.constant 0 : index
    %c0_1236 = arith.constant 0 : index
    %876 = vector.load %arg1[%c0_1232, %c2_1233, %c14_1234, %c0_1235, %c0_1236] : memref<1x4x16x16x8xf32, #tpu.memory_space<vmem>>, vector<1x1x1x15x8xf32>
    %877 = vector.shape_cast %876 : vector<1x1x1x15x8xf32> to vector<15x8xf32>
    %c3_1237 = arith.constant 3 : index
    %c0_1238 = arith.constant 0 : index
    %c0_1239 = arith.constant 0 : index
    %878 = vector.load %arg2[%c3_1237, %c0_1238, %c0_1239] : memref<9x8x8xf32, #tpu.memory_space<vmem>>, vector<1x8x8xf32>
    %879 = vector.shape_cast %878 : vector<1x8x8xf32> to vector<8x8xf32>
    %cst_1240 = arith.constant dense<0.000000e+00> : vector<15x8xf32>
    %880 = tpu.matmul %877, %879, %cst_1240 {dimension_numbers = #tpu.dot_dimension_numbers<[1], [0], [0], [1], [0, 0, 1, 1], [], []>} : vector<15x8xf32>, vector<8x8xf32>, vector<15x8xf32> -> vector<15x8xf32>
    %881 = arith.addf %875, %880 : vector<15x8xf32>
    %c0_1241 = arith.constant 0 : index
    %c3_1242 = arith.constant 3 : index
    %c14_1243 = arith.constant 14 : index
    %c0_1244 = arith.constant 0 : index
    %c0_1245 = arith.constant 0 : index
    %882 = vector.load %arg1[%c0_1241, %c3_1242, %c14_1243, %c0_1244, %c0_1245] : memref<1x4x16x16x8xf32, #tpu.memory_space<vmem>>, vector<1x1x1x15x8xf32>
    %883 = vector.shape_cast %882 : vector<1x1x1x15x8xf32> to vector<15x8xf32>
    %c4_1246 = arith.constant 4 : index
    %c0_1247 = arith.constant 0 : index
    %c0_1248 = arith.constant 0 : index
    %884 = vector.load %arg2[%c4_1246, %c0_1247, %c0_1248] : memref<9x8x8xf32, #tpu.memory_space<vmem>>, vector<1x8x8xf32>
    %885 = vector.shape_cast %884 : vector<1x8x8xf32> to vector<8x8xf32>
    %cst_1249 = arith.constant dense<0.000000e+00> : vector<15x8xf32>
    %886 = tpu.matmul %883, %885, %cst_1249 {dimension_numbers = #tpu.dot_dimension_numbers<[1], [0], [0], [1], [0, 0, 1, 1], [], []>} : vector<15x8xf32>, vector<8x8xf32>, vector<15x8xf32> -> vector<15x8xf32>
    %887 = arith.addf %881, %886 : vector<15x8xf32>
    %c0_1250 = arith.constant 0 : index
    %c2_1251 = arith.constant 2 : index
    %c14_1252 = arith.constant 14 : index
    %c1_1253 = arith.constant 1 : index
    %c0_1254 = arith.constant 0 : index
    %888 = vector.load %arg1[%c0_1250, %c2_1251, %c14_1252, %c1_1253, %c0_1254] : memref<1x4x16x16x8xf32, #tpu.memory_space<vmem>>, vector<1x1x1x15x8xf32>
    %889 = vector.shape_cast %888 : vector<1x1x1x15x8xf32> to vector<15x8xf32>
    %c5_1255 = arith.constant 5 : index
    %c0_1256 = arith.constant 0 : index
    %c0_1257 = arith.constant 0 : index
    %890 = vector.load %arg2[%c5_1255, %c0_1256, %c0_1257] : memref<9x8x8xf32, #tpu.memory_space<vmem>>, vector<1x8x8xf32>
    %891 = vector.shape_cast %890 : vector<1x8x8xf32> to vector<8x8xf32>
    %cst_1258 = arith.constant dense<0.000000e+00> : vector<15x8xf32>
    %892 = tpu.matmul %889, %891, %cst_1258 {dimension_numbers = #tpu.dot_dimension_numbers<[1], [0], [0], [1], [0, 0, 1, 1], [], []>} : vector<15x8xf32>, vector<8x8xf32>, vector<15x8xf32> -> vector<15x8xf32>
    %893 = arith.addf %887, %892 : vector<15x8xf32>
    %c0_1259 = arith.constant 0 : index
    %c0_1260 = arith.constant 0 : index
    %c15 = arith.constant 15 : index
    %c0_1261 = arith.constant 0 : index
    %c0_1262 = arith.constant 0 : index
    %894 = vector.load %arg1[%c0_1259, %c0_1260, %c15, %c0_1261, %c0_1262] : memref<1x4x16x16x8xf32, #tpu.memory_space<vmem>>, vector<1x1x1x15x8xf32>
    %895 = vector.shape_cast %894 : vector<1x1x1x15x8xf32> to vector<15x8xf32>
    %c6_1263 = arith.constant 6 : index
    %c0_1264 = arith.constant 0 : index
    %c0_1265 = arith.constant 0 : index
    %896 = vector.load %arg2[%c6_1263, %c0_1264, %c0_1265] : memref<9x8x8xf32, #tpu.memory_space<vmem>>, vector<1x8x8xf32>
    %897 = vector.shape_cast %896 : vector<1x8x8xf32> to vector<8x8xf32>
    %cst_1266 = arith.constant dense<0.000000e+00> : vector<15x8xf32>
    %898 = tpu.matmul %895, %897, %cst_1266 {dimension_numbers = #tpu.dot_dimension_numbers<[1], [0], [0], [1], [0, 0, 1, 1], [], []>} : vector<15x8xf32>, vector<8x8xf32>, vector<15x8xf32> -> vector<15x8xf32>
    %899 = arith.addf %893, %898 : vector<15x8xf32>
    %c0_1267 = arith.constant 0 : index
    %c1_1268 = arith.constant 1 : index
    %c15_1269 = arith.constant 15 : index
    %c0_1270 = arith.constant 0 : index
    %c0_1271 = arith.constant 0 : index
    %900 = vector.load %arg1[%c0_1267, %c1_1268, %c15_1269, %c0_1270, %c0_1271] : memref<1x4x16x16x8xf32, #tpu.memory_space<vmem>>, vector<1x1x1x15x8xf32>
    %901 = vector.shape_cast %900 : vector<1x1x1x15x8xf32> to vector<15x8xf32>
    %c7_1272 = arith.constant 7 : index
    %c0_1273 = arith.constant 0 : index
    %c0_1274 = arith.constant 0 : index
    %902 = vector.load %arg2[%c7_1272, %c0_1273, %c0_1274] : memref<9x8x8xf32, #tpu.memory_space<vmem>>, vector<1x8x8xf32>
    %903 = vector.shape_cast %902 : vector<1x8x8xf32> to vector<8x8xf32>
    %cst_1275 = arith.constant dense<0.000000e+00> : vector<15x8xf32>
    %904 = tpu.matmul %901, %903, %cst_1275 {dimension_numbers = #tpu.dot_dimension_numbers<[1], [0], [0], [1], [0, 0, 1, 1], [], []>} : vector<15x8xf32>, vector<8x8xf32>, vector<15x8xf32> -> vector<15x8xf32>
    %905 = arith.addf %899, %904 : vector<15x8xf32>
    %c0_1276 = arith.constant 0 : index
    %c0_1277 = arith.constant 0 : index
    %c15_1278 = arith.constant 15 : index
    %c1_1279 = arith.constant 1 : index
    %c0_1280 = arith.constant 0 : index
    %906 = vector.load %arg1[%c0_1276, %c0_1277, %c15_1278, %c1_1279, %c0_1280] : memref<1x4x16x16x8xf32, #tpu.memory_space<vmem>>, vector<1x1x1x15x8xf32>
    %907 = vector.shape_cast %906 : vector<1x1x1x15x8xf32> to vector<15x8xf32>
    %c8_1281 = arith.constant 8 : index
    %c0_1282 = arith.constant 0 : index
    %c0_1283 = arith.constant 0 : index
    %908 = vector.load %arg2[%c8_1281, %c0_1282, %c0_1283] : memref<9x8x8xf32, #tpu.memory_space<vmem>>, vector<1x8x8xf32>
    %909 = vector.shape_cast %908 : vector<1x8x8xf32> to vector<8x8xf32>
    %cst_1284 = arith.constant dense<0.000000e+00> : vector<15x8xf32>
    %910 = tpu.matmul %907, %909, %cst_1284 {dimension_numbers = #tpu.dot_dimension_numbers<[1], [0], [0], [1], [0, 0, 1, 1], [], []>} : vector<15x8xf32>, vector<8x8xf32>, vector<15x8xf32> -> vector<15x8xf32>
    %911 = arith.addf %905, %910 : vector<15x8xf32>
    %c14_1285 = arith.constant 14 : index
    %c0_1286 = arith.constant 0 : index
    %c0_1287 = arith.constant 0 : index
    %912 = vector.load %arg8[%c14_1285, %c0_1286, %c0_1287] : memref<15x15x8xf32, #tpu.memory_space<vmem>>, vector<1x15x8xf32>
    %913 = vector.shape_cast %912 : vector<1x15x8xf32> to vector<15x8xf32>
    %914 = vector.shape_cast %911 : vector<15x8xf32> to vector<1x15x8xf32>
    tpu.vector_store %arg8[%c14_1285, %c0_1286, %c0_1287], %914 {strides = array<i32>} : memref<15x15x8xf32, #tpu.memory_space<vmem>>, vector<1x15x8xf32>,
    %c0_1288 = arith.constant 0 : index
    %c0_1289 = arith.constant 0 : index
    %c0_1290 = arith.constant 0 : index
    %915 = vector.load %arg8[%c0_1288, %c0_1289, %c0_1290] : memref<15x15x8xf32, #tpu.memory_space<vmem>>, vector<15x7x8xf32>
    %cst_1291 = arith.constant dense<0xFF800000> : vector<15x8xf32>
    %916 = vector.multi_reduction <maximumf>, %915, %cst_1291 [1] : vector<15x7x8xf32> to vector<15x8xf32>
    %c0_1292 = arith.constant 0 : index
    %c0_1293 = arith.constant 0 : index
    %c0_1294 = arith.constant 0 : index
    %917 = vector.load %arg9[%c0_1292, %c0_1293, %c0_1294] : memref<3x15x8xf32, #tpu.memory_space<vmem>>, vector<1x15x8xf32>
    %918 = vector.shape_cast %917 : vector<1x15x8xf32> to vector<15x8xf32>
    %919 = vector.shape_cast %916 : vector<15x8xf32> to vector<1x15x8xf32>
    tpu.vector_store %arg9[%c0_1292, %c0_1293, %c0_1294], %919 {strides = array<i32>} : memref<3x15x8xf32, #tpu.memory_space<vmem>>, vector<1x15x8xf32>,
    %c0_1295 = arith.constant 0 : index
    %c3_1296 = arith.constant 3 : index
    %c0_1297 = arith.constant 0 : index
    %920 = vector.load %arg8[%c0_1295, %c3_1296, %c0_1297] : memref<15x15x8xf32, #tpu.memory_space<vmem>>, vector<15x7x8xf32>
    %cst_1298 = arith.constant dense<0xFF800000> : vector<15x8xf32>
    %921 = vector.multi_reduction <maximumf>, %920, %cst_1298 [1] : vector<15x7x8xf32> to vector<15x8xf32>
    %c1_1299 = arith.constant 1 : index
    %c0_1300 = arith.constant 0 : index
    %c0_1301 = arith.constant 0 : index
    %922 = vector.load %arg9[%c1_1299, %c0_1300, %c0_1301] : memref<3x15x8xf32, #tpu.memory_space<vmem>>, vector<1x15x8xf32>
    %923 = vector.shape_cast %922 : vector<1x15x8xf32> to vector<15x8xf32>
    %924 = vector.shape_cast %921 : vector<15x8xf32> to vector<1x15x8xf32>
    tpu.vector_store %arg9[%c1_1299, %c0_1300, %c0_1301], %924 {strides = array<i32>} : memref<3x15x8xf32, #tpu.memory_space<vmem>>, vector<1x15x8xf32>,
    %c0_1302 = arith.constant 0 : index
    %c6_1303 = arith.constant 6 : index
    %c0_1304 = arith.constant 0 : index
    %925 = vector.load %arg8[%c0_1302, %c6_1303, %c0_1304] : memref<15x15x8xf32, #tpu.memory_space<vmem>>, vector<15x7x8xf32>
    %cst_1305 = arith.constant dense<0xFF800000> : vector<15x8xf32>
    %926 = vector.multi_reduction <maximumf>, %925, %cst_1305 [1] : vector<15x7x8xf32> to vector<15x8xf32>
    %c2_1306 = arith.constant 2 : index
    %c0_1307 = arith.constant 0 : index
    %c0_1308 = arith.constant 0 : index
    %927 = vector.load %arg9[%c2_1306, %c0_1307, %c0_1308] : memref<3x15x8xf32, #tpu.memory_space<vmem>>, vector<1x15x8xf32>
    %928 = vector.shape_cast %927 : vector<1x15x8xf32> to vector<15x8xf32>
    %929 = vector.shape_cast %926 : vector<15x8xf32> to vector<1x15x8xf32>
    tpu.vector_store %arg9[%c2_1306, %c0_1307, %c0_1308], %929 {strides = array<i32>} : memref<3x15x8xf32, #tpu.memory_space<vmem>>, vector<1x15x8xf32>,
    %cst_1309 = arith.constant 0.000000e+00 : f32
    %930 = vector.broadcast %cst_1309 : f32 to vector<5x5x8xf32>
    %c0_1310 = arith.constant 0 : index
    %c0_1311 = arith.constant 0 : index
    %c0_1312 = arith.constant 0 : index
    %931 = vector.load %arg10[%c0_1310, %c0_1311, %c0_1312] : memref<5x5x8xf32, #tpu.memory_space<vmem>>, vector<5x5x8xf32>
    tpu.vector_store %arg10[%c0_1310, %c0_1311, %c0_1312], %930 {strides = array<i32>} : memref<5x5x8xf32, #tpu.memory_space<vmem>>, vector<5x5x8xf32>,
    %c0_1313 = arith.constant 0 : index
    %c0_1314 = arith.constant 0 : index
    %c0_1315 = arith.constant 0 : index
    %932 = vector.load %arg9[%c0_1313, %c0_1314, %c0_1315] : memref<3x15x8xf32, #tpu.memory_space<vmem>>, vector<3x7x8xf32>
    %cst_1316 = arith.constant dense<0xFF800000> : vector<3x8xf32>
    %933 = vector.multi_reduction <maximumf>, %932, %cst_1316 [1] : vector<3x7x8xf32> to vector<3x8xf32>
    %c1_1317 = arith.constant 1 : index
    %c1_1318 = arith.constant 1 : index
    %c0_1319 = arith.constant 0 : index
    %934 = vector.load %arg10[%c1_1317, %c1_1318, %c0_1319] : memref<5x5x8xf32, #tpu.memory_space<vmem>>, vector<1x3x8xf32>
    %935 = vector.shape_cast %934 : vector<1x3x8xf32> to vector<3x8xf32>
    %936 = vector.shape_cast %933 : vector<3x8xf32> to vector<1x3x8xf32>
    tpu.vector_store %arg10[%c1_1317, %c1_1318, %c0_1319], %936 {strides = array<i32>} : memref<5x5x8xf32, #tpu.memory_space<vmem>>, vector<1x3x8xf32>,
    %c0_1320 = arith.constant 0 : index
    %c3_1321 = arith.constant 3 : index
    %c0_1322 = arith.constant 0 : index
    %937 = vector.load %arg9[%c0_1320, %c3_1321, %c0_1322] : memref<3x15x8xf32, #tpu.memory_space<vmem>>, vector<3x7x8xf32>
    %cst_1323 = arith.constant dense<0xFF800000> : vector<3x8xf32>
    %938 = vector.multi_reduction <maximumf>, %937, %cst_1323 [1] : vector<3x7x8xf32> to vector<3x8xf32>
    %c2_1324 = arith.constant 2 : index
    %c1_1325 = arith.constant 1 : index
    %c0_1326 = arith.constant 0 : index
    %939 = vector.load %arg10[%c2_1324, %c1_1325, %c0_1326] : memref<5x5x8xf32, #tpu.memory_space<vmem>>, vector<1x3x8xf32>
    %940 = vector.shape_cast %939 : vector<1x3x8xf32> to vector<3x8xf32>
    %941 = vector.shape_cast %938 : vector<3x8xf32> to vector<1x3x8xf32>
    tpu.vector_store %arg10[%c2_1324, %c1_1325, %c0_1326], %941 {strides = array<i32>} : memref<5x5x8xf32, #tpu.memory_space<vmem>>, vector<1x3x8xf32>,
    %c0_1327 = arith.constant 0 : index
    %c6_1328 = arith.constant 6 : index
    %c0_1329 = arith.constant 0 : index
    %942 = vector.load %arg9[%c0_1327, %c6_1328, %c0_1329] : memref<3x15x8xf32, #tpu.memory_space<vmem>>, vector<3x7x8xf32>
    %cst_1330 = arith.constant dense<0xFF800000> : vector<3x8xf32>
    %943 = vector.multi_reduction <maximumf>, %942, %cst_1330 [1] : vector<3x7x8xf32> to vector<3x8xf32>
    %c3_1331 = arith.constant 3 : index
    %c1_1332 = arith.constant 1 : index
    %c0_1333 = arith.constant 0 : index
    %944 = vector.load %arg10[%c3_1331, %c1_1332, %c0_1333] : memref<5x5x8xf32, #tpu.memory_space<vmem>>, vector<1x3x8xf32>
    %945 = vector.shape_cast %944 : vector<1x3x8xf32> to vector<3x8xf32>
    %946 = vector.shape_cast %943 : vector<3x8xf32> to vector<1x3x8xf32>
    tpu.vector_store %arg10[%c3_1331, %c1_1332, %c0_1333], %946 {strides = array<i32>} : memref<5x5x8xf32, #tpu.memory_space<vmem>>, vector<1x3x8xf32>,
    %cst_1334 = arith.constant 0.000000e+00 : f32
    %947 = vector.broadcast %cst_1334 : f32 to vector<3x16xf32>
    %c0_1335 = arith.constant 0 : index
    %c0_1336 = arith.constant 0 : index
    %948 = vector.load %arg5[%c0_1335, %c0_1336] : memref<1x16xf32, #tpu.memory_space<vmem>>, vector<1x16xf32>
    %949 = vector.broadcast %948 : vector<1x16xf32> to vector<3x16xf32>
    %950 = arith.addf %947, %949 : vector<3x16xf32>
    %c0_1337 = arith.constant 0 : index
    %c0_1338 = arith.constant 0 : index
    %c0_1339 = arith.constant 0 : index
    %951 = vector.load %arg10[%c0_1337, %c0_1338, %c0_1339] : memref<5x5x8xf32, #tpu.memory_space<vmem>>, vector<1x3x8xf32>
    %952 = vector.shape_cast %951 : vector<1x3x8xf32> to vector<3x8xf32>
    %c0_1340 = arith.constant 0 : index
    %c0_1341 = arith.constant 0 : index
    %c0_1342 = arith.constant 0 : index
    %953 = vector.load %arg4[%c0_1340, %c0_1341, %c0_1342] : memref<9x8x16xf32, #tpu.memory_space<vmem>>, vector<1x8x16xf32>
    %954 = vector.shape_cast %953 : vector<1x8x16xf32> to vector<8x16xf32>
    %cst_1343 = arith.constant dense<0.000000e+00> : vector<3x16xf32>
    %955 = tpu.matmul %952, %954, %cst_1343 {dimension_numbers = #tpu.dot_dimension_numbers<[1], [0], [0], [1], [0, 0, 1, 1], [], []>} : vector<3x8xf32>, vector<8x16xf32>, vector<3x16xf32> -> vector<3x16xf32>
    %956 = arith.addf %950, %955 : vector<3x16xf32>
    %c0_1344 = arith.constant 0 : index
    %c1_1345 = arith.constant 1 : index
    %c0_1346 = arith.constant 0 : index
    %957 = vector.load %arg10[%c0_1344, %c1_1345, %c0_1346] : memref<5x5x8xf32, #tpu.memory_space<vmem>>, vector<1x3x8xf32>
    %958 = vector.shape_cast %957 : vector<1x3x8xf32> to vector<3x8xf32>
    %c1_1347 = arith.constant 1 : index
    %c0_1348 = arith.constant 0 : index
    %c0_1349 = arith.constant 0 : index
    %959 = vector.load %arg4[%c1_1347, %c0_1348, %c0_1349] : memref<9x8x16xf32, #tpu.memory_space<vmem>>, vector<1x8x16xf32>
    %960 = vector.shape_cast %959 : vector<1x8x16xf32> to vector<8x16xf32>
    %cst_1350 = arith.constant dense<0.000000e+00> : vector<3x16xf32>
    %961 = tpu.matmul %958, %960, %cst_1350 {dimension_numbers = #tpu.dot_dimension_numbers<[1], [0], [0], [1], [0, 0, 1, 1], [], []>} : vector<3x8xf32>, vector<8x16xf32>, vector<3x16xf32> -> vector<3x16xf32>
    %962 = arith.addf %956, %961 : vector<3x16xf32>
    %c0_1351 = arith.constant 0 : index
    %c2_1352 = arith.constant 2 : index
    %c0_1353 = arith.constant 0 : index
    %963 = vector.load %arg10[%c0_1351, %c2_1352, %c0_1353] : memref<5x5x8xf32, #tpu.memory_space<vmem>>, vector<1x3x8xf32>
    %964 = vector.shape_cast %963 : vector<1x3x8xf32> to vector<3x8xf32>
    %c2_1354 = arith.constant 2 : index
    %c0_1355 = arith.constant 0 : index
    %c0_1356 = arith.constant 0 : index
    %965 = vector.load %arg4[%c2_1354, %c0_1355, %c0_1356] : memref<9x8x16xf32, #tpu.memory_space<vmem>>, vector<1x8x16xf32>
    %966 = vector.shape_cast %965 : vector<1x8x16xf32> to vector<8x16xf32>
    %cst_1357 = arith.constant dense<0.000000e+00> : vector<3x16xf32>
    %967 = tpu.matmul %964, %966, %cst_1357 {dimension_numbers = #tpu.dot_dimension_numbers<[1], [0], [0], [1], [0, 0, 1, 1], [], []>} : vector<3x8xf32>, vector<8x16xf32>, vector<3x16xf32> -> vector<3x16xf32>
    %968 = arith.addf %962, %967 : vector<3x16xf32>
    %c1_1358 = arith.constant 1 : index
    %c0_1359 = arith.constant 0 : index
    %c0_1360 = arith.constant 0 : index
    %969 = vector.load %arg10[%c1_1358, %c0_1359, %c0_1360] : memref<5x5x8xf32, #tpu.memory_space<vmem>>, vector<1x3x8xf32>
    %970 = vector.shape_cast %969 : vector<1x3x8xf32> to vector<3x8xf32>
    %c3_1361 = arith.constant 3 : index
    %c0_1362 = arith.constant 0 : index
    %c0_1363 = arith.constant 0 : index
    %971 = vector.load %arg4[%c3_1361, %c0_1362, %c0_1363] : memref<9x8x16xf32, #tpu.memory_space<vmem>>, vector<1x8x16xf32>
    %972 = vector.shape_cast %971 : vector<1x8x16xf32> to vector<8x16xf32>
    %cst_1364 = arith.constant dense<0.000000e+00> : vector<3x16xf32>
    %973 = tpu.matmul %970, %972, %cst_1364 {dimension_numbers = #tpu.dot_dimension_numbers<[1], [0], [0], [1], [0, 0, 1, 1], [], []>} : vector<3x8xf32>, vector<8x16xf32>, vector<3x16xf32> -> vector<3x16xf32>
    %974 = arith.addf %968, %973 : vector<3x16xf32>
    %c1_1365 = arith.constant 1 : index
    %c1_1366 = arith.constant 1 : index
    %c0_1367 = arith.constant 0 : index
    %975 = vector.load %arg10[%c1_1365, %c1_1366, %c0_1367] : memref<5x5x8xf32, #tpu.memory_space<vmem>>, vector<1x3x8xf32>
    %976 = vector.shape_cast %975 : vector<1x3x8xf32> to vector<3x8xf32>
    %c4_1368 = arith.constant 4 : index
    %c0_1369 = arith.constant 0 : index
    %c0_1370 = arith.constant 0 : index
    %977 = vector.load %arg4[%c4_1368, %c0_1369, %c0_1370] : memref<9x8x16xf32, #tpu.memory_space<vmem>>, vector<1x8x16xf32>
    %978 = vector.shape_cast %977 : vector<1x8x16xf32> to vector<8x16xf32>
    %cst_1371 = arith.constant dense<0.000000e+00> : vector<3x16xf32>
    %979 = tpu.matmul %976, %978, %cst_1371 {dimension_numbers = #tpu.dot_dimension_numbers<[1], [0], [0], [1], [0, 0, 1, 1], [], []>} : vector<3x8xf32>, vector<8x16xf32>, vector<3x16xf32> -> vector<3x16xf32>
    %980 = arith.addf %974, %979 : vector<3x16xf32>
    %c1_1372 = arith.constant 1 : index
    %c2_1373 = arith.constant 2 : index
    %c0_1374 = arith.constant 0 : index
    %981 = vector.load %arg10[%c1_1372, %c2_1373, %c0_1374] : memref<5x5x8xf32, #tpu.memory_space<vmem>>, vector<1x3x8xf32>
    %982 = vector.shape_cast %981 : vector<1x3x8xf32> to vector<3x8xf32>
    %c5_1375 = arith.constant 5 : index
    %c0_1376 = arith.constant 0 : index
    %c0_1377 = arith.constant 0 : index
    %983 = vector.load %arg4[%c5_1375, %c0_1376, %c0_1377] : memref<9x8x16xf32, #tpu.memory_space<vmem>>, vector<1x8x16xf32>
    %984 = vector.shape_cast %983 : vector<1x8x16xf32> to vector<8x16xf32>
    %cst_1378 = arith.constant dense<0.000000e+00> : vector<3x16xf32>
    %985 = tpu.matmul %982, %984, %cst_1378 {dimension_numbers = #tpu.dot_dimension_numbers<[1], [0], [0], [1], [0, 0, 1, 1], [], []>} : vector<3x8xf32>, vector<8x16xf32>, vector<3x16xf32> -> vector<3x16xf32>
    %986 = arith.addf %980, %985 : vector<3x16xf32>
    %c2_1379 = arith.constant 2 : index
    %c0_1380 = arith.constant 0 : index
    %c0_1381 = arith.constant 0 : index
    %987 = vector.load %arg10[%c2_1379, %c0_1380, %c0_1381] : memref<5x5x8xf32, #tpu.memory_space<vmem>>, vector<1x3x8xf32>
    %988 = vector.shape_cast %987 : vector<1x3x8xf32> to vector<3x8xf32>
    %c6_1382 = arith.constant 6 : index
    %c0_1383 = arith.constant 0 : index
    %c0_1384 = arith.constant 0 : index
    %989 = vector.load %arg4[%c6_1382, %c0_1383, %c0_1384] : memref<9x8x16xf32, #tpu.memory_space<vmem>>, vector<1x8x16xf32>
    %990 = vector.shape_cast %989 : vector<1x8x16xf32> to vector<8x16xf32>
    %cst_1385 = arith.constant dense<0.000000e+00> : vector<3x16xf32>
    %991 = tpu.matmul %988, %990, %cst_1385 {dimension_numbers = #tpu.dot_dimension_numbers<[1], [0], [0], [1], [0, 0, 1, 1], [], []>} : vector<3x8xf32>, vector<8x16xf32>, vector<3x16xf32> -> vector<3x16xf32>
    %992 = arith.addf %986, %991 : vector<3x16xf32>
    %c2_1386 = arith.constant 2 : index
    %c1_1387 = arith.constant 1 : index
    %c0_1388 = arith.constant 0 : index
    %993 = vector.load %arg10[%c2_1386, %c1_1387, %c0_1388] : memref<5x5x8xf32, #tpu.memory_space<vmem>>, vector<1x3x8xf32>
    %994 = vector.shape_cast %993 : vector<1x3x8xf32> to vector<3x8xf32>
    %c7_1389 = arith.constant 7 : index
    %c0_1390 = arith.constant 0 : index
    %c0_1391 = arith.constant 0 : index
    %995 = vector.load %arg4[%c7_1389, %c0_1390, %c0_1391] : memref<9x8x16xf32, #tpu.memory_space<vmem>>, vector<1x8x16xf32>
    %996 = vector.shape_cast %995 : vector<1x8x16xf32> to vector<8x16xf32>
    %cst_1392 = arith.constant dense<0.000000e+00> : vector<3x16xf32>
    %997 = tpu.matmul %994, %996, %cst_1392 {dimension_numbers = #tpu.dot_dimension_numbers<[1], [0], [0], [1], [0, 0, 1, 1], [], []>} : vector<3x8xf32>, vector<8x16xf32>, vector<3x16xf32> -> vector<3x16xf32>
    %998 = arith.addf %992, %997 : vector<3x16xf32>
    %c2_1393 = arith.constant 2 : index
    %c2_1394 = arith.constant 2 : index
    %c0_1395 = arith.constant 0 : index
    %999 = vector.load %arg10[%c2_1393, %c2_1394, %c0_1395] : memref<5x5x8xf32, #tpu.memory_space<vmem>>, vector<1x3x8xf32>
    %1000 = vector.shape_cast %999 : vector<1x3x8xf32> to vector<3x8xf32>
    %c8_1396 = arith.constant 8 : index
    %c0_1397 = arith.constant 0 : index
    %c0_1398 = arith.constant 0 : index
    %1001 = vector.load %arg4[%c8_1396, %c0_1397, %c0_1398] : memref<9x8x16xf32, #tpu.memory_space<vmem>>, vector<1x8x16xf32>
    %1002 = vector.shape_cast %1001 : vector<1x8x16xf32> to vector<8x16xf32>
    %cst_1399 = arith.constant dense<0.000000e+00> : vector<3x16xf32>
    %1003 = tpu.matmul %1000, %1002, %cst_1399 {dimension_numbers = #tpu.dot_dimension_numbers<[1], [0], [0], [1], [0, 0, 1, 1], [], []>} : vector<3x8xf32>, vector<8x16xf32>, vector<3x16xf32> -> vector<3x16xf32>
    %1004 = arith.addf %998, %1003 : vector<3x16xf32>
    %c0_1400 = arith.constant 0 : index
    %c0_1401 = arith.constant 0 : index
    %1005 = vector.load %arg6[%c0_1400, %c0_1401] : memref<32x3xf32, #tpu.memory_space<vmem>>, vector<32x3xf32>
    %cst_1402 = arith.constant dense<0.000000e+00> : vector<32x16xf32>
    %1006 = tpu.matmul %1005, %1004, %cst_1402 {dimension_numbers = #tpu.dot_dimension_numbers<[1], [0], [0], [1], [0, 0, 1, 1], [], []>} : vector<32x3xf32>, vector<3x16xf32>, vector<32x16xf32> -> vector<32x16xf32>
    %c0_1403 = arith.constant 0 : index
    %c0_1404 = arith.constant 0 : index
    %c0_1405 = arith.constant 0 : index
    %c0_1406 = arith.constant 0 : index
    %1007 = vector.load %arg7[%c0_1403, %c0_1404, %c0_1405, %c0_1406] : memref<1x3x32x16xf32, #tpu.memory_space<vmem>>, vector<1x1x32x16xf32>
    %1008 = vector.shape_cast %1007 : vector<1x1x32x16xf32> to vector<32x16xf32>
    %1009 = vector.shape_cast %1006 : vector<32x16xf32> to vector<1x1x32x16xf32>
    tpu.vector_store %arg7[%c0_1403, %c0_1404, %c0_1405, %c0_1406], %1009 {strides = array<i32>} : memref<1x3x32x16xf32, #tpu.memory_space<vmem>>, vector<1x1x32x16xf32>,
    %cst_1407 = arith.constant 0.000000e+00 : f32
    %1010 = vector.broadcast %cst_1407 : f32 to vector<3x16xf32>
    %c0_1408 = arith.constant 0 : index
    %c0_1409 = arith.constant 0 : index
    %1011 = vector.load %arg5[%c0_1408, %c0_1409] : memref<1x16xf32, #tpu.memory_space<vmem>>, vector<1x16xf32>
    %1012 = vector.broadcast %1011 : vector<1x16xf32> to vector<3x16xf32>
    %1013 = arith.addf %1010, %1012 : vector<3x16xf32>
    %c1_1410 = arith.constant 1 : index
    %c0_1411 = arith.constant 0 : index
    %c0_1412 = arith.constant 0 : index
    %1014 = vector.load %arg10[%c1_1410, %c0_1411, %c0_1412] : memref<5x5x8xf32, #tpu.memory_space<vmem>>, vector<1x3x8xf32>
    %1015 = vector.shape_cast %1014 : vector<1x3x8xf32> to vector<3x8xf32>
    %c0_1413 = arith.constant 0 : index
    %c0_1414 = arith.constant 0 : index
    %c0_1415 = arith.constant 0 : index
    %1016 = vector.load %arg4[%c0_1413, %c0_1414, %c0_1415] : memref<9x8x16xf32, #tpu.memory_space<vmem>>, vector<1x8x16xf32>
    %1017 = vector.shape_cast %1016 : vector<1x8x16xf32> to vector<8x16xf32>
    %cst_1416 = arith.constant dense<0.000000e+00> : vector<3x16xf32>
    %1018 = tpu.matmul %1015, %1017, %cst_1416 {dimension_numbers = #tpu.dot_dimension_numbers<[1], [0], [0], [1], [0, 0, 1, 1], [], []>} : vector<3x8xf32>, vector<8x16xf32>, vector<3x16xf32> -> vector<3x16xf32>
    %1019 = arith.addf %1013, %1018 : vector<3x16xf32>
    %c1_1417 = arith.constant 1 : index
    %c1_1418 = arith.constant 1 : index
    %c0_1419 = arith.constant 0 : index
    %1020 = vector.load %arg10[%c1_1417, %c1_1418, %c0_1419] : memref<5x5x8xf32, #tpu.memory_space<vmem>>, vector<1x3x8xf32>
    %1021 = vector.shape_cast %1020 : vector<1x3x8xf32> to vector<3x8xf32>
    %c1_1420 = arith.constant 1 : index
    %c0_1421 = arith.constant 0 : index
    %c0_1422 = arith.constant 0 : index
    %1022 = vector.load %arg4[%c1_1420, %c0_1421, %c0_1422] : memref<9x8x16xf32, #tpu.memory_space<vmem>>, vector<1x8x16xf32>
    %1023 = vector.shape_cast %1022 : vector<1x8x16xf32> to vector<8x16xf32>
    %cst_1423 = arith.constant dense<0.000000e+00> : vector<3x16xf32>
    %1024 = tpu.matmul %1021, %1023, %cst_1423 {dimension_numbers = #tpu.dot_dimension_numbers<[1], [0], [0], [1], [0, 0, 1, 1], [], []>} : vector<3x8xf32>, vector<8x16xf32>, vector<3x16xf32> -> vector<3x16xf32>
    %1025 = arith.addf %1019, %1024 : vector<3x16xf32>
    %c1_1424 = arith.constant 1 : index
    %c2_1425 = arith.constant 2 : index
    %c0_1426 = arith.constant 0 : index
    %1026 = vector.load %arg10[%c1_1424, %c2_1425, %c0_1426] : memref<5x5x8xf32, #tpu.memory_space<vmem>>, vector<1x3x8xf32>
    %1027 = vector.shape_cast %1026 : vector<1x3x8xf32> to vector<3x8xf32>
    %c2_1427 = arith.constant 2 : index
    %c0_1428 = arith.constant 0 : index
    %c0_1429 = arith.constant 0 : index
    %1028 = vector.load %arg4[%c2_1427, %c0_1428, %c0_1429] : memref<9x8x16xf32, #tpu.memory_space<vmem>>, vector<1x8x16xf32>
    %1029 = vector.shape_cast %1028 : vector<1x8x16xf32> to vector<8x16xf32>
    %cst_1430 = arith.constant dense<0.000000e+00> : vector<3x16xf32>
    %1030 = tpu.matmul %1027, %1029, %cst_1430 {dimension_numbers = #tpu.dot_dimension_numbers<[1], [0], [0], [1], [0, 0, 1, 1], [], []>} : vector<3x8xf32>, vector<8x16xf32>, vector<3x16xf32> -> vector<3x16xf32>
    %1031 = arith.addf %1025, %1030 : vector<3x16xf32>
    %c2_1431 = arith.constant 2 : index
    %c0_1432 = arith.constant 0 : index
    %c0_1433 = arith.constant 0 : index
    %1032 = vector.load %arg10[%c2_1431, %c0_1432, %c0_1433] : memref<5x5x8xf32, #tpu.memory_space<vmem>>, vector<1x3x8xf32>
    %1033 = vector.shape_cast %1032 : vector<1x3x8xf32> to vector<3x8xf32>
    %c3_1434 = arith.constant 3 : index
    %c0_1435 = arith.constant 0 : index
    %c0_1436 = arith.constant 0 : index
    %1034 = vector.load %arg4[%c3_1434, %c0_1435, %c0_1436] : memref<9x8x16xf32, #tpu.memory_space<vmem>>, vector<1x8x16xf32>
    %1035 = vector.shape_cast %1034 : vector<1x8x16xf32> to vector<8x16xf32>
    %cst_1437 = arith.constant dense<0.000000e+00> : vector<3x16xf32>
    %1036 = tpu.matmul %1033, %1035, %cst_1437 {dimension_numbers = #tpu.dot_dimension_numbers<[1], [0], [0], [1], [0, 0, 1, 1], [], []>} : vector<3x8xf32>, vector<8x16xf32>, vector<3x16xf32> -> vector<3x16xf32>
    %1037 = arith.addf %1031, %1036 : vector<3x16xf32>
    %c2_1438 = arith.constant 2 : index
    %c1_1439 = arith.constant 1 : index
    %c0_1440 = arith.constant 0 : index
    %1038 = vector.load %arg10[%c2_1438, %c1_1439, %c0_1440] : memref<5x5x8xf32, #tpu.memory_space<vmem>>, vector<1x3x8xf32>
    %1039 = vector.shape_cast %1038 : vector<1x3x8xf32> to vector<3x8xf32>
    %c4_1441 = arith.constant 4 : index
    %c0_1442 = arith.constant 0 : index
    %c0_1443 = arith.constant 0 : index
    %1040 = vector.load %arg4[%c4_1441, %c0_1442, %c0_1443] : memref<9x8x16xf32, #tpu.memory_space<vmem>>, vector<1x8x16xf32>
    %1041 = vector.shape_cast %1040 : vector<1x8x16xf32> to vector<8x16xf32>
    %cst_1444 = arith.constant dense<0.000000e+00> : vector<3x16xf32>
    %1042 = tpu.matmul %1039, %1041, %cst_1444 {dimension_numbers = #tpu.dot_dimension_numbers<[1], [0], [0], [1], [0, 0, 1, 1], [], []>} : vector<3x8xf32>, vector<8x16xf32>, vector<3x16xf32> -> vector<3x16xf32>
    %1043 = arith.addf %1037, %1042 : vector<3x16xf32>
    %c2_1445 = arith.constant 2 : index
    %c2_1446 = arith.constant 2 : index
    %c0_1447 = arith.constant 0 : index
    %1044 = vector.load %arg10[%c2_1445, %c2_1446, %c0_1447] : memref<5x5x8xf32, #tpu.memory_space<vmem>>, vector<1x3x8xf32>
    %1045 = vector.shape_cast %1044 : vector<1x3x8xf32> to vector<3x8xf32>
    %c5_1448 = arith.constant 5 : index
    %c0_1449 = arith.constant 0 : index
    %c0_1450 = arith.constant 0 : index
    %1046 = vector.load %arg4[%c5_1448, %c0_1449, %c0_1450] : memref<9x8x16xf32, #tpu.memory_space<vmem>>, vector<1x8x16xf32>
    %1047 = vector.shape_cast %1046 : vector<1x8x16xf32> to vector<8x16xf32>
    %cst_1451 = arith.constant dense<0.000000e+00> : vector<3x16xf32>
    %1048 = tpu.matmul %1045, %1047, %cst_1451 {dimension_numbers = #tpu.dot_dimension_numbers<[1], [0], [0], [1], [0, 0, 1, 1], [], []>} : vector<3x8xf32>, vector<8x16xf32>, vector<3x16xf32> -> vector<3x16xf32>
    %1049 = arith.addf %1043, %1048 : vector<3x16xf32>
    %c3_1452 = arith.constant 3 : index
    %c0_1453 = arith.constant 0 : index
    %c0_1454 = arith.constant 0 : index
    %1050 = vector.load %arg10[%c3_1452, %c0_1453, %c0_1454] : memref<5x5x8xf32, #tpu.memory_space<vmem>>, vector<1x3x8xf32>
    %1051 = vector.shape_cast %1050 : vector<1x3x8xf32> to vector<3x8xf32>
    %c6_1455 = arith.constant 6 : index
    %c0_1456 = arith.constant 0 : index
    %c0_1457 = arith.constant 0 : index
    %1052 = vector.load %arg4[%c6_1455, %c0_1456, %c0_1457] : memref<9x8x16xf32, #tpu.memory_space<vmem>>, vector<1x8x16xf32>
    %1053 = vector.shape_cast %1052 : vector<1x8x16xf32> to vector<8x16xf32>
    %cst_1458 = arith.constant dense<0.000000e+00> : vector<3x16xf32>
    %1054 = tpu.matmul %1051, %1053, %cst_1458 {dimension_numbers = #tpu.dot_dimension_numbers<[1], [0], [0], [1], [0, 0, 1, 1], [], []>} : vector<3x8xf32>, vector<8x16xf32>, vector<3x16xf32> -> vector<3x16xf32>
    %1055 = arith.addf %1049, %1054 : vector<3x16xf32>
    %c3_1459 = arith.constant 3 : index
    %c1_1460 = arith.constant 1 : index
    %c0_1461 = arith.constant 0 : index
    %1056 = vector.load %arg10[%c3_1459, %c1_1460, %c0_1461] : memref<5x5x8xf32, #tpu.memory_space<vmem>>, vector<1x3x8xf32>
    %1057 = vector.shape_cast %1056 : vector<1x3x8xf32> to vector<3x8xf32>
    %c7_1462 = arith.constant 7 : index
    %c0_1463 = arith.constant 0 : index
    %c0_1464 = arith.constant 0 : index
    %1058 = vector.load %arg4[%c7_1462, %c0_1463, %c0_1464] : memref<9x8x16xf32, #tpu.memory_space<vmem>>, vector<1x8x16xf32>
    %1059 = vector.shape_cast %1058 : vector<1x8x16xf32> to vector<8x16xf32>
    %cst_1465 = arith.constant dense<0.000000e+00> : vector<3x16xf32>
    %1060 = tpu.matmul %1057, %1059, %cst_1465 {dimension_numbers = #tpu.dot_dimension_numbers<[1], [0], [0], [1], [0, 0, 1, 1], [], []>} : vector<3x8xf32>, vector<8x16xf32>, vector<3x16xf32> -> vector<3x16xf32>
    %1061 = arith.addf %1055, %1060 : vector<3x16xf32>
    %c3_1466 = arith.constant 3 : index
    %c2_1467 = arith.constant 2 : index
    %c0_1468 = arith.constant 0 : index
    %1062 = vector.load %arg10[%c3_1466, %c2_1467, %c0_1468] : memref<5x5x8xf32, #tpu.memory_space<vmem>>, vector<1x3x8xf32>
    %1063 = vector.shape_cast %1062 : vector<1x3x8xf32> to vector<3x8xf32>
    %c8_1469 = arith.constant 8 : index
    %c0_1470 = arith.constant 0 : index
    %c0_1471 = arith.constant 0 : index
    %1064 = vector.load %arg4[%c8_1469, %c0_1470, %c0_1471] : memref<9x8x16xf32, #tpu.memory_space<vmem>>, vector<1x8x16xf32>
    %1065 = vector.shape_cast %1064 : vector<1x8x16xf32> to vector<8x16xf32>
    %cst_1472 = arith.constant dense<0.000000e+00> : vector<3x16xf32>
    %1066 = tpu.matmul %1063, %1065, %cst_1472 {dimension_numbers = #tpu.dot_dimension_numbers<[1], [0], [0], [1], [0, 0, 1, 1], [], []>} : vector<3x8xf32>, vector<8x16xf32>, vector<3x16xf32> -> vector<3x16xf32>
    %1067 = arith.addf %1061, %1066 : vector<3x16xf32>
    %c0_1473 = arith.constant 0 : index
    %c0_1474 = arith.constant 0 : index
    %1068 = vector.load %arg6[%c0_1473, %c0_1474] : memref<32x3xf32, #tpu.memory_space<vmem>>, vector<32x3xf32>
    %cst_1475 = arith.constant dense<0.000000e+00> : vector<32x16xf32>
    %1069 = tpu.matmul %1068, %1067, %cst_1475 {dimension_numbers = #tpu.dot_dimension_numbers<[1], [0], [0], [1], [0, 0, 1, 1], [], []>} : vector<32x3xf32>, vector<3x16xf32>, vector<32x16xf32> -> vector<32x16xf32>
    %c0_1476 = arith.constant 0 : index
    %c1_1477 = arith.constant 1 : index
    %c0_1478 = arith.constant 0 : index
    %c0_1479 = arith.constant 0 : index
    %1070 = vector.load %arg7[%c0_1476, %c1_1477, %c0_1478, %c0_1479] : memref<1x3x32x16xf32, #tpu.memory_space<vmem>>, vector<1x1x32x16xf32>
    %1071 = vector.shape_cast %1070 : vector<1x1x32x16xf32> to vector<32x16xf32>
    %1072 = vector.shape_cast %1069 : vector<32x16xf32> to vector<1x1x32x16xf32>
    tpu.vector_store %arg7[%c0_1476, %c1_1477, %c0_1478, %c0_1479], %1072 {strides = array<i32>} : memref<1x3x32x16xf32, #tpu.memory_space<vmem>>, vector<1x1x32x16xf32>,
    %cst_1480 = arith.constant 0.000000e+00 : f32
    %1073 = vector.broadcast %cst_1480 : f32 to vector<3x16xf32>
    %c0_1481 = arith.constant 0 : index
    %c0_1482 = arith.constant 0 : index
    %1074 = vector.load %arg5[%c0_1481, %c0_1482] : memref<1x16xf32, #tpu.memory_space<vmem>>, vector<1x16xf32>
    %1075 = vector.broadcast %1074 : vector<1x16xf32> to vector<3x16xf32>
    %1076 = arith.addf %1073, %1075 : vector<3x16xf32>
    %c2_1483 = arith.constant 2 : index
    %c0_1484 = arith.constant 0 : index
    %c0_1485 = arith.constant 0 : index
    %1077 = vector.load %arg10[%c2_1483, %c0_1484, %c0_1485] : memref<5x5x8xf32, #tpu.memory_space<vmem>>, vector<1x3x8xf32>
    %1078 = vector.shape_cast %1077 : vector<1x3x8xf32> to vector<3x8xf32>
    %c0_1486 = arith.constant 0 : index
    %c0_1487 = arith.constant 0 : index
    %c0_1488 = arith.constant 0 : index
    %1079 = vector.load %arg4[%c0_1486, %c0_1487, %c0_1488] : memref<9x8x16xf32, #tpu.memory_space<vmem>>, vector<1x8x16xf32>
    %1080 = vector.shape_cast %1079 : vector<1x8x16xf32> to vector<8x16xf32>
    %cst_1489 = arith.constant dense<0.000000e+00> : vector<3x16xf32>
    %1081 = tpu.matmul %1078, %1080, %cst_1489 {dimension_numbers = #tpu.dot_dimension_numbers<[1], [0], [0], [1], [0, 0, 1, 1], [], []>} : vector<3x8xf32>, vector<8x16xf32>, vector<3x16xf32> -> vector<3x16xf32>
    %1082 = arith.addf %1076, %1081 : vector<3x16xf32>
    %c2_1490 = arith.constant 2 : index
    %c1_1491 = arith.constant 1 : index
    %c0_1492 = arith.constant 0 : index
    %1083 = vector.load %arg10[%c2_1490, %c1_1491, %c0_1492] : memref<5x5x8xf32, #tpu.memory_space<vmem>>, vector<1x3x8xf32>
    %1084 = vector.shape_cast %1083 : vector<1x3x8xf32> to vector<3x8xf32>
    %c1_1493 = arith.constant 1 : index
    %c0_1494 = arith.constant 0 : index
    %c0_1495 = arith.constant 0 : index
    %1085 = vector.load %arg4[%c1_1493, %c0_1494, %c0_1495] : memref<9x8x16xf32, #tpu.memory_space<vmem>>, vector<1x8x16xf32>
    %1086 = vector.shape_cast %1085 : vector<1x8x16xf32> to vector<8x16xf32>
    %cst_1496 = arith.constant dense<0.000000e+00> : vector<3x16xf32>
    %1087 = tpu.matmul %1084, %1086, %cst_1496 {dimension_numbers = #tpu.dot_dimension_numbers<[1], [0], [0], [1], [0, 0, 1, 1], [], []>} : vector<3x8xf32>, vector<8x16xf32>, vector<3x16xf32> -> vector<3x16xf32>
    %1088 = arith.addf %1082, %1087 : vector<3x16xf32>
    %c2_1497 = arith.constant 2 : index
    %c2_1498 = arith.constant 2 : index
    %c0_1499 = arith.constant 0 : index
    %1089 = vector.load %arg10[%c2_1497, %c2_1498, %c0_1499] : memref<5x5x8xf32, #tpu.memory_space<vmem>>, vector<1x3x8xf32>
    %1090 = vector.shape_cast %1089 : vector<1x3x8xf32> to vector<3x8xf32>
    %c2_1500 = arith.constant 2 : index
    %c0_1501 = arith.constant 0 : index
    %c0_1502 = arith.constant 0 : index
    %1091 = vector.load %arg4[%c2_1500, %c0_1501, %c0_1502] : memref<9x8x16xf32, #tpu.memory_space<vmem>>, vector<1x8x16xf32>
    %1092 = vector.shape_cast %1091 : vector<1x8x16xf32> to vector<8x16xf32>
    %cst_1503 = arith.constant dense<0.000000e+00> : vector<3x16xf32>
    %1093 = tpu.matmul %1090, %1092, %cst_1503 {dimension_numbers = #tpu.dot_dimension_numbers<[1], [0], [0], [1], [0, 0, 1, 1], [], []>} : vector<3x8xf32>, vector<8x16xf32>, vector<3x16xf32> -> vector<3x16xf32>
    %1094 = arith.addf %1088, %1093 : vector<3x16xf32>
    %c3_1504 = arith.constant 3 : index
    %c0_1505 = arith.constant 0 : index
    %c0_1506 = arith.constant 0 : index
    %1095 = vector.load %arg10[%c3_1504, %c0_1505, %c0_1506] : memref<5x5x8xf32, #tpu.memory_space<vmem>>, vector<1x3x8xf32>
    %1096 = vector.shape_cast %1095 : vector<1x3x8xf32> to vector<3x8xf32>
    %c3_1507 = arith.constant 3 : index
    %c0_1508 = arith.constant 0 : index
    %c0_1509 = arith.constant 0 : index
    %1097 = vector.load %arg4[%c3_1507, %c0_1508, %c0_1509] : memref<9x8x16xf32, #tpu.memory_space<vmem>>, vector<1x8x16xf32>
    %1098 = vector.shape_cast %1097 : vector<1x8x16xf32> to vector<8x16xf32>
    %cst_1510 = arith.constant dense<0.000000e+00> : vector<3x16xf32>
    %1099 = tpu.matmul %1096, %1098, %cst_1510 {dimension_numbers = #tpu.dot_dimension_numbers<[1], [0], [0], [1], [0, 0, 1, 1], [], []>} : vector<3x8xf32>, vector<8x16xf32>, vector<3x16xf32> -> vector<3x16xf32>
    %1100 = arith.addf %1094, %1099 : vector<3x16xf32>
    %c3_1511 = arith.constant 3 : index
    %c1_1512 = arith.constant 1 : index
    %c0_1513 = arith.constant 0 : index
    %1101 = vector.load %arg10[%c3_1511, %c1_1512, %c0_1513] : memref<5x5x8xf32, #tpu.memory_space<vmem>>, vector<1x3x8xf32>
    %1102 = vector.shape_cast %1101 : vector<1x3x8xf32> to vector<3x8xf32>
    %c4_1514 = arith.constant 4 : index
    %c0_1515 = arith.constant 0 : index
    %c0_1516 = arith.constant 0 : index
    %1103 = vector.load %arg4[%c4_1514, %c0_1515, %c0_1516] : memref<9x8x16xf32, #tpu.memory_space<vmem>>, vector<1x8x16xf32>
    %1104 = vector.shape_cast %1103 : vector<1x8x16xf32> to vector<8x16xf32>
    %cst_1517 = arith.constant dense<0.000000e+00> : vector<3x16xf32>
    %1105 = tpu.matmul %1102, %1104, %cst_1517 {dimension_numbers = #tpu.dot_dimension_numbers<[1], [0], [0], [1], [0, 0, 1, 1], [], []>} : vector<3x8xf32>, vector<8x16xf32>, vector<3x16xf32> -> vector<3x16xf32>
    %1106 = arith.addf %1100, %1105 : vector<3x16xf32>
    %c3_1518 = arith.constant 3 : index
    %c2_1519 = arith.constant 2 : index
    %c0_1520 = arith.constant 0 : index
    %1107 = vector.load %arg10[%c3_1518, %c2_1519, %c0_1520] : memref<5x5x8xf32, #tpu.memory_space<vmem>>, vector<1x3x8xf32>
    %1108 = vector.shape_cast %1107 : vector<1x3x8xf32> to vector<3x8xf32>
    %c5_1521 = arith.constant 5 : index
    %c0_1522 = arith.constant 0 : index
    %c0_1523 = arith.constant 0 : index
    %1109 = vector.load %arg4[%c5_1521, %c0_1522, %c0_1523] : memref<9x8x16xf32, #tpu.memory_space<vmem>>, vector<1x8x16xf32>
    %1110 = vector.shape_cast %1109 : vector<1x8x16xf32> to vector<8x16xf32>
    %cst_1524 = arith.constant dense<0.000000e+00> : vector<3x16xf32>
    %1111 = tpu.matmul %1108, %1110, %cst_1524 {dimension_numbers = #tpu.dot_dimension_numbers<[1], [0], [0], [1], [0, 0, 1, 1], [], []>} : vector<3x8xf32>, vector<8x16xf32>, vector<3x16xf32> -> vector<3x16xf32>
    %1112 = arith.addf %1106, %1111 : vector<3x16xf32>
    %c4_1525 = arith.constant 4 : index
    %c0_1526 = arith.constant 0 : index
    %c0_1527 = arith.constant 0 : index
    %1113 = vector.load %arg10[%c4_1525, %c0_1526, %c0_1527] : memref<5x5x8xf32, #tpu.memory_space<vmem>>, vector<1x3x8xf32>
    %1114 = vector.shape_cast %1113 : vector<1x3x8xf32> to vector<3x8xf32>
    %c6_1528 = arith.constant 6 : index
    %c0_1529 = arith.constant 0 : index
    %c0_1530 = arith.constant 0 : index
    %1115 = vector.load %arg4[%c6_1528, %c0_1529, %c0_1530] : memref<9x8x16xf32, #tpu.memory_space<vmem>>, vector<1x8x16xf32>
    %1116 = vector.shape_cast %1115 : vector<1x8x16xf32> to vector<8x16xf32>
    %cst_1531 = arith.constant dense<0.000000e+00> : vector<3x16xf32>
    %1117 = tpu.matmul %1114, %1116, %cst_1531 {dimension_numbers = #tpu.dot_dimension_numbers<[1], [0], [0], [1], [0, 0, 1, 1], [], []>} : vector<3x8xf32>, vector<8x16xf32>, vector<3x16xf32> -> vector<3x16xf32>
    %1118 = arith.addf %1112, %1117 : vector<3x16xf32>
    %c4_1532 = arith.constant 4 : index
    %c1_1533 = arith.constant 1 : index
    %c0_1534 = arith.constant 0 : index
    %1119 = vector.load %arg10[%c4_1532, %c1_1533, %c0_1534] : memref<5x5x8xf32, #tpu.memory_space<vmem>>, vector<1x3x8xf32>
    %1120 = vector.shape_cast %1119 : vector<1x3x8xf32> to vector<3x8xf32>
    %c7_1535 = arith.constant 7 : index
    %c0_1536 = arith.constant 0 : index
    %c0_1537 = arith.constant 0 : index
    %1121 = vector.load %arg4[%c7_1535, %c0_1536, %c0_1537] : memref<9x8x16xf32, #tpu.memory_space<vmem>>, vector<1x8x16xf32>
    %1122 = vector.shape_cast %1121 : vector<1x8x16xf32> to vector<8x16xf32>
    %cst_1538 = arith.constant dense<0.000000e+00> : vector<3x16xf32>
    %1123 = tpu.matmul %1120, %1122, %cst_1538 {dimension_numbers = #tpu.dot_dimension_numbers<[1], [0], [0], [1], [0, 0, 1, 1], [], []>} : vector<3x8xf32>, vector<8x16xf32>, vector<3x16xf32> -> vector<3x16xf32>
    %1124 = arith.addf %1118, %1123 : vector<3x16xf32>
    %c4_1539 = arith.constant 4 : index
    %c2_1540 = arith.constant 2 : index
    %c0_1541 = arith.constant 0 : index
    %1125 = vector.load %arg10[%c4_1539, %c2_1540, %c0_1541] : memref<5x5x8xf32, #tpu.memory_space<vmem>>, vector<1x3x8xf32>
    %1126 = vector.shape_cast %1125 : vector<1x3x8xf32> to vector<3x8xf32>
    %c8_1542 = arith.constant 8 : index
    %c0_1543 = arith.constant 0 : index
    %c0_1544 = arith.constant 0 : index
    %1127 = vector.load %arg4[%c8_1542, %c0_1543, %c0_1544] : memref<9x8x16xf32, #tpu.memory_space<vmem>>, vector<1x8x16xf32>
    %1128 = vector.shape_cast %1127 : vector<1x8x16xf32> to vector<8x16xf32>
    %cst_1545 = arith.constant dense<0.000000e+00> : vector<3x16xf32>
    %1129 = tpu.matmul %1126, %1128, %cst_1545 {dimension_numbers = #tpu.dot_dimension_numbers<[1], [0], [0], [1], [0, 0, 1, 1], [], []>} : vector<3x8xf32>, vector<8x16xf32>, vector<3x16xf32> -> vector<3x16xf32>
    %1130 = arith.addf %1124, %1129 : vector<3x16xf32>
    %c0_1546 = arith.constant 0 : index
    %c0_1547 = arith.constant 0 : index
    %1131 = vector.load %arg6[%c0_1546, %c0_1547] : memref<32x3xf32, #tpu.memory_space<vmem>>, vector<32x3xf32>
    %cst_1548 = arith.constant dense<0.000000e+00> : vector<32x16xf32>
    %1132 = tpu.matmul %1131, %1130, %cst_1548 {dimension_numbers = #tpu.dot_dimension_numbers<[1], [0], [0], [1], [0, 0, 1, 1], [], []>} : vector<32x3xf32>, vector<3x16xf32>, vector<32x16xf32> -> vector<32x16xf32>
    %c0_1549 = arith.constant 0 : index
    %c2_1550 = arith.constant 2 : index
    %c0_1551 = arith.constant 0 : index
    %c0_1552 = arith.constant 0 : index
    %1133 = vector.load %arg7[%c0_1549, %c2_1550, %c0_1551, %c0_1552] : memref<1x3x32x16xf32, #tpu.memory_space<vmem>>, vector<1x1x32x16xf32>
    %1134 = vector.shape_cast %1133 : vector<1x1x32x16xf32> to vector<32x16xf32>
    %1135 = vector.shape_cast %1132 : vector<32x16xf32> to vector<1x1x32x16xf32>
    tpu.vector_store %arg7[%c0_1549, %c2_1550, %c0_1551, %c0_1552], %1135 {strides = array<i32>} : memref<1x3x32x16xf32, #tpu.memory_space<vmem>>, vector<1x1x32x16xf32>,
    return
  }
  func.func @transform_0(%arg0: i32) -> (i32, i32, i32, i32, i32) {
    %c0_i32 = arith.constant 0 : i32
    %c0_i32_0 = arith.constant 0 : i32
    %c0_i32_1 = arith.constant 0 : i32
    %c0_i32_2 = arith.constant 0 : i32
    %c0_i32_3 = arith.constant 0 : i32
    return %arg0, %c0_i32, %c0_i32_0, %c0_i32_1, %c0_i32_2 : i32, i32, i32, i32, i32
  }
  func.func @transform_1(%arg0: i32) -> (i32, i32, i32) {
    %c0_i32 = arith.constant 0 : i32
    %c0_i32_0 = arith.constant 0 : i32
    %c0_i32_1 = arith.constant 0 : i32
    %c0_i32_2 = arith.constant 0 : i32
    return %c0_i32, %c0_i32_0, %c0_i32_1 : i32, i32, i32
  }
  func.func @transform_2(%arg0: i32) -> (i32, i32) {
    %c0_i32 = arith.constant 0 : i32
    %c0_i32_0 = arith.constant 0 : i32
    %c0_i32_1 = arith.constant 0 : i32
    return %c0_i32, %c0_i32_0 : i32, i32
  }
  func.func @transform_3(%arg0: i32) -> (i32, i32, i32) {
    %c0_i32 = arith.constant 0 : i32
    %c0_i32_0 = arith.constant 0 : i32
    %c0_i32_1 = arith.constant 0 : i32
    %c0_i32_2 = arith.constant 0 : i32
    return %c0_i32, %c0_i32_0, %c0_i32_1 : i32, i32, i32
  }
  func.func @transform_4(%arg0: i32) -> (i32, i32) {
    %c0_i32 = arith.constant 0 : i32
    %c0_i32_0 = arith.constant 0 : i32
    %c0_i32_1 = arith.constant 0 : i32
    return %c0_i32, %c0_i32_0 : i32, i32
  }
  func.func @transform_5(%arg0: i32) -> (i32, i32) {
    %c0_i32 = arith.constant 0 : i32
    %c0_i32_0 = arith.constant 0 : i32
    %c0_i32_1 = arith.constant 0 : i32
    return %c0_i32, %c0_i32_0 : i32, i32
  }
  func.func @transform_6(%arg0: i32) -> (i32, i32, i32, i32) {
    %c0_i32 = arith.constant 0 : i32
    %c0_i32_0 = arith.constant 0 : i32
    %c0_i32_1 = arith.constant 0 : i32
    %c0_i32_2 = arith.constant 0 : i32
    return %arg0, %c0_i32, %c0_i32_0, %c0_i32_1 : i32, i32, i32, i32
  }
}

module attributes {stable_mosaic.version = 11 : i64} {
  func.func @_tail_kernel(%arg0: i32, %arg1: i32, %arg2: memref<32x3xf32, #tpu.memory_space<vmem>>, %arg3: memref<1x3x512xf32, #tpu.memory_space<vmem>>, %arg4: memref<1x32x512xf32, #tpu.memory_space<vmem>>, %arg5: memref<1x512xf32, #tpu.memory_space<vmem>>, %arg6: memref<1x32x512xf32, #tpu.memory_space<vmem>>, %arg7: memref<1x32x512xf32, #tpu.memory_space<vmem>>) attributes {dimension_semantics = [#tpu.dimension_semantics<parallel>, #tpu.dimension_semantics<parallel>], iteration_bounds = array<i64: 2, 1>, scalar_prefetch = 0 : i64, scratch_operands = 0 : i64, tpu.core_type = #tpu.core_type<tc>, window_params = [{transform_indices = @transform_0, window_bounds = array<i64: 32, 3>}, {transform_indices = @transform_1, window_bounds = array<i64: 1, 3, 512>}, {transform_indices = @transform_2, window_bounds = array<i64: 1, 32, 512>}, {pipeline_mode = #tpu.pipeline_mode<synchronous>, transform_indices = @transform_3, window_bounds = array<i64: 1, 512>}, {transform_indices = @transform_4, window_bounds = array<i64: 1, 32, 512>}, {transform_indices = @transform_5, window_bounds = array<i64: 1, 32, 512>}]} {
    %c0 = arith.constant 0 : index
    %c0_0 = arith.constant 0 : index
    %0 = vector.load %arg2[%c0, %c0_0] : memref<32x3xf32, #tpu.memory_space<vmem>>, vector<32x3xf32>
    %c0_1 = arith.constant 0 : index
    %c0_2 = arith.constant 0 : index
    %c0_3 = arith.constant 0 : index
    %1 = vector.load %arg3[%c0_1, %c0_2, %c0_3] : memref<1x3x512xf32, #tpu.memory_space<vmem>>, vector<1x3x512xf32>
    %2 = vector.shape_cast %1 : vector<1x3x512xf32> to vector<3x512xf32>
    %cst = arith.constant dense<0.000000e+00> : vector<32x512xf32>
    %3 = tpu.matmul %0, %2, %cst {dimension_numbers = #tpu.dot_dimension_numbers<[1], [0], [0], [1], [0, 0, 1, 1], [], []>} : vector<32x3xf32>, vector<3x512xf32>, vector<32x512xf32> -> vector<32x512xf32>
    %c0_4 = arith.constant 0 : index
    %c0_5 = arith.constant 0 : index
    %c0_6 = arith.constant 0 : index
    %4 = vector.load %arg4[%c0_4, %c0_5, %c0_6] : memref<1x32x512xf32, #tpu.memory_space<vmem>>, vector<1x32x512xf32>
    %5 = vector.shape_cast %4 : vector<1x32x512xf32> to vector<32x512xf32>
    %6 = arith.addf %3, %5 : vector<32x512xf32>
    %c0_7 = arith.constant 0 : index
    %c0_8 = arith.constant 0 : index
    %7 = vector.load %arg5[%c0_7, %c0_8] : memref<1x512xf32, #tpu.memory_space<vmem>>, vector<1x512xf32>
    %8 = vector.broadcast %7 : vector<1x512xf32> to vector<32x512xf32>
    %9 = arith.addf %6, %8 : vector<32x512xf32>
    %c0_9 = arith.constant 0 : index
    %c0_10 = arith.constant 0 : index
    %c0_11 = arith.constant 0 : index
    %10 = vector.load %arg6[%c0_9, %c0_10, %c0_11] : memref<1x32x512xf32, #tpu.memory_space<vmem>>, vector<1x32x512xf32>
    %11 = vector.shape_cast %10 : vector<1x32x512xf32> to vector<32x512xf32>
    %12 = arith.negf %9 : vector<32x512xf32>
    %13 = math.exp %12 : vector<32x512xf32>
    %cst_12 = arith.constant 1.000000e+00 : f32
    %14 = vector.broadcast %cst_12 : f32 to vector<32x512xf32>
    %15 = arith.addf %14, %13 : vector<32x512xf32>
    %16 = arith.divf %14, %15 : vector<32x512xf32>
    %17 = arith.mulf %11, %16 : vector<32x512xf32>
    %c0_13 = arith.constant 0 : index
    %c0_14 = arith.constant 0 : index
    %c0_15 = arith.constant 0 : index
    %18 = vector.load %arg7[%c0_13, %c0_14, %c0_15] : memref<1x32x512xf32, #tpu.memory_space<vmem>>, vector<1x32x512xf32>
    %19 = vector.shape_cast %18 : vector<1x32x512xf32> to vector<32x512xf32>
    %20 = vector.shape_cast %17 : vector<32x512xf32> to vector<1x32x512xf32>
    tpu.vector_store %arg7[%c0_13, %c0_14, %c0_15], %20 {strides = array<i32>} : memref<1x32x512xf32, #tpu.memory_space<vmem>>, vector<1x32x512xf32>,
    return
  }
  func.func @transform_0(%arg0: i32, %arg1: i32) -> (i32, i32) {
    %c0_i32 = arith.constant 0 : i32
    %c0_i32_0 = arith.constant 0 : i32
    return %arg1, %c0_i32 : i32, i32
  }
  func.func @transform_1(%arg0: i32, %arg1: i32) -> (i32, i32, i32) {
    %c0_i32 = arith.constant 0 : i32
    %c0_i32_0 = arith.constant 0 : i32
    %c0_i32_1 = arith.constant 0 : i32
    return %arg0, %c0_i32, %c0_i32_0 : i32, i32, i32
  }
  func.func @transform_2(%arg0: i32, %arg1: i32) -> (i32, i32, i32) {
    %c0_i32 = arith.constant 0 : i32
    %c0_i32_0 = arith.constant 0 : i32
    return %arg0, %arg1, %c0_i32 : i32, i32, i32
  }
  func.func @transform_3(%arg0: i32, %arg1: i32) -> (i32, i32) {
    %c0_i32 = arith.constant 0 : i32
    %c0_i32_0 = arith.constant 0 : i32
    %c0_i32_1 = arith.constant 0 : i32
    return %c0_i32, %c0_i32_0 : i32, i32
  }
  func.func @transform_4(%arg0: i32, %arg1: i32) -> (i32, i32, i32) {
    %c0_i32 = arith.constant 0 : i32
    %c0_i32_0 = arith.constant 0 : i32
    return %arg0, %arg1, %c0_i32 : i32, i32, i32
  }
  func.func @transform_5(%arg0: i32, %arg1: i32) -> (i32, i32, i32) {
    %c0_i32 = arith.constant 0 : i32
    %c0_i32_0 = arith.constant 0 : i32
    return %arg0, %arg1, %c0_i32 : i32, i32, i32
  }
}

</mosaic_0001>

<bundles_post_ra>
// kernel: esa_forward_nchw.3
= control target key start
LH: loop header
LB: loop body
LE: loop exit
PB: predicated region body
PF: predicated region fallthrough
CT: control target
= control target key end

     0   :  { %s2653_s21 = smov 0   ;;  %s3869_s0 = inlined_call_operand.vmem [shape: f32[2048,16], index: 0, kind: input, shape index: {}]   ;;  %s3870_s1 = inlined_call_operand.vmem [shape: f32[16,8], index: 1, kind: input, shape index: {}]   ;;  %s3871_s2 = inlined_call_operand.vmem [shape: f32[1,8], index: 2, kind: input, shape index: {}]   ;;  %s3872_s3 = inlined_call_operand.vmem [shape: f32[8,16], index: 3, kind: input, shape index: {}]   ;;  %s3873_s4 = inlined_call_operand.vmem [shape: f32[1,16], index: 4, kind: input, shape index: {}]   ;;  %s3874_s5 = inlined_call_operand.vmem [shape: f32[2048,8], index: 5, kind: output, shape index: {0}]   ;;  %s3875_s6 = inlined_call_operand.vmem [shape: f32[2048,16], index: 6, kind: output, shape index: {1}]  }
   0x1 LB: > { %s2326_s22 = sadd.s32 4294967295, %s2616_s21   ;;  %p2330_p0 = scmp.ge.s32.totalorder %s2616_s21, 1  ;;  %s2616_s21 = sphi %s2653_s21, %s17_s21  }
   0x2   : > { %p216_p1 = scmp.lt.s32.totalorder %s2616_s21, 3 }
   0x4   : > { %p217_p2 = pnand %p2330_p0, %p216_p1 }
   0x5   : > { %s2331_s27 = sshll.u32 (!%p217_p2), %s2326_s22, 7 }
   0x6   : > { %220 = sbr.rel (%p217_p2) target bundleno = 789 (0x315), region = 40  ;;  %p252_p3 = scmp.lt.s32.totalorder (!%p217_p2), %s2331_s27, 255 }
   0xb   : > { %v398_v0 = vld [vmem:[%s3870_s1 + $0x8] sm:$0xff]  ;;  %v397_v1 = vld [vmem:[%s3870_s1] sm:$0xff]  ;;  %s3877_s27 = smov (!%p252_p3, %s2331_s27), 255  ;;  %vm403_vm0 = vcmask 130048   ;;  %vm1189_vm1 = vcmask 64512  }
   0xc   : > { %802 = vmatpush.msra.mxu0 %v398_v0  ;;  %2595 = vmatpush.msra.mxu2 %v398_v0  ;;  %s2667_s28 = sshll.u32 %s3877_s27, 3  ;;  %v1318_v28 = vld [vmem:[%s3872_s3] sm:$0xff] }
   0xd   : > { %s2673_s7 = scalar_lea.vmem %s3869_s0, %s2667_s28  ;;  %1722 = vmatpush.msra.mxu1 %v1318_v28  ;;  %2597 = vmatpush.msra.mxu3 %v1318_v28  ;;  %v2745_v35 = vld [vmem:[%s3871_s2] ss:$0 sm:$0xff]  ;;  %s2751_s14 = scalar_lea.vmem %s3874_s5, %s2667_s28 }
   0xe   : > { %803 = vmatpush.msra.mxu0 %v397_v1  ;;  %2596 = vmatpush.msra.mxu2 %v397_v1  ;;  %v269_v2 = vld [vmem:[%s2673_s7] sm:$0xff]  ;;  %v270_v4 = vld [vmem:[%s2673_s7 + $0x8] sm:$0xff]  ;;  %v271_v6 = vld [vmem:[%s2673_s7 + $0x10] sm:$0xff]  ;;  %s2958_s19 = scalar_lea.vmem %s3875_s6, %s2667_s28 }
   0xf   : > { %v333_v3 = vld [vmem:[%s2673_s7 + $0x200] sm:$0xff]  ;;  %2337 = vmatmul.msk.f32.vlgmr.msra.gmra.mxu0 %vm403_vm0, %v269_v2  ;;  %v334_v5 = vld [vmem:[%s2673_s7 + $0x208] sm:$0xff]  ;;  %v335_v7 = vld [vmem:[%s2673_s7 + $0x210] sm:$0xff] }
  0x10   : > { %2401 = vmatmul.msk.f32.vlgmr.msra.gmra.mxu2 %vm403_vm0, %v333_v3  ;;  %v272_v8 = vld [vmem:[%s2673_s7 + $0x18] sm:$0xff]  ;;  %v273_v10 = vld [vmem:[%s2673_s7 + $0x20] sm:$0xff]  ;;  %v274_v12 = vld [vmem:[%s2673_s7 + $0x28] sm:$0xff] }
  0x11   : > { %v336_v9 = vld [vmem:[%s2673_s7 + $0x218] sm:$0xff]  ;;  %v337_v11 = vld [vmem:[%s2673_s7 + $0x220] sm:$0xff]  ;;  %v338_v13 = vld [vmem:[%s2673_s7 + $0x228] sm:$0xff] }
  0x12   : > { %v275_v14 = vld [vmem:[%s2673_s7 + $0x30] sm:$0xff]  ;;  %v276_v16 = vld [vmem:[%s2673_s7 + $0x38] sm:$0xff]  ;;  %v277_v18 = vld [vmem:[%s2673_s7 + $0x40] sm:$0xff] }
  0x13   : > { %v339_v15 = vld [vmem:[%s2673_s7 + $0x230] sm:$0xff]  ;;  %v340_v17 = vld [vmem:[%s2673_s7 + $0x238] sm:$0xff]  ;;  %v341_v19 = vld [vmem:[%s2673_s7 + $0x240] sm:$0xff] }
  0x14   : > { %v278_v20 = vld [vmem:[%s2673_s7 + $0x48] sm:$0xff]  ;;  %v279_v22 = vld [vmem:[%s2673_s7 + $0x50] sm:$0xff]  ;;  %v280_v24 = vld [vmem:[%s2673_s7 + $0x58] sm:$0xff] }
  0x15   : > { %v342_v21 = vld [vmem:[%s2673_s7 + $0x248] sm:$0xff]  ;;  %v343_v23 = vld [vmem:[%s2673_s7 + $0x250] sm:$0xff]  ;;  %v344_v25 = vld [vmem:[%s2673_s7 + $0x258] sm:$0xff] }
  0x16   : > { %v281_v26 = vld [vmem:[%s2673_s7 + $0x60] sm:$0xff]  ;;  %v282_v29 = vld [vmem:[%s2673_s7 + $0x68] sm:$0xff]  ;;  %v283_v31 = vld [vmem:[%s2673_s7 + $0x70] sm:$0xff] }
  0x17   : > { %2338 = vmatmul.msk.f32.gmra.mxu0 %vm403_vm0, %v270_v4  ;;  %v345_v27 = vld [vmem:[%s2673_s7 + $0x260] sm:$0xff]  ;;  %v346_v30 = vld [vmem:[%s2673_s7 + $0x268] sm:$0xff]  ;;  %v347_v32 = vld [vmem:[%s2673_s7 + $0x270] sm:$0xff] }
  0x18   : > { %2402 = vmatmul.msk.f32.gmra.mxu2 %vm403_vm0, %v334_v5  ;;  %v284_v33 = vld [vmem:[%s2673_s7 + $0x78] sm:$0xff]  ;;  %v285_v37 = vld [vmem:[%s2673_s7 + $0x80] sm:$0xff]  ;;  %v286_v43 = vld [vmem:[%s2673_s7 + $0x88] sm:$0xff] }
  0x19   : > { %v348_v34 = vld [vmem:[%s2673_s7 + $0x278] sm:$0xff]  ;;  %v349_v38 = vld [vmem:[%s2673_s7 + $0x280] sm:$0xff]  ;;  %v350_v44 = vld [vmem:[%s2673_s7 + $0x288] sm:$0xff] }
  0x1a   : > { %v287_v49 = vld [vmem:[%s2673_s7 + $0x90] sm:$0xff]  ;;  %v288_v55 = vld [vmem:[%s2673_s7 + $0x98] sm:$0xff]  ;;  %v289_v61 = vld [vmem:[%s2673_s7 + $0xa0] sm:$0xff] }
  0x1b   : > { %v351_v50 = vld [vmem:[%s2673_s7 + $0x290] sm:$0xff]  ;;  %v352_v56 = vld [vmem:[%s2673_s7 + $0x298] sm:$0xff]  ;;  %v353_v62 = vld [vmem:[%s2673_s7 + $0x2a0] sm:$0xff] }
  0x1c   : > { %v290_v3 = vld [vmem:[%s2673_s7 + $0xa8] sm:$0xff] }
  0x1d   : > { %v354_v4 = vld [vmem:[%s2673_s7 + $0x2a8] sm:$0xff] }
  0x1e   : > { %v358_v28 = vld [vmem:[%s2673_s7 + $0x2c8] sm:$0xff] }
  0x1f   : > { %2339 = vmatmul.msk.f32.gmra.mxu0 %vm403_vm0, %v271_v6 }
  0x20   : > { %2403 = vmatmul.msk.f32.gmra.mxu2 %vm403_vm0, %v335_v7 }
  0x27   : > { %2340 = vmatmul.msk.f32.gmra.mxu0 %vm403_vm0, %v272_v8 }
  0x28   : > { %2404 = vmatmul.msk.f32.gmra.mxu2 %vm403_vm0, %v336_v9  ;;  %v291_v9 = vld [vmem:[%s2673_s7 + $0xb0] sm:$0xff] }
  0x2f   : > { %2341 = vmatmul.msk.f32.gmra.mxu0 %vm403_vm0, %v273_v10  ;;  %v355_v10 = vld [vmem:[%s2673_s7 + $0x2b0] sm:$0xff] }
  0x30   : > { %2405 = vmatmul.msk.f32.gmra.mxu2 %vm403_vm0, %v337_v11 }
  0x37   : > { %2342 = vmatmul.msk.f32.gmra.mxu0 %vm403_vm0, %v274_v12 }
  0x38   : > { %2406 = vmatmul.msk.f32.gmra.mxu2 %vm403_vm0, %v338_v13 }
  0x3f   : > { %2343 = vmatmul.msk.f32.gmra.mxu0 %vm403_vm0, %v275_v14 }
  0x40   : > { %2407 = vmatmul.msk.f32.gmra.mxu2 %vm403_vm0, %v339_v15  ;;  %v292_v15 = vld [vmem:[%s2673_s7 + $0xb8] sm:$0xff] }
  0x47   : > { %2344 = vmatmul.msk.f32.gmra.mxu0 %vm403_vm0, %v276_v16  ;;  %v356_v16 = vld [vmem:[%s2673_s7 + $0x2b8] sm:$0xff] }
  0x48   : > { %2408 = vmatmul.msk.f32.gmra.mxu2 %vm403_vm0, %v340_v17 }
  0x4f   : > { %2345 = vmatmul.msk.f32.gmra.mxu0 %vm403_vm0, %v277_v18 }
  0x50   : > { %2409 = vmatmul.msk.f32.gmra.mxu2 %vm403_vm0, %v341_v19 }
  0x57   : > { %2346 = vmatmul.msk.f32.gmra.mxu0 %vm403_vm0, %v278_v20 }
  0x58   : > { %2410 = vmatmul.msk.f32.gmra.mxu2 %vm403_vm0, %v342_v21  ;;  %v293_v21 = vld [vmem:[%s2673_s7 + $0xc0] sm:$0xff] }
  0x5f   : > { %2347 = vmatmul.msk.f32.gmra.mxu0 %vm403_vm0, %v279_v22  ;;  %v357_v22 = vld [vmem:[%s2673_s7 + $0x2c0] sm:$0xff] }
  0x60   : > { %2411 = vmatmul.msk.f32.gmra.mxu2 %vm403_vm0, %v343_v23 }
  0x67   : > { %2348 = vmatmul.msk.f32.gmra.mxu0 %vm403_vm0, %v280_v24 }
  0x68   : > { %2412 = vmatmul.msk.f32.gmra.mxu2 %vm403_vm0, %v344_v25 }
  0x6f   : > { %2349 = vmatmul.msk.f32.gmra.mxu0 %vm403_vm0, %v281_v26 }
  0x70   : > { %2413 = vmatmul.msk.f32.gmra.mxu2 %vm403_vm0, %v345_v27  ;;  %v294_v27 = vld [vmem:[%s2673_s7 + $0xc8] sm:$0xff] }
  0x77   : > { %2350 = vmatmul.msk.f32.gmra.mxu0 %vm403_vm0, %v282_v29 }
  0x78   : > { %2414 = vmatmul.msk.f32.gmra.mxu2 %vm403_vm0, %v346_v30 }
  0x7f   : > { %2351 = vmatmul.msk.f32.gmra.mxu0 %vm403_vm0, %v283_v31 }
  0x80   : > { %2415 = vmatmul.msk.f32.gmra.mxu2 %vm403_vm0, %v347_v32 }
  0x87   : > { %2352 = vmatmul.msk.f32.gmra.mxu0 %vm403_vm0, %v284_v33  ;;  %v295_v33 = vld [vmem:[%s2673_s7 + $0xd0] sm:$0xff] }
  0x88   : > { %2416 = vmatmul.msk.f32.gmra.mxu2 %vm403_vm0, %v348_v34  ;;  %v359_v34 = vld [vmem:[%s2673_s7 + $0x2d0] sm:$0xff] }
  0x8c   : > { %v805_v36 = vpop.f32.mrf.mxu0 }
  0x8d   : > { %v806_v39 = vadd.f32 %v2745_v35, %v805_v36 }
  0x8f   : > { %1190 = vst.msk [vmem:[%s2751_s14] sm:$0xff] %vm1189_vm1, %v806_v39  ;;  %2353 = vmatmul.msk.f32.gmra.mxu0 %vm403_vm0, %v285_v37  ;;  %2465 = vmatmul.msk.f32.vlgmr.msra.gmra.mxu1 %vm1189_vm1, %v806_v39 }
  0x90   : > { %2417 = vmatmul.msk.f32.gmra.mxu2 %vm403_vm0, %v349_v38 }
  0x93   : > { %v997_v40 = vpop.f32.mrf.mxu2 }
  0x94   : > { %v2762_v41 = vadd.f32 %v2745_v35, %v997_v40  ;;  %v808_v42 = vpop.f32.mrf.mxu0  ;;  %v296_v40 = vld [vmem:[%s2673_s7 + $0xd8] sm:$0xff] }
  0x95   : > { %v809_v45 = vadd.f32 %v2745_v35, %v808_v42  ;;  %v360_v42 = vld [vmem:[%s2673_s7 + $0x2d8] sm:$0xff] }
  0x96   : > { %1254 = vst.msk [vmem:[%s2751_s14 + $0x200] sm:$0xff] %vm1189_vm1, %v2762_v41 }
  0x97   : > { %1191 = vst.msk [vmem:[%s2751_s14 + $0x8] sm:$0xff] %vm1189_vm1, %v809_v45  ;;  %2354 = vmatmul.msk.f32.gmra.mxu0 %vm403_vm0, %v286_v43  ;;  %2466 = vmatmul.msk.f32.gmra.mxu1 %vm1189_vm1, %v809_v45 }
  0x98   : > { %2418 = vmatmul.msk.f32.gmra.mxu2 %vm403_vm0, %v350_v44 }
  0x9b   : > { %v1000_v46 = vpop.f32.mrf.mxu2 }
  0x9c   : > { %v1001_v47 = vadd.f32 %v2745_v35, %v1000_v46  ;;  %v811_v48 = vpop.f32.mrf.mxu0 }
  0x9d   : > { %v812_v51 = vadd.f32 %v2745_v35, %v811_v48  ;;  %v361_v48 = vld [vmem:[%s2673_s7 + $0x2e0] sm:$0xff] }
  0x9e   : > { %1255 = vst.msk [vmem:[%s2751_s14 + $0x208] sm:$0xff] %vm1189_vm1, %v1001_v47  ;;  %2530 = vmatmul.msk.f32.vlgmr.msra.gmra.mxu3 %vm1189_vm1, %v1001_v47  ;;  %v297_v47 = vld [vmem:[%s2673_s7 + $0xe0] sm:$0xff] }
  0x9f   : > { %1192 = vst.msk [vmem:[%s2751_s14 + $0x10] sm:$0xff] %vm1189_vm1, %v812_v51  ;;  %2355 = vmatmul.msk.f32.gmra.mxu0 %vm403_vm0, %v287_v49  ;;  %2467 = vmatmul.msk.f32.gmra.mxu1 %vm1189_vm1, %v812_v51 }
  0xa0   : > { %2419 = vmatmul.msk.f32.gmra.mxu2 %vm403_vm0, %v351_v50 }
  0xa3   : > { %v1003_v52 = vpop.f32.mrf.mxu2 }
  0xa4   : > { %v1004_v53 = vadd.f32 %v2745_v35, %v1003_v52  ;;  %v814_v54 = vpop.f32.mrf.mxu0 }
  0xa5   : > { %v815_v57 = vadd.f32 %v2745_v35, %v814_v54  ;;  %v362_v54 = vld [vmem:[%s2673_s7 + $0x2e8] sm:$0xff] }
  0xa6   : > { %1256 = vst.msk [vmem:[%s2751_s14 + $0x210] sm:$0xff] %vm1189_vm1, %v1004_v53  ;;  %2531 = vmatmul.msk.f32.gmra.mxu3 %vm1189_vm1, %v1004_v53  ;;  %v298_v53 = vld [vmem:[%s2673_s7 + $0xe8] sm:$0xff] }
  0xa7   : > { %1193 = vst.msk [vmem:[%s2751_s14 + $0x18] sm:$0xff] %vm1189_vm1, %v815_v57  ;;  %2356 = vmatmul.msk.f32.gmra.mxu0 %vm403_vm0, %v288_v55  ;;  %2468 = vmatmul.msk.f32.gmra.mxu1 %vm1189_vm1, %v815_v57 }
  0xa8   : > { %2420 = vmatmul.msk.f32.gmra.mxu2 %vm403_vm0, %v352_v56 }
  0xab   : > { %v1006_v58 = vpop.f32.mrf.mxu2 }
  0xac   : > { %v1007_v59 = vadd.f32 %v2745_v35, %v1006_v58  ;;  %v817_v60 = vpop.f32.mrf.mxu0 }
  0xad   : > { %v818_v63 = vadd.f32 %v2745_v35, %v817_v60  ;;  %v363_v60 = vld [vmem:[%s2673_s7 + $0x2f0] sm:$0xff] }
  0xae   : > { %1257 = vst.msk [vmem:[%s2751_s14 + $0x218] sm:$0xff] %vm1189_vm1, %v1007_v59  ;;  %2532 = vmatmul.msk.f32.gmra.mxu3 %vm1189_vm1, %v1007_v59  ;;  %v299_v59 = vld [vmem:[%s2673_s7 + $0xf0] sm:$0xff] }
  0xaf   : > { %1194 = vst.msk [vmem:[%s2751_s14 + $0x20] sm:$0xff] %vm1189_vm1, %v818_v63  ;;  %2357 = vmatmul.msk.f32.gmra.mxu0 %vm403_vm0, %v289_v61  ;;  %2469 = vmatmul.msk.f32.gmra.mxu1 %vm1189_vm1, %v818_v63 }
  0xb0   : > { %2421 = vmatmul.msk.f32.gmra.mxu2 %vm403_vm0, %v353_v62 }
  0xb3   : > { %v1009_v0 = vpop.f32.mrf.mxu2 }
  0xb4   : > { %v1010_v1 = vadd.f32 %v2745_v35, %v1009_v0  ;;  %v820_v2 = vpop.f32.mrf.mxu0 }
  0xb5   : > { %v821_v5 = vadd.f32 %v2745_v35, %v820_v2  ;;  %v364_v2 = vld [vmem:[%s2673_s7 + $0x2f8] sm:$0xff] }
  0xb6   : > { %1258 = vst.msk [vmem:[%s2751_s14 + $0x220] sm:$0xff] %vm1189_vm1, %v1010_v1  ;;  %2533 = vmatmul.msk.f32.gmra.mxu3 %vm1189_vm1, %v1010_v1  ;;  %v300_v1 = vld [vmem:[%s2673_s7 + $0xf8] sm:$0xff] }
  0xb7   : > { %1195 = vst.msk [vmem:[%s2751_s14 + $0x28] sm:$0xff] %vm1189_vm1, %v821_v5  ;;  %2358 = vmatmul.msk.f32.gmra.mxu0 %vm403_vm0, %v290_v3  ;;  %2470 = vmatmul.msk.f32.gmra.mxu1 %vm1189_vm1, %v821_v5  ;;  %v2946_v5 = vld [vmem:[%s3873_s4] ss:$0 sm:$0xff] }
  0xb8   : > { %2422 = vmatmul.msk.f32.gmra.mxu2 %vm403_vm0, %v354_v4 }
  0xbb   : > { %v1012_v6 = vpop.f32.mrf.mxu2 }
  0xbc   : > { %v1013_v7 = vadd.f32 %v2745_v35, %v1012_v6  ;;  %v823_v8 = vpop.f32.mrf.mxu0 }
  0xbd   : > { %v824_v11 = vadd.f32 %v2745_v35, %v823_v8  ;;  %v301_v8 = vld [vmem:[%s2673_s7 + $0x100] sm:$0xff] }
  0xbe   : > { %1259 = vst.msk [vmem:[%s2751_s14 + $0x228] sm:$0xff] %vm1189_vm1, %v1013_v7  ;;  %2534 = vmatmul.msk.f32.gmra.mxu3 %vm1189_vm1, %v1013_v7 }
  0xbf   : > { %1196 = vst.msk [vmem:[%s2751_s14 + $0x30] sm:$0xff] %vm1189_vm1, %v824_v11  ;;  %2359 = vmatmul.msk.f32.gmra.mxu0 %vm403_vm0, %v291_v9  ;;  %2471 = vmatmul.msk.f32.gmra.mxu1 %vm1189_vm1, %v824_v11  ;;  %v365_v9 = vld [vmem:[%s2673_s7 + $0x300] sm:$0xff] }
  0xc0   : > { %2423 = vmatmul.msk.f32.gmra.mxu2 %vm403_vm0, %v355_v10 }
  0xc3   : > { %v1015_v12 = vpop.f32.mrf.mxu2 }
  0xc4   : > { %v1016_v13 = vadd.f32 %v2745_v35, %v1015_v12  ;;  %v826_v14 = vpop.f32.mrf.mxu0 }
  0xc5   : > { %v827_v17 = vadd.f32 %v2745_v35, %v826_v14 }
  0xc6   : > { %1260 = vst.msk [vmem:[%s2751_s14 + $0x230] sm:$0xff] %vm1189_vm1, %v1016_v13  ;;  %2535 = vmatmul.msk.f32.gmra.mxu3 %vm1189_vm1, %v1016_v13 }
  0xc7   : > { %1197 = vst.msk [vmem:[%s2751_s14 + $0x38] sm:$0xff] %vm1189_vm1, %v827_v17  ;;  %2360 = vmatmul.msk.f32.gmra.mxu0 %vm403_vm0, %v292_v15  ;;  %2472 = vmatmul.msk.f32.gmra.mxu1 %vm1189_vm1, %v827_v17  ;;  %v366_v17 = vld [vmem:[%s2673_s7 + $0x308] sm:$0xff] }
  0xc8   : > { %2424 = vmatmul.msk.f32.gmra.mxu2 %vm403_vm0, %v356_v16  ;;  %v302_v16 = vld [vmem:[%s2673_s7 + $0x108] sm:$0xff] }
  0xcb   : > { %v1018_v18 = vpop.f32.mrf.mxu2 }
  0xcc   : > { %v1019_v19 = vadd.f32 %v2745_v35, %v1018_v18  ;;  %v829_v20 = vpop.f32.mrf.mxu0 }
  0xcd   : > { %v830_v23 = vadd.f32 %v2745_v35, %v829_v20 }
  0xce   : > { %1261 = vst.msk [vmem:[%s2751_s14 + $0x238] sm:$0xff] %vm1189_vm1, %v1019_v19  ;;  %2536 = vmatmul.msk.f32.gmra.mxu3 %vm1189_vm1, %v1019_v19 }
  0xcf   : > { %1198 = vst.msk [vmem:[%s2751_s14 + $0x40] sm:$0xff] %vm1189_vm1, %v830_v23  ;;  %2361 = vmatmul.msk.f32.gmra.mxu0 %vm403_vm0, %v293_v21  ;;  %2473 = vmatmul.msk.f32.gmra.mxu1 %vm1189_vm1, %v830_v23 }
  0xd0   : > { %2425 = vmatmul.msk.f32.gmra.mxu2 %vm403_vm0, %v357_v22 }
  0xd3   : > { %v1021_v24 = vpop.f32.mrf.mxu2 }
  0xd4   : > { %v1022_v25 = vadd.f32 %v2745_v35, %v1021_v24  ;;  %v832_v26 = vpop.f32.mrf.mxu0  ;;  %v303_v24 = vld [vmem:[%s2673_s7 + $0x110] sm:$0xff] }
  0xd5   : > { %v833_v29 = vadd.f32 %v2745_v35, %v832_v26 }
  0xd6   : > { %1262 = vst.msk [vmem:[%s2751_s14 + $0x240] sm:$0xff] %vm1189_vm1, %v1022_v25  ;;  %2537 = vmatmul.msk.f32.gmra.mxu3 %vm1189_vm1, %v1022_v25  ;;  %v367_v25 = vld [vmem:[%s2673_s7 + $0x310] sm:$0xff] }
  0xd7   : > { %1199 = vst.msk [vmem:[%s2751_s14 + $0x48] sm:$0xff] %vm1189_vm1, %v833_v29  ;;  %2362 = vmatmul.msk.f32.gmra.mxu0 %vm403_vm0, %v294_v27  ;;  %2474 = vmatmul.msk.f32.gmra.mxu1 %vm1189_vm1, %v833_v29 }
  0xd8   : > { %2426 = vmatmul.msk.f32.gmra.mxu2 %vm403_vm0, %v358_v28 }
  0xdb   : > { %v1024_v30 = vpop.f32.mrf.mxu2 }
  0xdc   : > { %v1025_v31 = vadd.f32 %v2745_v35, %v1024_v30  ;;  %v835_v32 = vpop.f32.mrf.mxu0 }
  0xdd   : > { %v836_v36 = vadd.f32 %v2745_v35, %v835_v32 }
  0xde   : > { %1263 = vst.msk [vmem:[%s2751_s14 + $0x248] sm:$0xff] %vm1189_vm1, %v1025_v31  ;;  %2538 = vmatmul.msk.f32.gmra.mxu3 %vm1189_vm1, %v1025_v31 }
  0xdf   : > { %1200 = vst.msk [vmem:[%s2751_s14 + $0x50] sm:$0xff] %vm1189_vm1, %v836_v36  ;;  %2363 = vmatmul.msk.f32.gmra.mxu0 %vm403_vm0, %v295_v33  ;;  %2475 = vmatmul.msk.f32.gmra.mxu1 %vm1189_vm1, %v836_v36  ;;  %v368_v36 = vld [vmem:[%s2673_s7 + $0x318] sm:$0xff] }
  0xe0   : > { %2427 = vmatmul.msk.f32.gmra.mxu2 %vm403_vm0, %v359_v34  ;;  %v304_v34 = vld [vmem:[%s2673_s7 + $0x118] sm:$0xff] }
  0xe3   : > { %v1027_v37 = vpop.f32.mrf.mxu2 }
  0xe4   : > { %v1028_v38 = vadd.f32 %v2745_v35, %v1027_v37  ;;  %v838_v39 = vpop.f32.mrf.mxu0 }
  0xe5   : > { %v839_v43 = vadd.f32 %v2745_v35, %v838_v39 }
  0xe6   : > { %1264 = vst.msk [vmem:[%s2751_s14 + $0x250] sm:$0xff] %vm1189_vm1, %v1028_v38  ;;  %2539 = vmatmul.msk.f32.gmra.mxu3 %vm1189_vm1, %v1028_v38 }
  0xe7   : > { %1201 = vst.msk [vmem:[%s2751_s14 + $0x58] sm:$0xff] %vm1189_vm1, %v839_v43  ;;  %2364 = vmatmul.msk.f32.gmra.mxu0 %vm403_vm0, %v296_v40  ;;  %2476 = vmatmul.msk.f32.gmra.mxu1 %vm1189_vm1, %v839_v43 }
  0xe8   : > { %2428 = vmatmul.msk.f32.gmra.mxu2 %vm403_vm0, %v360_v42 }
  0xeb   : > { %v1030_v44 = vpop.f32.mrf.mxu2 }
  0xec   : > { %v1031_v45 = vadd.f32 %v2745_v35, %v1030_v44  ;;  %v841_v46 = vpop.f32.mrf.mxu0 }
  0xed   : > { %v842_v49 = vadd.f32 %v2745_v35, %v841_v46  ;;  %v305_v46 = vld [vmem:[%s2673_s7 + $0x120] sm:$0xff] }
  0xee   : > { %1265 = vst.msk [vmem:[%s2751_s14 + $0x258] sm:$0xff] %vm1189_vm1, %v1031_v45  ;;  %2540 = vmatmul.msk.f32.gmra.mxu3 %vm1189_vm1, %v1031_v45 }
  0xef   : > { %1202 = vst.msk [vmem:[%s2751_s14 + $0x60] sm:$0xff] %vm1189_vm1, %v842_v49  ;;  %2365 = vmatmul.msk.f32.gmra.mxu0 %vm403_vm0, %v297_v47  ;;  %2477 = vmatmul.msk.f32.gmra.mxu1 %vm1189_vm1, %v842_v49  ;;  %v369_v47 = vld [vmem:[%s2673_s7 + $0x320] sm:$0xff] }
  0xf0   : > { %2429 = vmatmul.msk.f32.gmra.mxu2 %vm403_vm0, %v361_v48 }
  0xf3   : > { %v1033_v50 = vpop.f32.mrf.mxu2 }
  0xf4   : > { %v1034_v51 = vadd.f32 %v2745_v35, %v1033_v50  ;;  %v844_v52 = vpop.f32.mrf.mxu0 }
  0xf5   : > { %v845_v55 = vadd.f32 %v2745_v35, %v844_v52 }
  0xf6   : > { %1266 = vst.msk [vmem:[%s2751_s14 + $0x260] sm:$0xff] %vm1189_vm1, %v1034_v51  ;;  %2541 = vmatmul.msk.f32.gmra.mxu3 %vm1189_vm1, %v1034_v51 }
  0xf7   : > { %1203 = vst.msk [vmem:[%s2751_s14 + $0x68] sm:$0xff] %vm1189_vm1, %v845_v55  ;;  %2366 = vmatmul.msk.f32.gmra.mxu0 %vm403_vm0, %v298_v53  ;;  %2478 = vmatmul.msk.f32.gmra.mxu1 %vm1189_vm1, %v845_v55 }
  0xf8   : > { %2430 = vmatmul.msk.f32.gmra.mxu2 %vm403_vm0, %v362_v54 }
  0xfb   : > { %v1036_v56 = vpop.f32.mrf.mxu2 }
  0xfc   : > { %v1037_v57 = vadd.f32 %v2745_v35, %v1036_v56  ;;  %v847_v58 = vpop.f32.mrf.mxu0  ;;  %v306_v56 = vld [vmem:[%s2673_s7 + $0x128] sm:$0xff] }
  0xfd   : > { %v848_v61 = vadd.f32 %v2745_v35, %v847_v58 }
  0xfe   : > { %1267 = vst.msk [vmem:[%s2751_s14 + $0x268] sm:$0xff] %vm1189_vm1, %v1037_v57  ;;  %2542 = vmatmul.msk.f32.gmra.mxu3 %vm1189_vm1, %v1037_v57  ;;  %v370_v57 = vld [vmem:[%s2673_s7 + $0x328] sm:$0xff] }
  0xff   : > { %1204 = vst.msk [vmem:[%s2751_s14 + $0x70] sm:$0xff] %vm1189_vm1, %v848_v61  ;;  %2367 = vmatmul.msk.f32.gmra.mxu0 %vm403_vm0, %v299_v59  ;;  %2479 = vmatmul.msk.f32.gmra.mxu1 %vm1189_vm1, %v848_v61 }
 0x100   : > { %2431 = vmatmul.msk.f32.gmra.mxu2 %vm403_vm0, %v363_v60 }
 0x103   : > { %v1039_v62 = vpop.f32.mrf.mxu2 }
 0x104   : > { %v1040_v63 = vadd.f32 %v2745_v35, %v1039_v62  ;;  %v850_v0 = vpop.f32.mrf.mxu0 }
 0x105   : > { %v851_v3 = vadd.f32 %v2745_v35, %v850_v0 }
 0x106   : > { %1268 = vst.msk [vmem:[%s2751_s14 + $0x270] sm:$0xff] %vm1189_vm1, %v1040_v63  ;;  %2543 = vmatmul.msk.f32.gmra.mxu3 %vm1189_vm1, %v1040_v63 }
 0x107   : > { %1205 = vst.msk [vmem:[%s2751_s14 + $0x78] sm:$0xff] %vm1189_vm1, %v851_v3  ;;  %2368 = vmatmul.msk.f32.gmra.mxu0 %vm403_vm0, %v300_v1  ;;  %2480 = vmatmul.msk.f32.gmra.mxu1 %vm1189_vm1, %v851_v3  ;;  %v371_v3 = vld [vmem:[%s2673_s7 + $0x330] sm:$0xff] }
 0x108   : > { %2432 = vmatmul.msk.f32.gmra.mxu2 %vm403_vm0, %v364_v2  ;;  %v307_v2 = vld [vmem:[%s2673_s7 + $0x130] sm:$0xff] }
 0x10b   : > { %v1042_v4 = vpop.f32.mrf.mxu2 }
 0x10c   : > { %v1043_v6 = vadd.f32 %v2745_v35, %v1042_v4  ;;  %v853_v7 = vpop.f32.mrf.mxu0  ;;  %v1724_v11 = vpop.f32.mrf.mxu1 }
 0x10d   : > { %v854_v10 = vadd.f32 %v2745_v35, %v853_v7  ;;  %v1725_v12 = vadd.f32 %v2946_v5, %v1724_v11 }
 0x10e   : > { %1269 = vst.msk [vmem:[%s2751_s14 + $0x278] sm:$0xff] %vm1189_vm1, %v1043_v6  ;;  %2544 = vmatmul.msk.f32.gmra.mxu3 %vm1189_vm1, %v1043_v6 }
 0x10f   : > { %1206 = vst.msk [vmem:[%s2751_s14 + $0x80] sm:$0xff] %vm1189_vm1, %v854_v10  ;;  %2369 = vmatmul.msk.f32.gmra.mxu0 %vm403_vm0, %v301_v8  ;;  %2481 = vmatmul.msk.f32.gmra.mxu1 %vm1189_vm1, %v854_v10 }
 0x110   : > { %2433 = vmatmul.msk.f32.gmra.mxu2 %vm403_vm0, %v365_v9  ;;  %2108 = vst.msk [vmem:[%s2958_s19] sm:$0xff] %vm403_vm0, %v1725_v12 }
 0x113   : > { %v1045_v13 = vpop.f32.mrf.mxu2 }
 0x114   : > { %v1046_v14 = vadd.f32 %v2745_v35, %v1045_v13  ;;  %v856_v15 = vpop.f32.mrf.mxu0  ;;  %v1727_v19 = vpop.f32.mrf.mxu1  ;;  %v308_v13 = vld [vmem:[%s2673_s7 + $0x138] sm:$0xff] }
 0x115   : > { %v857_v18 = vadd.f32 %v2745_v35, %v856_v15  ;;  %v1728_v20 = vadd.f32 %v2946_v5, %v1727_v19 }
 0x116   : > { %1270 = vst.msk [vmem:[%s2751_s14 + $0x280] sm:$0xff] %vm1189_vm1, %v1046_v14  ;;  %2545 = vmatmul.msk.f32.gmra.mxu3 %vm1189_vm1, %v1046_v14  ;;  %v372_v14 = vld [vmem:[%s2673_s7 + $0x338] sm:$0xff] }
 0x117   : > { %1207 = vst.msk [vmem:[%s2751_s14 + $0x88] sm:$0xff] %vm1189_vm1, %v857_v18  ;;  %2370 = vmatmul.msk.f32.gmra.mxu0 %vm403_vm0, %v302_v16  ;;  %2482 = vmatmul.msk.f32.gmra.mxu1 %vm1189_vm1, %v857_v18 }
 0x118   : > { %2434 = vmatmul.msk.f32.gmra.mxu2 %vm403_vm0, %v366_v17  ;;  %2109 = vst.msk [vmem:[%s2958_s19 + $0x8] sm:$0xff] %vm403_vm0, %v1728_v20 }
 0x11b   : > { %v1048_v21 = vpop.f32.mrf.mxu2 }
 0x11c   : > { %v1049_v22 = vadd.f32 %v2745_v35, %v1048_v21  ;;  %v859_v23 = vpop.f32.mrf.mxu0  ;;  %v1730_v27 = vpop.f32.mrf.mxu1 }
 0x11d   : > { %v860_v26 = vadd.f32 %v2745_v35, %v859_v23  ;;  %v1731_v28 = vadd.f32 %v2946_v5, %v1730_v27  ;;  %v309_v23 = vld [vmem:[%s2673_s7 + $0x140] sm:$0xff] }
 0x11e   : > { %1271 = vst.msk [vmem:[%s2751_s14 + $0x288] sm:$0xff] %vm1189_vm1, %v1049_v22  ;;  %2546 = vmatmul.msk.f32.gmra.mxu3 %vm1189_vm1, %v1049_v22 }
 0x11f   : > { %1208 = vst.msk [vmem:[%s2751_s14 + $0x90] sm:$0xff] %vm1189_vm1, %v860_v26  ;;  %2371 = vmatmul.msk.f32.gmra.mxu0 %vm403_vm0, %v303_v24  ;;  %2483 = vmatmul.msk.f32.gmra.mxu1 %vm1189_vm1, %v860_v26  ;;  %v373_v24 = vld [vmem:[%s2673_s7 + $0x340] sm:$0xff] }
 0x120   : > { %2435 = vmatmul.msk.f32.gmra.mxu2 %vm403_vm0, %v367_v25  ;;  %2110 = vst.msk [vmem:[%s2958_s19 + $0x10] sm:$0xff] %vm403_vm0, %v1731_v28 }
 0x121   : > { %v1919_v29 = vpop.f32.mrf.mxu3 }
 0x122   : > { %v1920_v30 = vadd.f32 %v2946_v5, %v1919_v29 }
 0x123   : > { %v1051_v31 = vpop.f32.mrf.mxu2 }
 0x124   : > { %2173 = vst.msk [vmem:[%s2958_s19 + $0x208] sm:$0xff] %vm403_vm0, %v1920_v30  ;;  %v1052_v32 = vadd.f32 %v2745_v35, %v1051_v31  ;;  %v862_v33 = vpop.f32.mrf.mxu0  ;;  %v1733_v38 = vpop.f32.mrf.mxu1 }
 0x125   : > { %v863_v37 = vadd.f32 %v2745_v35, %v862_v33  ;;  %v1734_v39 = vadd.f32 %v2946_v5, %v1733_v38  ;;  %v310_v33 = vld [vmem:[%s2673_s7 + $0x148] sm:$0xff] }
 0x126   : > { %1272 = vst.msk [vmem:[%s2751_s14 + $0x290] sm:$0xff] %vm1189_vm1, %v1052_v32  ;;  %2547 = vmatmul.msk.f32.gmra.mxu3 %vm1189_vm1, %v1052_v32 }
 0x127   : > { %1209 = vst.msk [vmem:[%s2751_s14 + $0x98] sm:$0xff] %vm1189_vm1, %v863_v37  ;;  %2372 = vmatmul.msk.f32.gmra.mxu0 %vm403_vm0, %v304_v34  ;;  %2484 = vmatmul.msk.f32.gmra.mxu1 %vm1189_vm1, %v863_v37  ;;  %v374_v34 = vld [vmem:[%s2673_s7 + $0x348] sm:$0xff] }
 0x128   : > { %2436 = vmatmul.msk.f32.gmra.mxu2 %vm403_vm0, %v368_v36  ;;  %2111 = vst.msk [vmem:[%s2958_s19 + $0x18] sm:$0xff] %vm403_vm0, %v1734_v39 }
 0x129   : > { %v1922_v40 = vpop.f32.mrf.mxu3 }
 0x12a   : > { %v1923_v42 = vadd.f32 %v2946_v5, %v1922_v40 }
 0x12b   : > { %v1054_v43 = vpop.f32.mrf.mxu2 }
 0x12c   : > { %2174 = vst.msk [vmem:[%s2958_s19 + $0x210] sm:$0xff] %vm403_vm0, %v1923_v42  ;;  %v1055_v44 = vadd.f32 %v2745_v35, %v1054_v43  ;;  %v865_v45 = vpop.f32.mrf.mxu0  ;;  %v1736_v49 = vpop.f32.mrf.mxu1 }
 0x12d   : > { %v866_v48 = vadd.f32 %v2745_v35, %v865_v45  ;;  %v1737_v50 = vadd.f32 %v2946_v5, %v1736_v49  ;;  %v311_v45 = vld [vmem:[%s2673_s7 + $0x150] sm:$0xff] }
 0x12e   : > { %1273 = vst.msk [vmem:[%s2751_s14 + $0x298] sm:$0xff] %vm1189_vm1, %v1055_v44  ;;  %2548 = vmatmul.msk.f32.gmra.mxu3 %vm1189_vm1, %v1055_v44 }
 0x12f   : > { %1210 = vst.msk [vmem:[%s2751_s14 + $0xa0] sm:$0xff] %vm1189_vm1, %v866_v48  ;;  %2373 = vmatmul.msk.f32.gmra.mxu0 %vm403_vm0, %v305_v46  ;;  %2485 = vmatmul.msk.f32.gmra.mxu1 %vm1189_vm1, %v866_v48  ;;  %v375_v46 = vld [vmem:[%s2673_s7 + $0x350] sm:$0xff] }
 0x130   : > { %2437 = vmatmul.msk.f32.gmra.mxu2 %vm403_vm0, %v369_v47  ;;  %2112 = vst.msk [vmem:[%s2958_s19 + $0x20] sm:$0xff] %vm403_vm0, %v1737_v50 }
 0x131   : > { %v1925_v51 = vpop.f32.mrf.mxu3 }
 0x132   : > { %v1926_v52 = vadd.f32 %v2946_v5, %v1925_v51 }
 0x133   : > { %v1057_v53 = vpop.f32.mrf.mxu2 }
 0x134   : > { %2175 = vst.msk [vmem:[%s2958_s19 + $0x218] sm:$0xff] %vm403_vm0, %v1926_v52  ;;  %v1058_v54 = vadd.f32 %v2745_v35, %v1057_v53  ;;  %v868_v55 = vpop.f32.mrf.mxu0  ;;  %v1739_v59 = vpop.f32.mrf.mxu1 }
 0x135   : > { %v869_v58 = vadd.f32 %v2745_v35, %v868_v55  ;;  %v1740_v60 = vadd.f32 %v2946_v5, %v1739_v59  ;;  %v312_v55 = vld [vmem:[%s2673_s7 + $0x158] sm:$0xff] }
 0x136   : > { %1274 = vst.msk [vmem:[%s2751_s14 + $0x2a0] sm:$0xff] %vm1189_vm1, %v1058_v54  ;;  %2549 = vmatmul.msk.f32.gmra.mxu3 %vm1189_vm1, %v1058_v54 }
 0x137   : > { %1211 = vst.msk [vmem:[%s2751_s14 + $0xa8] sm:$0xff] %vm1189_vm1, %v869_v58  ;;  %2374 = vmatmul.msk.f32.gmra.mxu0 %vm403_vm0, %v306_v56  ;;  %2486 = vmatmul.msk.f32.gmra.mxu1 %vm1189_vm1, %v869_v58  ;;  %v376_v56 = vld [vmem:[%s2673_s7 + $0x358] sm:$0xff] }
 0x138   : > { %2438 = vmatmul.msk.f32.gmra.mxu2 %vm403_vm0, %v370_v57  ;;  %2113 = vst.msk [vmem:[%s2958_s19 + $0x28] sm:$0xff] %vm403_vm0, %v1740_v60 }
 0x139   : > { %v1928_v61 = vpop.f32.mrf.mxu3 }
 0x13a   : > { %v1929_v62 = vadd.f32 %v2946_v5, %v1928_v61 }
 0x13b   : > { %v1060_v63 = vpop.f32.mrf.mxu2 }
 0x13c   : > { %2176 = vst.msk [vmem:[%s2958_s19 + $0x220] sm:$0xff] %vm403_vm0, %v1929_v62  ;;  %v1061_v0 = vadd.f32 %v2745_v35, %v1060_v63  ;;  %v871_v1 = vpop.f32.mrf.mxu0  ;;  %v1742_v6 = vpop.f32.mrf.mxu1 }
 0x13d   : > { %v872_v4 = vadd.f32 %v2745_v35, %v871_v1  ;;  %v1743_v7 = vadd.f32 %v2946_v5, %v1742_v6  ;;  %v313_v1 = vld [vmem:[%s2673_s7 + $0x160] sm:$0xff] }
 0x13e   : > { %1275 = vst.msk [vmem:[%s2751_s14 + $0x2a8] sm:$0xff] %vm1189_vm1, %v1061_v0  ;;  %2550 = vmatmul.msk.f32.gmra.mxu3 %vm1189_vm1, %v1061_v0 }
 0x13f   : > { %1212 = vst.msk [vmem:[%s2751_s14 + $0xb0] sm:$0xff] %vm1189_vm1, %v872_v4  ;;  %2375 = vmatmul.msk.f32.gmra.mxu0 %vm403_vm0, %v307_v2  ;;  %2487 = vmatmul.msk.f32.gmra.mxu1 %vm1189_vm1, %v872_v4  ;;  %v377_v2 = vld [vmem:[%s2673_s7 + $0x360] sm:$0xff] }
 0x140   : > { %2439 = vmatmul.msk.f32.gmra.mxu2 %vm403_vm0, %v371_v3  ;;  %2114 = vst.msk [vmem:[%s2958_s19 + $0x30] sm:$0xff] %vm403_vm0, %v1743_v7 }
 0x141   : > { %v1931_v8 = vpop.f32.mrf.mxu3 }
 0x142   : > { %v1932_v9 = vadd.f32 %v2946_v5, %v1931_v8 }
 0x143   : > { %v1063_v10 = vpop.f32.mrf.mxu2 }
 0x144   : > { %2177 = vst.msk [vmem:[%s2958_s19 + $0x228] sm:$0xff] %vm403_vm0, %v1932_v9  ;;  %v1064_v11 = vadd.f32 %v2745_v35, %v1063_v10  ;;  %v874_v12 = vpop.f32.mrf.mxu0  ;;  %v1745_v16 = vpop.f32.mrf.mxu1 }
 0x145   : > { %v875_v15 = vadd.f32 %v2745_v35, %v874_v12  ;;  %v1746_v17 = vadd.f32 %v2946_v5, %v1745_v16  ;;  %v314_v12 = vld [vmem:[%s2673_s7 + $0x168] sm:$0xff] }
 0x146   : > { %1276 = vst.msk [vmem:[%s2751_s14 + $0x2b0] sm:$0xff] %vm1189_vm1, %v1064_v11  ;;  %2551 = vmatmul.msk.f32.gmra.mxu3 %vm1189_vm1, %v1064_v11 }
 0x147   : > { %1213 = vst.msk [vmem:[%s2751_s14 + $0xb8] sm:$0xff] %vm1189_vm1, %v875_v15  ;;  %2376 = vmatmul.msk.f32.gmra.mxu0 %vm403_vm0, %v308_v13  ;;  %2488 = vmatmul.msk.f32.gmra.mxu1 %vm1189_vm1, %v875_v15  ;;  %v378_v13 = vld [vmem:[%s2673_s7 + $0x368] sm:$0xff] }
 0x148   : > { %2440 = vmatmul.msk.f32.gmra.mxu2 %vm403_vm0, %v372_v14  ;;  %2115 = vst.msk [vmem:[%s2958_s19 + $0x38] sm:$0xff] %vm403_vm0, %v1746_v17 }
 0x149   : > { %v1934_v18 = vpop.f32.mrf.mxu3 }
 0x14a   : > { %v1935_v19 = vadd.f32 %v2946_v5, %v1934_v18 }
 0x14b   : > { %v1066_v20 = vpop.f32.mrf.mxu2 }
 0x14c   : > { %2178 = vst.msk [vmem:[%s2958_s19 + $0x230] sm:$0xff] %vm403_vm0, %v1935_v19  ;;  %v1067_v21 = vadd.f32 %v2745_v35, %v1066_v20  ;;  %v877_v22 = vpop.f32.mrf.mxu0  ;;  %v1748_v26 = vpop.f32.mrf.mxu1 }
 0x14d   : > { %v878_v25 = vadd.f32 %v2745_v35, %v877_v22  ;;  %v1749_v27 = vadd.f32 %v2946_v5, %v1748_v26  ;;  %v315_v22 = vld [vmem:[%s2673_s7 + $0x170] sm:$0xff] }
 0x14e   : > { %1277 = vst.msk [vmem:[%s2751_s14 + $0x2b8] sm:$0xff] %vm1189_vm1, %v1067_v21  ;;  %2552 = vmatmul.msk.f32.gmra.mxu3 %vm1189_vm1, %v1067_v21 }
 0x14f   : > { %1214 = vst.msk [vmem:[%s2751_s14 + $0xc0] sm:$0xff] %vm1189_vm1, %v878_v25  ;;  %2377 = vmatmul.msk.f32.gmra.mxu0 %vm403_vm0, %v309_v23  ;;  %2489 = vmatmul.msk.f32.gmra.mxu1 %vm1189_vm1, %v878_v25  ;;  %v379_v23 = vld [vmem:[%s2673_s7 + $0x370] sm:$0xff] }
 0x150   : > { %2441 = vmatmul.msk.f32.gmra.mxu2 %vm403_vm0, %v373_v24  ;;  %2116 = vst.msk [vmem:[%s2958_s19 + $0x40] sm:$0xff] %vm403_vm0, %v1749_v27 }
 0x151   : > { %v1937_v28 = vpop.f32.mrf.mxu3 }
 0x152   : > { %v1938_v29 = vadd.f32 %v2946_v5, %v1937_v28 }
 0x153   : > { %v1069_v30 = vpop.f32.mrf.mxu2 }
 0x154   : > { %2179 = vst.msk [vmem:[%s2958_s19 + $0x238] sm:$0xff] %vm403_vm0, %v1938_v29  ;;  %v1070_v31 = vadd.f32 %v2745_v35, %v1069_v30  ;;  %v880_v32 = vpop.f32.mrf.mxu0  ;;  %v1751_v37 = vpop.f32.mrf.mxu1 }
 0x155   : > { %v881_v36 = vadd.f32 %v2745_v35, %v880_v32  ;;  %v1752_v38 = vadd.f32 %v2946_v5, %v1751_v37  ;;  %v316_v32 = vld [vmem:[%s2673_s7 + $0x178] sm:$0xff] }
 0x156   : > { %1278 = vst.msk [vmem:[%s2751_s14 + $0x2c0] sm:$0xff] %vm1189_vm1, %v1070_v31  ;;  %2553 = vmatmul.msk.f32.gmra.mxu3 %vm1189_vm1, %v1070_v31 }
 0x157   : > { %1215 = vst.msk [vmem:[%s2751_s14 + $0xc8] sm:$0xff] %vm1189_vm1, %v881_v36  ;;  %2378 = vmatmul.msk.f32.gmra.mxu0 %vm403_vm0, %v310_v33  ;;  %2490 = vmatmul.msk.f32.gmra.mxu1 %vm1189_vm1, %v881_v36  ;;  %v380_v33 = vld [vmem:[%s2673_s7 + $0x378] sm:$0xff] }
 0x158   : > { %2442 = vmatmul.msk.f32.gmra.mxu2 %vm403_vm0, %v374_v34  ;;  %2117 = vst.msk [vmem:[%s2958_s19 + $0x48] sm:$0xff] %vm403_vm0, %v1752_v38 }
 0x159   : > { %v1940_v39 = vpop.f32.mrf.mxu3 }
 0x15a   : > { %v1941_v40 = vadd.f32 %v2946_v5, %v1940_v39 }
 0x15b   : > { %v1072_v42 = vpop.f32.mrf.mxu2 }
 0x15c   : > { %2180 = vst.msk [vmem:[%s2958_s19 + $0x240] sm:$0xff] %vm403_vm0, %v1941_v40  ;;  %v1073_v43 = vadd.f32 %v2745_v35, %v1072_v42  ;;  %v883_v44 = vpop.f32.mrf.mxu0  ;;  %v1754_v48 = vpop.f32.mrf.mxu1 }
 0x15d   : > { %v884_v47 = vadd.f32 %v2745_v35, %v883_v44  ;;  %v1755_v49 = vadd.f32 %v2946_v5, %v1754_v48  ;;  %v317_v44 = vld [vmem:[%s2673_s7 + $0x180] sm:$0xff] }
 0x15e   : > { %1279 = vst.msk [vmem:[%s2751_s14 + $0x2c8] sm:$0xff] %vm1189_vm1, %v1073_v43  ;;  %2554 = vmatmul.msk.f32.gmra.mxu3 %vm1189_vm1, %v1073_v43 }
 0x15f   : > { %1216 = vst.msk [vmem:[%s2751_s14 + $0xd0] sm:$0xff] %vm1189_vm1, %v884_v47  ;;  %2379 = vmatmul.msk.f32.gmra.mxu0 %vm403_vm0, %v311_v45  ;;  %2491 = vmatmul.msk.f32.gmra.mxu1 %vm1189_vm1, %v884_v47  ;;  %v381_v45 = vld [vmem:[%s2673_s7 + $0x380] sm:$0xff] }
 0x160   : > { %2443 = vmatmul.msk.f32.gmra.mxu2 %vm403_vm0, %v375_v46  ;;  %2118 = vst.msk [vmem:[%s2958_s19 + $0x50] sm:$0xff] %vm403_vm0, %v1755_v49 }
 0x161   : > { %v1943_v50 = vpop.f32.mrf.mxu3 }
 0x162   : > { %v1944_v51 = vadd.f32 %v2946_v5, %v1943_v50 }
 0x163   : > { %v1075_v52 = vpop.f32.mrf.mxu2 }
 0x164   : > { %2181 = vst.msk [vmem:[%s2958_s19 + $0x248] sm:$0xff] %vm403_vm0, %v1944_v51  ;;  %v1076_v53 = vadd.f32 %v2745_v35, %v1075_v52  ;;  %v886_v54 = vpop.f32.mrf.mxu0  ;;  %v1757_v58 = vpop.f32.mrf.mxu1 }
 0x165   : > { %v887_v57 = vadd.f32 %v2745_v35, %v886_v54  ;;  %v1758_v59 = vadd.f32 %v2946_v5, %v1757_v58  ;;  %v318_v54 = vld [vmem:[%s2673_s7 + $0x188] sm:$0xff] }
 0x166   : > { %1280 = vst.msk [vmem:[%s2751_s14 + $0x2d0] sm:$0xff] %vm1189_vm1, %v1076_v53  ;;  %2555 = vmatmul.msk.f32.gmra.mxu3 %vm1189_vm1, %v1076_v53 }
 0x167   : > { %1217 = vst.msk [vmem:[%s2751_s14 + $0xd8] sm:$0xff] %vm1189_vm1, %v887_v57  ;;  %2380 = vmatmul.msk.f32.gmra.mxu0 %vm403_vm0, %v312_v55  ;;  %2492 = vmatmul.msk.f32.gmra.mxu1 %vm1189_vm1, %v887_v57  ;;  %v382_v55 = vld [vmem:[%s2673_s7 + $0x388] sm:$0xff] }
 0x168   : > { %2444 = vmatmul.msk.f32.gmra.mxu2 %vm403_vm0, %v376_v56  ;;  %2119 = vst.msk [vmem:[%s2958_s19 + $0x58] sm:$0xff] %vm403_vm0, %v1758_v59 }
 0x169   : > { %v1946_v60 = vpop.f32.mrf.mxu3 }
 0x16a   : > { %v1947_v61 = vadd.f32 %v2946_v5, %v1946_v60 }
 0x16b   : > { %v1078_v62 = vpop.f32.mrf.mxu2 }
 0x16c   : > { %2182 = vst.msk [vmem:[%s2958_s19 + $0x250] sm:$0xff] %vm403_vm0, %v1947_v61  ;;  %v1079_v63 = vadd.f32 %v2745_v35, %v1078_v62  ;;  %v889_v0 = vpop.f32.mrf.mxu0  ;;  %v1760_v4 = vpop.f32.mrf.mxu1 }
 0x16d   : > { %v890_v3 = vadd.f32 %v2745_v35, %v889_v0  ;;  %v1761_v6 = vadd.f32 %v2946_v5, %v1760_v4  ;;  %v319_v0 = vld [vmem:[%s2673_s7 + $0x190] sm:$0xff] }
 0x16e   : > { %1281 = vst.msk [vmem:[%s2751_s14 + $0x2d8] sm:$0xff] %vm1189_vm1, %v1079_v63  ;;  %2556 = vmatmul.msk.f32.gmra.mxu3 %vm1189_vm1, %v1079_v63 }
 0x16f   : > { %1218 = vst.msk [vmem:[%s2751_s14 + $0xe0] sm:$0xff] %vm1189_vm1, %v890_v3  ;;  %2381 = vmatmul.msk.f32.gmra.mxu0 %vm403_vm0, %v313_v1  ;;  %2493 = vmatmul.msk.f32.gmra.mxu1 %vm1189_vm1, %v890_v3  ;;  %v383_v1 = vld [vmem:[%s2673_s7 + $0x390] sm:$0xff] }
 0x170   : > { %2445 = vmatmul.msk.f32.gmra.mxu2 %vm403_vm0, %v377_v2  ;;  %2120 = vst.msk [vmem:[%s2958_s19 + $0x60] sm:$0xff] %vm403_vm0, %v1761_v6  ;;  %v3280_v2 = vld [vmem:[%s3871_s2] ss:$0 sm:$0xff] }
 0x171   : > { %v1949_v7 = vpop.f32.mrf.mxu3 }
 0x172   : > { %v1950_v8 = vadd.f32 %v2946_v5, %v1949_v7 }
 0x173   : > { %v1081_v9 = vpop.f32.mrf.mxu2 }
 0x174   : > { %2183 = vst.msk [vmem:[%s2958_s19 + $0x258] sm:$0xff] %vm403_vm0, %v1950_v8  ;;  %v1082_v10 = vadd.f32 %v2745_v35, %v1081_v9  ;;  %v892_v11 = vpop.f32.mrf.mxu0  ;;  %v1763_v15 = vpop.f32.mrf.mxu1 }
 0x175   : > { %v893_v14 = vadd.f32 %v2745_v35, %v892_v11  ;;  %v1764_v16 = vadd.f32 %v2946_v5, %v1763_v15  ;;  %v320_v11 = vld [vmem:[%s2673_s7 + $0x198] sm:$0xff] }
 0x176   : > { %1282 = vst.msk [vmem:[%s2751_s14 + $0x2e0] sm:$0xff] %vm1189_vm1, %v1082_v10  ;;  %2557 = vmatmul.msk.f32.gmra.mxu3 %vm1189_vm1, %v1082_v10 }
 0x177   : > { %1219 = vst.msk [vmem:[%s2751_s14 + $0xe8] sm:$0xff] %vm1189_vm1, %v893_v14  ;;  %2382 = vmatmul.msk.f32.gmra.mxu0 %vm403_vm0, %v314_v12  ;;  %2494 = vmatmul.msk.f32.gmra.mxu1 %vm1189_vm1, %v893_v14  ;;  %v384_v12 = vld [vmem:[%s2673_s7 + $0x398] sm:$0xff] }
 0x178   : > { %2446 = vmatmul.msk.f32.gmra.mxu2 %vm403_vm0, %v378_v13  ;;  %2121 = vst.msk [vmem:[%s2958_s19 + $0x68] sm:$0xff] %vm403_vm0, %v1764_v16 }
 0x179   : > { %v1952_v17 = vpop.f32.mrf.mxu3 }
 0x17a   : > { %v1953_v18 = vadd.f32 %v2946_v5, %v1952_v17 }
 0x17b   : > { %v1084_v19 = vpop.f32.mrf.mxu2 }
 0x17c   : > { %2184 = vst.msk [vmem:[%s2958_s19 + $0x260] sm:$0xff] %vm403_vm0, %v1953_v18  ;;  %v1085_v20 = vadd.f32 %v2745_v35, %v1084_v19  ;;  %v895_v21 = vpop.f32.mrf.mxu0  ;;  %v1766_v25 = vpop.f32.mrf.mxu1 }
 0x17d   : > { %v896_v24 = vadd.f32 %v2745_v35, %v895_v21  ;;  %v1767_v26 = vadd.f32 %v2946_v5, %v1766_v25  ;;  %v321_v21 = vld [vmem:[%s2673_s7 + $0x1a0] sm:$0xff] }
 0x17e   : > { %1283 = vst.msk [vmem:[%s2751_s14 + $0x2e8] sm:$0xff] %vm1189_vm1, %v1085_v20  ;;  %2558 = vmatmul.msk.f32.gmra.mxu3 %vm1189_vm1, %v1085_v20 }
 0x17f   : > { %1220 = vst.msk [vmem:[%s2751_s14 + $0xf0] sm:$0xff] %vm1189_vm1, %v896_v24  ;;  %2383 = vmatmul.msk.f32.gmra.mxu0 %vm403_vm0, %v315_v22  ;;  %2495 = vmatmul.msk.f32.gmra.mxu1 %vm1189_vm1, %v896_v24  ;;  %v385_v22 = vld [vmem:[%s2673_s7 + $0x3a0] sm:$0xff] }
 0x180   : > { %2447 = vmatmul.msk.f32.gmra.mxu2 %vm403_vm0, %v379_v23  ;;  %2122 = vst.msk [vmem:[%s2958_s19 + $0x70] sm:$0xff] %vm403_vm0, %v1767_v26 }
 0x181   : > { %v1955_v27 = vpop.f32.mrf.mxu3 }
 0x182   : > { %v1956_v28 = vadd.f32 %v2946_v5, %v1955_v27 }
 0x183   : > { %v1087_v29 = vpop.f32.mrf.mxu2 }
 0x184   : > { %2185 = vst.msk [vmem:[%s2958_s19 + $0x268] sm:$0xff] %vm403_vm0, %v1956_v28  ;;  %v1088_v30 = vadd.f32 %v2745_v35, %v1087_v29  ;;  %v898_v31 = vpop.f32.mrf.mxu0  ;;  %v1769_v36 = vpop.f32.mrf.mxu1 }
 0x185   : > { %v899_v34 = vadd.f32 %v2745_v35, %v898_v31  ;;  %v1770_v37 = vadd.f32 %v2946_v5, %v1769_v36  ;;  %v322_v31 = vld [vmem:[%s2673_s7 + $0x1a8] sm:$0xff] }
 0x186   : > { %1284 = vst.msk [vmem:[%s2751_s14 + $0x2f0] sm:$0xff] %vm1189_vm1, %v1088_v30  ;;  %2559 = vmatmul.msk.f32.gmra.mxu3 %vm1189_vm1, %v1088_v30 }
 0x187   : > { %1221 = vst.msk [vmem:[%s2751_s14 + $0xf8] sm:$0xff] %vm1189_vm1, %v899_v34  ;;  %2384 = vmatmul.msk.f32.gmra.mxu0 %vm403_vm0, %v316_v32  ;;  %2496 = vmatmul.msk.f32.gmra.mxu1 %vm1189_vm1, %v899_v34  ;;  %v386_v32 = vld [vmem:[%s2673_s7 + $0x3a8] sm:$0xff] }
 0x188   : > { %2448 = vmatmul.msk.f32.gmra.mxu2 %vm403_vm0, %v380_v33  ;;  %2123 = vst.msk [vmem:[%s2958_s19 + $0x78] sm:$0xff] %vm403_vm0, %v1770_v37 }
 0x189   : > { %v1958_v38 = vpop.f32.mrf.mxu3 }
 0x18a   : > { %v1959_v39 = vadd.f32 %v2946_v5, %v1958_v38 }
 0x18b   : > { %v1090_v40 = vpop.f32.mrf.mxu2 }
 0x18c   : > { %2186 = vst.msk [vmem:[%s2958_s19 + $0x270] sm:$0xff] %vm403_vm0, %v1959_v39  ;;  %v1091_v42 = vadd.f32 %v2745_v35, %v1090_v40  ;;  %v901_v43 = vpop.f32.mrf.mxu0  ;;  %v1772_v47 = vpop.f32.mrf.mxu1 }
 0x18d   : > { %v902_v46 = vadd.f32 %v2745_v35, %v901_v43  ;;  %v1773_v48 = vadd.f32 %v2946_v5, %v1772_v47  ;;  %v323_v43 = vld [vmem:[%s2673_s7 + $0x1b0] sm:$0xff] }
 0x18e   : > { %1285 = vst.msk [vmem:[%s2751_s14 + $0x2f8] sm:$0xff] %vm1189_vm1, %v1091_v42  ;;  %2560 = vmatmul.msk.f32.gmra.mxu3 %vm1189_vm1, %v1091_v42 }
 0x18f   : > { %1222 = vst.msk [vmem:[%s2751_s14 + $0x100] sm:$0xff] %vm1189_vm1, %v902_v46  ;;  %2385 = vmatmul.msk.f32.gmra.mxu0 %vm403_vm0, %v317_v44  ;;  %2497 = vmatmul.msk.f32.gmra.mxu1 %vm1189_vm1, %v902_v46  ;;  %v387_v44 = vld [vmem:[%s2673_s7 + $0x3b0] sm:$0xff] }
 0x190   : > { %2449 = vmatmul.msk.f32.gmra.mxu2 %vm403_vm0, %v381_v45  ;;  %2124 = vst.msk [vmem:[%s2958_s19 + $0x80] sm:$0xff] %vm403_vm0, %v1773_v48 }
 0x191   : > { %v1961_v49 = vpop.f32.mrf.mxu3 }
 0x192   : > { %v1962_v50 = vadd.f32 %v2946_v5, %v1961_v49 }
 0x193   : > { %v1093_v51 = vpop.f32.mrf.mxu2 }
 0x194   : > { %2187 = vst.msk [vmem:[%s2958_s19 + $0x278] sm:$0xff] %vm403_vm0, %v1962_v50  ;;  %v1094_v52 = vadd.f32 %v2745_v35, %v1093_v51  ;;  %v904_v53 = vpop.f32.mrf.mxu0  ;;  %v1775_v57 = vpop.f32.mrf.mxu1 }
 0x195   : > { %v905_v56 = vadd.f32 %v2745_v35, %v904_v53  ;;  %v1776_v58 = vadd.f32 %v2946_v5, %v1775_v57  ;;  %v324_v53 = vld [vmem:[%s2673_s7 + $0x1b8] sm:$0xff] }
 0x196   : > { %1286 = vst.msk [vmem:[%s2751_s14 + $0x300] sm:$0xff] %vm1189_vm1, %v1094_v52  ;;  %2561 = vmatmul.msk.f32.gmra.mxu3 %vm1189_vm1, %v1094_v52 }
 0x197   : > { %1223 = vst.msk [vmem:[%s2751_s14 + $0x108] sm:$0xff] %vm1189_vm1, %v905_v56  ;;  %2386 = vmatmul.msk.f32.gmra.mxu0 %vm403_vm0, %v318_v54  ;;  %2498 = vmatmul.msk.f32.gmra.mxu1 %vm1189_vm1, %v905_v56  ;;  %v388_v54 = vld [vmem:[%s2673_s7 + $0x3b8] sm:$0xff] }
 0x198   : > { %2450 = vmatmul.msk.f32.gmra.mxu2 %vm403_vm0, %v382_v55  ;;  %2125 = vst.msk [vmem:[%s2958_s19 + $0x88] sm:$0xff] %vm403_vm0, %v1776_v58 }
 0x199   : > { %v1964_v59 = vpop.f32.mrf.mxu3 }
 0x19a   : > { %v1965_v60 = vadd.f32 %v2946_v5, %v1964_v59 }
 0x19b   : > { %v1096_v61 = vpop.f32.mrf.mxu2 }
 0x19c   : > { %2188 = vst.msk [vmem:[%s2958_s19 + $0x280] sm:$0xff] %vm403_vm0, %v1965_v60  ;;  %v1097_v62 = vadd.f32 %v2745_v35, %v1096_v61  ;;  %v907_v63 = vpop.f32.mrf.mxu0  ;;  %v1778_v4 = vpop.f32.mrf.mxu1 }
 0x19d   : > { %v908_v3 = vadd.f32 %v3280_v2, %v907_v63  ;;  %v1779_v35 = vadd.f32 %v2946_v5, %v1778_v4  ;;  %v325_v63 = vld [vmem:[%s2673_s7 + $0x1c0] sm:$0xff] }
 0x19e   : > { %1287 = vst.msk [vmem:[%s2751_s14 + $0x308] sm:$0xff] %vm1189_vm1, %v1097_v62  ;;  %2562 = vmatmul.msk.f32.gmra.mxu3 %vm1189_vm1, %v1097_v62 }
 0x19f   : > { %1224 = vst.msk [vmem:[%s2751_s14 + $0x110] sm:$0xff] %vm1189_vm1, %v908_v3  ;;  %2387 = vmatmul.msk.f32.gmra.mxu0 %vm403_vm0, %v319_v0  ;;  %2499 = vmatmul.msk.f32.gmra.mxu1 %vm1189_vm1, %v908_v3  ;;  %v389_v0 = vld [vmem:[%s2673_s7 + $0x3c0] sm:$0xff] }
 0x1a0   : > { %2451 = vmatmul.msk.f32.gmra.mxu2 %vm403_vm0, %v383_v1  ;;  %2126 = vst.msk [vmem:[%s2958_s19 + $0x90] sm:$0xff] %vm403_vm0, %v1779_v35 }
 0x1a1   : > { %v1967_v6 = vpop.f32.mrf.mxu3 }
 0x1a2   : > { %v1968_v7 = vadd.f32 %v2946_v5, %v1967_v6 }
 0x1a3   : > { %v1099_v8 = vpop.f32.mrf.mxu2 }
 0x1a4   : > { %2189 = vst.msk [vmem:[%s2958_s19 + $0x288] sm:$0xff] %vm403_vm0, %v1968_v7  ;;  %v1100_v9 = vadd.f32 %v3280_v2, %v1099_v8  ;;  %v910_v10 = vpop.f32.mrf.mxu0  ;;  %v1781_v14 = vpop.f32.mrf.mxu1 }
 0x1a5   : > { %v911_v13 = vadd.f32 %v3280_v2, %v910_v10  ;;  %v1782_v15 = vadd.f32 %v2946_v5, %v1781_v14  ;;  %v326_v10 = vld [vmem:[%s2673_s7 + $0x1c8] sm:$0xff] }
 0x1a6   : > { %1288 = vst.msk [vmem:[%s2751_s14 + $0x310] sm:$0xff] %vm1189_vm1, %v1100_v9  ;;  %2563 = vmatmul.msk.f32.gmra.mxu3 %vm1189_vm1, %v1100_v9 }
 0x1a7   : > { %1225 = vst.msk [vmem:[%s2751_s14 + $0x118] sm:$0xff] %vm1189_vm1, %v911_v13  ;;  %2388 = vmatmul.msk.f32.gmra.mxu0 %vm403_vm0, %v320_v11  ;;  %2500 = vmatmul.msk.f32.gmra.mxu1 %vm1189_vm1, %v911_v13  ;;  %v390_v11 = vld [vmem:[%s2673_s7 + $0x3c8] sm:$0xff] }
 0x1a8   : > { %2452 = vmatmul.msk.f32.gmra.mxu2 %vm403_vm0, %v384_v12  ;;  %2127 = vst.msk [vmem:[%s2958_s19 + $0x98] sm:$0xff] %vm403_vm0, %v1782_v15 }
 0x1a9   : > { %v1970_v16 = vpop.f32.mrf.mxu3 }
 0x1aa   : > { %v1971_v17 = vadd.f32 %v2946_v5, %v1970_v16 }
 0x1ab   : > { %v1102_v18 = vpop.f32.mrf.mxu2 }
 0x1ac   : > { %2190 = vst.msk [vmem:[%s2958_s19 + $0x290] sm:$0xff] %vm403_vm0, %v1971_v17  ;;  %v1103_v19 = vadd.f32 %v3280_v2, %v1102_v18  ;;  %v913_v20 = vpop.f32.mrf.mxu0  ;;  %v1784_v24 = vpop.f32.mrf.mxu1 }
 0x1ad   : > { %v914_v23 = vadd.f32 %v3280_v2, %v913_v20  ;;  %v1785_v25 = vadd.f32 %v2946_v5, %v1784_v24  ;;  %v327_v20 = vld [vmem:[%s2673_s7 + $0x1d0] sm:$0xff] }
 0x1ae   : > { %1289 = vst.msk [vmem:[%s2751_s14 + $0x318] sm:$0xff] %vm1189_vm1, %v1103_v19  ;;  %2564 = vmatmul.msk.f32.gmra.mxu3 %vm1189_vm1, %v1103_v19 }
 0x1af   : > { %1226 = vst.msk [vmem:[%s2751_s14 + $0x120] sm:$0xff] %vm1189_vm1, %v914_v23  ;;  %2389 = vmatmul.msk.f32.gmra.mxu0 %vm403_vm0, %v321_v21  ;;  %2501 = vmatmul.msk.f32.gmra.mxu1 %vm1189_vm1, %v914_v23  ;;  %v391_v21 = vld [vmem:[%s2673_s7 + $0x3d0] sm:$0xff] }
 0x1b0   : > { %2453 = vmatmul.msk.f32.gmra.mxu2 %vm403_vm0, %v385_v22  ;;  %2128 = vst.msk [vmem:[%s2958_s19 + $0xa0] sm:$0xff] %vm403_vm0, %v1785_v25 }
 0x1b1   : > { %v1973_v26 = vpop.f32.mrf.mxu3 }
 0x1b2   : > { %v1974_v27 = vadd.f32 %v2946_v5, %v1973_v26 }
 0x1b3   : > { %v1105_v28 = vpop.f32.mrf.mxu2 }
 0x1b4   : > { %2191 = vst.msk [vmem:[%s2958_s19 + $0x298] sm:$0xff] %vm403_vm0, %v1974_v27  ;;  %v1106_v29 = vadd.f32 %v3280_v2, %v1105_v28  ;;  %v916_v30 = vpop.f32.mrf.mxu0  ;;  %v1787_v34 = vpop.f32.mrf.mxu1 }
 0x1b5   : > { %v917_v33 = vadd.f32 %v3280_v2, %v916_v30  ;;  %v1788_v36 = vadd.f32 %v2946_v5, %v1787_v34  ;;  %v328_v30 = vld [vmem:[%s2673_s7 + $0x1d8] sm:$0xff] }
 0x1b6   : > { %1290 = vst.msk [vmem:[%s2751_s14 + $0x320] sm:$0xff] %vm1189_vm1, %v1106_v29  ;;  %2565 = vmatmul.msk.f32.gmra.mxu3 %vm1189_vm1, %v1106_v29 }
 0x1b7   : > { %1227 = vst.msk [vmem:[%s2751_s14 + $0x128] sm:$0xff] %vm1189_vm1, %v917_v33  ;;  %2390 = vmatmul.msk.f32.gmra.mxu0 %vm403_vm0, %v322_v31  ;;  %2502 = vmatmul.msk.f32.gmra.mxu1 %vm1189_vm1, %v917_v33  ;;  %v392_v31 = vld [vmem:[%s2673_s7 + $0x3d8] sm:$0xff] }
 0x1b8   : > { %2454 = vmatmul.msk.f32.gmra.mxu2 %vm403_vm0, %v386_v32  ;;  %2129 = vst.msk [vmem:[%s2958_s19 + $0xa8] sm:$0xff] %vm403_vm0, %v1788_v36 }
 0x1b9   : > { %v1976_v37 = vpop.f32.mrf.mxu3 }
 0x1ba   : > { %v1977_v38 = vadd.f32 %v2946_v5, %v1976_v37 }
 0x1bb   : > { %v1108_v39 = vpop.f32.mrf.mxu2 }
 0x1bc   : > { %2192 = vst.msk [vmem:[%s2958_s19 + $0x2a0] sm:$0xff] %vm403_vm0, %v1977_v38  ;;  %v1109_v40 = vadd.f32 %v3280_v2, %v1108_v39  ;;  %v919_v42 = vpop.f32.mrf.mxu0  ;;  %v1790_v46 = vpop.f32.mrf.mxu1 }
 0x1bd   : > { %v920_v45 = vadd.f32 %v3280_v2, %v919_v42  ;;  %v1791_v47 = vadd.f32 %v2946_v5, %v1790_v46  ;;  %v329_v42 = vld [vmem:[%s2673_s7 + $0x1e0] sm:$0xff] }
 0x1be   : > { %1291 = vst.msk [vmem:[%s2751_s14 + $0x328] sm:$0xff] %vm1189_vm1, %v1109_v40  ;;  %2566 = vmatmul.msk.f32.gmra.mxu3 %vm1189_vm1, %v1109_v40 }
 0x1bf   : > { %1228 = vst.msk [vmem:[%s2751_s14 + $0x130] sm:$0xff] %vm1189_vm1, %v920_v45  ;;  %2391 = vmatmul.msk.f32.gmra.mxu0 %vm403_vm0, %v323_v43  ;;  %2503 = vmatmul.msk.f32.gmra.mxu1 %vm1189_vm1, %v920_v45  ;;  %v393_v43 = vld [vmem:[%s2673_s7 + $0x3e0] sm:$0xff] }
 0x1c0   : > { %2455 = vmatmul.msk.f32.gmra.mxu2 %vm403_vm0, %v387_v44  ;;  %2130 = vst.msk [vmem:[%s2958_s19 + $0xb0] sm:$0xff] %vm403_vm0, %v1791_v47 }
 0x1c1   : > { %v1979_v48 = vpop.f32.mrf.mxu3 }
 0x1c2   : > { %v1980_v49 = vadd.f32 %v2946_v5, %v1979_v48  ;;  %v3475_v48 = vld [vmem:[%s3873_s4] ss:$0 sm:$0xff] }
 0x1c3   : > { %v1111_v50 = vpop.f32.mrf.mxu2 }
 0x1c4   : > { %2193 = vst.msk [vmem:[%s2958_s19 + $0x2a8] sm:$0xff] %vm403_vm0, %v1980_v49  ;;  %v1112_v51 = vadd.f32 %v3280_v2, %v1111_v50  ;;  %v922_v52 = vpop.f32.mrf.mxu0  ;;  %v1793_v56 = vpop.f32.mrf.mxu1 }
 0x1c5   : > { %v923_v55 = vadd.f32 %v3280_v2, %v922_v52  ;;  %v1794_v57 = vadd.f32 %v2946_v5, %v1793_v56  ;;  %v330_v52 = vld [vmem:[%s2673_s7 + $0x1e8] sm:$0xff] }
 0x1c6   : > { %1292 = vst.msk [vmem:[%s2751_s14 + $0x330] sm:$0xff] %vm1189_vm1, %v1112_v51  ;;  %2567 = vmatmul.msk.f32.gmra.mxu3 %vm1189_vm1, %v1112_v51 }
 0x1c7   : > { %1229 = vst.msk [vmem:[%s2751_s14 + $0x138] sm:$0xff] %vm1189_vm1, %v923_v55  ;;  %2392 = vmatmul.msk.f32.gmra.mxu0 %vm403_vm0, %v324_v53  ;;  %2504 = vmatmul.msk.f32.gmra.mxu1 %vm1189_vm1, %v923_v55  ;;  %v394_v53 = vld [vmem:[%s2673_s7 + $0x3e8] sm:$0xff] }
 0x1c8   : > { %2456 = vmatmul.msk.f32.gmra.mxu2 %vm403_vm0, %v388_v54  ;;  %2131 = vst.msk [vmem:[%s2958_s19 + $0xb8] sm:$0xff] %vm403_vm0, %v1794_v57 }
 0x1c9   : > { %v1982_v58 = vpop.f32.mrf.mxu3 }
 0x1ca   : > { %v1983_v59 = vadd.f32 %v2946_v5, %v1982_v58 }
 0x1cb   : > { %v1114_v60 = vpop.f32.mrf.mxu2 }
 0x1cc   : > { %2194 = vst.msk [vmem:[%s2958_s19 + $0x2b0] sm:$0xff] %vm403_vm0, %v1983_v59  ;;  %v1115_v61 = vadd.f32 %v3280_v2, %v1114_v60  ;;  %v925_v62 = vpop.f32.mrf.mxu0  ;;  %v1796_v3 = vpop.f32.mrf.mxu1 }
 0x1cd   : > { %v926_v1 = vadd.f32 %v3280_v2, %v925_v62  ;;  %v1797_v4 = vadd.f32 %v2946_v5, %v1796_v3  ;;  %v331_v62 = vld [vmem:[%s2673_s7 + $0x1f0] sm:$0xff] }
 0x1ce   : > { %1293 = vst.msk [vmem:[%s2751_s14 + $0x338] sm:$0xff] %vm1189_vm1, %v1115_v61  ;;  %2568 = vmatmul.msk.f32.gmra.mxu3 %vm1189_vm1, %v1115_v61 }
 0x1cf   : > { %1230 = vst.msk [vmem:[%s2751_s14 + $0x140] sm:$0xff] %vm1189_vm1, %v926_v1  ;;  %2393 = vmatmul.msk.f32.gmra.mxu0 %vm403_vm0, %v325_v63  ;;  %2505 = vmatmul.msk.f32.gmra.mxu1 %vm1189_vm1, %v926_v1  ;;  %v395_v63 = vld [vmem:[%s2673_s7 + $0x3f0] sm:$0xff] }
 0x1d0   : > { %2457 = vmatmul.msk.f32.gmra.mxu2 %vm403_vm0, %v389_v0  ;;  %2132 = vst.msk [vmem:[%s2958_s19 + $0xc0] sm:$0xff] %vm403_vm0, %v1797_v4 }
 0x1d1   : > { %v1985_v35 = vpop.f32.mrf.mxu3 }
 0x1d2   : > { %v1986_v6 = vadd.f32 %v2946_v5, %v1985_v35 }
 0x1d3   : > { %v1117_v7 = vpop.f32.mrf.mxu2 }
 0x1d4   : > { %2195 = vst.msk [vmem:[%s2958_s19 + $0x2b8] sm:$0xff] %vm403_vm0, %v1986_v6  ;;  %v1118_v8 = vadd.f32 %v3280_v2, %v1117_v7  ;;  %v928_v9 = vpop.f32.mrf.mxu0  ;;  %v1799_v13 = vpop.f32.mrf.mxu1 }
 0x1d5   : > { %v929_v12 = vadd.f32 %v3280_v2, %v928_v9  ;;  %v1800_v14 = vadd.f32 %v2946_v5, %v1799_v13  ;;  %v332_v9 = vld [vmem:[%s2673_s7 + $0x1f8] sm:$0xff] }
 0x1d6   : > { %1294 = vst.msk [vmem:[%s2751_s14 + $0x340] sm:$0xff] %vm1189_vm1, %v1118_v8  ;;  %2569 = vmatmul.msk.f32.gmra.mxu3 %vm1189_vm1, %v1118_v8 }
 0x1d7   : > { %1231 = vst.msk [vmem:[%s2751_s14 + $0x148] sm:$0xff] %vm1189_vm1, %v929_v12  ;;  %2394 = vmatmul.msk.f32.gmra.mxu0 %vm403_vm0, %v326_v10  ;;  %2506 = vmatmul.msk.f32.gmra.mxu1 %vm1189_vm1, %v929_v12  ;;  %v396_v10 = vld [vmem:[%s2673_s7 + $0x3f8] sm:$0xff] }
 0x1d8   : > { %2458 = vmatmul.msk.f32.gmra.mxu2 %vm403_vm0, %v390_v11  ;;  %2133 = vst.msk [vmem:[%s2958_s19 + $0xc8] sm:$0xff] %vm403_vm0, %v1800_v14 }
 0x1d9   : > { %v1988_v15 = vpop.f32.mrf.mxu3 }
 0x1da   : > { %v1989_v16 = vadd.f32 %v2946_v5, %v1988_v15 }
 0x1db   : > { %v1120_v17 = vpop.f32.mrf.mxu2 }
 0x1dc   : > { %2196 = vst.msk [vmem:[%s2958_s19 + $0x2c0] sm:$0xff] %vm403_vm0, %v1989_v16  ;;  %v1121_v18 = vadd.f32 %v3280_v2, %v1120_v17  ;;  %v931_v19 = vpop.f32.mrf.mxu0  ;;  %v1802_v23 = vpop.f32.mrf.mxu1 }
 0x1dd   : > { %v932_v22 = vadd.f32 %v3280_v2, %v931_v19  ;;  %v1803_v24 = vadd.f32 %v2946_v5, %v1802_v23 }
 0x1de   : > { %1295 = vst.msk [vmem:[%s2751_s14 + $0x348] sm:$0xff] %vm1189_vm1, %v1121_v18  ;;  %2570 = vmatmul.msk.f32.gmra.mxu3 %vm1189_vm1, %v1121_v18 }
 0x1df   : > { %1232 = vst.msk [vmem:[%s2751_s14 + $0x150] sm:$0xff] %vm1189_vm1, %v932_v22  ;;  %2395 = vmatmul.msk.f32.gmra.mxu0 %vm403_vm0, %v327_v20  ;;  %2507 = vmatmul.msk.f32.gmra.mxu1 %vm1189_vm1, %v932_v22 }
 0x1e0   : > { %2459 = vmatmul.msk.f32.gmra.mxu2 %vm403_vm0, %v391_v21  ;;  %2134 = vst.msk [vmem:[%s2958_s19 + $0xd0] sm:$0xff] %vm403_vm0, %v1803_v24 }
 0x1e1   : > { %v1991_v25 = vpop.f32.mrf.mxu3 }
 0x1e2   : > { %v1992_v26 = vadd.f32 %v2946_v5, %v1991_v25 }
 0x1e3   : > { %v1123_v27 = vpop.f32.mrf.mxu2 }
 0x1e4   : > { %2197 = vst.msk [vmem:[%s2958_s19 + $0x2c8] sm:$0xff] %vm403_vm0, %v1992_v26  ;;  %v1124_v28 = vadd.f32 %v3280_v2, %v1123_v27  ;;  %v934_v29 = vpop.f32.mrf.mxu0  ;;  %v1805_v33 = vpop.f32.mrf.mxu1 }
 0x1e5   : > { %v935_v32 = vadd.f32 %v3280_v2, %v934_v29  ;;  %v1806_v34 = vadd.f32 %v2946_v5, %v1805_v33 }
 0x1e6   : > { %1296 = vst.msk [vmem:[%s2751_s14 + $0x350] sm:$0xff] %vm1189_vm1, %v1124_v28  ;;  %2571 = vmatmul.msk.f32.gmra.mxu3 %vm1189_vm1, %v1124_v28 }
 0x1e7   : > { %1233 = vst.msk [vmem:[%s2751_s14 + $0x158] sm:$0xff] %vm1189_vm1, %v935_v32  ;;  %2396 = vmatmul.msk.f32.gmra.mxu0 %vm403_vm0, %v328_v30  ;;  %2508 = vmatmul.msk.f32.gmra.mxu1 %vm1189_vm1, %v935_v32 }
 0x1e8   : > { %2460 = vmatmul.msk.f32.gmra.mxu2 %vm403_vm0, %v392_v31  ;;  %2135 = vst.msk [vmem:[%s2958_s19 + $0xd8] sm:$0xff] %vm403_vm0, %v1806_v34 }
 0x1e9   : > { %v1994_v36 = vpop.f32.mrf.mxu3 }
 0x1ea   : > { %v1995_v37 = vadd.f32 %v2946_v5, %v1994_v36 }
 0x1eb   : > { %v1126_v38 = vpop.f32.mrf.mxu2 }
 0x1ec   : > { %2198 = vst.msk [vmem:[%s2958_s19 + $0x2d0] sm:$0xff] %vm403_vm0, %v1995_v37  ;;  %v1127_v39 = vadd.f32 %v3280_v2, %v1126_v38  ;;  %v937_v40 = vpop.f32.mrf.mxu0  ;;  %v1808_v45 = vpop.f32.mrf.mxu1 }
 0x1ed   : > { %v938_v44 = vadd.f32 %v3280_v2, %v937_v40  ;;  %v1809_v46 = vadd.f32 %v2946_v5, %v1808_v45 }
 0x1ee   : > { %1297 = vst.msk [vmem:[%s2751_s14 + $0x358] sm:$0xff] %vm1189_vm1, %v1127_v39  ;;  %2572 = vmatmul.msk.f32.gmra.mxu3 %vm1189_vm1, %v1127_v39 }
 0x1ef   : > { %1234 = vst.msk [vmem:[%s2751_s14 + $0x160] sm:$0xff] %vm1189_vm1, %v938_v44  ;;  %2397 = vmatmul.msk.f32.gmra.mxu0 %vm403_vm0, %v329_v42  ;;  %2509 = vmatmul.msk.f32.gmra.mxu1 %vm1189_vm1, %v938_v44 }
 0x1f0   : > { %2461 = vmatmul.msk.f32.gmra.mxu2 %vm403_vm0, %v393_v43  ;;  %2136 = vst.msk [vmem:[%s2958_s19 + $0xe0] sm:$0xff] %vm403_vm0, %v1809_v46 }
 0x1f1   : > { %v1997_v47 = vpop.f32.mrf.mxu3 }
 0x1f2   : > { %v1998_v5 = vadd.f32 %v3475_v48, %v1997_v47 }
 0x1f3   : > { %v1129_v49 = vpop.f32.mrf.mxu2 }
 0x1f4   : > { %2199 = vst.msk [vmem:[%s2958_s19 + $0x2d8] sm:$0xff] %vm403_vm0, %v1998_v5  ;;  %v1130_v50 = vadd.f32 %v3280_v2, %v1129_v49  ;;  %v940_v51 = vpop.f32.mrf.mxu0  ;;  %v1811_v55 = vpop.f32.mrf.mxu1 }
 0x1f5   : > { %v941_v54 = vadd.f32 %v3280_v2, %v940_v51  ;;  %v1812_v56 = vadd.f32 %v3475_v48, %v1811_v55 }
 0x1f6   : > { %1298 = vst.msk [vmem:[%s2751_s14 + $0x360] sm:$0xff] %vm1189_vm1, %v1130_v50  ;;  %2573 = vmatmul.msk.f32.gmra.mxu3 %vm1189_vm1, %v1130_v50 }
 0x1f7   : > { %1235 = vst.msk [vmem:[%s2751_s14 + $0x168] sm:$0xff] %vm1189_vm1, %v941_v54  ;;  %2398 = vmatmul.msk.f32.gmra.mxu0 %vm403_vm0, %v330_v52  ;;  %2510 = vmatmul.msk.f32.gmra.mxu1 %vm1189_vm1, %v941_v54 }
 0x1f8   : > { %2462 = vmatmul.msk.f32.gmra.mxu2 %vm403_vm0, %v394_v53  ;;  %2137 = vst.msk [vmem:[%s2958_s19 + $0xe8] sm:$0xff] %vm403_vm0, %v1812_v56 }
 0x1f9   : > { %v2000_v57 = vpop.f32.mrf.mxu3 }
 0x1fa   : > { %v2001_v58 = vadd.f32 %v3475_v48, %v2000_v57 }
 0x1fb   : > { %v1132_v59 = vpop.f32.mrf.mxu2 }
 0x1fc   : > { %2200 = vst.msk [vmem:[%s2958_s19 + $0x2e0] sm:$0xff] %vm403_vm0, %v2001_v58  ;;  %v1133_v60 = vadd.f32 %v3280_v2, %v1132_v59  ;;  %v943_v61 = vpop.f32.mrf.mxu0  ;;  %v1814_v1 = vpop.f32.mrf.mxu1 }
 0x1fd   : > { %v944_v0 = vadd.f32 %v3280_v2, %v943_v61  ;;  %v1815_v3 = vadd.f32 %v3475_v48, %v1814_v1 }
 0x1fe   : > { %1299 = vst.msk [vmem:[%s2751_s14 + $0x368] sm:$0xff] %vm1189_vm1, %v1133_v60  ;;  %2574 = vmatmul.msk.f32.gmra.mxu3 %vm1189_vm1, %v1133_v60 }
 0x1ff   : > { %1236 = vst.msk [vmem:[%s2751_s14 + $0x170] sm:$0xff] %vm1189_vm1, %v944_v0  ;;  %2399 = vmatmul.msk.f32.gmra.mxu0 %vm403_vm0, %v331_v62  ;;  %2511 = vmatmul.msk.f32.gmra.mxu1 %vm1189_vm1, %v944_v0 }
 0x200   : > { %2463 = vmatmul.msk.f32.gmra.mxu2 %vm403_vm0, %v395_v63  ;;  %2138 = vst.msk [vmem:[%s2958_s19 + $0xf0] sm:$0xff] %vm403_vm0, %v1815_v3 }
 0x201   : > { %v2003_v4 = vpop.f32.mrf.mxu3 }
 0x202   : > { %v2004_v35 = vadd.f32 %v3475_v48, %v2003_v4 }
 0x203   : > { %v1135_v6 = vpop.f32.mrf.mxu2 }
 0x204   : > { %2201 = vst.msk [vmem:[%s2958_s19 + $0x2e8] sm:$0xff] %vm403_vm0, %v2004_v35  ;;  %v1136_v7 = vadd.f32 %v3280_v2, %v1135_v6  ;;  %v946_v8 = vpop.f32.mrf.mxu0  ;;  %v1817_v12 = vpop.f32.mrf.mxu1 }
 0x205   : > { %v947_v11 = vadd.f32 %v3280_v2, %v946_v8  ;;  %v1818_v13 = vadd.f32 %v3475_v48, %v1817_v12 }
 0x206   : > { %1300 = vst.msk [vmem:[%s2751_s14 + $0x370] sm:$0xff] %vm1189_vm1, %v1136_v7  ;;  %2575 = vmatmul.msk.f32.gmra.mxu3 %vm1189_vm1, %v1136_v7 }
 0x207   : > { %1237 = vst.msk [vmem:[%s2751_s14 + $0x178] sm:$0xff] %vm1189_vm1, %v947_v11  ;;  %2400 = vmatmul.msk.f32.gmra.mxu0 %vm403_vm0, %v332_v9  ;;  %2512 = vmatmul.msk.f32.gmra.mxu1 %vm1189_vm1, %v947_v11 }
 0x208   : > { %2464 = vmatmul.msk.f32.gmra.mxu2 %vm403_vm0, %v396_v10  ;;  %2139 = vst.msk [vmem:[%s2958_s19 + $0xf8] sm:$0xff] %vm403_vm0, %v1818_v13 }
 0x209   : > { %v2006_v14 = vpop.f32.mrf.mxu3 }
 0x20a   : > { %v2007_v15 = vadd.f32 %v3475_v48, %v2006_v14 }
 0x20b   : > { %v1138_v16 = vpop.f32.mrf.mxu2 }
 0x20c   : > { %2202 = vst.msk [vmem:[%s2958_s19 + $0x2f0] sm:$0xff] %vm403_vm0, %v2007_v15  ;;  %v1139_v17 = vadd.f32 %v3280_v2, %v1138_v16  ;;  %v949_v18 = vpop.f32.mrf.mxu0  ;;  %v1820_v20 = vpop.f32.mrf.mxu1 }
 0x20d   : > { %v950_v19 = vadd.f32 %v3280_v2, %v949_v18  ;;  %v1821_v21 = vadd.f32 %v3475_v48, %v1820_v20 }
 0x20e   : > { %1301 = vst.msk [vmem:[%s2751_s14 + $0x378] sm:$0xff] %vm1189_vm1, %v1139_v17  ;;  %2576 = vmatmul.msk.f32.gmra.mxu3 %vm1189_vm1, %v1139_v17 }
 0x20f   : > { %1238 = vst.msk [vmem:[%s2751_s14 + $0x180] sm:$0xff] %vm1189_vm1, %v950_v19  ;;  %2513 = vmatmul.msk.f32.gmra.mxu1 %vm1189_vm1, %v950_v19 }
 0x210   : > { %2140 = vst.msk [vmem:[%s2958_s19 + $0x100] sm:$0xff] %vm403_vm0, %v1821_v21 }
 0x211   : > { %v2009_v22 = vpop.f32.mrf.mxu3 }
 0x212   : > { %v2010_v23 = vadd.f32 %v3475_v48, %v2009_v22 }
 0x213   : > { %v1141_v24 = vpop.f32.mrf.mxu2 }
 0x214   : > { %2203 = vst.msk [vmem:[%s2958_s19 + $0x2f8] sm:$0xff] %vm403_vm0, %v2010_v23  ;;  %v1142_v25 = vadd.f32 %v3280_v2, %v1141_v24  ;;  %v952_v26 = vpop.f32.mrf.mxu0  ;;  %v1823_v28 = vpop.f32.mrf.mxu1 }
 0x215   : > { %v953_v27 = vadd.f32 %v3280_v2, %v952_v26  ;;  %v1824_v29 = vadd.f32 %v3475_v48, %v1823_v28 }
 0x216   : > { %1302 = vst.msk [vmem:[%s2751_s14 + $0x380] sm:$0xff] %vm1189_vm1, %v1142_v25  ;;  %2577 = vmatmul.msk.f32.gmra.mxu3 %vm1189_vm1, %v1142_v25 }
 0x217   : > { %1239 = vst.msk [vmem:[%s2751_s14 + $0x188] sm:$0xff] %vm1189_vm1, %v953_v27  ;;  %2514 = vmatmul.msk.f32.gmra.mxu1 %vm1189_vm1, %v953_v27 }
 0x218   : > { %2141 = vst.msk [vmem:[%s2958_s19 + $0x108] sm:$0xff] %vm403_vm0, %v1824_v29 }
 0x219   : > { %v2012_v30 = vpop.f32.mrf.mxu3 }
 0x21a   : > { %v2013_v31 = vadd.f32 %v3475_v48, %v2012_v30 }
 0x21b   : > { %v1144_v32 = vpop.f32.mrf.mxu2 }
 0x21c   : > { %2204 = vst.msk [vmem:[%s2958_s19 + $0x300] sm:$0xff] %vm403_vm0, %v2013_v31  ;;  %v1145_v33 = vadd.f32 %v3280_v2, %v1144_v32  ;;  %v955_v34 = vpop.f32.mrf.mxu0  ;;  %v1826_v37 = vpop.f32.mrf.mxu1 }
 0x21d   : > { %v956_v36 = vadd.f32 %v3280_v2, %v955_v34  ;;  %v1827_v38 = vadd.f32 %v3475_v48, %v1826_v37 }
 0x21e   : > { %1303 = vst.msk [vmem:[%s2751_s14 + $0x388] sm:$0xff] %vm1189_vm1, %v1145_v33  ;;  %2578 = vmatmul.msk.f32.gmra.mxu3 %vm1189_vm1, %v1145_v33 }
 0x21f   : > { %1240 = vst.msk [vmem:[%s2751_s14 + $0x190] sm:$0xff] %vm1189_vm1, %v956_v36  ;;  %2515 = vmatmul.msk.f32.gmra.mxu1 %vm1189_vm1, %v956_v36 }
 0x220   : > { %2142 = vst.msk [vmem:[%s2958_s19 + $0x110] sm:$0xff] %vm403_vm0, %v1827_v38 }
 0x221   : > { %v2015_v39 = vpop.f32.mrf.mxu3 }
 0x222   : > { %v2016_v40 = vadd.f32 %v3475_v48, %v2015_v39 }
 0x223   : > { %v1147_v42 = vpop.f32.mrf.mxu2 }
 0x224   : > { %2205 = vst.msk [vmem:[%s2958_s19 + $0x308] sm:$0xff] %vm403_vm0, %v2016_v40  ;;  %v1148_v43 = vadd.f32 %v3280_v2, %v1147_v42  ;;  %v958_v44 = vpop.f32.mrf.mxu0  ;;  %v1829_v46 = vpop.f32.mrf.mxu1 }
 0x225   : > { %v959_v45 = vadd.f32 %v3280_v2, %v958_v44  ;;  %v1830_v47 = vadd.f32 %v3475_v48, %v1829_v46 }
 0x226   : > { %1304 = vst.msk [vmem:[%s2751_s14 + $0x390] sm:$0xff] %vm1189_vm1, %v1148_v43  ;;  %2579 = vmatmul.msk.f32.gmra.mxu3 %vm1189_vm1, %v1148_v43 }
 0x227   : > { %1241 = vst.msk [vmem:[%s2751_s14 + $0x198] sm:$0xff] %vm1189_vm1, %v959_v45  ;;  %2516 = vmatmul.msk.f32.gmra.mxu1 %vm1189_vm1, %v959_v45 }
 0x228   : > { %2143 = vst.msk [vmem:[%s2958_s19 + $0x118] sm:$0xff] %vm403_vm0, %v1830_v47 }
 0x229   : > { %v2018_v5 = vpop.f32.mrf.mxu3 }
 0x22a   : > { %v2019_v49 = vadd.f32 %v3475_v48, %v2018_v5 }
 0x22b   : > { %v1150_v50 = vpop.f32.mrf.mxu2 }
 0x22c   : > { %2206 = vst.msk [vmem:[%s2958_s19 + $0x310] sm:$0xff] %vm403_vm0, %v2019_v49  ;;  %v1151_v51 = vadd.f32 %v3280_v2, %v1150_v50  ;;  %v961_v52 = vpop.f32.mrf.mxu0  ;;  %v1832_v54 = vpop.f32.mrf.mxu1 }
 0x22d   : > { %v962_v53 = vadd.f32 %v3280_v2, %v961_v52  ;;  %v1833_v55 = vadd.f32 %v3475_v48, %v1832_v54 }
 0x22e   : > { %1305 = vst.msk [vmem:[%s2751_s14 + $0x398] sm:$0xff] %vm1189_vm1, %v1151_v51  ;;  %2580 = vmatmul.msk.f32.gmra.mxu3 %vm1189_vm1, %v1151_v51 }
 0x22f   : > { %1242 = vst.msk [vmem:[%s2751_s14 + $0x1a0] sm:$0xff] %vm1189_vm1, %v962_v53  ;;  %2517 = vmatmul.msk.f32.gmra.mxu1 %vm1189_vm1, %v962_v53 }
 0x230   : > { %2144 = vst.msk [vmem:[%s2958_s19 + $0x120] sm:$0xff] %vm403_vm0, %v1833_v55 }
 0x231   : > { %v2021_v56 = vpop.f32.mrf.mxu3 }
 0x232   : > { %v2022_v57 = vadd.f32 %v3475_v48, %v2021_v56 }
 0x233   : > { %v1153_v58 = vpop.f32.mrf.mxu2 }
 0x234   : > { %2207 = vst.msk [vmem:[%s2958_s19 + $0x318] sm:$0xff] %vm403_vm0, %v2022_v57  ;;  %v1154_v59 = vadd.f32 %v3280_v2, %v1153_v58  ;;  %v964_v60 = vpop.f32.mrf.mxu0  ;;  %v1835_v62 = vpop.f32.mrf.mxu1 }
 0x235   : > { %v965_v61 = vadd.f32 %v3280_v2, %v964_v60  ;;  %v1836_v63 = vadd.f32 %v3475_v48, %v1835_v62 }
 0x236   : > { %1306 = vst.msk [vmem:[%s2751_s14 + $0x3a0] sm:$0xff] %vm1189_vm1, %v1154_v59  ;;  %2581 = vmatmul.msk.f32.gmra.mxu3 %vm1189_vm1, %v1154_v59 }
 0x237   : > { %1243 = vst.msk [vmem:[%s2751_s14 + $0x1a8] sm:$0xff] %vm1189_vm1, %v965_v61  ;;  %2518 = vmatmul.msk.f32.gmra.mxu1 %vm1189_vm1, %v965_v61 }
 0x238   : > { %2145 = vst.msk [vmem:[%s2958_s19 + $0x128] sm:$0xff] %vm403_vm0, %v1836_v63 }
 0x239   : > { %v2024_v0 = vpop.f32.mrf.mxu3 }
 0x23a   : > { %v2025_v1 = vadd.f32 %v3475_v48, %v2024_v0 }
 0x23b   : > { %v1156_v3 = vpop.f32.mrf.mxu2 }
 0x23c   : > { %2208 = vst.msk [vmem:[%s2958_s19 + $0x320] sm:$0xff] %vm403_vm0, %v2025_v1  ;;  %v1157_v4 = vadd.f32 %v3280_v2, %v1156_v3  ;;  %v967_v35 = vpop.f32.mrf.mxu0  ;;  %v1838_v7 = vpop.f32.mrf.mxu1 }
 0x23d   : > { %v968_v6 = vadd.f32 %v3280_v2, %v967_v35  ;;  %v1839_v8 = vadd.f32 %v3475_v48, %v1838_v7 }
 0x23e   : > { %1307 = vst.msk [vmem:[%s2751_s14 + $0x3a8] sm:$0xff] %vm1189_vm1, %v1157_v4  ;;  %2582 = vmatmul.msk.f32.gmra.mxu3 %vm1189_vm1, %v1157_v4 }
 0x23f   : > { %1244 = vst.msk [vmem:[%s2751_s14 + $0x1b0] sm:$0xff] %vm1189_vm1, %v968_v6  ;;  %2519 = vmatmul.msk.f32.gmra.mxu1 %vm1189_vm1, %v968_v6 }
 0x240   : > { %2146 = vst.msk [vmem:[%s2958_s19 + $0x130] sm:$0xff] %vm403_vm0, %v1839_v8 }
 0x241   : > { %v2027_v9 = vpop.f32.mrf.mxu3 }
 0x242   : > { %v2028_v10 = vadd.f32 %v3475_v48, %v2027_v9 }
 0x243   : > { %v1159_v11 = vpop.f32.mrf.mxu2 }
 0x244   : > { %2209 = vst.msk [vmem:[%s2958_s19 + $0x328] sm:$0xff] %vm403_vm0, %v2028_v10  ;;  %v1160_v12 = vadd.f32 %v3280_v2, %v1159_v11  ;;  %v970_v13 = vpop.f32.mrf.mxu0  ;;  %v1841_v15 = vpop.f32.mrf.mxu1 }
 0x245   : > { %v971_v14 = vadd.f32 %v3280_v2, %v970_v13  ;;  %v1842_v16 = vadd.f32 %v3475_v48, %v1841_v15 }
 0x246   : > { %1308 = vst.msk [vmem:[%s2751_s14 + $0x3b0] sm:$0xff] %vm1189_vm1, %v1160_v12  ;;  %2583 = vmatmul.msk.f32.gmra.mxu3 %vm1189_vm1, %v1160_v12 }
 0x247   : > { %1245 = vst.msk [vmem:[%s2751_s14 + $0x1b8] sm:$0xff] %vm1189_vm1, %v971_v14  ;;  %2520 = vmatmul.msk.f32.gmra.mxu1 %vm1189_vm1, %v971_v14 }
 0x248   : > { %2147 = vst.msk [vmem:[%s2958_s19 + $0x138] sm:$0xff] %vm403_vm0, %v1842_v16 }
 0x249   : > { %v2030_v17 = vpop.f32.mrf.mxu3 }
 0x24a   : > { %v2031_v18 = vadd.f32 %v3475_v48, %v2030_v17 }
 0x24b   : > { %v1162_v19 = vpop.f32.mrf.mxu2 }
 0x24c   : > { %2210 = vst.msk [vmem:[%s2958_s19 + $0x330] sm:$0xff] %vm403_vm0, %v2031_v18  ;;  %v1163_v20 = vadd.f32 %v3280_v2, %v1162_v19  ;;  %v973_v21 = vpop.f32.mrf.mxu0  ;;  %v1844_v23 = vpop.f32.mrf.mxu1 }
 0x24d   : > { %v974_v22 = vadd.f32 %v3280_v2, %v973_v21  ;;  %v1845_v24 = vadd.f32 %v3475_v48, %v1844_v23 }
 0x24e   : > { %1309 = vst.msk [vmem:[%s2751_s14 + $0x3b8] sm:$0xff] %vm1189_vm1, %v1163_v20  ;;  %2584 = vmatmul.msk.f32.gmra.mxu3 %vm1189_vm1, %v1163_v20 }
 0x24f   : > { %1246 = vst.msk [vmem:[%s2751_s14 + $0x1c0] sm:$0xff] %vm1189_vm1, %v974_v22  ;;  %2521 = vmatmul.msk.f32.gmra.mxu1 %vm1189_vm1, %v974_v22 }
 0x250   : > { %2148 = vst.msk [vmem:[%s2958_s19 + $0x140] sm:$0xff] %vm403_vm0, %v1845_v24 }
 0x251   : > { %v2033_v25 = vpop.f32.mrf.mxu3 }
 0x252   : > { %v2034_v26 = vadd.f32 %v3475_v48, %v2033_v25 }
 0x253   : > { %v1165_v27 = vpop.f32.mrf.mxu2 }
 0x254   : > { %2211 = vst.msk [vmem:[%s2958_s19 + $0x338] sm:$0xff] %vm403_vm0, %v2034_v26  ;;  %v1166_v28 = vadd.f32 %v3280_v2, %v1165_v27  ;;  %v976_v29 = vpop.f32.mrf.mxu0  ;;  %v1847_v31 = vpop.f32.mrf.mxu1 }
 0x255   : > { %v977_v30 = vadd.f32 %v3280_v2, %v976_v29  ;;  %v1848_v32 = vadd.f32 %v3475_v48, %v1847_v31 }
 0x256   : > { %1310 = vst.msk [vmem:[%s2751_s14 + $0x3c0] sm:$0xff] %vm1189_vm1, %v1166_v28  ;;  %2585 = vmatmul.msk.f32.gmra.mxu3 %vm1189_vm1, %v1166_v28 }
 0x257   : > { %1247 = vst.msk [vmem:[%s2751_s14 + $0x1c8] sm:$0xff] %vm1189_vm1, %v977_v30  ;;  %2522 = vmatmul.msk.f32.gmra.mxu1 %vm1189_vm1, %v977_v30 }
 0x258   : > { %2149 = vst.msk [vmem:[%s2958_s19 + $0x148] sm:$0xff] %vm403_vm0, %v1848_v32 }
 0x259   : > { %v2036_v33 = vpop.f32.mrf.mxu3 }
 0x25a   : > { %v2037_v34 = vadd.f32 %v3475_v48, %v2036_v33 }
 0x25b   : > { %v1168_v36 = vpop.f32.mrf.mxu2 }
 0x25c   : > { %2212 = vst.msk [vmem:[%s2958_s19 + $0x340] sm:$0xff] %vm403_vm0, %v2037_v34  ;;  %v1169_v37 = vadd.f32 %v3280_v2, %v1168_v36  ;;  %v979_v38 = vpop.f32.mrf.mxu0  ;;  %v1850_v40 = vpop.f32.mrf.mxu1 }
 0x25d   : > { %v980_v39 = vadd.f32 %v3280_v2, %v979_v38  ;;  %v1851_v42 = vadd.f32 %v3475_v48, %v1850_v40 }
 0x25e   : > { %1311 = vst.msk [vmem:[%s2751_s14 + $0x3c8] sm:$0xff] %vm1189_vm1, %v1169_v37  ;;  %2586 = vmatmul.msk.f32.gmra.mxu3 %vm1189_vm1, %v1169_v37 }
 0x25f   : > { %1248 = vst.msk [vmem:[%s2751_s14 + $0x1d0] sm:$0xff] %vm1189_vm1, %v980_v39  ;;  %2523 = vmatmul.msk.f32.gmra.mxu1 %vm1189_vm1, %v980_v39 }
 0x260   : > { %2150 = vst.msk [vmem:[%s2958_s19 + $0x150] sm:$0xff] %vm403_vm0, %v1851_v42 }
 0x261   : > { %v2039_v43 = vpop.f32.mrf.mxu3 }
 0x262   : > { %v2040_v44 = vadd.f32 %v3475_v48, %v2039_v43 }
 0x263   : > { %v1171_v45 = vpop.f32.mrf.mxu2 }
 0x264   : > { %2213 = vst.msk [vmem:[%s2958_s19 + $0x348] sm:$0xff] %vm403_vm0, %v2040_v44  ;;  %v1172_v46 = vadd.f32 %v3280_v2, %v1171_v45  ;;  %v982_v47 = vpop.f32.mrf.mxu0  ;;  %v1853_v49 = vpop.f32.mrf.mxu1 }
 0x265   : > { %v983_v5 = vadd.f32 %v3280_v2, %v982_v47  ;;  %v1854_v50 = vadd.f32 %v3475_v48, %v1853_v49 }
 0x266   : > { %1312 = vst.msk [vmem:[%s2751_s14 + $0x3d0] sm:$0xff] %vm1189_vm1, %v1172_v46  ;;  %2587 = vmatmul.msk.f32.gmra.mxu3 %vm1189_vm1, %v1172_v46 }
 0x267   : > { %1249 = vst.msk [vmem:[%s2751_s14 + $0x1d8] sm:$0xff] %vm1189_vm1, %v983_v5  ;;  %2524 = vmatmul.msk.f32.gmra.mxu1 %vm1189_vm1, %v983_v5 }
 0x268   : > { %2151 = vst.msk [vmem:[%s2958_s19 + $0x158] sm:$0xff] %vm403_vm0, %v1854_v50 }
 0x269   : > { %v2042_v51 = vpop.f32.mrf.mxu3 }
 0x26a   : > { %v2043_v52 = vadd.f32 %v3475_v48, %v2042_v51 }
 0x26b   : > { %v1174_v53 = vpop.f32.mrf.mxu2 }
 0x26c   : > { %2214 = vst.msk [vmem:[%s2958_s19 + $0x350] sm:$0xff] %vm403_vm0, %v2043_v52  ;;  %v1175_v54 = vadd.f32 %v3280_v2, %v1174_v53  ;;  %v985_v55 = vpop.f32.mrf.mxu0  ;;  %v1856_v57 = vpop.f32.mrf.mxu1 }
 0x26d   : > { %v986_v56 = vadd.f32 %v3280_v2, %v985_v55  ;;  %v1857_v58 = vadd.f32 %v3475_v48, %v1856_v57 }
 0x26e   : > { %1313 = vst.msk [vmem:[%s2751_s14 + $0x3d8] sm:$0xff] %vm1189_vm1, %v1175_v54  ;;  %2588 = vmatmul.msk.f32.gmra.mxu3 %vm1189_vm1, %v1175_v54 }
 0x26f   : > { %1250 = vst.msk [vmem:[%s2751_s14 + $0x1e0] sm:$0xff] %vm1189_vm1, %v986_v56  ;;  %2525 = vmatmul.msk.f32.gmra.mxu1 %vm1189_vm1, %v986_v56 }
 0x270   : > { %2152 = vst.msk [vmem:[%s2958_s19 + $0x160] sm:$0xff] %vm403_vm0, %v1857_v58 }
 0x271   : > { %v2045_v59 = vpop.f32.mrf.mxu3 }
 0x272   : > { %v2046_v60 = vadd.f32 %v3475_v48, %v2045_v59 }
 0x273   : > { %v1177_v61 = vpop.f32.mrf.mxu2 }
 0x274   : > { %2215 = vst.msk [vmem:[%s2958_s19 + $0x358] sm:$0xff] %vm403_vm0, %v2046_v60  ;;  %v1178_v62 = vadd.f32 %v3280_v2, %v1177_v61  ;;  %v988_v63 = vpop.f32.mrf.mxu0  ;;  %v1859_v1 = vpop.f32.mrf.mxu1 }
 0x275   : > { %v989_v0 = vadd.f32 %v3280_v2, %v988_v63  ;;  %v1860_v3 = vadd.f32 %v3475_v48, %v1859_v1 }
 0x276   : > { %1314 = vst.msk [vmem:[%s2751_s14 + $0x3e0] sm:$0xff] %vm1189_vm1, %v1178_v62  ;;  %2589 = vmatmul.msk.f32.gmra.mxu3 %vm1189_vm1, %v1178_v62 }
 0x277   : > { %1251 = vst.msk [vmem:[%s2751_s14 + $0x1e8] sm:$0xff] %vm1189_vm1, %v989_v0  ;;  %2526 = vmatmul.msk.f32.gmra.mxu1 %vm1189_vm1, %v989_v0 }
 0x278   : > { %2153 = vst.msk [vmem:[%s2958_s19 + $0x168] sm:$0xff] %vm403_vm0, %v1860_v3 }
 0x279   : > { %v2048_v4 = vpop.f32.mrf.mxu3 }
 0x27a   : > { %v2049_v35 = vadd.f32 %v3475_v48, %v2048_v4 }
 0x27b   : > { %v1180_v6 = vpop.f32.mrf.mxu2 }
 0x27c   : > { %2216 = vst.msk [vmem:[%s2958_s19 + $0x360] sm:$0xff] %vm403_vm0, %v2049_v35  ;;  %v1181_v7 = vadd.f32 %v3280_v2, %v1180_v6  ;;  %v991_v8 = vpop.f32.mrf.mxu0  ;;  %v1862_v10 = vpop.f32.mrf.mxu1 }
 0x27d   : > { %v992_v9 = vadd.f32 %v3280_v2, %v991_v8  ;;  %v1863_v11 = vadd.f32 %v3475_v48, %v1862_v10 }
 0x27e   : > { %1315 = vst.msk [vmem:[%s2751_s14 + $0x3e8] sm:$0xff] %vm1189_vm1, %v1181_v7  ;;  %2590 = vmatmul.msk.f32.gmra.mxu3 %vm1189_vm1, %v1181_v7 }
 0x27f   : > { %1252 = vst.msk [vmem:[%s2751_s14 + $0x1f0] sm:$0xff] %vm1189_vm1, %v992_v9  ;;  %2527 = vmatmul.msk.f32.gmra.mxu1 %vm1189_vm1, %v992_v9 }
 0x280   : > { %2154 = vst.msk [vmem:[%s2958_s19 + $0x170] sm:$0xff] %vm403_vm0, %v1863_v11 }
 0x281   : > { %v2051_v12 = vpop.f32.mrf.mxu3 }
 0x282   : > { %v2052_v13 = vadd.f32 %v3475_v48, %v2051_v12 }
 0x283   : > { %v1183_v14 = vpop.f32.mrf.mxu2 }
 0x284   : > { %2217 = vst.msk [vmem:[%s2958_s19 + $0x368] sm:$0xff] %vm403_vm0, %v2052_v13  ;;  %v1184_v15 = vadd.f32 %v3280_v2, %v1183_v14  ;;  %v994_v16 = vpop.f32.mrf.mxu0  ;;  %v1865_v18 = vpop.f32.mrf.mxu1 }
 0x285   : > { %v995_v17 = vadd.f32 %v3280_v2, %v994_v16  ;;  %v1866_v19 = vadd.f32 %v3475_v48, %v1865_v18 }
 0x286   : > { %1316 = vst.msk [vmem:[%s2751_s14 + $0x3f0] sm:$0xff] %vm1189_vm1, %v1184_v15  ;;  %2591 = vmatmul.msk.f32.gmra.mxu3 %vm1189_vm1, %v1184_v15 }
 0x287   : > { %1253 = vst.msk [vmem:[%s2751_s14 + $0x1f8] sm:$0xff] %vm1189_vm1, %v995_v17  ;;  %2528 = vmatmul.msk.f32.gmra.mxu1 %vm1189_vm1, %v995_v17 }
 0x288   : > { %2155 = vst.msk [vmem:[%s2958_s19 + $0x178] sm:$0xff] %vm403_vm0, %v1866_v19 }
 0x289   : > { %v2054_v20 = vpop.f32.mrf.mxu3 }
 0x28a   : > { %v2055_v21 = vadd.f32 %v3475_v48, %v2054_v20 }
 0x28b   : > { %v1186_v22 = vpop.f32.mrf.mxu2 }
 0x28c   : > { %2218 = vst.msk [vmem:[%s2958_s19 + $0x370] sm:$0xff] %vm403_vm0, %v2055_v21  ;;  %v1187_v23 = vadd.f32 %v3280_v2, %v1186_v22  ;;  %v1868_v24 = vpop.f32.mrf.mxu1 }
 0x28d   : > { %v1869_v25 = vadd.f32 %v3475_v48, %v1868_v24 }
 0x28e   : > { %1317 = vst.msk [vmem:[%s2751_s14 + $0x3f8] sm:$0xff] %vm1189_vm1, %v1187_v23  ;;  %2592 = vmatmul.msk.f32.gmra.mxu3 %vm1189_vm1, %v1187_v23 }
 0x28f   : > { %2156 = vst.msk [vmem:[%s2958_s19 + $0x180] sm:$0xff] %vm403_vm0, %v1869_v25  ;;  %2529 = vmatmul.msk.f32.gmra.mxu1 %vm1189_vm1, %v2762_v41 }
 0x291   : > { %v2057_v26 = vpop.f32.mrf.mxu3 }
 0x292   : > { %v2058_v27 = vadd.f32 %v3475_v48, %v2057_v26 }
 0x294   : > { %2219 = vst.msk [vmem:[%s2958_s19 + $0x378] sm:$0xff] %vm403_vm0, %v2058_v27  ;;  %v1871_v2 = vpop.f32.mrf.mxu1 }
 0x295   : > { %v1872_v28 = vadd.f32 %v3475_v48, %v1871_v2 }
 0x297   : > { %2157 = vst.msk [vmem:[%s2958_s19 + $0x188] sm:$0xff] %vm403_vm0, %v1872_v28 }
 0x299   : > { %v2060_v29 = vpop.f32.mrf.mxu3 }
 0x29a   : > { %v2061_v30 = vadd.f32 %v3475_v48, %v2060_v29 }
 0x29c   : > { %2220 = vst.msk [vmem:[%s2958_s19 + $0x380] sm:$0xff] %vm403_vm0, %v2061_v30  ;;  %v1874_v31 = vpop.f32.mrf.mxu1 }
 0x29d   : > { %v1875_v41 = vadd.f32 %v3475_v48, %v1874_v31 }
 0x29f   : > { %2158 = vst.msk [vmem:[%s2958_s19 + $0x190] sm:$0xff] %vm403_vm0, %v1875_v41 }
 0x2a1   : > { %v2063_v32 = vpop.f32.mrf.mxu3 }
 0x2a2   : > { %v2064_v33 = vadd.f32 %v3475_v48, %v2063_v32 }
 0x2a4   : > { %2221 = vst.msk [vmem:[%s2958_s19 + $0x388] sm:$0xff] %vm403_vm0, %v2064_v33  ;;  %v1877_v34 = vpop.f32.mrf.mxu1 }
 0x2a5   : > { %v1878_v36 = vadd.f32 %v3475_v48, %v1877_v34 }
 0x2a7   : > { %2159 = vst.msk [vmem:[%s2958_s19 + $0x198] sm:$0xff] %vm403_vm0, %v1878_v36 }
 0x2a9   : > { %v2066_v37 = vpop.f32.mrf.mxu3 }
 0x2aa   : > { %v2067_v38 = vadd.f32 %v3475_v48, %v2066_v37 }
 0x2ac   : > { %2222 = vst.msk [vmem:[%s2958_s19 + $0x390] sm:$0xff] %vm403_vm0, %v2067_v38  ;;  %v1880_v39 = vpop.f32.mrf.mxu1 }
 0x2ad   : > { %v1881_v40 = vadd.f32 %v3475_v48, %v1880_v39 }
 0x2af   : > { %2160 = vst.msk [vmem:[%s2958_s19 + $0x1a0] sm:$0xff] %vm403_vm0, %v1881_v40 }
 0x2b1   : > { %v2069_v42 = vpop.f32.mrf.mxu3 }
 0x2b2   : > { %v2070_v43 = vadd.f32 %v3475_v48, %v2069_v42 }
 0x2b4   : > { %2223 = vst.msk [vmem:[%s2958_s19 + $0x398] sm:$0xff] %vm403_vm0, %v2070_v43  ;;  %v1883_v44 = vpop.f32.mrf.mxu1 }
 0x2b5   : > { %v1884_v45 = vadd.f32 %v3475_v48, %v1883_v44 }
 0x2b7   : > { %2161 = vst.msk [vmem:[%s2958_s19 + $0x1a8] sm:$0xff] %vm403_vm0, %v1884_v45 }
 0x2b9   : > { %v2072_v46 = vpop.f32.mrf.mxu3 }
 0x2ba   : > { %v2073_v47 = vadd.f32 %v3475_v48, %v2072_v46 }
 0x2bc   : > { %2224 = vst.msk [vmem:[%s2958_s19 + $0x3a0] sm:$0xff] %vm403_vm0, %v2073_v47  ;;  %v1886_v5 = vpop.f32.mrf.mxu1 }
 0x2bd   : > { %v1887_v49 = vadd.f32 %v3475_v48, %v1886_v5 }
 0x2bf   : > { %2162 = vst.msk [vmem:[%s2958_s19 + $0x1b0] sm:$0xff] %vm403_vm0, %v1887_v49 }
 0x2c1   : > { %v2075_v50 = vpop.f32.mrf.mxu3 }
 0x2c2   : > { %v2076_v51 = vadd.f32 %v3475_v48, %v2075_v50 }
 0x2c4   : > { %2225 = vst.msk [vmem:[%s2958_s19 + $0x3a8] sm:$0xff] %vm403_vm0, %v2076_v51  ;;  %v1889_v52 = vpop.f32.mrf.mxu1 }
 0x2c5   : > { %v1890_v53 = vadd.f32 %v3475_v48, %v1889_v52 }
 0x2c7   : > { %2163 = vst.msk [vmem:[%s2958_s19 + $0x1b8] sm:$0xff] %vm403_vm0, %v1890_v53 }
 0x2c9   : > { %v2078_v54 = vpop.f32.mrf.mxu3 }
 0x2ca   : > { %v2079_v55 = vadd.f32 %v3475_v48, %v2078_v54 }
 0x2cc   : > { %2226 = vst.msk [vmem:[%s2958_s19 + $0x3b0] sm:$0xff] %vm403_vm0, %v2079_v55  ;;  %v1892_v56 = vpop.f32.mrf.mxu1 }
 0x2cd   : > { %v1893_v57 = vadd.f32 %v3475_v48, %v1892_v56 }
 0x2cf   : > { %2164 = vst.msk [vmem:[%s2958_s19 + $0x1c0] sm:$0xff] %vm403_vm0, %v1893_v57 }
 0x2d1   : > { %v2081_v58 = vpop.f32.mrf.mxu3 }
 0x2d2   : > { %v2082_v59 = vadd.f32 %v3475_v48, %v2081_v58 }
 0x2d4   : > { %2227 = vst.msk [vmem:[%s2958_s19 + $0x3b8] sm:$0xff] %vm403_vm0, %v2082_v59  ;;  %v1895_v60 = vpop.f32.mrf.mxu1 }
 0x2d5   : > { %v1896_v61 = vadd.f32 %v3475_v48, %v1895_v60 }
 0x2d7   : > { %2165 = vst.msk [vmem:[%s2958_s19 + $0x1c8] sm:$0xff] %vm403_vm0, %v1896_v61 }
 0x2d9   : > { %v2084_v62 = vpop.f32.mrf.mxu3 }
 0x2da   : > { %v2085_v63 = vadd.f32 %v3475_v48, %v2084_v62 }
 0x2dc   : > { %2228 = vst.msk [vmem:[%s2958_s19 + $0x3c0] sm:$0xff] %vm403_vm0, %v2085_v63  ;;  %v1898_v0 = vpop.f32.mrf.mxu1 }
 0x2dd   : > { %v1899_v1 = vadd.f32 %v3475_v48, %v1898_v0 }
 0x2df   : > { %2166 = vst.msk [vmem:[%s2958_s19 + $0x1d0] sm:$0xff] %vm403_vm0, %v1899_v1 }
 0x2e1   : > { %v2087_v3 = vpop.f32.mrf.mxu3 }
 0x2e2   : > { %v2088_v4 = vadd.f32 %v3475_v48, %v2087_v3 }
 0x2e4   : > { %2229 = vst.msk [vmem:[%s2958_s19 + $0x3c8] sm:$0xff] %vm403_vm0, %v2088_v4  ;;  %v1901_v35 = vpop.f32.mrf.mxu1 }
 0x2e5   : > { %v1902_v6 = vadd.f32 %v3475_v48, %v1901_v35 }
 0x2e7   : > { %2167 = vst.msk [vmem:[%s2958_s19 + $0x1d8] sm:$0xff] %vm403_vm0, %v1902_v6 }
 0x2e9   : > { %v2090_v7 = vpop.f32.mrf.mxu3 }
 0x2ea   : > { %v2091_v8 = vadd.f32 %v3475_v48, %v2090_v7 }
 0x2ec   : > { %2230 = vst.msk [vmem:[%s2958_s19 + $0x3d0] sm:$0xff] %vm403_vm0, %v2091_v8  ;;  %v1904_v9 = vpop.f32.mrf.mxu1 }
 0x2ed   : > { %v1905_v10 = vadd.f32 %v3475_v48, %v1904_v9 }
 0x2ef   : > { %2168 = vst.msk [vmem:[%s2958_s19 + $0x1e0] sm:$0xff] %vm403_vm0, %v1905_v10 }
 0x2f1   : > { %v2093_v11 = vpop.f32.mrf.mxu3 }
 0x2f2   : > { %v2094_v12 = vadd.f32 %v3475_v48, %v2093_v11 }
 0x2f4   : > { %2231 = vst.msk [vmem:[%s2958_s19 + $0x3d8] sm:$0xff] %vm403_vm0, %v2094_v12  ;;  %v1907_v13 = vpop.f32.mrf.mxu1 }
 0x2f5   : > { %v1908_v14 = vadd.f32 %v3475_v48, %v1907_v13 }
 0x2f7   : > { %2169 = vst.msk [vmem:[%s2958_s19 + $0x1e8] sm:$0xff] %vm403_vm0, %v1908_v14 }
 0x2f9   : > { %v2096_v15 = vpop.f32.mrf.mxu3 }
 0x2fa   : > { %v2097_v16 = vadd.f32 %v3475_v48, %v2096_v15 }
 0x2fc   : > { %2232 = vst.msk [vmem:[%s2958_s19 + $0x3e0] sm:$0xff] %vm403_vm0, %v2097_v16  ;;  %v1910_v17 = vpop.f32.mrf.mxu1 }
 0x2fd   : > { %v1911_v18 = vadd.f32 %v3475_v48, %v1910_v17 }
 0x2ff   : > { %2170 = vst.msk [vmem:[%s2958_s19 + $0x1f0] sm:$0xff] %vm403_vm0, %v1911_v18 }
 0x301   : > { %v2099_v19 = vpop.f32.mrf.mxu3 }
 0x302   : > { %v2100_v20 = vadd.f32 %v3475_v48, %v2099_v19 }
 0x304   : > { %2233 = vst.msk [vmem:[%s2958_s19 + $0x3e8] sm:$0xff] %vm403_vm0, %v2100_v20  ;;  %v1913_v21 = vpop.f32.mrf.mxu1 }
 0x305   : > { %v1914_v22 = vadd.f32 %v3475_v48, %v1913_v21 }
 0x307   : > { %2171 = vst.msk [vmem:[%s2958_s19 + $0x1f8] sm:$0xff] %vm403_vm0, %v1914_v22 }
 0x309   : > { %v2102_v23 = vpop.f32.mrf.mxu3 }
 0x30a   : > { %v2103_v24 = vadd.f32 %v3475_v48, %v2102_v23 }
 0x30c   : > { %2234 = vst.msk [vmem:[%s2958_s19 + $0x3f0] sm:$0xff] %vm403_vm0, %v2103_v24  ;;  %v1916_v25 = vpop.f32.mrf.mxu1 }
 0x30d   : > { %v1917_v26 = vadd.f32 %v3475_v48, %v1916_v25 }
 0x30f   : > { %2172 = vst.msk [vmem:[%s2958_s19 + $0x200] sm:$0xff] %vm403_vm0, %v1917_v26 }
 0x311   : > { %v2105_v27 = vpop.f32.mrf.mxu3 }
 0x312   : > { %v2106_v2 = vadd.f32 %v3475_v48, %v2105_v27 }
 0x314   : > { %2235 = vst.msk [vmem:[%s2958_s19 + $0x3f8] sm:$0xff] %vm403_vm0, %v2106_v2 }
 0x315 PF: > { %s17_s21 = sadd.s32 1, %s2616_s21  }
 0x316   : > { %p14_p4 = scmp.ge.s32.totalorder %s17_s21, 4  }
 0x318   :  { %16 = sbr.rel (!%p14_p4) target bundleno = 1 (0x1), region = 82 }

// kernel: tile.8
= control target key start
LH: loop header
LB: loop body
LE: loop exit
PB: predicated region body
PF: predicated region fallthrough
CT: control target
= control target key end

     0   :  { %s40_s0 = inlined_call_operand.vmem [shape: f32[16], index: 0, kind: input, shape index: {}]   ;;  %s41_s1 = inlined_call_operand.vmem [shape: f32[32,16], index: 1, kind: output, shape index: {}]  }
   0x1   :  { %v4_v0 = vld [vmem:[%s40_s0] ss:$0 sm:$0xff] }
   0x2   :  { %5 = vst [vmem:[%s41_s1] sm:$0xff] %v4_v0 }
   0x3   :  { %12 = vst [vmem:[%s41_s1 + $0x8] sm:$0xff] %v4_v0 }
   0x4   :  { %13 = vst [vmem:[%s41_s1 + $0x10] sm:$0xff] %v4_v0 }
   0x5   :  { %14 = vst [vmem:[%s41_s1 + $0x18] sm:$0xff] %v4_v0 }

// kernel: tile.9
= control target key start
LH: loop header
LB: loop body
LE: loop exit
PB: predicated region body
PF: predicated region fallthrough
CT: control target
= control target key end

     0   :  { %s88_s8 = smov 112   ;;  %s89_s11 = smov 80   ;;  %vm3_vm0 = vcmask 130048   ;;  %vm9_vm1 = vcmask 1048448   ;;  %vm15_vm2 = vcmask 917248   ;;  %vm21_vm3 = vcmask 786048   ;;  %s141_s0 = inlined_call_operand.vmem [shape: f32[32,16], index: 0, kind: input, shape index: {}]   ;;  %s142_s1 = inlined_call_operand.vmem [shape: f32[1,512], index: 1, kind: output, shape index: {}]  }
   0x1   :  { %v71_v0 = vld [vmem:[%s141_s0 + $0x7] ss:$8 sm:$0xf]   ;;  %v73_v1 = vld [vmem:[%s141_s0 + $0x5] ss:$8 sm:$0xf]  }
   0x2   :  { %7 = vrot.lane.b32.xlu0 %v71_v0, %s88_s8  ;;  %19 = vrot.lane.b32.xlu1 %v73_v1, %s89_s11  ;;  %v75_v2 = vld [vmem:[%s141_s0 + $0x3] ss:$8 sm:$0xf]   ;;  %s90_s14 = smov 48   ;;  %s91_s19 = smov 96   ;;  %vm27_vm4 = vcmask 654848  }
   0x3   :  { %31 = vrot.lane.b32.xlu2 %v75_v2, %s90_s14  ;;  %v72_v3 = vld [vmem:[%s141_s0 + $0x6] ss:$8 sm:$0xf]   ;;  %v74_v4 = vld [vmem:[%s141_s0 + $0x4] ss:$8 sm:$0xf]  }
   0x4   :  { %s92_s20 = smov 64   ;;  %v76_v5 = vld [vmem:[%s141_s0 + $0x2] ss:$8 sm:$0xf]   ;;  %s93_s23 = smov 32   ;;  %vm33_vm5 = vcmask 523648  }
   0x5   :  { %v77_v6 = vld [vmem:[%s141_s0 + $0x1] ss:$8 sm:$0xf]   ;;  %s94_s26 = smov 16   ;;  %vm39_vm6 = vcmask 392448   ;;  %vm45_vm7 = vcmask 261248  }
   0x6   :  { %v2_v7 = vld [vmem:[%s141_s0] ss:$8 sm:$0xf]  }
   0x7   :  { %4 = vst.msk [vmem:[#allocation0] ss:$8 sm:$0xf] %vm3_vm0, %v2_v7  }
   0xa   :  { %13 = vrot.lane.b32.xlu0 %v72_v3, %s91_s19  ;;  %25 = vrot.lane.b32.xlu1 %v74_v4, %s92_s20 }
   0xb   :  { %37 = vrot.lane.b32.xlu2 %v76_v5, %s93_s23 }
  0x12   :  { %43 = vrot.lane.b32.xlu0 %v77_v6, %s94_s26 }
  0x5d   :  { %v32_v8 = vpop.permute.xlu2 %31  }
  0x65   :  { %v38_v9 = vpop.permute.xlu2 %37  }
  0x74   :  { %v8_v10 = vpop.permute.xlu0 %7   ;;  %v20_v11 = vpop.permute.xlu1 %19  }
  0x75   :  { %10 = vst.msk [vmem:[#allocation0] ss:$8 sm:$0xf] %vm9_vm1, %v8_v10  }
  0x7c   :  { %v14_v12 = vpop.permute.xlu0 %13   ;;  %v26_v13 = vpop.permute.xlu1 %25  }
  0x7d   :  { %16 = vst.msk [vmem:[#allocation0] ss:$8 sm:$0xf] %vm15_vm2, %v14_v12  }
  0x7e   :  { %22 = vst.msk [vmem:[#allocation0] ss:$8 sm:$0xf] %vm21_vm3, %v20_v11  }
  0x7f   :  { %28 = vst.msk [vmem:[#allocation0] ss:$8 sm:$0xf] %vm27_vm4, %v26_v13  }
  0x80   :  { %34 = vst.msk [vmem:[#allocation0] ss:$8 sm:$0xf] %vm33_vm5, %v32_v8  }
  0x81   :  { %40 = vst.msk [vmem:[#allocation0] ss:$8 sm:$0xf] %vm39_vm6, %v38_v9  }
  0x84   :  { %v44_v14 = vpop.permute.xlu0 %43  }
  0x85   :  { %46 = vst.msk [vmem:[#allocation0] ss:$8 sm:$0xf] %vm45_vm7, %v44_v14  }
  0x8c   :  { %v49_v15 = vld [vmem:[#allocation0] sm:$0x1]  ;;  %v54_v16 = vld [vmem:[#allocation0 + $0x8] sm:$0x1]  ;;  %v60_v17 = vld [vmem:[#allocation0 + $0x10] sm:$0x1] }
  0x8d   :  { %52 = vst [vmem:[%s142_s1] sm:$0x1] %v49_v15  ;;  %v66_v18 = vld [vmem:[#allocation0 + $0x18] sm:$0x1] }
  0x8e   :  { %78 = vst [vmem:[%s142_s1 + $0x1] sm:$0x1] %v54_v16 }
  0x8f   :  { %79 = vst [vmem:[%s142_s1 + $0x2] sm:$0x1] %v60_v17 }
  0x90   :  { %80 = vst [vmem:[%s142_s1 + $0x3] sm:$0x1] %v66_v18 }

// kernel: esa_forward_nchw.5
= control target key start
LH: loop header
LB: loop body
LE: loop exit
PB: predicated region body
PF: predicated region fallthrough
CT: control target
= control target key end

     0   :  { %s1239_s18 = smov 0   ;;  %s1241_s19 = smov 0   ;;  %s1600_s0 = inlined_call_operand.vmem [shape: f32[32,3], index: 0, kind: input, shape index: {}]   ;;  %s1601_s1 = inlined_call_operand.vmem [shape: f32[2,3,512], index: 1, kind: input, shape index: {}]   ;;  %s1602_s2 = inlined_call_operand.vmem [shape: f32[2,32,512], index: 2, kind: input, shape index: {}]   ;;  %s1603_s3 = inlined_call_operand.vmem [shape: f32[1,512], index: 3, kind: input, shape index: {}]   ;;  %s1604_s4 = inlined_call_operand.vmem [shape: f32[2,32,512], index: 4, kind: input, shape index: {}]   ;;  %s1605_s5 = inlined_call_operand.vmem [shape: f32[2,32,512], index: 5, kind: output, shape index: {}]  }
   0x1   :  { %s1243_s20 = smov 0  }
   0x2 LB: > { %s27_s21 = sadd.s32 1, %s1203_s19  ;;  %p1046_p0 = scmp.ge.s32.totalorder %s1207_s20, 1  ;;  %s1207_s20 = sphi %s1243_s20, %s15_s20   ;;  %s1203_s19 = sphi %s1241_s19, %s1629_s19   ;;  %s1199_s18 = sphi %s1239_s18, %s1628_s18  }
   0x3   : > { %p29_p1 = scmp.ge.s32.totalorder %s27_s21, 2  ;;  %p248_p2 = scmp.lt.s32.totalorder %s1207_s20, 3 }
   0x5   : > { %s1631_s21 = smov (%p29_p1, %s27_s21), 0  ;;  %p249_p3 = pnand %p1046_p0, %p248_p2 }
   0x6   : > { %p312_p4 = scmp.lt.s32.totalorder (!%p249_p3), %s1199_s18, 1 }
   0x7   : > { %252 = sbr.rel (%p249_p3) target bundleno = 251 (0xfb), region = 40 }
   0xc   : > { %s1633_s18 = smov (!%p312_p4, %s1199_s18), 1  ;;  %vm394_vm0 = vcmask 1042432   ;;  %v350_v2 = vld [vmem:[%s1600_s0] sm:$0xff]  ;;  %vm381_vm1 = vcmask 23552   ;;  %v351_v7 = vld [vmem:[%s1600_s0 + $0x8] sm:$0xff]  ;;  %v352_v8 = vld [vmem:[%s1600_s0 + $0x10] sm:$0xff] }
   0xd   : > { %s1093_s22 = sshll.u32 %s1633_s18, 4  ;;  %v353_v9 = vld [vmem:[%s1600_s0 + $0x18] sm:$0xff]  ;;  %s1292_s9 = sshll.u32 %s1633_s18, 7  ;;  %v519_v10 = vld [vmem:[%s1603_s3] sm:$0xf] }
   0xe   : > { %s316_s25 = scalar_lea.vmem %s1601_s1, %s1093_s22  ;;  %s1298_s12 = scalar_lea.vmem %s1602_s2, %s1292_s9  ;;  %v1305_v13 = vperm.slane %v519_v10, 0  ;;  %v1307_v14 = vperm.slane %v519_v10, 1  ;;  %v1313_v25 = vperm.slane %v519_v10, 2  ;;  %v1315_v26 = vperm.slane %v519_v10, 3 }
   0xf   : > { %v354_v0 = vld [vmem:[%s316_s25] sm:$0x77]  ;;  %v355_v1 = vld [vmem:[%s316_s25 + $0x8] sm:$0x77]  ;;  %v358_v23 = vld [vmem:[%s1298_s12 + $0x10] sm:$0xff]  ;;  %s1364_s17 = scalar_lea.vmem %s1604_s4, %s1292_s9  ;;  %s1395_s23 = scalar_lea.vmem %s1605_s5, %s1292_s9 }
  0x10   : > { %374 = vst [vmem:[#allocation1] ss:$2 sm:$0xff] %v354_v0  ;;  %v356_v11 = vld [vmem:[%s1298_s12] sm:$0xff]  ;;  %v357_v12 = vld [vmem:[%s1298_s12 + $0x8] sm:$0xff]  ;;  %v359_v24 = vld [vmem:[%s1298_s12 + $0x18] sm:$0xff] }
  0x11   : > { %376 = vst [vmem:[#allocation1 + $0x10] ss:$2 sm:$0xff] %v355_v1  ;;  %v360_v27 = vld [vmem:[%s1298_s12 + $0x20] sm:$0xff]  ;;  %v361_v28 = vld [vmem:[%s1298_s12 + $0x28] sm:$0xff]  ;;  %v362_v49 = vld [vmem:[%s1298_s12 + $0x30] sm:$0xff] }
  0x12   : > { %v363_v52 = vld [vmem:[%s1298_s12 + $0x38] sm:$0xff]  ;;  %v364_v56 = vld [vmem:[%s1298_s12 + $0x40] sm:$0xff]  ;;  %v365_v1 = vld [vmem:[%s1298_s12 + $0x48] sm:$0xff] }
  0x17   : > { %v377_v3 = vld.sshfl [vmem:[#allocation1] sm:$0xff pattern:$0x75316420]  ;;  %v378_v4 = vld.sshfl [vmem:[#allocation1 + $0x8] sm:$0xff pattern:$0x75316420] }
  0x18   : > { %1055 = vmatpush.msk.msra.mxu0 %vm394_vm0, %v377_v3  ;;  %1060 = vmatpush.msk.msra.mxu1 %vm394_vm0, %v378_v4  ;;  %v379_v5 = vld.sshfl [vmem:[#allocation1 + $0x10] sm:$0xff pattern:$0x75316420]  ;;  %v380_v6 = vld.sshfl [vmem:[#allocation1 + $0x18] sm:$0xff pattern:$0x75316420] }
  0x19   : > { %1065 = vmatpush.msk.msra.mxu2 %vm394_vm0, %v379_v5  ;;  %1070 = vmatpush.msk.msra.mxu3 %vm394_vm0, %v380_v6 }
  0x1a   : > { %1056 = vmatmul.msk.f32.vlgmr.msra.gmra.mxu0 %vm381_vm1, %v350_v2  ;;  %1061 = vmatmul.msk.f32.vlgmr.msra.gmra.mxu1 %vm381_vm1, %v350_v2 }
  0x1b   : > { %1066 = vmatmul.msk.f32.vlgmr.msra.gmra.mxu2 %vm381_vm1, %v350_v2  ;;  %1071 = vmatmul.msk.f32.vlgmr.msra.gmra.mxu3 %vm381_vm1, %v350_v2 }
  0x22   : > { %1057 = vmatmul.msk.f32.gmra.mxu0 %vm381_vm1, %v351_v7  ;;  %1062 = vmatmul.msk.f32.gmra.mxu1 %vm381_vm1, %v351_v7 }
  0x23   : > { %1067 = vmatmul.msk.f32.gmra.mxu2 %vm381_vm1, %v351_v7  ;;  %1072 = vmatmul.msk.f32.gmra.mxu3 %vm381_vm1, %v351_v7 }
  0x2a   : > { %1058 = vmatmul.msk.f32.gmra.mxu0 %vm381_vm1, %v352_v8  ;;  %1063 = vmatmul.msk.f32.gmra.mxu1 %vm381_vm1, %v352_v8 }
  0x2b   : > { %1068 = vmatmul.msk.f32.gmra.mxu2 %vm381_vm1, %v352_v8  ;;  %1073 = vmatmul.msk.f32.gmra.mxu3 %vm381_vm1, %v352_v8 }
  0x32   : > { %1059 = vmatmul.msk.f32.gmra.mxu0 %vm381_vm1, %v353_v9  ;;  %1064 = vmatmul.msk.f32.gmra.mxu1 %vm381_vm1, %v353_v9 }
  0x33   : > { %1069 = vmatmul.msk.f32.gmra.mxu2 %vm381_vm1, %v353_v9  ;;  %1074 = vmatmul.msk.f32.gmra.mxu3 %vm381_vm1, %v353_v9 }
  0x97   : > { %v420_v15 = vpop.f32.mrf.mxu0  ;;  %v449_v16 = vpop.f32.mrf.mxu1 }
  0x98   : > { %v421_v17 = vadd.f32 %v420_v15, %v356_v11  ;;  %v450_v18 = vadd.f32 %v449_v16, %v357_v12 }
  0x9a   : > { %v529_v19 = vadd.f32 %v1305_v13, %v421_v17  ;;  %v530_v20 = vadd.f32 %v1307_v14, %v450_v18 }
  0x9c   : > { %v1075_v21 = vmul.f32 -1.442695, %v529_v19  ;;  %v1076_v22 = vmul.f32 -1.442695, %v530_v20 }
  0x9e   : > { %1121 = vpow2.f32 %v1075_v21  ;;  %v478_v29 = vpop.f32.mrf.mxu2  ;;  %v507_v30 = vpop.f32.mrf.mxu3 }
  0x9f   : > { %1123 = vpow2.f32 %v1076_v22  ;;  %v479_v31 = vadd.f32 %v478_v29, %v358_v23  ;;  %v508_v32 = vadd.f32 %v507_v30, %v359_v24  ;;  %v423_v33 = vpop.f32.mrf.mxu0  ;;  %v452_v34 = vpop.f32.mrf.mxu1 }
  0xa0   : > { %v424_v35 = vadd.f32 %v423_v33, %v360_v27  ;;  %v453_v36 = vadd.f32 %v452_v34, %v361_v28 }
  0xa1   : > { %v531_v37 = vadd.f32 %v1313_v25, %v479_v31  ;;  %v532_v38 = vadd.f32 %v1315_v26, %v508_v32 }
  0xa2   : > { %v533_v39 = vadd.f32 %v1305_v13, %v424_v35  ;;  %v534_v40 = vadd.f32 %v1307_v14, %v453_v36  ;;  %v545_v35 = vld [vmem:[%s1364_s17] sm:$0xff] }
  0xa3   : > { %v1077_v41 = vmul.f32 -1.442695, %v531_v37  ;;  %v1078_v42 = vmul.f32 -1.442695, %v532_v38 }
  0xa4   : > { %v1122_v43 = vpop.eup %1121  ;;  %v1079_v46 = vmul.f32 -1.442695, %v533_v39  ;;  %v1080_v48 = vmul.f32 -1.442695, %v534_v40 }
  0xa5   : > { %v1124_v44 = vpop.eup %1123  ;;  %v1323_v45 = vadd.f32 1.0, %v1122_v43  ;;  %1125 = vpow2.f32 %v1077_v41 }
  0xa6   : > { %v1325_v47 = vadd.f32 1.0, %v1124_v44  ;;  %1127 = vpow2.f32 %v1078_v42  ;;  %v481_v50 = vpop.f32.mrf.mxu2  ;;  %v510_v53 = vpop.f32.mrf.mxu3  ;;  %v546_v42 = vld [vmem:[%s1364_s17 + $0x8] sm:$0xff] }
  0xa7   : > { %1129 = vrcp.f32 %v1323_v45  ;;  %v482_v51 = vadd.f32 %v481_v50, %v362_v49  ;;  %v634_v54 = vand.u32 2147483647, %v1323_v45  ;;  %v636_v55 = vand.u32 2147483648, %v1323_v45  ;;  %v426_v57 = vpop.f32.mrf.mxu0  ;;  %v455_v2 = vpop.f32.mrf.mxu1 }
  0xa8   : > { %1131 = vrcp.f32 %v1325_v47  ;;  %v649_v59 = vand.u32 2147483647, %v1325_v47  ;;  %v651_v62 = vand.u32 2147483648, %v1325_v47  ;;  %v511_v0 = vadd.f32 %v510_v53, %v363_v52 }
  0xa9   : > { %1133 = vpow2.f32 %v1079_v46  ;;  %v535_v60 = vadd.f32 %v1313_v25, %v482_v51  ;;  %vm630_vm2 = vweird.f32 %v1323_v45  ;;  %vm645_vm3 = vweird.f32 %v1325_v47  ;;  %v369_v51 = vld [vmem:[%s1298_s12 + $0x68] sm:$0xff] }
  0xaa   : > { %1135 = vpow2.f32 %v1080_v48  ;;  %v427_v5 = vadd.f32 %v426_v57, %v364_v56  ;;  %vm1345_vm4 = vcmp.eq.f32.partialorder %v634_v54, 8.507059e+37  ;;  %v637_v9 = vor.u32 1.1754944e-38, %v636_v55 }
  0xab   : > { %v1126_v58 = vpop.eup %1125  ;;  %vm1351_vm5 = vcmp.eq.f32.partialorder %v649_v59, 8.507059e+37  ;;  %v1081_v15 = vmul.f32 -1.442695, %v535_v60  ;;  %v456_v16 = vadd.f32 %v455_v2, %v365_v1  ;;  %v652_v19 = vor.u32 1.1754944e-38, %v651_v62  ;;  %v547_v1 = vld [vmem:[%s1364_s17 + $0x10] sm:$0xff] }
  0xac   : > { %v1128_v61 = vpop.eup %1127  ;;  %v1337_v63 = vadd.f32 1.0, %v1126_v58  ;;  %v536_v20 = vadd.f32 %v1315_v26, %v511_v0  ;;  %v537_v24 = vadd.f32 %v1305_v13, %v427_v5 }
  0xad   : > { %v1130_v3 = vpop.eup %1129  ;;  %v1342_v4 = vadd.f32 1.0, %v1128_v61  ;;  %v1371_v31 = vadd.f32 %v1307_v14, %v456_v16 }
  0xae   : > { %v1132_v6 = vpop.eup %1131  ;;  %v626_v7 = vmul.f32 %v1130_v3, %v1323_v45  ;;  %1137 = vrcp.f32 %v1337_v63  ;;  %v664_v22 = vand.u32 2147483647, %v1337_v63  ;;  %v666_v23 = vand.u32 2147483648, %v1337_v63 }
  0xaf   : > { %v1134_v10 = vpop.eup %1133  ;;  %v641_v11 = vmul.f32 %v1132_v6, %v1325_v47  ;;  %1139 = vrcp.f32 %v1342_v4  ;;  %vm631_vm6 = vweird.f32 %v1130_v3  ;;  %vm646_vm7 = vweird.f32 %v1132_v6 }
  0xb0   : > { %v1136_v17 = vpop.eup %1135  ;;  %v627_v18 = vsub.f32 1.0, %v626_v7  ;;  %v1366_v28 = vadd.f32 1.0, %v1134_v10  ;;  %1141 = vpow2.f32 %v1081_v15  ;;  %vm660_vm8 = vweird.f32 %v1337_v63  ;;  %vm632_vm9 = vmor %vm630_vm2, %vm631_vm6  ;;  %v548_v10 = vld [vmem:[%s1364_s17 + $0x18] sm:$0xff] }
  0xb1   : > { %v642_v21 = vsub.f32 1.0, %v641_v11  ;;  %v1368_v29 = vadd.f32 1.0, %v1136_v17  ;;  %v679_v34 = vand.u32 2147483647, %v1342_v4  ;;  %vm1380_vm10 = vcmp.eq.f32.partialorder %v664_v22, 8.507059e+37  ;;  %vm647_vm12 = vmor %vm645_vm3, %vm646_vm7 }
  0xb2   : > { %v628_v27 = vmul.f32 %v1130_v3, %v627_v18  ;;  %1143 = vrcp.f32 %v1366_v28  ;;  %v667_v39 = vor.u32 1.1754944e-38, %v666_v23  ;;  %vm675_vm11 = vweird.f32 %v1342_v4 }
  0xb3   : > { %v643_v30 = vmul.f32 %v1132_v6, %v642_v21  ;;  %v681_v43 = vand.u32 2147483648, %v1342_v4  ;;  %1145 = vrcp.f32 %v1368_v29  ;;  %v1082_v44 = vmul.f32 -1.442695, %v536_v20  ;;  %v484_v20 = vpop.f32.mrf.mxu2 }
  0xb4   : > { %v1138_v32 = vpop.eup %1137  ;;  %v629_v33 = vadd.f32 %v1130_v3, %v628_v27  ;;  %vm1402_vm13 = vcmp.eq.f32.partialorder %v679_v34, 8.507059e+37  ;;  %v694_v52 = vand.u32 2147483647, %v1366_v28  ;;  %vm690_vm15 = vweird.f32 %v1366_v28  ;;  %v429_v34 = vpop.f32.mrf.mxu0 }
  0xb5   : > { %v644_v36 = vadd.f32 %v1132_v6, %v643_v30  ;;  %v656_v37 = vmul.f32 %v1138_v32, %v1337_v63  ;;  %v1140_v40 = vpop.eup %1139  ;;  %vm661_vm14 = vweird.f32 %v1138_v32  ;;  %v682_v58 = vor.u32 1.1754944e-38, %v681_v43  ;;  %v367_v30 = vld [vmem:[%s1298_s12 + $0x58] sm:$0xff] }
  0xb6   : > { %v633_v41 = vsel %vm632_vm9, %v1130_v3, %v629_v33  ;;  %v671_v49 = vmul.f32 %v1140_v40, %v1342_v4  ;;  %v1142_v53 = vpop.eup %1141  ;;  %1147 = vpow2.f32 %v1082_v44  ;;  %vm676_vm0 = vweird.f32 %v1140_v40  ;;  %vm662_vm1 = vmor %vm660_vm8, %vm661_vm14  ;;  %v368_v33 = vld [vmem:[%s1298_s12 + $0x60] sm:$0xff] }
  0xb7   : > { %v638_v45 = vsel %vm1345_vm4, %v637_v9, %v633_v41  ;;  %v648_v46 = vsel %vm647_vm12, %v1132_v6, %v644_v36  ;;  %v657_v48 = vsub.f32 1.0, %v656_v37  ;;  %v1409_v59 = vadd.f32 1.0, %v1142_v53  ;;  %vm677_vm3 = vmor %vm675_vm11, %vm676_vm0  ;;  %v549_v36 = vld [vmem:[%s1364_s17 + $0x20] sm:$0xff] }
  0xb8   : > { %v865_v47 = vmul.f32 %v638_v45, %v545_v35  ;;  %v653_v50 = vsel %vm1351_vm5, %v652_v19, %v648_v46  ;;  %v672_v56 = vsub.f32 1.0, %v671_v49  ;;  %v1144_v57 = vpop.eup %1143  ;;  %vm1419_vm2 = vcmp.eq.f32.partialorder %v694_v52, 8.507059e+37  ;;  %v366_v19 = vld [vmem:[%s1298_s12 + $0x50] sm:$0xff]  ;;  %v550_v45 = vld [vmem:[%s1364_s17 + $0x28] sm:$0xff]  ;;  %v458_v52 = vpop.f32.mrf.mxu1 }
  0xb9   : > { %v866_v54 = vmul.f32 %v653_v50, %v546_v42  ;;  %v658_v55 = vmul.f32 %v1138_v32, %v657_v48  ;;  %v686_v62 = vmul.f32 %v1144_v57, %v1366_v28  ;;  %v1413_v0 = vpop.eup %1145  ;;  %v696_v3 = vand.u32 2147483648, %v1366_v28 }
  0xba   : > { %881 = vst [vmem:[%s1395_s23] sm:$0xff] %v865_v47  ;;  %v673_v61 = vmul.f32 %v1140_v40, %v672_v56  ;;  %1149 = vrcp.f32 %v1409_v59  ;;  %v1083_v5 = vmul.f32 -1.442695, %v537_v24  ;;  %v701_v9 = vmul.f32 %v1413_v0, %v1368_v29 }
  0xbb   : > { %882 = vst [vmem:[%s1395_s23 + $0x8] sm:$0xff] %v866_v54  ;;  %v659_v60 = vadd.f32 %v1138_v32, %v658_v55  ;;  %v687_v8 = vsub.f32 1.0, %v686_v62  ;;  %vm691_vm4 = vweird.f32 %v1144_v57  ;;  %v709_v11 = vand.u32 2147483647, %v1368_v29 }
  0xbc   : > { %v674_v7 = vadd.f32 %v1140_v40, %v673_v61  ;;  %v711_v12 = vand.u32 2147483648, %v1368_v29  ;;  %v702_v18 = vsub.f32 1.0, %v701_v9  ;;  %v1148_v21 = vpop.eup %1147  ;;  %vm705_vm5 = vweird.f32 %v1368_v29  ;;  %vm692_vm7 = vmor %vm690_vm15, %vm691_vm4 }
  0xbd   : > { %v663_v6 = vsel %vm662_vm1, %v1138_v32, %v659_v60  ;;  %v688_v17 = vmul.f32 %v1144_v57, %v687_v8  ;;  %vm706_vm6 = vweird.f32 %v1413_v0  ;;  %1151 = vpow2.f32 %v1083_v5  ;;  %v513_v32 = vpop.f32.mrf.mxu3 }
  0xbe   : > { %v668_v63 = vsel %vm1380_vm10, %v667_v39, %v663_v6  ;;  %v678_v16 = vsel %vm677_vm3, %v1140_v40, %v674_v7  ;;  %v703_v24 = vmul.f32 %v1413_v0, %v702_v18  ;;  %v1442_v27 = vadd.f32 1.0, %v1148_v21  ;;  %vm707_vm9 = vmor %vm705_vm5, %vm706_vm6 }
  0xbf   : > { %v867_v15 = vmul.f32 %v668_v63, %v547_v1  ;;  %v683_v4 = vsel %vm1402_vm13, %v682_v58, %v678_v16  ;;  %v689_v23 = vadd.f32 %v1144_v57, %v688_v17  ;;  %v697_v37 = vor.u32 1.1754944e-38, %v696_v3  ;;  %v551_v3 = vld [vmem:[%s1364_s17 + $0x30] sm:$0xff] }
  0xc0   : > { %v868_v22 = vmul.f32 %v683_v4, %v548_v10  ;;  %v1150_v35 = vpop.eup %1149  ;;  %vm1450_vm8 = vcmp.eq.f32.partialorder %v709_v11, 8.507059e+37  ;;  %v1084_v39 = vmul.f32 -1.442695, %v1371_v31  ;;  %v485_v40 = vadd.f32 %v484_v20, %v366_v19 }
  0xc1   : > { %883 = vst [vmem:[%s1395_s23 + $0x10] sm:$0xff] %v867_v15  ;;  %v693_v41 = vsel %vm692_vm7, %v1144_v57, %v689_v23  ;;  %v704_v42 = vadd.f32 %v1413_v0, %v703_v24  ;;  %v712_v43 = vor.u32 1.1754944e-38, %v711_v12  ;;  %v716_v44 = vmul.f32 %v1150_v35, %v1409_v59  ;;  %v370_v12 = vld [vmem:[%s1298_s12 + $0x70] sm:$0xff]  ;;  %v487_v15 = vpop.f32.mrf.mxu2 }
  0xc2   : > { %884 = vst [vmem:[%s1395_s23 + $0x18] sm:$0xff] %v868_v22  ;;  %v698_v28 = vsel %vm1419_vm2, %v697_v37, %v693_v41  ;;  %1153 = vrcp.f32 %v1442_v27  ;;  %v514_v31 = vadd.f32 %v513_v32, %v367_v30  ;;  %v430_v46 = vadd.f32 %v429_v34, %v368_v33  ;;  %v552_v34 = vld [vmem:[%s1364_s17 + $0x38] sm:$0xff] }
  0xc3   : > { %v869_v48 = vmul.f32 %v698_v28, %v549_v36  ;;  %v708_v49 = vsel %vm707_vm9, %v1413_v0, %v704_v42  ;;  %v717_v47 = vsub.f32 1.0, %v716_v44  ;;  %v724_v50 = vand.u32 2147483647, %v1409_v59  ;;  %v1152_v53 = vpop.eup %1151 }
  0xc4   : > { %v713_v54 = vsel %vm1450_vm8, %v712_v43, %v708_v49  ;;  %v726_v29 = vand.u32 2147483648, %v1409_v59  ;;  %1155 = vpow2.f32 %v1084_v39  ;;  %v539_v55 = vadd.f32 %v1313_v25, %v485_v40 }
  0xc5   : > { %885 = vst [vmem:[%s1395_s23 + $0x20] sm:$0xff] %v869_v48  ;;  %v870_v56 = vmul.f32 %v713_v54, %v550_v45  ;;  %v718_v57 = vmul.f32 %v1150_v35, %v717_v47  ;;  %vm721_vm10 = vweird.f32 %v1150_v35  ;;  %v1474_v58 = vadd.f32 1.0, %v1152_v53  ;;  %v516_v38 = vpop.f32.mrf.mxu3 }
  0xc6   : > { %v1085_v60 = vmul.f32 -1.442695, %v539_v55  ;;  %v540_v61 = vadd.f32 %v1315_v26, %v514_v31  ;;  %v541_v62 = vadd.f32 %v1305_v13, %v430_v46  ;;  %v459_v0 = vadd.f32 %v458_v52, %v369_v51 }
  0xc7   : > { %886 = vst [vmem:[%s1395_s23 + $0x28] sm:$0xff] %v870_v56  ;;  %v719_v1 = vadd.f32 %v1150_v35, %v718_v57  ;;  %vm720_vm11 = vweird.f32 %v1409_v59  ;;  %1157 = vrcp.f32 %v1474_v58  ;;  %v727_v5 = vor.u32 1.1754944e-38, %v726_v29 }
  0xc8   : > { %v1154_v2 = vpop.eup %1153  ;;  %vm722_vm12 = vmor %vm720_vm11, %vm721_vm10  ;;  %1159 = vpow2.f32 %v1085_v60  ;;  %v1086_v6 = vmul.f32 -1.442695, %v540_v61  ;;  %v1087_v7 = vmul.f32 -1.442695, %v541_v62  ;;  %vm725_vm13 = vcmp.eq.f32.partialorder %v724_v50, 8.507059e+37  ;;  %v553_v50 = vld [vmem:[%s1364_s17 + $0x40] sm:$0xff] }
  0xc9   : > { %v723_v8 = vsel %vm722_vm12, %v1150_v35, %v719_v1  ;;  %v731_v13 = vmul.f32 %v1154_v2, %v1442_v27  ;;  %v739_v9 = vand.u32 2147483647, %v1442_v27  ;;  %v741_v59 = vand.u32 2147483648, %v1442_v27 }
  0xca   : > { %v1156_v63 = vpop.eup %1155  ;;  %v728_v10 = vsel %vm725_vm13, %v727_v5, %v723_v8  ;;  %1161 = vpow2.f32 %v1086_v6  ;;  %v542_v11 = vadd.f32 %v1307_v14, %v459_v0  ;;  %vm736_vm14 = vweird.f32 %v1154_v2 }
  0xcb   : > { %v871_v16 = vmul.f32 %v728_v10, %v551_v3  ;;  %v732_v17 = vsub.f32 1.0, %v731_v13  ;;  %v1487_v18 = vadd.f32 1.0, %v1156_v63  ;;  %1163 = vpow2.f32 %v1087_v7 }
  0xcc   : > { %v1088_v19 = vmul.f32 -1.442695, %v542_v11  ;;  %v488_v4 = vadd.f32 %v487_v15, %v370_v12  ;;  %vm735_vm15 = vweird.f32 %v1442_v27  ;;  %vm1493_vm0 = vcmp.eq.f32.partialorder %v739_v9, 8.507059e+37  ;;  %v371_v27 = vld [vmem:[%s1298_s12 + $0x78] sm:$0xff] }
  0xcd   : > { %v1158_v20 = vpop.eup %1157  ;;  %887 = vst [vmem:[%s1395_s23 + $0x30] sm:$0xff] %v871_v16  ;;  %v733_v21 = vmul.f32 %v1154_v2, %v732_v17  ;;  %1165 = vrcp.f32 %v1487_v18  ;;  %v742_v30 = vor.u32 1.1754944e-38, %v741_v59  ;;  %vm737_vm1 = vmor %vm735_vm15, %vm736_vm14  ;;  %v754_v36 = vand.u32 2147483647, %v1474_v58 }
  0xce   : > { %v1160_v22 = vpop.eup %1159  ;;  %v746_v14 = vmul.f32 %v1158_v20, %v1474_v58  ;;  %v756_v37 = vand.u32 2147483648, %v1474_v58  ;;  %1167 = vpow2.f32 %v1088_v19  ;;  %vm750_vm2 = vweird.f32 %v1474_v58 }
  0xcf   : > { %v734_v23 = vadd.f32 %v1154_v2, %v733_v21  ;;  %v1497_v32 = vadd.f32 1.0, %v1160_v22  ;;  %v543_v41 = vadd.f32 %v1313_v25, %v488_v4  ;;  %vm751_vm3 = vweird.f32 %v1158_v20  ;;  %v555_v22 = vld [vmem:[%s1364_s17 + $0x50] sm:$0xff] }
  0xd0   : > { %v1162_v33 = vpop.eup %1161  ;;  %v747_v35 = vsub.f32 1.0, %v746_v14  ;;  %v517_v46 = vadd.f32 %v516_v38, %v371_v27  ;;  %vm1512_vm4 = vcmp.eq.f32.partialorder %v754_v36, 8.507059e+37  ;;  %v757_v47 = vor.u32 1.1754944e-38, %v756_v37  ;;  %vm752_vm5 = vmor %vm750_vm2, %vm751_vm3 }
  0xd1   : > { %v1164_v39 = vpop.eup %1163  ;;  %v738_v40 = vsel %vm737_vm1, %v1154_v2, %v734_v23  ;;  %1169 = vrcp.f32 %v1497_v32  ;;  %v1508_v44 = vadd.f32 1.0, %v1162_v33  ;;  %vm765_vm6 = vweird.f32 %v1487_v18 }
  0xd2   : > { %v743_v42 = vsel %vm1493_vm0, %v742_v30, %v738_v40  ;;  %v748_v43 = vmul.f32 %v1158_v20, %v747_v35  ;;  %v1510_v31 = vadd.f32 1.0, %v1164_v39  ;;  %v769_v51 = vand.u32 2147483647, %v1487_v18  ;;  %v556_v40 = vld [vmem:[%s1364_s17 + $0x58] sm:$0xff] }
  0xd3   : > { %v1166_v28 = vpop.eup %1165  ;;  %v872_v45 = vmul.f32 %v743_v42, %v552_v34  ;;  %1171 = vrcp.f32 %v1508_v44  ;;  %v1089_v52 = vmul.f32 -1.442695, %v543_v41  ;;  %v771_v55 = vand.u32 2147483648, %v1487_v18 }
  0xd4   : > { %v749_v48 = vadd.f32 %v1158_v20, %v748_v43  ;;  %v761_v25 = vmul.f32 %v1166_v28, %v1487_v18  ;;  %v1168_v53 = vpop.eup %1167  ;;  %1173 = vrcp.f32 %v1510_v31  ;;  %v784_v58 = vand.u32 2147483647, %v1497_v32 }
  0xd5   : > { %888 = vst [vmem:[%s1395_s23 + $0x38] sm:$0xff] %v872_v45  ;;  %v786_v60 = vand.u32 2147483648, %v1497_v32  ;;  %v544_v61 = vadd.f32 %v1315_v26, %v517_v46  ;;  %vm766_vm7 = vweird.f32 %v1166_v28  ;;  %vm1532_vm8 = vcmp.eq.f32.partialorder %v769_v51, 8.507059e+37  ;;  %v554_v26 = vld [vmem:[%s1364_s17 + $0x48] sm:$0xff] }
  0xd6   : > { %v753_v54 = vsel %vm752_vm5, %v1158_v20, %v749_v48  ;;  %v762_v29 = vsub.f32 1.0, %v761_v25  ;;  %v1536_v3 = vadd.f32 1.0, %v1168_v53  ;;  %1175 = vpow2.f32 %v1089_v52  ;;  %vm767_vm10 = vmor %vm765_vm6, %vm766_vm7 }
  0xd7   : > { %v1170_v56 = vpop.eup %1169  ;;  %v758_v57 = vsel %vm1512_vm4, %v757_v47, %v753_v54  ;;  %v772_v6 = vor.u32 1.1754944e-38, %v771_v55  ;;  %vm780_vm9 = vweird.f32 %v1497_v32  ;;  %vm1543_vm11 = vcmp.eq.f32.partialorder %v784_v58, 8.507059e+37  ;;  %v558_v55 = vld [vmem:[%s1364_s17 + $0x68] sm:$0xff] }
  0xd8   : > { %v873_v62 = vmul.f32 %v758_v57, %v553_v50  ;;  %v763_v0 = vmul.f32 %v1166_v28, %v762_v29  ;;  %v776_v1 = vmul.f32 %v1170_v56, %v1497_v32  ;;  %v787_v9 = vor.u32 1.1754944e-38, %v786_v60 }
  0xd9   : > { %v1172_v8 = vpop.eup %1171  ;;  %1177 = vrcp.f32 %v1536_v3  ;;  %v1090_v63 = vmul.f32 -1.442695, %v544_v61  ;;  %vm781_vm12 = vweird.f32 %v1170_v56  ;;  %vm795_vm13 = vweird.f32 %v1508_v44 }
  0xda   : > { %889 = vst [vmem:[%s1395_s23 + $0x40] sm:$0xff] %v873_v62  ;;  %v764_v5 = vadd.f32 %v1166_v28, %v763_v0  ;;  %v777_v7 = vsub.f32 1.0, %v776_v1  ;;  %v1174_v10 = vpop.eup %1173  ;;  %v791_v12 = vmul.f32 %v1172_v8, %v1508_v44  ;;  %v799_v16 = vand.u32 2147483647, %v1508_v44  ;;  %vm782_vm14 = vmor %vm780_vm9, %vm781_vm12 }
  0xdb   : > { %v806_v17 = vmul.f32 %v1174_v10, %v1510_v31  ;;  %v801_v21 = vand.u32 2147483648, %v1508_v44  ;;  %v814_v23 = vand.u32 2147483647, %v1510_v31  ;;  %v816_v24 = vand.u32 2147483648, %v1510_v31 }
  0xdc   : > { %v768_v59 = vsel %vm767_vm10, %v1166_v28, %v764_v5  ;;  %v778_v11 = vmul.f32 %v1170_v56, %v777_v7  ;;  %v792_v20 = vsub.f32 1.0, %v791_v12  ;;  %v1176_v4 = vpop.eup %1175  ;;  %1179 = vpow2.f32 %v1090_v63  ;;  %v557_v28 = vld [vmem:[%s1364_s17 + $0x60] sm:$0xff]  ;;  %v559_v7 = vld [vmem:[%s1364_s17 + $0x70] sm:$0xff] }
  0xdd   : > { %v773_v15 = vsel %vm1532_vm8, %v772_v6, %v768_v59  ;;  %v807_v14 = vsub.f32 1.0, %v806_v17  ;;  %vm796_vm15 = vweird.f32 %v1172_v8  ;;  %v623_v34 = vadd.f32 1.0, %v1176_v4 }
  0xde   : > { %v874_v18 = vmul.f32 %v773_v15, %v554_v26  ;;  %v779_v19 = vadd.f32 %v1170_v56, %v778_v11  ;;  %v793_v33 = vmul.f32 %v1172_v8, %v792_v20  ;;  %vm810_vm0 = vweird.f32 %v1510_v31  ;;  %vm797_vm3 = vmor %vm795_vm13, %vm796_vm15  ;;  %v560_v15 = vld [vmem:[%s1364_s17 + $0x78] sm:$0xff] }
  0xdf   : > { %v1178_v35 = vpop.eup %1177  ;;  %v808_v32 = vmul.f32 %v1174_v10, %v807_v14  ;;  %vm811_vm1 = vweird.f32 %v1174_v10  ;;  %vm1564_vm2 = vcmp.eq.f32.partialorder %v799_v16, 8.507059e+37  ;;  %v802_v41 = vor.u32 1.1754944e-38, %v801_v21 }
  0xe0   : > { %890 = vst [vmem:[%s1395_s23 + $0x48] sm:$0xff] %v874_v18  ;;  %v783_v30 = vsel %vm782_vm14, %v1170_v56, %v779_v19  ;;  %v794_v27 = vadd.f32 %v1172_v8, %v793_v33  ;;  %v821_v39 = vmul.f32 %v1178_v35, %v1536_v3  ;;  %vm815_vm4 = vcmp.eq.f32.partialorder %v814_v23, 8.507059e+37  ;;  %vm812_vm5 = vmor %vm810_vm0, %vm811_vm1 }
  0xe1   : > { %v788_v36 = vsel %vm1543_vm11, %v787_v9, %v783_v30  ;;  %v809_v42 = vadd.f32 %v1174_v10, %v808_v32  ;;  %1181 = vrcp.f32 %v623_v34  ;;  %v817_v45 = vor.u32 1.1754944e-38, %v816_v24 }
  0xe2   : > { %v875_v37 = vmul.f32 %v788_v36, %v555_v22  ;;  %v798_v43 = vsel %vm797_vm3, %v1172_v8, %v794_v27  ;;  %v822_v46 = vsub.f32 1.0, %v821_v39  ;;  %vm825_vm6 = vweird.f32 %v1536_v3  ;;  %v1180_v48 = vpop.eup %1179 }
  0xe3   : > { %v803_v44 = vsel %vm1564_vm2, %v802_v41, %v798_v43  ;;  %v813_v49 = vsel %vm812_vm5, %v1174_v10, %v809_v42  ;;  %v829_v47 = vand.u32 2147483647, %v1536_v3  ;;  %v831_v25 = vand.u32 2147483648, %v1536_v3 }
  0xe4   : > { %891 = vst [vmem:[%s1395_s23 + $0x50] sm:$0xff] %v875_v37  ;;  %v876_v50 = vmul.f32 %v803_v44, %v556_v40  ;;  %v818_v51 = vsel %vm815_vm4, %v817_v45, %v813_v49  ;;  %v823_v31 = vmul.f32 %v1178_v35, %v822_v46  ;;  %vm826_vm7 = vweird.f32 %v1178_v35 }
  0xe5   : > { %v877_v52 = vmul.f32 %v818_v51, %v557_v28  ;;  %v624_v53 = vadd.f32 1.0, %v1180_v48  ;;  %vm827_vm8 = vmor %vm825_vm6, %vm826_vm7  ;;  %v832_v56 = vor.u32 1.1754944e-38, %v831_v25  ;;  %vm830_vm9 = vcmp.eq.f32.partialorder %v829_v47, 8.507059e+37 }
  0xe6   : > { %892 = vst [vmem:[%s1395_s23 + $0x58] sm:$0xff] %v876_v50  ;;  %v824_v54 = vadd.f32 %v1178_v35, %v823_v31  ;;  %v846_v0 = vand.u32 2147483648, %v623_v34  ;;  %v844_v2 = vand.u32 2147483647, %v623_v34  ;;  %vm840_vm11 = vweird.f32 %v623_v34 }
  0xe7   : > { %v1182_v29 = vpop.eup %1181  ;;  %893 = vst [vmem:[%s1395_s23 + $0x60] sm:$0xff] %v877_v52  ;;  %1183 = vrcp.f32 %v624_v53  ;;  %v861_v63 = vand.u32 2147483648, %v624_v53  ;;  %v859_v11 = vand.u32 2147483647, %v624_v53  ;;  %vm855_vm15 = vweird.f32 %v624_v53 }
  0xe8   : > { %v828_v57 = vsel %vm827_vm8, %v1178_v35, %v824_v54  ;;  %v836_v58 = vmul.f32 %v1182_v29, %v623_v34  ;;  %vm841_vm10 = vweird.f32 %v1182_v29  ;;  %v847_v8 = vor.u32 1.1754944e-38, %v846_v0 }
  0xe9   : > { %v833_v60 = vsel %vm830_vm9, %v832_v56, %v828_v57  ;;  %vm842_vm12 = vmor %vm840_vm11, %vm841_vm10  ;;  %vm845_vm13 = vcmp.eq.f32.partialorder %v844_v2, 8.507059e+37  ;;  %v862_v16 = vor.u32 1.1754944e-38, %v861_v63  ;;  %vm860_vm1 = vcmp.eq.f32.partialorder %v859_v11, 8.507059e+37 }
  0xea   : > { %v878_v61 = vmul.f32 %v833_v60, %v558_v55  ;;  %v837_v62 = vsub.f32 1.0, %v836_v58 }
  0xec   : > { %894 = vst [vmem:[%s1395_s23 + $0x68] sm:$0xff] %v878_v61  ;;  %v838_v1 = vmul.f32 %v1182_v29, %v837_v62 }
  0xed   : > { %v1184_v5 = vpop.eup %1183 }
  0xee   : > { %v839_v6 = vadd.f32 %v1182_v29, %v838_v1  ;;  %v851_v3 = vmul.f32 %v1184_v5, %v624_v53  ;;  %vm856_vm14 = vweird.f32 %v1184_v5 }
  0xef   : > { %vm857_vm0 = vmor %vm855_vm15, %vm856_vm14 }
  0xf0   : > { %v843_v26 = vsel %vm842_vm12, %v1182_v29, %v839_v6  ;;  %v852_v13 = vsub.f32 1.0, %v851_v3 }
  0xf1   : > { %v848_v9 = vsel %vm845_vm13, %v847_v8, %v843_v26 }
  0xf2   : > { %v879_v10 = vmul.f32 %v848_v9, %v559_v7  ;;  %v853_v59 = vmul.f32 %v1184_v5, %v852_v13 }
  0xf4   : > { %895 = vst [vmem:[%s1395_s23 + $0x70] sm:$0xff] %v879_v10  ;;  %v854_v12 = vadd.f32 %v1184_v5, %v853_v59 }
  0xf6   : > { %v858_v17 = vsel %vm857_vm0, %v1184_v5, %v854_v12 }
  0xf7   : > { %v863_v18 = vsel %vm860_vm1, %v862_v16, %v858_v17 }
  0xf8   : > { %v880_v19 = vmul.f32 %v863_v18, %v560_v15 }
  0xfa   : > { %896 = vst [vmem:[%s1395_s23 + $0x78] sm:$0xff] %v880_v19 }
  0xfb PF: > { %s15_s20 = sadd.s32 1, %s1207_s20   ;;  %s1628_s18 = smov %s1203_s19 }
  0xfc   : > { %p12_p5 = scmp.ge.s32.totalorder %s15_s20, 4   ;;  %s1629_s19 = smov %s1631_s21 }
  0xfe   :  { %14 = sbr.rel (!%p12_p5) target bundleno = 2 (0x2), region = 80 }

// kernel: esa_forward_nchw.4
= control target key start
LH: loop header
LB: loop body
LE: loop exit
PB: predicated region body
PF: predicated region fallthrough
CT: control target
= control target key end

     0   :  { %s7359_s21 = smov 0   ;;  %s8825_s0 = inlined_call_operand.vmem [shape: f32[2,4,16,16,8], index: 0, kind: input, shape index: {}]   ;;  %s8826_s1 = inlined_call_operand.vmem [shape: f32[9,8,8], index: 1, kind: input, shape index: {}]   ;;  %s8827_s2 = inlined_call_operand.vmem [shape: f32[1,8], index: 2, kind: input, shape index: {}]   ;;  %s8828_s3 = inlined_call_operand.vmem [shape: f32[9,8,16], index: 3, kind: input, shape index: {}]   ;;  %s8829_s4 = inlined_call_operand.vmem [shape: f32[1,16], index: 4, kind: input, shape index: {}]   ;;  %s8830_s5 = inlined_call_operand.vmem [shape: f32[32,3], index: 5, kind: input, shape index: {}]   ;;  %s8831_s6 = inlined_call_operand.vmem [shape: f32[2,3,32,16], index: 6, kind: output, shape index: {}]  }
   0x1 LB: > { %s6542_s22 = sadd.s32 4294967295, %s7321_s21   ;;  %p6546_p0 = scmp.ge.s32.totalorder %s7321_s21, 1  ;;  %s7321_s21 = sphi %s7359_s21, %s16_s21  }
   0x2   : > { %p212_p1 = scmp.lt.s32.totalorder %s7321_s21, 3 }
   0x4   : > { %p213_p2 = pnand %p6546_p0, %p212_p1 }
   0x5   : > { %p242_p3 = scmp.lt.s32.totalorder (!%p213_p2), %s6542_s22, 1 }
   0x6   : > { %216 = sbr.rel (%p213_p2) target bundleno = 1226 (0x4ca), region = 44 }
   0xb   : > { %v7370_v0 = vld [vmem:[%s8826_s1 + $0x8] sm:$0xff]  ;;  %v7375_v1 = vld [vmem:[%s8826_s1 + $0x18] sm:$0xff]  ;;  %v7387_v3 = vld [vmem:[%s8826_s1] sm:$0xff]  ;;  %s8833_s22 = smov (!%p242_p3, %s6542_s22), 1  ;;  %vm260_vm0 = vcmask 64512   ;;  %vm578_vm1 = vcmask 63488  }
   0xc   : > { %v7380_v2 = vld [vmem:[%s8826_s1 + $0x28] sm:$0xff]  ;;  %318 = vmatpush.msra.mxu2 %v7370_v0  ;;  %389 = vmatpush.msra.mxu3 %v7375_v1  ;;  %v7392_v4 = vld [vmem:[%s8826_s1 + $0x10] sm:$0xff]  ;;  %v7397_v5 = vld [vmem:[%s8826_s1 + $0x20] sm:$0xff]  ;;  %s7282_s11 = sshll.u32 %s8833_s22, 10  ;;  %vm5167_vm2 = vcmask 1041409   ;;  %vm5169_vm3 = vcmask 1042434  }
   0xd   : > { %460 = vmatpush.msra.mxu1 %v7380_v2  ;;  %282 = vmatpush.msra.mxu0 %v7387_v3  ;;  %v7411_v6 = vld [vmem:[%s8826_s1 + $0x30] sm:$0xff]  ;;  %v7416_v7 = vld [vmem:[%s8826_s1 + $0x38] sm:$0xff]  ;;  %s7421_s18 = scalar_lea.vmem %s8825_s0, %s7282_s11  ;;  %v7441_v16 = vld [vmem:[%s8826_s1 + $0x40] sm:$0xff]  ;;  %vm5171_vm4 = vcmask 1043459   ;;  %vm5173_vm5 = vcmask 1044484   ;;  %vm5175_vm6 = vcmask 1045509  }
   0xe   : > { %353 = vmatpush.msrb.mxu2 %v7392_v4  ;;  %7283 = vmatpush.msrb.mxu3 %v7380_v2  ;;  %v6552_v8 = vld [vmem:[%s7421_s18 + $0x100] sm:$0xff]  ;;  %v6553_v12 = vld [vmem:[%s7421_s18 + $0x108] sm:$0x7f]  ;;  %v6590_v14 = vld [vmem:[%s7421_s18 + $0x10] sm:$0xff]  ;;  %vm5177_vm7 = vcmask 1046534   ;;  %vm5179_vm8 = vcmask 1047559  }
   0xf   : > { %609 = vmatpush.msrb.mxu1 %v7387_v3  ;;  %425 = vmatpush.msrb.mxu0 %v7397_v5  ;;  %v6560_v9 = vld [vmem:[%s7421_s18 + $0x200] sm:$0xff]  ;;  %v6561_v13 = vld [vmem:[%s7421_s18 + $0x208] sm:$0x7f]  ;;  %v6591_v19 = vld [vmem:[%s7421_s18 + $0x18] sm:$0x7f]  ;;  %vm5497_vm9 = vcmask 61440  }
  0x10   : > { %v6570_v10 = vld [vmem:[%s7421_s18 + $0x201] sm:$0xff]  ;;  %6555 = vmatmul.msk.f32.vlgmr.msra.gmra.mxu2 %vm260_vm0, %v6552_v8  ;;  %6563 = vmatmul.msk.f32.vlgmr.msra.gmra.mxu3 %vm260_vm0, %v6560_v9  ;;  %v6571_v18 = vld [vmem:[%s7421_s18 + $0x209] sm:$0x7f]  ;;  %v6580_v22 = vld [vmem:[%s7421_s18 + $0x110] sm:$0xff]  ;;  %vm5534_vm10 = vcmask 59392   ;;  %vm5864_vm11 = vcmask 1042432  }
  0x11   : > { %v257_v11 = vld [vmem:[%s7421_s18] sm:$0xff]  ;;  %6573 = vmatmul.msk.f32.vlgmr.msra.gmra.mxu1 %vm260_vm0, %v6570_v10  ;;  %496 = vmatpush.msra.mxu2 %v7411_v6  ;;  %v258_v15 = vld [vmem:[%s7421_s18 + $0x8] sm:$0x7f]  ;;  %v6609_v23 = vld [vmem:[%s7421_s18 + $0x310] sm:$0xff]  ;;  %vm5851_vm12 = vcmask 23552   ;;  %s7284_s17 = smul.u32 96, %s8833_s22 }
  0x12   : > { %6550 = vmatmul.msk.f32.vlgmr.msra.gmra.mxu0 %vm260_vm0, %v257_v11  ;;  %532 = vmatpush.msra.mxu3 %v7416_v7  ;;  %v328_v17 = vld [vmem:[%s7421_s18 + $0x1] sm:$0xff]  ;;  %v329_v21 = vld [vmem:[%s7421_s18 + $0x9] sm:$0x7f]  ;;  %v6581_v25 = vld [vmem:[%s7421_s18 + $0x118] sm:$0x7f]  ;;  %vm5897_vm13 = vcmask 130048  }
  0x13   : > { %747 = vmatpush.msra.mxu1 %v7397_v5  ;;  %567 = vmatpush.msra.mxu0 %v7441_v16  ;;  %v6565_v20 = vld [vmem:[%s7421_s18 + $0x300] sm:$0xff]  ;;  %v6566_v24 = vld [vmem:[%s7421_s18 + $0x308] sm:$0x7f]  ;;  %v6610_v26 = vld [vmem:[%s7421_s18 + $0x318] sm:$0x7f]  ;;  %s8786_s23 = scalar_lea.vmem %s8831_s6, %s7284_s17 }
  0x14   : > { %v6585_v27 = vld [vmem:[%s7421_s18 + $0x11] sm:$0xff]  ;;  %v6629_v29 = vld [vmem:[%s7421_s18 + $0x21] sm:$0xff]  ;;  %v6586_v30 = vld [vmem:[%s7421_s18 + $0x19] sm:$0x7f] }
  0x15   : > { %v6576_v28 = vld [vmem:[%s7421_s18 + $0x18] sm:$0x7f]  ;;  %v6630_v32 = vld [vmem:[%s7421_s18 + $0x29] sm:$0x7f]  ;;  %v6604_v33 = vld [vmem:[%s7421_s18 + $0x210] sm:$0xff] }
  0x16   : > { %v6600_v31 = vld [vmem:[%s7421_s18 + $0x19] sm:$0x7f]  ;;  %v6619_v35 = vld [vmem:[%s7421_s18 + $0x20] sm:$0xff]  ;;  %v6614_v38 = vld [vmem:[%s7421_s18 + $0x211] sm:$0xff] }
  0x17   : > { %v6595_v34 = vld [vmem:[%s7421_s18 + $0x118] sm:$0x7f]  ;;  %v6648_v36 = vld [vmem:[%s7421_s18 + $0x220] sm:$0xff]  ;;  %v6620_v39 = vld [vmem:[%s7421_s18 + $0x28] sm:$0x7f] }
  0x18   : > { %6556 = vmatmul.msk.f32.gmra.mxu2 %vm260_vm0, %v6553_v12  ;;  %6564 = vmatmul.msk.f32.gmra.mxu3 %vm260_vm0, %v6561_v13  ;;  %v6605_v37 = vld [vmem:[%s7421_s18 + $0x218] sm:$0x7f]  ;;  %v6649_v40 = vld [vmem:[%s7421_s18 + $0x228] sm:$0x7f]  ;;  %v6624_v41 = vld [vmem:[%s7421_s18 + $0x120] sm:$0xff] }
  0x19   : > { %6592 = vmatmul.msk.f32.vlgmr.msrb.gmra.mxu1 %vm260_vm0, %v6590_v14  ;;  %v6615_v42 = vld [vmem:[%s7421_s18 + $0x219] sm:$0x7f]  ;;  %v6668_v43 = vld [vmem:[%s7421_s18 + $0x130] sm:$0xff]  ;;  %v6625_v44 = vld [vmem:[%s7421_s18 + $0x128] sm:$0x7f] }
  0x1a   : > { %6551 = vmatmul.msk.f32.gmra.mxu0 %vm260_vm0, %v258_v15  ;;  %885 = vmatpush.msrb.mxu1 %v7441_v16  ;;  %v6639_v45 = vld [vmem:[%s7421_s18 + $0x128] sm:$0x7f]  ;;  %v6669_v46 = vld [vmem:[%s7421_s18 + $0x138] sm:$0x7f]  ;;  %v6653_v51 = vld [vmem:[%s7421_s18 + $0x320] sm:$0xff] }
  0x1b   : > { %v6635_v47 = vld [vmem:[%s7421_s18 + $0x28] sm:$0x7f]  ;;  %v6687_v49 = vld [vmem:[%s7421_s18 + $0x31] sm:$0xff]  ;;  %v6688_v53 = vld [vmem:[%s7421_s18 + $0x39] sm:$0x7f] }
  0x1c   : > { %v6658_v48 = vld [vmem:[%s7421_s18 + $0x221] sm:$0xff]  ;;  %v6644_v50 = vld [vmem:[%s7421_s18 + $0x29] sm:$0x7f]  ;;  %v6663_v54 = vld [vmem:[%s7421_s18 + $0x30] sm:$0xff] }
  0x1d   : > { %v6659_v52 = vld [vmem:[%s7421_s18 + $0x229] sm:$0x7f]  ;;  %v7556_v56 = vld [vmem:[%s7421_s18 + $0x40] sm:$0xff]  ;;  %v6664_v57 = vld [vmem:[%s7421_s18 + $0x38] sm:$0x7f] }
  0x1e   : > { %v6654_v55 = vld [vmem:[%s7421_s18 + $0x328] sm:$0x7f]  ;;  %v6679_v58 = vld [vmem:[%s7421_s18 + $0x38] sm:$0x7f]  ;;  %v6697_v61 = vld [vmem:[%s7421_s18 + $0x330] sm:$0xff] }
  0x1f   : > { %v6708_v59 = vld [vmem:[%s7421_s18 + $0x48] sm:$0x7f]  ;;  %v6674_v60 = vld [vmem:[%s7421_s18 + $0x39] sm:$0x7f]  ;;  %v6726_v62 = vld [vmem:[%s7421_s18 + $0x140] sm:$0xff] }
  0x20   : > { %6558 = vmatmul.msk.f32.vlgmr.msrb.gmra.mxu2 %vm260_vm0, %v328_v17  ;;  %6574 = vmatmul.msk.f32.vlgmr.msrb.gmra.mxu3 %vm260_vm0, %v6571_v18  ;;  %v6683_v63 = vld [vmem:[%s7421_s18 + $0x138] sm:$0x7f]  ;;  %v6692_v8 = vld [vmem:[%s7421_s18 + $0x230] sm:$0xff]  ;;  %v6727_v11 = vld [vmem:[%s7421_s18 + $0x148] sm:$0x7f] }
  0x21   : > { %6593 = vmatmul.msk.f32.gmra.mxu1 %vm260_vm0, %v6591_v19  ;;  %643 = vmatpush.msrb.mxu2 %v7370_v0  ;;  %v6698_v9 = vld [vmem:[%s7421_s18 + $0x338] sm:$0x7f]  ;;  %v6717_v18 = vld [vmem:[%s7421_s18 + $0x41] sm:$0xff] }
  0x22   : > { %6568 = vmatmul.msk.f32.vlgmr.msrb.gmra.mxu0 %vm260_vm0, %v6565_v20  ;;  %677 = vmatpush.msrb.mxu3 %v7392_v4  ;;  %v6702_v13 = vld [vmem:[%s7421_s18 + $0x231] sm:$0xff]  ;;  %v6746_v20 = vld [vmem:[%s7421_s18 + $0x241] sm:$0xff] }
  0x23   : > { %712 = vmatpush.msrb.mxu0 %v7375_v1  ;;  %v6693_v17 = vld [vmem:[%s7421_s18 + $0x238] sm:$0x7f] }
  0x28   : > { %6559 = vmatmul.msk.f32.gmra.mxu2 %vm260_vm0, %v329_v21  ;;  %6583 = vmatmul.msk.f32.vlgmr.msra.gmra.mxu3 %vm260_vm0, %v6580_v22 }
  0x29   : > { %6612 = vmatmul.msk.f32.vlgmr.msra.gmra.mxu1 %vm260_vm0, %v6609_v23  ;;  %816 = vmatpush.msra.mxu3 %v7411_v6 }
  0x2a   : > { %6569 = vmatmul.msk.f32.gmra.mxu0 %vm260_vm0, %v6566_v24  ;;  %1030 = vmatpush.msra.mxu1 %v7375_v1 }
  0x30   : > { %6578 = vmatmul.msk.f32.vlgmr.msra.gmra.mxu2 %vm260_vm0, %v6590_v14  ;;  %6584 = vmatmul.msk.f32.gmra.mxu3 %vm260_vm0, %v6581_v25  ;;  %v7294_v25 = vld [vmem:[%s8827_s2] ss:$0 sm:$0xff] }
  0x31   : > { %6613 = vmatmul.msk.f32.gmra.mxu1 %vm260_vm0, %v6610_v26  ;;  %781 = vmatpush.msra.mxu2 %v7380_v2  ;;  %v6718_v26 = vld [vmem:[%s7421_s18 + $0x49] sm:$0x7f] }
  0x32   : > { %6588 = vmatmul.msk.f32.vlgmr.msra.gmra.mxu0 %vm260_vm0, %v6585_v27 }
  0x33   : > { %851 = vmatpush.msra.mxu0 %v7416_v7 }
  0x38   : > { %6579 = vmatmul.msk.f32.gmra.mxu2 %vm260_vm0, %v6576_v28  ;;  %6602 = vmatmul.msk.f32.vlgmr.msrb.gmra.mxu3 %vm260_vm0, %v6585_v27  ;;  %v6747_v28 = vld [vmem:[%s7421_s18 + $0x249] sm:$0x7f] }
  0x39   : > { %6632 = vmatmul.msk.f32.vlgmr.msrb.gmra.mxu1 %vm260_vm0, %v6629_v29  ;;  %961 = vmatpush.msrb.mxu3 %v7370_v0 }
  0x3a   : > { %6589 = vmatmul.msk.f32.gmra.mxu0 %vm260_vm0, %v6586_v30  ;;  %1169 = vmatpush.msrb.mxu1 %v7416_v7 }
  0x40   : > { %6597 = vmatmul.msk.f32.vlgmr.msrb.gmra.mxu2 %vm260_vm0, %v6580_v22  ;;  %6603 = vmatmul.msk.f32.gmra.mxu3 %vm260_vm0, %v6600_v31  ;;  %v6703_v22 = vld [vmem:[%s7421_s18 + $0x239] sm:$0x7f] }
  0x41   : > { %6633 = vmatmul.msk.f32.gmra.mxu1 %vm260_vm0, %v6630_v32  ;;  %927 = vmatpush.msrb.mxu2 %v7387_v3 }
  0x42   : > { %6607 = vmatmul.msk.f32.vlgmr.msrb.gmra.mxu0 %vm260_vm0, %v6604_v33 }
  0x43   : > { %995 = vmatpush.msrb.mxu0 %v7392_v4 }
  0x48   : > { %6598 = vmatmul.msk.f32.gmra.mxu2 %vm260_vm0, %v6595_v34  ;;  %6622 = vmatmul.msk.f32.vlgmr.msra.gmra.mxu3 %vm260_vm0, %v6619_v35  ;;  %v6713_v34 = vld [vmem:[%s7421_s18 + $0x148] sm:$0x7f] }
  0x49   : > { %6651 = vmatmul.msk.f32.vlgmr.msra.gmra.mxu1 %vm260_vm0, %v6648_v36  ;;  %1099 = vmatpush.msra.mxu3 %v7380_v2 }
  0x4a   : > { %6608 = vmatmul.msk.f32.gmra.mxu0 %vm260_vm0, %v6605_v37  ;;  %1313 = vmatpush.msra.mxu1 %v7392_v4 }
  0x50   : > { %6617 = vmatmul.msk.f32.vlgmr.msra.gmra.mxu2 %vm260_vm0, %v6614_v38  ;;  %6623 = vmatmul.msk.f32.gmra.mxu3 %vm260_vm0, %v6620_v39  ;;  %v6766_v38 = vld [vmem:[%s7421_s18 + $0x50] sm:$0xff] }
  0x51   : > { %6652 = vmatmul.msk.f32.gmra.mxu1 %vm260_vm0, %v6649_v40  ;;  %1065 = vmatpush.msra.mxu2 %v7397_v5  ;;  %v6723_v40 = vld [vmem:[%s7421_s18 + $0x48] sm:$0x7f] }
  0x52   : > { %6627 = vmatmul.msk.f32.vlgmr.msra.gmra.mxu0 %vm260_vm0, %v6624_v41 }
  0x53   : > { %1134 = vmatpush.msra.mxu0 %v7411_v6 }
  0x58   : > { %6618 = vmatmul.msk.f32.gmra.mxu2 %vm260_vm0, %v6615_v42  ;;  %6641 = vmatmul.msk.f32.vlgmr.msrb.gmra.mxu3 %vm260_vm0, %v6624_v41 }
  0x59   : > { %6671 = vmatmul.msk.f32.vlgmr.msrb.gmra.mxu1 %vm260_vm0, %v6668_v43  ;;  %1245 = vmatpush.msrb.mxu3 %v7387_v3 }
  0x5a   : > { %6628 = vmatmul.msk.f32.gmra.mxu0 %vm260_vm0, %v6625_v44  ;;  %1452 = vmatpush.msrb.mxu1 %v7411_v6 }
  0x60   : > { %6636 = vmatmul.msk.f32.vlgmr.msrb.gmra.mxu2 %vm260_vm0, %v6619_v35  ;;  %6642 = vmatmul.msk.f32.gmra.mxu3 %vm260_vm0, %v6639_v45  ;;  %v6736_v35 = vld [vmem:[%s7421_s18 + $0x240] sm:$0xff] }
  0x61   : > { %6672 = vmatmul.msk.f32.gmra.mxu1 %vm260_vm0, %v6669_v46  ;;  %1203 = vmatpush.msrb.mxu2 %v7441_v16  ;;  %v6737_v46 = vld [vmem:[%s7421_s18 + $0x248] sm:$0x7f] }
  0x62   : > { %6646 = vmatmul.msk.f32.vlgmr.msrb.gmra.mxu0 %vm260_vm0, %v6629_v29 }
  0x63   : > { %1279 = vmatpush.msrb.mxu0 %v7370_v0 }
  0x68   : > { %6637 = vmatmul.msk.f32.gmra.mxu2 %vm260_vm0, %v6635_v47  ;;  %6661 = vmatmul.msk.f32.vlgmr.msra.gmra.mxu3 %vm260_vm0, %v6658_v48 }
  0x69   : > { %6690 = vmatmul.msk.f32.vlgmr.msra.gmra.mxu1 %vm260_vm0, %v6687_v49  ;;  %1383 = vmatpush.msra.mxu3 %v7397_v5 }
  0x6a   : > { %6647 = vmatmul.msk.f32.gmra.mxu0 %vm260_vm0, %v6644_v50  ;;  %1597 = vmatpush.msra.mxu1 %v7370_v0  ;;  %v6767_v50 = vld [vmem:[%s7421_s18 + $0x58] sm:$0x7f] }
  0x70   : > { %6656 = vmatmul.msk.f32.vlgmr.msra.gmra.mxu2 %vm260_vm0, %v6653_v51  ;;  %6662 = vmatmul.msk.f32.gmra.mxu3 %vm260_vm0, %v6659_v52  ;;  %v6741_v52 = vld [vmem:[%s7421_s18 + $0x340] sm:$0xff] }
  0x71   : > { %6691 = vmatmul.msk.f32.gmra.mxu1 %vm260_vm0, %v6688_v53  ;;  %1348 = vmatpush.msra.mxu2 %v7375_v1 }
  0x72   : > { %6666 = vmatmul.msk.f32.vlgmr.msra.gmra.mxu0 %vm260_vm0, %v6663_v54 }
  0x73   : > { %1417 = vmatpush.msra.mxu0 %v7380_v2 }
  0x78   : > { %6657 = vmatmul.msk.f32.gmra.mxu2 %vm260_vm0, %v6654_v55  ;;  %6680 = vmatmul.msk.f32.vlgmr.msrb.gmra.mxu3 %vm260_vm0, %v6663_v54 }
  0x79   : > { %6710 = vmatmul.msk.f32.vlgmr.msrb.gmra.mxu1 %vm260_vm0, %v7556_v56  ;;  %1521 = vmatpush.msrb.mxu3 %v7441_v16 }
  0x7a   : > { %6667 = vmatmul.msk.f32.gmra.mxu0 %vm260_vm0, %v6664_v57  ;;  %1735 = vmatpush.msrb.mxu1 %v7380_v2 }
  0x80   : > { %6676 = vmatmul.msk.f32.vlgmr.msrb.gmra.mxu2 %vm260_vm0, %v6687_v49  ;;  %6681 = vmatmul.msk.f32.gmra.mxu3 %vm260_vm0, %v6679_v58  ;;  %v6732_v58 = vld [vmem:[%s7421_s18 + $0x49] sm:$0x7f] }
  0x81   : > { %6711 = vmatmul.msk.f32.gmra.mxu1 %vm260_vm0, %v6708_v59  ;;  %1487 = vmatpush.msrb.mxu2 %v7416_v7  ;;  %v6756_v59 = vld [vmem:[%s7421_s18 + $0x150] sm:$0xff] }
  0x82   : > { %6685 = vmatmul.msk.f32.vlgmr.msrb.gmra.mxu0 %vm260_vm0, %v6668_v43 }
  0x83   : > { %1563 = vmatpush.msrb.mxu0 %v7387_v3 }
  0x88   : > { %6677 = vmatmul.msk.f32.gmra.mxu2 %vm260_vm0, %v6674_v60  ;;  %6700 = vmatmul.msk.f32.vlgmr.msra.gmra.mxu3 %vm260_vm0, %v6697_v61 }
  0x89   : > { %6729 = vmatmul.msk.f32.vlgmr.msra.gmra.mxu1 %vm260_vm0, %v6726_v62  ;;  %1666 = vmatpush.msra.mxu3 %v7375_v1 }
  0x8a   : > { %6686 = vmatmul.msk.f32.gmra.mxu0 %vm260_vm0, %v6683_v63  ;;  %1881 = vmatpush.msra.mxu1 %v7387_v3  ;;  %v6785_v63 = vld [vmem:[%s7421_s18 + $0x350] sm:$0xff] }
  0x8e   : > { %v7586_v10 = vpop.f32.mrf.mxu1 }
  0x8f   : > { %v284_v12 = vpop.f32.mrf.mxu0 }
  0x90   : > { %6695 = vmatmul.msk.f32.vlgmr.msra.gmra.mxu2 %vm260_vm0, %v6692_v8  ;;  %6701 = vmatmul.msk.f32.gmra.mxu3 %vm260_vm0, %v6698_v9  ;;  %v290_v30 = vadd.f32 %v7294_v25, %v284_v12  ;;  %v6742_v9 = vld [vmem:[%s7421_s18 + $0x348] sm:$0x7f] }
  0x91   : > { %6730 = vmatmul.msk.f32.gmra.mxu1 %vm260_vm0, %v6727_v11  ;;  %1631 = vmatpush.msra.mxu2 %v7392_v4 }
  0x92   : > { %6705 = vmatmul.msk.f32.vlgmr.msra.gmra.mxu0 %vm260_vm0, %v6702_v13 }
  0x93   : > { %1701 = vmatpush.msra.mxu0 %v7397_v5  ;;  %v320_v14 = vpop.f32.mrf.mxu2  ;;  %v391_v15 = vpop.f32.mrf.mxu3 }
  0x94   : > { %v326_v33 = vadd.f32 %v320_v14, %v290_v30  ;;  %v7679_v30 = vld [vmem:[%s7421_s18 + $0x61] sm:$0xff] }
  0x96   : > { %v7598_v19 = vpop.f32.mrf.mxu1 }
  0x97   : > { %v287_v21 = vpop.f32.mrf.mxu0 }
  0x98   : > { %6696 = vmatmul.msk.f32.gmra.mxu2 %vm260_vm0, %v6693_v17  ;;  %6720 = vmatmul.msk.f32.vlgmr.msrb.gmra.mxu3 %vm260_vm0, %v6717_v18  ;;  %v291_v41 = vadd.f32 %v7294_v25, %v287_v21  ;;  %v7295_v17 = vld [vmem:[%s8827_s2] ss:$0 sm:$0xff]  ;;  %v6786_v21 = vld [vmem:[%s7421_s18 + $0x358] sm:$0x7f] }
  0x99   : > { %6749 = vmatmul.msk.f32.vlgmr.msrb.gmra.mxu1 %vm260_vm0, %v6746_v20  ;;  %1805 = vmatpush.msrb.mxu3 %v7416_v7 }
  0x9a   : > { %6706 = vmatmul.msk.f32.gmra.mxu0 %vm260_vm0, %v6703_v22  ;;  %2019 = vmatpush.msrb.mxu1 %v7397_v5 }
  0x9b   : > { %v323_v23 = vpop.f32.mrf.mxu2  ;;  %v394_v24 = vpop.f32.mrf.mxu3 }
  0x9c   : > { %v327_v45 = vadd.f32 %v323_v23, %v291_v41  ;;  %v6761_v23 = vld [vmem:[%s7421_s18 + $0x51] sm:$0xff] }
  0x9e   : > { %v7612_v27 = vpop.f32.mrf.mxu1 }
  0x9f   : > { %v427_v29 = vpop.f32.mrf.mxu0 }
  0xa0   : > { %6715 = vmatmul.msk.f32.vlgmr.msrb.gmra.mxu2 %vm260_vm0, %v6726_v62  ;;  %6721 = vmatmul.msk.f32.gmra.mxu3 %vm260_vm0, %v6718_v26  ;;  %v6752_v26 = vld [vmem:[%s7421_s18 + $0x58] sm:$0x7f] }
  0xa1   : > { %6750 = vmatmul.msk.f32.gmra.mxu1 %vm260_vm0, %v6747_v28  ;;  %1770 = vmatpush.msrb.mxu2 %v7411_v6 }
  0xa2   : > { %6724 = vmatmul.msk.f32.vlgmr.msrb.gmra.mxu0 %vm260_vm0, %v7556_v56 }
  0xa3   : > { %1839 = vmatpush.msrb.mxu0 %v7441_v16  ;;  %v355_v31 = vpop.f32.mrf.mxu2  ;;  %v465_v32 = vpop.f32.mrf.mxu3 }
  0xa4   : > { %v361_v36 = vadd.f32 %v355_v31, %v326_v33 }
  0xa6   : > { %v7624_v37 = vpop.f32.mrf.mxu1  ;;  %v397_v42 = vadd.f32 %v391_v15, %v361_v36  ;;  %v6757_v15 = vld [vmem:[%s7421_s18 + $0x158] sm:$0x7f] }
  0xa7   : > { %v430_v39 = vpop.f32.mrf.mxu0 }
  0xa8   : > { %6716 = vmatmul.msk.f32.gmra.mxu2 %vm260_vm0, %v6713_v34  ;;  %6739 = vmatmul.msk.f32.vlgmr.msra.gmra.mxu3 %vm260_vm0, %v6736_v35  ;;  %v433_v47 = vadd.f32 %v427_v29, %v397_v42  ;;  %v6776_v35 = vld [vmem:[%s7421_s18 + $0x59] sm:$0x7f]  ;;  %v6780_v42 = vld [vmem:[%s7421_s18 + $0x250] sm:$0xff] }
  0xa9   : > { %6768 = vmatmul.msk.f32.vlgmr.msra.gmra.mxu1 %vm260_vm0, %v6766_v38  ;;  %1949 = vmatpush.msra.mxu3 %v7392_v4 }
  0xaa   : > { %6725 = vmatmul.msk.f32.gmra.mxu0 %vm260_vm0, %v6723_v40  ;;  %2157 = vmatpush.msra.mxu1 %v7441_v16  ;;  %v468_v54 = vadd.f32 %v7586_v10, %v433_v47  ;;  %v6806_v40 = vld [vmem:[%s7421_s18 + $0x69] sm:$0x7f] }
  0xab   : > { %v358_v43 = vpop.f32.mrf.mxu2  ;;  %v534_v44 = vpop.f32.mrf.mxu3 }
  0xac   : > { %v362_v48 = vadd.f32 %v358_v43, %v327_v45  ;;  %v6771_v45 = vld [vmem:[%s7421_s18 + $0x158] sm:$0x7f] }
  0xae   : > { %v7635_v49 = vpop.f32.mrf.mxu1  ;;  %v398_v53 = vadd.f32 %v394_v24, %v362_v48 }
  0xaf   : > { %v569_v51 = vpop.f32.mrf.mxu0 }
  0xb0   : > { %6734 = vmatmul.msk.f32.vlgmr.msra.gmra.mxu2 %vm260_vm0, %v6717_v18  ;;  %6740 = vmatmul.msk.f32.gmra.mxu3 %vm260_vm0, %v6737_v46  ;;  %v434_v60 = vadd.f32 %v430_v39, %v398_v53  ;;  %v7704_v46 = vld [vmem:[%s7421_s18 + $0x60] sm:$0xff]  ;;  %v6781_v53 = vld [vmem:[%s7421_s18 + $0x258] sm:$0x7f] }
  0xb1   : > { %6769 = vmatmul.msk.f32.gmra.mxu1 %vm260_vm0, %v6767_v50  ;;  %1915 = vmatpush.msra.mxu2 %v7370_v0 }
  0xb2   : > { %6744 = vmatmul.msk.f32.vlgmr.msra.gmra.mxu0 %vm260_vm0, %v6741_v52  ;;  %v469_v10 = vadd.f32 %v465_v32, %v434_v60  ;;  %v6762_v32 = vld [vmem:[%s7421_s18 + $0x59] sm:$0x7f]  ;;  %v6796_v60 = vld [vmem:[%s7421_s18 + $0x68] sm:$0x7f] }
  0xb3   : > { %1984 = vmatpush.msra.mxu0 %v7375_v1  ;;  %v498_v55 = vpop.f32.mrf.mxu2  ;;  %v537_v56 = vpop.f32.mrf.mxu3 }
  0xb4   : > { %v504_v57 = vadd.f32 %v498_v55, %v468_v54 }
  0xb6   : > { %v540_v61 = vadd.f32 %v534_v44, %v504_v57  ;;  %v7648_v62 = vpop.f32.mrf.mxu1 }
  0xb7   : > { %v572_v8 = vpop.f32.mrf.mxu0 }
  0xb8   : > { %v575_v11 = vadd.f32 %v569_v51, %v540_v61  ;;  %6735 = vmatmul.msk.f32.gmra.mxu2 %vm260_vm0, %v6732_v58  ;;  %6759 = vmatmul.msk.f32.vlgmr.msrb.gmra.mxu3 %vm260_vm0, %v6756_v59  ;;  %v6824_v51 = vld [vmem:[%s7421_s18 + $0x260] sm:$0xff] }
  0xb9   : > { %6788 = vmatmul.msk.f32.vlgmr.msrb.gmra.mxu1 %vm260_vm0, %v6785_v63  ;;  %2088 = vmatpush.msrb.mxu3 %v7411_v6 }
  0xba   : > { %6745 = vmatmul.msk.f32.gmra.mxu0 %vm260_vm0, %v6742_v9  ;;  %577 = vst.msk [vmem:[#allocation2] sm:$0xff] %vm260_vm0, %v575_v11  ;;  %2302 = vmatpush.msrb.mxu1 %v7375_v1  ;;  %v617_v1 = vadd.f32 %v7295_v17, %v7598_v19  ;;  %v6800_v9 = vld [vmem:[%s7421_s18 + $0x160] sm:$0xff] }
  0xbb   : > { %v501_v12 = vpop.f32.mrf.mxu2  ;;  %v679_v13 = vpop.f32.mrf.mxu3 }
  0xbc   : > { %v505_v14 = vadd.f32 %v501_v12, %v469_v10  ;;  %v7296_v12 = vld [vmem:[%s8827_s2] ss:$0 sm:$0xff] }
  0xbe   : > { %v541_v18 = vadd.f32 %v537_v56, %v505_v14  ;;  %v7663_v20 = vpop.f32.mrf.mxu1 }
  0xbf   : > { %v714_v22 = vpop.f32.mrf.mxu0 }
  0xc0   : > { %v576_v6 = vadd.f32 %v572_v8, %v541_v18  ;;  %6754 = vmatmul.msk.f32.vlgmr.msrb.gmra.mxu2 %vm260_vm0, %v6766_v38  ;;  %6760 = vmatmul.msk.f32.gmra.mxu3 %vm260_vm0, %v6757_v15  ;;  %v6825_v8 = vld [vmem:[%s7421_s18 + $0x268] sm:$0x7f]  ;;  %v7745_v15 = vld [vmem:[%s7421_s18 + $0x170] sm:$0xff] }
  0xc1   : > { %6789 = vmatmul.msk.f32.gmra.mxu1 %vm260_vm0, %v6786_v21  ;;  %2053 = vmatpush.msrb.mxu2 %v7380_v2  ;;  %v618_v2 = vadd.f32 %v7295_v17, %v7612_v27  ;;  %v6801_v18 = vld [vmem:[%s7421_s18 + $0x168] sm:$0x7f] }
  0xc2   : > { %6764 = vmatmul.msk.f32.vlgmr.msrb.gmra.mxu0 %vm260_vm0, %v6761_v23  ;;  %579 = vst.msk [vmem:[#allocation2 + $0x8] sm:$0x7f] %vm578_vm1, %v576_v6 }
  0xc3   : > { %2123 = vmatpush.msrb.mxu0 %v7416_v7  ;;  %v645_v24 = vpop.f32.mrf.mxu2  ;;  %v682_v25 = vpop.f32.mrf.mxu3 }
  0xc4   : > { %v651_v28 = vadd.f32 %v645_v24, %v617_v1  ;;  %v6815_v1 = vld [vmem:[%s7421_s18 + $0x168] sm:$0x7f] }
  0xc6   : > { %v7676_v29 = vpop.f32.mrf.mxu1  ;;  %v685_v19 = vadd.f32 %v679_v13, %v651_v28  ;;  %v6791_v13 = vld [vmem:[%s7421_s18 + $0x259] sm:$0x7f] }
  0xc7   : > { %v717_v31 = vpop.f32.mrf.mxu0 }
  0xc8   : > { %6755 = vmatmul.msk.f32.gmra.mxu2 %vm260_vm0, %v6752_v26  ;;  %6778 = vmatmul.msk.f32.vlgmr.msra.gmra.mxu3 %vm260_vm0, %v6761_v23  ;;  %v720_v36 = vadd.f32 %v714_v22, %v685_v19 }
  0xc9   : > { %6808 = vmatmul.msk.f32.vlgmr.msra.gmra.mxu1 %vm260_vm0, %v7679_v30  ;;  %2233 = vmatpush.msra.mxu3 %v7370_v0 }
  0xca   : > { %6765 = vmatmul.msk.f32.gmra.mxu0 %vm260_vm0, %v6762_v32  ;;  %2441 = vmatpush.msra.mxu1 %v7416_v7  ;;  %v755_v7 = vadd.f32 %v7624_v37, %v720_v36 }
  0xcb   : > { %v648_v33 = vpop.f32.mrf.mxu2  ;;  %v818_v34 = vpop.f32.mrf.mxu3 }
  0xcc   : > { %v652_v38 = vadd.f32 %v648_v33, %v618_v2 }
  0xce   : > { %v7691_v39 = vpop.f32.mrf.mxu1  ;;  %v686_v0 = vadd.f32 %v682_v25, %v652_v38  ;;  %v6845_v25 = vld [vmem:[%s7421_s18 + $0x178] sm:$0x7f] }
  0xcf   : > { %v853_v41 = vpop.f32.mrf.mxu0 }
  0xd0   : > { %6773 = vmatmul.msk.f32.vlgmr.msra.gmra.mxu2 %vm260_vm0, %v6756_v59  ;;  %6779 = vmatmul.msk.f32.gmra.mxu3 %vm260_vm0, %v6776_v35  ;;  %v721_v47 = vadd.f32 %v717_v31, %v686_v0  ;;  %v6790_v59 = vld [vmem:[%s7421_s18 + $0x251] sm:$0xff]  ;;  %v6834_v35 = vld [vmem:[%s7421_s18 + $0x261] sm:$0xff] }
  0xd1   : > { %6809 = vmatmul.msk.f32.gmra.mxu1 %vm260_vm0, %v6806_v40  ;;  %2199 = vmatpush.msra.mxu2 %v7387_v3  ;;  %v7713_v3 = vld [vmem:[%s8826_s1 + $0x28] sm:$0xff]  ;;  %v7783_v40 = vld [vmem:[%s7421_s18 + $0x71] sm:$0xff] }
  0xd2   : > { %6783 = vmatmul.msk.f32.vlgmr.msra.gmra.mxu0 %vm260_vm0, %v6780_v42  ;;  %v756_v55 = vadd.f32 %v7635_v49, %v721_v47  ;;  %v6820_v42 = vld [vmem:[%s7421_s18 + $0x69] sm:$0x7f] }
  0xd3   : > { %2267 = vmatpush.msra.mxu0 %v7392_v4  ;;  %v783_v27 = vpop.f32.mrf.mxu2  ;;  %v821_v43 = vpop.f32.mrf.mxu3 }
  0xd4   : > { %v789_v44 = vadd.f32 %v783_v27, %v755_v7 }
  0xd6   : > { %v824_v48 = vadd.f32 %v818_v34, %v789_v44  ;;  %v7706_v50 = vpop.f32.mrf.mxu1  ;;  %v6811_v34 = vld [vmem:[%s7421_s18 + $0x68] sm:$0x7f]  ;;  %v6829_v44 = vld [vmem:[%s7421_s18 + $0x360] sm:$0xff] }
  0xd7   : > { %v856_v52 = vpop.f32.mrf.mxu0 }
  0xd8   : > { %v859_v37 = vadd.f32 %v853_v41, %v824_v48  ;;  %6774 = vmatmul.msk.f32.gmra.mxu2 %vm260_vm0, %v6771_v45  ;;  %6798 = vmatmul.msk.f32.vlgmr.msrb.gmra.mxu3 %vm260_vm0, %v7704_v46  ;;  %v6835_v45 = vld [vmem:[%s7421_s18 + $0x269] sm:$0x7f] }
  0xd9   : > { %6827 = vmatmul.msk.f32.vlgmr.msrb.gmra.mxu1 %vm260_vm0, %v6824_v51  ;;  %2371 = vmatpush.msrb.mxu3 %v7713_v3  ;;  %v6864_v51 = vld [vmem:[%s7421_s18 + $0x79] sm:$0x7f] }
  0xda   : > { %6784 = vmatmul.msk.f32.gmra.mxu0 %vm260_vm0, %v6781_v53  ;;  %v893_v54 = vadd.f32 %v7648_v62, %v859_v37  ;;  %2585 = vmatpush.msrb.mxu1 %v7392_v4  ;;  %v6839_v53 = vld [vmem:[%s7421_s18 + $0x70] sm:$0xff]  ;;  %v7814_v37 = vld [vmem:[%s8826_s1 + $0x18] sm:$0xff] }
  0xdb   : > { %v786_v56 = vpop.f32.mrf.mxu2  ;;  %v963_v57 = vpop.f32.mrf.mxu3 }
  0xdc   : > { %896 = vst.msk [vmem:[#allocation2 + $0x10] sm:$0xff] %vm260_vm0, %v893_v54  ;;  %v790_v58 = vadd.f32 %v786_v56, %v756_v55 }
  0xde   : > { %v825_v61 = vadd.f32 %v821_v43, %v790_v58  ;;  %v7727_v63 = vpop.f32.mrf.mxu1  ;;  %v6830_v58 = vld [vmem:[%s7421_s18 + $0x368] sm:$0x7f] }
  0xdf   : > { %v997_v62 = vpop.f32.mrf.mxu0 }
  0xe0   : > { %v860_v49 = vadd.f32 %v856_v52, %v825_v61  ;;  %6793 = vmatmul.msk.f32.vlgmr.msrb.gmra.mxu2 %vm260_vm0, %v6790_v59  ;;  %6799 = vmatmul.msk.f32.gmra.mxu3 %vm260_vm0, %v6796_v60  ;;  %v7297_v59 = vld [vmem:[%s8827_s2] ss:$0 sm:$0xff] }
  0xe1   : > { %6828 = vmatmul.msk.f32.gmra.mxu1 %vm260_vm0, %v6825_v8  ;;  %2337 = vmatpush.msrb.mxu2 %v7397_v5  ;;  %v7751_v5 = vld [vmem:[%s8826_s1 + $0x30] sm:$0xff]  ;;  %v7831_v8 = vld [vmem:[%s7421_s18 + $0x80] sm:$0xff] }
  0xe2   : > { %6803 = vmatmul.msk.f32.vlgmr.msrb.gmra.mxu0 %vm260_vm0, %v6800_v9  ;;  %v894_v4 = vadd.f32 %v7663_v20, %v860_v49  ;;  %v7756_v20 = vld [vmem:[%s8826_s1] sm:$0xff] }
  0xe3   : > { %v929_v11 = vpop.f32.mrf.mxu2  ;;  %v966_v10 = vpop.f32.mrf.mxu3  ;;  %2406 = vmatpush.msrb.mxu0 %v7751_v5 }
  0xe4   : > { %897 = vst.msk [vmem:[#allocation2 + $0x18] sm:$0x7f] %vm578_vm1, %v894_v4  ;;  %v935_v21 = vadd.f32 %v7296_v12, %v929_v11 }
  0xe6   : > { %v7742_v14 = vpop.f32.mrf.mxu1  ;;  %v969_v6 = vadd.f32 %v963_v57, %v935_v21  ;;  %v6884_v21 = vld [vmem:[%s7421_s18 + $0x88] sm:$0x7f] }
  0xe7   : > { %v1000_v17 = vpop.f32.mrf.mxu0 }
  0xe8   : > { %6794 = vmatmul.msk.f32.gmra.mxu2 %vm260_vm0, %v6791_v13  ;;  %6817 = vmatmul.msk.f32.vlgmr.msra.gmra.mxu3 %vm260_vm0, %v6800_v9  ;;  %v1003_v28 = vadd.f32 %v997_v62, %v969_v6  ;;  %v6840_v62 = vld [vmem:[%s7421_s18 + $0x78] sm:$0x7f]  ;;  %v7837_v9 = vld [vmem:[%s8826_s1 + $0x40] sm:$0xff] }
  0xe9   : > { %6847 = vmatmul.msk.f32.vlgmr.msra.gmra.mxu1 %vm260_vm0, %v7745_v15  ;;  %2517 = vmatpush.msra.mxu3 %v7756_v20  ;;  %v6855_v13 = vld [vmem:[%s7421_s18 + $0x78] sm:$0x7f] }
  0xea   : > { %6804 = vmatmul.msk.f32.gmra.mxu0 %vm260_vm0, %v6801_v18  ;;  %2724 = vmatpush.msra.mxu1 %v7751_v5  ;;  %v1038_v33 = vadd.f32 %v7676_v29, %v1003_v28  ;;  %v7794_v29 = vld [vmem:[%s8826_s1 + $0x20] sm:$0xff]  ;;  %v6873_v28 = vld [vmem:[%s7421_s18 + $0x370] sm:$0xff] }
  0xeb   : > { %v932_v22 = vpop.f32.mrf.mxu2  ;;  %v1101_v23 = vpop.f32.mrf.mxu3 }
  0xec   : > { %v936_v31 = vadd.f32 %v7296_v12, %v932_v22 }
  0xee   : > { %v7767_v24 = vpop.f32.mrf.mxu1  ;;  %v970_v19 = vadd.f32 %v966_v10, %v936_v31 }
  0xef   : > { %v1136_v26 = vpop.f32.mrf.mxu0 }
  0xf0   : > { %6812 = vmatmul.msk.f32.vlgmr.msra.gmra.mxu2 %vm260_vm0, %v7704_v46  ;;  %6818 = vmatmul.msk.f32.gmra.mxu3 %vm260_vm0, %v6815_v1 }
  0xf1   : > { %6848 = vmatmul.msk.f32.gmra.mxu1 %vm260_vm0, %v6845_v25  ;;  %2475 = vmatpush.msra.mxu2 %v7441_v16  ;;  %v7789_v16 = vld [vmem:[%s8826_s1 + $0x8] sm:$0xff] }
  0xf2   : > { %6822 = vmatmul.msk.f32.vlgmr.msra.gmra.mxu0 %vm260_vm0, %v7679_v30  ;;  %v1004_v30 = vadd.f32 %v1000_v17, %v970_v19  ;;  %v6902_v19 = vld [vmem:[%s7421_s18 + $0x180] sm:$0xff] }
  0xf3   : > { %v1067_v32 = vpop.f32.mrf.mxu2  ;;  %v1104_v2 = vpop.f32.mrf.mxu3  ;;  %2551 = vmatpush.msra.mxu0 %v7789_v16 }
  0xf4   : > { %v1073_v36 = vadd.f32 %v1067_v32, %v1038_v33  ;;  %v1039_v43 = vadd.f32 %v7691_v39, %v1004_v30 }
  0xf6   : > { %v7780_v38 = vpop.f32.mrf.mxu1  ;;  %v1107_v0 = vadd.f32 %v1101_v23, %v1073_v36 }
  0xf7   : > { %v1139_v41 = vpop.f32.mrf.mxu0 }
  0xf8   : > { %6813 = vmatmul.msk.f32.gmra.mxu2 %vm260_vm0, %v6811_v34  ;;  %6837 = vmatmul.msk.f32.vlgmr.msrb.gmra.mxu3 %vm260_vm0, %v6834_v35  ;;  %v1142_v46 = vadd.f32 %v1136_v26, %v1107_v0  ;;  %v6850_v26 = vld [vmem:[%s7421_s18 + $0x79] sm:$0x7f] }
  0xf9   : > { %6866 = vmatmul.msk.f32.vlgmr.msrb.gmra.mxu1 %vm260_vm0, %v7783_v40  ;;  %2655 = vmatpush.msrb.mxu3 %v7794_v29 }
  0xfa   : > { %6823 = vmatmul.msk.f32.gmra.mxu0 %vm260_vm0, %v6820_v42  ;;  %2869 = vmatpush.msrb.mxu1 %v7789_v16  ;;  %v1177_v54 = vadd.f32 %v7706_v50, %v1142_v46 }
  0xfb   : > { %v1070_v7 = vpop.f32.mrf.mxu2  ;;  %v1247_v27 = vpop.f32.mrf.mxu3 }
  0xfc   : > { %v1074_v47 = vadd.f32 %v1070_v7, %v1039_v43  ;;  %v1253_v49 = vadd.f32 %v7297_v59, %v1247_v27  ;;  %v6903_v7 = vld [vmem:[%s7421_s18 + $0x188] sm:$0x7f]  ;;  %v6878_v43 = vld [vmem:[%s7421_s18 + $0x271] sm:$0xff] }
  0xfe   : > { %v7807_v48 = vpop.f32.mrf.mxu1  ;;  %v1108_v39 = vadd.f32 %v1104_v2, %v1074_v47 }
  0xff   : > { %v1281_v52 = vpop.f32.mrf.mxu0 }
 0x100   : > { %6832 = vmatmul.msk.f32.vlgmr.msrb.gmra.mxu2 %vm260_vm0, %v6829_v44  ;;  %6838 = vmatmul.msk.f32.gmra.mxu3 %vm260_vm0, %v6835_v45  ;;  %v1143_v60 = vadd.f32 %v1139_v41, %v1108_v39  ;;  %v1287_v17 = vadd.f32 %v1281_v52, %v1253_v49  ;;  %v6874_v41 = vld [vmem:[%s7421_s18 + $0x378] sm:$0x7f]  ;;  %v6894_v49 = vld [vmem:[%s7421_s18 + $0x89] sm:$0x7f] }
 0x101   : > { %6867 = vmatmul.msk.f32.gmra.mxu1 %vm260_vm0, %v6864_v51  ;;  %2620 = vmatpush.msrb.mxu2 %v7814_v37  ;;  %v6869_v52 = vld [vmem:[%s7421_s18 + $0x278] sm:$0x7f] }
 0x102   : > { %6842 = vmatmul.msk.f32.vlgmr.msrb.gmra.mxu0 %vm260_vm0, %v6839_v53  ;;  %v1178_v4 = vadd.f32 %v7727_v63, %v1143_v60  ;;  %v7855_v63 = vld [vmem:[%s8826_s1 + $0x38] sm:$0xff]  ;;  %v1321_v6 = vadd.f32 %v7742_v14, %v1287_v17 }
 0x103   : > { %2689 = vmatpush.msrb.mxu0 %v7713_v3  ;;  %v1205_v55 = vpop.f32.mrf.mxu2  ;;  %v1250_v56 = vpop.f32.mrf.mxu3 }
 0x104   : > { %v1211_v57 = vadd.f32 %v1205_v55, %v1177_v54  ;;  %v1254_v23 = vadd.f32 %v7297_v59, %v1250_v56  ;;  %v6922_v56 = vld [vmem:[%s7421_s18 + $0x281] sm:$0xff] }
 0x106   : > { %1214 = vst.msk [vmem:[#allocation2 + $0x20] sm:$0xff] %vm260_vm0, %v1211_v57  ;;  %v7828_v61 = vpop.f32.mrf.mxu1 }
 0x107   : > { %v1284_v50 = vpop.f32.mrf.mxu0 }
 0x108   : > { %6833 = vmatmul.msk.f32.gmra.mxu2 %vm260_vm0, %v6830_v58  ;;  %6856 = vmatmul.msk.f32.vlgmr.msra.gmra.mxu3 %vm260_vm0, %v6839_v53  ;;  %v1288_v31 = vadd.f32 %v1284_v50, %v1254_v23  ;;  %v6893_v53 = vld [vmem:[%s7421_s18 + $0x81] sm:$0xff]  ;;  %v6879_v58 = vld [vmem:[%s7421_s18 + $0x279] sm:$0x7f] }
 0x109   : > { %6886 = vmatmul.msk.f32.vlgmr.msra.gmra.mxu1 %vm260_vm0, %v7831_v8  ;;  %2793 = vmatpush.msra.mxu3 %v7837_v9  ;;  %v6912_v23 = vld [vmem:[%s7421_s18 + $0x280] sm:$0xff] }
 0x10a   : > { %6843 = vmatmul.msk.f32.gmra.mxu0 %vm260_vm0, %v6840_v62  ;;  %3007 = vmatpush.msra.mxu1 %v7713_v3  ;;  %v1322_v34 = vadd.f32 %v7767_v24, %v1288_v31  ;;  %v7888_v24 = vld [vmem:[%s8826_s1 + $0x10] sm:$0xff]  ;;  %v6899_v31 = vld [vmem:[%s7421_s18 + $0x88] sm:$0x7f] }
 0x10b   : > { %v1208_v11 = vpop.f32.mrf.mxu2  ;;  %v1385_v10 = vpop.f32.mrf.mxu3 }
 0x10c   : > { %v1212_v12 = vadd.f32 %v1208_v11, %v1178_v4 }
 0x10e   : > { %1215 = vst.msk [vmem:[#allocation2 + $0x28] sm:$0x7f] %vm578_vm1, %v1212_v12  ;;  %v7849_v18 = vpop.f32.mrf.mxu1  ;;  %v6923_v12 = vld [vmem:[%s7421_s18 + $0x289] sm:$0x7f] }
 0x10f   : > { %v1419_v22 = vpop.f32.mrf.mxu0 }
 0x110   : > { %6852 = vmatmul.msk.f32.vlgmr.msra.gmra.mxu2 %vm260_vm0, %v7783_v40  ;;  %6857 = vmatmul.msk.f32.gmra.mxu3 %vm260_vm0, %v6855_v13  ;;  %v6868_v40 = vld [vmem:[%s7421_s18 + $0x270] sm:$0xff] }
 0x111   : > { %6887 = vmatmul.msk.f32.gmra.mxu1 %vm260_vm0, %v6884_v21  ;;  %2759 = vmatpush.msra.mxu2 %v7855_v63 }
 0x112   : > { %6861 = vmatmul.msk.f32.vlgmr.msra.gmra.mxu0 %vm260_vm0, %v7745_v15  ;;  %v6859_v15 = vld [vmem:[%s7421_s18 + $0x178] sm:$0x7f] }
 0x113   : > { %2835 = vmatpush.msra.mxu0 %v7756_v20  ;;  %v1350_v1 = vpop.f32.mrf.mxu2  ;;  %v1388_v25 = vpop.f32.mrf.mxu3 }
 0x114   : > { %v1356_v32 = vadd.f32 %v1350_v1, %v1321_v6 }
 0x116   : > { %v7868_v2 = vpop.f32.mrf.mxu1  ;;  %v1391_v14 = vadd.f32 %v1385_v10, %v1356_v32 }
 0x117   : > { %v1422_v33 = vpop.f32.mrf.mxu0 }
 0x118   : > { %6853 = vmatmul.msk.f32.gmra.mxu2 %vm260_vm0, %v6850_v26  ;;  %6876 = vmatmul.msk.f32.vlgmr.msrb.gmra.mxu3 %vm260_vm0, %v6873_v28  ;;  %v1425_v42 = vadd.f32 %v1419_v22, %v1391_v14  ;;  %v6889_v22 = vld [vmem:[%s7421_s18 + $0x188] sm:$0x7f]  ;;  %v6942_v26 = vld [vmem:[%s7421_s18 + $0x90] sm:$0xff] }
 0x119   : > { %6905 = vmatmul.msk.f32.vlgmr.msrb.gmra.mxu1 %vm260_vm0, %v6902_v19  ;;  %2938 = vmatpush.msrb.mxu3 %v7814_v37 }
 0x11a   : > { %6862 = vmatmul.msk.f32.gmra.mxu0 %vm260_vm0, %v6859_v15  ;;  %3153 = vmatpush.msrb.mxu1 %v7756_v20  ;;  %v1460_v45 = vadd.f32 %v7780_v38, %v1425_v42  ;;  %v7298_v38 = vld [vmem:[%s8827_s2] ss:$0 sm:$0xff] }
 0x11b   : > { %v1353_v35 = vpop.f32.mrf.mxu2  ;;  %v1523_v36 = vpop.f32.mrf.mxu3 }
 0x11c   : > { %v1357_v30 = vadd.f32 %v1353_v35, %v1322_v34  ;;  %v6943_v35 = vld [vmem:[%s7421_s18 + $0x98] sm:$0x7f] }
 0x11e   : > { %v7881_v0 = vpop.f32.mrf.mxu1  ;;  %v1392_v44 = vadd.f32 %v1388_v25, %v1357_v30 }
 0x11f   : > { %v1565_v27 = vpop.f32.mrf.mxu0 }
 0x120   : > { %6871 = vmatmul.msk.f32.vlgmr.msrb.gmra.mxu2 %vm260_vm0, %v6868_v40  ;;  %6877 = vmatmul.msk.f32.gmra.mxu3 %vm260_vm0, %v6874_v41  ;;  %v1426_v39 = vadd.f32 %v1422_v33, %v1392_v44  ;;  %v1571_v4 = vadd.f32 %v7298_v38, %v1565_v27  ;;  %v6913_v33 = vld [vmem:[%s7421_s18 + $0x288] sm:$0x7f]  ;;  %v6917_v40 = vld [vmem:[%s7421_s18 + $0x380] sm:$0xff] }
 0x121   : > { %6906 = vmatmul.msk.f32.gmra.mxu1 %vm260_vm0, %v6903_v7  ;;  %2903 = vmatpush.msrb.mxu2 %v7888_v24  ;;  %v6908_v27 = vld [vmem:[%s7421_s18 + $0x89] sm:$0x7f] }
 0x122   : > { %6881 = vmatmul.msk.f32.vlgmr.msrb.gmra.mxu0 %vm260_vm0, %v6878_v43  ;;  %v1461_v59 = vadd.f32 %v7807_v48, %v1426_v39  ;;  %v1605_v48 = vadd.f32 %v7828_v61, %v1571_v4  ;;  %v6932_v43 = vld [vmem:[%s7421_s18 + $0x190] sm:$0xff] }
 0x123   : > { %2973 = vmatpush.msrb.mxu0 %v7794_v29  ;;  %v1489_v46 = vpop.f32.mrf.mxu2  ;;  %v1526_v47 = vpop.f32.mrf.mxu3 }
 0x124   : > { %v1495_v51 = vadd.f32 %v1489_v46, %v1460_v45 }
 0x126   : > { %v1529_v54 = vadd.f32 %v1523_v36, %v1495_v51  ;;  %v7899_v55 = vpop.f32.mrf.mxu1 }
 0x127   : > { %v1568_v57 = vpop.f32.mrf.mxu0 }
 0x128   : > { %1532 = vst.msk [vmem:[#allocation2 + $0x30] sm:$0xff] %vm260_vm0, %v1529_v54  ;;  %6872 = vmatmul.msk.f32.gmra.mxu2 %vm260_vm0, %v6869_v52  ;;  %6896 = vmatmul.msk.f32.vlgmr.msra.gmra.mxu3 %vm260_vm0, %v6893_v53  ;;  %v1572_v6 = vadd.f32 %v7298_v38, %v1568_v57  ;;  %v6918_v52 = vld [vmem:[%s7421_s18 + $0x388] sm:$0x7f]  ;;  %v6933_v57 = vld [vmem:[%s7421_s18 + $0x198] sm:$0x7f] }
 0x129   : > { %6925 = vmatmul.msk.f32.vlgmr.msra.gmra.mxu1 %vm260_vm0, %v6922_v56  ;;  %3077 = vmatpush.msra.mxu3 %v7855_v63 }
 0x12a   : > { %6882 = vmatmul.msk.f32.gmra.mxu0 %vm260_vm0, %v6879_v58  ;;  %3291 = vmatpush.msra.mxu1 %v7794_v29  ;;  %v7299_v58 = vld [vmem:[%s8827_s2] ss:$0 sm:$0xff] }
 0x12b   : > { %v1492_v60 = vpop.f32.mrf.mxu2  ;;  %v1668_v50 = vpop.f32.mrf.mxu3 }
 0x12c   : > { %v1496_v62 = vadd.f32 %v1492_v60, %v1461_v59  ;;  %v6962_v60 = vld [vmem:[%s7421_s18 + $0x398] sm:$0x7f] }
 0x12e   : > { %v1530_v11 = vadd.f32 %v1526_v47, %v1496_v62  ;;  %v7915_v10 = vpop.f32.mrf.mxu1  ;;  %v6961_v47 = vld [vmem:[%s7421_s18 + $0x390] sm:$0xff] }
 0x12f   : > { %v1703_v13 = vpop.f32.mrf.mxu0 }
 0x130   : > { %1533 = vst.msk [vmem:[#allocation2 + $0x38] sm:$0x7f] %vm578_vm1, %v1530_v11  ;;  %6891 = vmatmul.msk.f32.vlgmr.msra.gmra.mxu2 %vm260_vm0, %v6902_v19  ;;  %6897 = vmatmul.msk.f32.gmra.mxu3 %vm260_vm0, %v6894_v49  ;;  %v1889_v49 = vadd.f32 %v7299_v58, %v7899_v55  ;;  %v1890_v55 = vadd.f32 %v7299_v58, %v7915_v10 }
 0x131   : > { %6926 = vmatmul.msk.f32.gmra.mxu1 %vm260_vm0, %v6923_v12  ;;  %3042 = vmatpush.msra.mxu2 %v7751_v5  ;;  %v6928_v12 = vld [vmem:[%s7421_s18 + $0x98] sm:$0x7f] }
 0x132   : > { %6900 = vmatmul.msk.f32.vlgmr.msra.gmra.mxu0 %vm260_vm0, %v7831_v8  ;;  %v1606_v8 = vadd.f32 %v7849_v18, %v1572_v6 }
 0x133   : > { %3111 = vmatpush.msra.mxu0 %v7837_v9  ;;  %v1633_v17 = vpop.f32.mrf.mxu2  ;;  %v1671_v21 = vpop.f32.mrf.mxu3 }
 0x134   : > { %v1639_v1 = vadd.f32 %v1633_v17, %v1605_v48  ;;  %v7986_v17 = vld [vmem:[%s7421_s18 + $0xa1] sm:$0xff] }
 0x136   : > { %v7929_v25 = vpop.f32.mrf.mxu1  ;;  %v1674_v61 = vadd.f32 %v1668_v50, %v1639_v1 }
 0x137   : > { %v1706_v28 = vpop.f32.mrf.mxu0 }
 0x138   : > { %6892 = vmatmul.msk.f32.gmra.mxu2 %vm260_vm0, %v6889_v22  ;;  %6915 = vmatmul.msk.f32.vlgmr.msrb.gmra.mxu3 %vm260_vm0, %v6912_v23  ;;  %v1709_v15 = vadd.f32 %v1703_v13, %v1674_v61  ;;  %v6938_v22 = vld [vmem:[%s7421_s18 + $0x99] sm:$0x7f] }
 0x139   : > { %6944 = vmatmul.msk.f32.vlgmr.msrb.gmra.mxu1 %vm260_vm0, %v6942_v26  ;;  %3221 = vmatpush.msrb.mxu3 %v7888_v24 }
 0x13a   : > { %6901 = vmatmul.msk.f32.gmra.mxu0 %vm260_vm0, %v6899_v31  ;;  %3429 = vmatpush.msrb.mxu1 %v7837_v9  ;;  %v1743_v41 = vadd.f32 %v7868_v2, %v1709_v15 }
 0x13b   : > { %v1636_v32 = vpop.f32.mrf.mxu2  ;;  %v1807_v19 = vpop.f32.mrf.mxu3 }
 0x13c   : > { %v1640_v14 = vadd.f32 %v1636_v32, %v1606_v8  ;;  %v6982_v8 = vld [vmem:[%s7421_s18 + $0xa9] sm:$0x7f] }
 0x13e   : > { %v7941_v34 = vpop.f32.mrf.mxu1  ;;  %v1675_v18 = vadd.f32 %v1671_v21, %v1640_v14 }
 0x13f   : > { %v1841_v36 = vpop.f32.mrf.mxu0 }
 0x140   : > { %6910 = vmatmul.msk.f32.vlgmr.msrb.gmra.mxu2 %vm260_vm0, %v6893_v53  ;;  %6916 = vmatmul.msk.f32.gmra.mxu3 %vm260_vm0, %v6913_v33  ;;  %v1710_v44 = vadd.f32 %v1706_v28, %v1675_v18 }
 0x141   : > { %6945 = vmatmul.msk.f32.gmra.mxu1 %vm260_vm0, %v6943_v35  ;;  %3187 = vmatpush.msrb.mxu2 %v7789_v16 }
 0x142   : > { %6920 = vmatmul.msk.f32.vlgmr.msrb.gmra.mxu0 %vm260_vm0, %v6917_v40  ;;  %v1744_v2 = vadd.f32 %v7881_v0, %v1710_v44  ;;  %v6937_v0 = vld [vmem:[%s7421_s18 + $0x91] sm:$0xff]  ;;  %v6971_v40 = vld [vmem:[%s7421_s18 + $0xa0] sm:$0xff] }
 0x143   : > { %3256 = vmatpush.msrb.mxu0 %v7814_v37  ;;  %v1772_v42 = vpop.f32.mrf.mxu2  ;;  %v1810_v30 = vpop.f32.mrf.mxu3 }
 0x144   : > { %v1778_v7 = vadd.f32 %v1772_v42, %v1743_v41 }
 0x146   : > { %v1813_v45 = vadd.f32 %v1807_v19, %v1778_v7  ;;  %v7954_v46 = vpop.f32.mrf.mxu1  ;;  %v6956_v19 = vld [vmem:[%s7421_s18 + $0x290] sm:$0xff] }
 0x147   : > { %v1844_v51 = vpop.f32.mrf.mxu0 }
 0x148   : > { %v1847_v53 = vadd.f32 %v1841_v36, %v1813_v45  ;;  %6911 = vmatmul.msk.f32.gmra.mxu2 %vm260_vm0, %v6908_v27  ;;  %6935 = vmatmul.msk.f32.vlgmr.msra.gmra.mxu3 %vm260_vm0, %v6932_v43  ;;  %v6947_v36 = vld [vmem:[%s7421_s18 + $0x198] sm:$0x7f] }
 0x149   : > { %6964 = vmatmul.msk.f32.vlgmr.msra.gmra.mxu1 %vm260_vm0, %v6961_v47  ;;  %3360 = vmatpush.msra.mxu3 %v7751_v5  ;;  %v6957_v27 = vld [vmem:[%s7421_s18 + $0x298] sm:$0x7f] }
 0x14a   : > { %6921 = vmatmul.msk.f32.gmra.mxu0 %vm260_vm0, %v6918_v52  ;;  %1850 = vst.msk [vmem:[#allocation2 + $0x40] sm:$0xff] %vm260_vm0, %v1847_v53  ;;  %3574 = vmatpush.msra.mxu1 %v7814_v37  ;;  %v6966_v52 = vld [vmem:[%s7421_s18 + $0x291] sm:$0xff]  ;;  %v6972_v53 = vld [vmem:[%s7421_s18 + $0xa8] sm:$0x7f] }
 0x14b   : > { %v1775_v39 = vpop.f32.mrf.mxu2  ;;  %v1951_v54 = vpop.f32.mrf.mxu3 }
 0x14c   : > { %v1779_v56 = vadd.f32 %v1775_v39, %v1744_v2 }
 0x14e   : > { %v1814_v38 = vadd.f32 %v1810_v30, %v1779_v56  ;;  %v7970_v59 = vpop.f32.mrf.mxu1  ;;  %v7000_v30 = vld [vmem:[%s7421_s18 + $0x2a0] sm:$0xff] }
 0x14f   : > { %v1986_v50 = vpop.f32.mrf.mxu0 }
 0x150   : > { %v1848_v62 = vadd.f32 %v1844_v51, %v1814_v38  ;;  %6930 = vmatmul.msk.f32.vlgmr.msra.gmra.mxu2 %vm260_vm0, %v6942_v26  ;;  %6936 = vmatmul.msk.f32.gmra.mxu3 %vm260_vm0, %v6933_v57  ;;  %v6952_v26 = vld [vmem:[%s7421_s18 + $0x99] sm:$0x7f]  ;;  %v7300_v38 = vld [vmem:[%s8827_s2] ss:$0 sm:$0xff] }
 0x151   : > { %6965 = vmatmul.msk.f32.gmra.mxu1 %vm260_vm0, %v6962_v60  ;;  %3325 = vmatpush.msra.mxu2 %v7713_v3  ;;  %v6967_v60 = vld [vmem:[%s7421_s18 + $0x299] sm:$0x7f] }
 0x152   : > { %6940 = vmatmul.msk.f32.vlgmr.msra.gmra.mxu0 %vm260_vm0, %v6937_v0  ;;  %1851 = vst.msk [vmem:[#allocation2 + $0x48] sm:$0x7f] %vm578_vm1, %v1848_v62  ;;  %v6977_v62 = vld [vmem:[%s7421_s18 + $0x1a8] sm:$0x7f] }
 0x153   : > { %3395 = vmatpush.msra.mxu0 %v7855_v63  ;;  %v1917_v4 = vpop.f32.mrf.mxu2  ;;  %v1954_v11 = vpop.f32.mrf.mxu3 }
 0x154   : > { %v1923_v13 = vadd.f32 %v1917_v4, %v1889_v49 }
 0x156   : > { %v7983_v48 = vpop.f32.mrf.mxu1  ;;  %v1957_v23 = vadd.f32 %v1951_v54, %v1923_v13  ;;  %v7001_v54 = vld [vmem:[%s7421_s18 + $0x2a8] sm:$0x7f] }
 0x157   : > { %v1989_v21 = vpop.f32.mrf.mxu0  ;;  %v6991_v13 = vld [vmem:[%s7421_s18 + $0x1a8] sm:$0x7f] }
 0x158   : > { %6931 = vmatmul.msk.f32.gmra.mxu2 %vm260_vm0, %v6928_v12  ;;  %6954 = vmatmul.msk.f32.vlgmr.msrb.gmra.mxu3 %vm260_vm0, %v6937_v0  ;;  %v1992_v28 = vadd.f32 %v1986_v50, %v1957_v23  ;;  %v8045_v0 = vld [vmem:[%s7421_s18 + $0x1b0] sm:$0xff] }
 0x159   : > { %6984 = vmatmul.msk.f32.vlgmr.msrb.gmra.mxu1 %vm260_vm0, %v7986_v17  ;;  %3505 = vmatpush.msrb.mxu3 %v7789_v16 }
 0x15a   : > { %6941 = vmatmul.msk.f32.gmra.mxu0 %vm260_vm0, %v6938_v22  ;;  %3713 = vmatpush.msrb.mxu1 %v7855_v63  ;;  %v2027_v33 = vadd.f32 %v7929_v25, %v1992_v28  ;;  %v7021_v22 = vld [vmem:[%s7421_s18 + $0x1b8] sm:$0x7f]  ;;  %v6987_v28 = vld [vmem:[%s7421_s18 + $0xa8] sm:$0x7f] }
 0x15b   : > { %v1920_v6 = vpop.f32.mrf.mxu2  ;;  %v2090_v1 = vpop.f32.mrf.mxu3 }
 0x15c   : > { %v1924_v31 = vadd.f32 %v1920_v6, %v1890_v55 }
 0x15e   : > { %v7998_v61 = vpop.f32.mrf.mxu1  ;;  %v1958_v10 = vadd.f32 %v1954_v11, %v1924_v31  ;;  %v7010_v31 = vld [vmem:[%s7421_s18 + $0x2a1] sm:$0xff] }
 0x15f   : > { %v2125_v32 = vpop.f32.mrf.mxu0 }
 0x160   : > { %6949 = vmatmul.msk.f32.vlgmr.msrb.gmra.mxu2 %vm260_vm0, %v6932_v43  ;;  %6955 = vmatmul.msk.f32.gmra.mxu3 %vm260_vm0, %v6952_v26  ;;  %v1993_v18 = vadd.f32 %v1989_v21, %v1958_v10 }
 0x161   : > { %6985 = vmatmul.msk.f32.gmra.mxu1 %vm260_vm0, %v6982_v8  ;;  %3471 = vmatpush.msrb.mxu2 %v7756_v20 }
 0x162   : > { %6959 = vmatmul.msk.f32.vlgmr.msrb.gmra.mxu0 %vm260_vm0, %v6956_v19  ;;  %v2028_v44 = vadd.f32 %v7941_v34, %v1993_v18  ;;  %v8072_v19 = vld [vmem:[%s7421_s18 + $0xb1] sm:$0xff]  ;;  %v7011_v18 = vld [vmem:[%s7421_s18 + $0x2a9] sm:$0x7f] }
 0x163   : > { %3539 = vmatpush.msrb.mxu0 %v7888_v24  ;;  %v2055_v15 = vpop.f32.mrf.mxu2  ;;  %v2093_v14 = vpop.f32.mrf.mxu3 }
 0x164   : > { %v2061_v35 = vadd.f32 %v2055_v15, %v2027_v33 }
 0x166   : > { %v2096_v41 = vadd.f32 %v2090_v1, %v2061_v35  ;;  %v8011_v42 = vpop.f32.mrf.mxu1 }
 0x167   : > { %v2128_v7 = vpop.f32.mrf.mxu0 }
 0x168   : > { %v2131_v43 = vadd.f32 %v2125_v32, %v2096_v41  ;;  %6950 = vmatmul.msk.f32.gmra.mxu2 %vm260_vm0, %v6947_v36  ;;  %6974 = vmatmul.msk.f32.vlgmr.msra.gmra.mxu3 %vm260_vm0, %v6971_v40  ;;  %v5032_v36 = vld [vmem:[#allocation2] sm:$0x7f] }
 0x169   : > { %7003 = vmatmul.msk.f32.vlgmr.msra.gmra.mxu1 %vm260_vm0, %v7000_v30  ;;  %3643 = vmatpush.msra.mxu3 %v7713_v3 }
 0x16a   : > { %6960 = vmatmul.msk.f32.gmra.mxu0 %vm260_vm0, %v6957_v27  ;;  %v2165_v25 = vadd.f32 %v7954_v46, %v2131_v43  ;;  %3857 = vmatpush.msra.mxu1 %v7888_v24  ;;  %v6976_v46 = vld [vmem:[%s7421_s18 + $0x1a0] sm:$0xff]  ;;  %v7040_v27 = vld [vmem:[%s7421_s18 + $0xb9] sm:$0x7f] }
 0x16b   : > { %v2058_v45 = vpop.f32.mrf.mxu2  ;;  %v2235_v47 = vpop.f32.mrf.mxu3 }
 0x16c   : > { %2168 = vst.msk [vmem:[#allocation2 + $0x50] sm:$0xff] %vm260_vm0, %v2165_v25  ;;  %v2062_v51 = vadd.f32 %v2058_v45, %v2028_v44  ;;  %v7015_v25 = vld [vmem:[%s7421_s18 + $0xb0] sm:$0xff]  ;;  %v5047_v44 = vsel %vm578_vm1, %v5032_v36, -inf }
 0x16e   : > { %v2097_v2 = vadd.f32 %v2093_v14, %v2062_v51  ;;  %v8026_v39 = vpop.f32.mrf.mxu1 }
 0x16f   : > { %v2269_v56 = vpop.f32.mrf.mxu0 }
 0x170   : > { %v2132_v34 = vadd.f32 %v2128_v7, %v2097_v2  ;;  %6969 = vmatmul.msk.f32.vlgmr.msra.gmra.mxu2 %vm260_vm0, %v6966_v52  ;;  %6975 = vmatmul.msk.f32.gmra.mxu3 %vm260_vm0, %v6972_v53 }
 0x171   : > { %7004 = vmatmul.msk.f32.gmra.mxu1 %vm260_vm0, %v7001_v54  ;;  %3609 = vmatpush.msra.mxu2 %v7794_v29  ;;  %v5033_v54 = vld [vmem:[#allocation2 + $0x10] sm:$0x7f] }
 0x172   : > { %6979 = vmatmul.msk.f32.vlgmr.msra.gmra.mxu0 %vm260_vm0, %v6976_v46  ;;  %v2166_v3 = vadd.f32 %v7970_v59, %v2132_v34  ;;  %v5345_v34 = vld [vmem:[#allocation2 + $0x16] sm:$0x7f] }
 0x173   : > { %3678 = vmatpush.msra.mxu0 %v7751_v5  ;;  %v2201_v57 = vpop.f32.mrf.mxu2  ;;  %v2238_v58 = vpop.f32.mrf.mxu3 }
 0x174   : > { %2169 = vst.msk [vmem:[#allocation2 + $0x58] sm:$0x7f] %vm578_vm1, %v2166_v3  ;;  %v2207_v49 = vadd.f32 %v7300_v38, %v2201_v57  ;;  %v5034_v3 = vld [vmem:[#allocation2 + $0x20] sm:$0x7f]  ;;  %v7006_v57 = vld [vmem:[%s7421_s18 + $0x3a8] sm:$0x7f] }
 0x176   : > { %v8042_v50 = vpop.f32.mrf.mxu1  ;;  %v2241_v12 = vadd.f32 %v2235_v47, %v2207_v49  ;;  %v5048_v47 = vrot.slane %v5047_v44, 4  ;;  %v8119_v49 = vld [vmem:[%s8826_s1 + $0x28] sm:$0xff] }
 0x177   : > { %v2272_v59 = vpop.f32.mrf.mxu0 }
 0x178   : > { %6970 = vmatmul.msk.f32.gmra.mxu2 %vm260_vm0, %v6967_v60  ;;  %6993 = vmatmul.msk.f32.vlgmr.msrb.gmra.mxu3 %vm260_vm0, %v6976_v46  ;;  %v2275_v23 = vadd.f32 %v2269_v56, %v2241_v12  ;;  %v5192_v56 = vld [vmem:[#allocation2 + $0x13] sm:$0x7f] }
 0x179   : > { %7023 = vmatmul.msk.f32.vlgmr.msrb.gmra.mxu1 %vm260_vm0, %v8045_v0  ;;  %3789 = vmatpush.msrb.mxu3 %v7756_v20  ;;  %v5213_v12 = vsel %vm578_vm1, %v5192_v56, -inf }
 0x17a   : > { %6980 = vmatmul.msk.f32.gmra.mxu0 %vm260_vm0, %v6977_v62  ;;  %3996 = vmatpush.msrb.mxu1 %v7751_v5  ;;  %v2310_v26 = vadd.f32 %v7983_v48, %v2275_v23  ;;  %v5054_v62 = vsel %vm578_vm1, %v5033_v54, -inf }
 0x17b   : > { %v2204_v4 = vpop.f32.mrf.mxu2  ;;  %v2373_v11 = vpop.f32.mrf.mxu3  ;;  %v5055_v23 = vrot.slane %v5054_v62, 4 }
 0x17c   : > { %v2208_v6 = vadd.f32 %v7300_v38, %v2204_v4  ;;  %v8110_v38 = vld [vmem:[%s7421_s18 + $0xc0] sm:$0xff] }
 0x17e   : > { %v8056_v21 = vpop.f32.mrf.mxu1  ;;  %v2242_v1 = vadd.f32 %v2238_v58, %v2208_v6 }
 0x17f   : > { %v2408_v55 = vpop.f32.mrf.mxu0 }
 0x180   : > { %6988 = vmatmul.msk.f32.vlgmr.msrb.gmra.mxu2 %vm260_vm0, %v6971_v40  ;;  %6994 = vmatmul.msk.f32.gmra.mxu3 %vm260_vm0, %v6991_v13  ;;  %v2276_v33 = vadd.f32 %v2272_v59, %v2242_v1  ;;  %v7005_v40 = vld [vmem:[%s7421_s18 + $0x3a0] sm:$0xff]  ;;  %v7016_v59 = vld [vmem:[%s7421_s18 + $0xb8] sm:$0x7f]  ;;  %v5366_v13 = vsel %vm578_vm1, %v5345_v34, -inf }
 0x181   : > { %7024 = vmatmul.msk.f32.gmra.mxu1 %vm260_vm0, %v7021_v22  ;;  %3747 = vmatpush.msrb.mxu2 %v7837_v9  ;;  %v5049_v22 = vmax.f32 %v5047_v44, %v5048_v47  ;;  %v5367_v1 = vrot.slane %v5366_v13, 4 }
 0x182   : > { %6998 = vmatmul.msk.f32.vlgmr.msrb.gmra.mxu0 %vm260_vm0, %v7986_v17  ;;  %v6996_v17 = vld [vmem:[%s7421_s18 + $0xa9] sm:$0x7f]  ;;  %v2311_v35 = vadd.f32 %v7998_v61, %v2276_v33 }
 0x183   : > { %3823 = vmatpush.msrb.mxu0 %v7789_v16  ;;  %v2339_v5 = vpop.f32.mrf.mxu2  ;;  %v2376_v20 = vpop.f32.mrf.mxu3  ;;  %v5346_v33 = vld [vmem:[#allocation2 + $0x26] sm:$0x7f] }
 0x184   : > { %v2345_v8 = vadd.f32 %v2339_v5, %v2310_v26  ;;  %v5193_v26 = vld [vmem:[#allocation2 + $0x23] sm:$0x7f] }
 0x186   : > { %v8069_v32 = vpop.f32.mrf.mxu1  ;;  %v2379_v48 = vadd.f32 %v2373_v11, %v2345_v8 }
 0x187   : > { %v2411_v10 = vpop.f32.mrf.mxu0 }
 0x188   : > { %6989 = vmatmul.msk.f32.gmra.mxu2 %vm260_vm0, %v6987_v28  ;;  %7013 = vmatmul.msk.f32.vlgmr.msra.gmra.mxu3 %vm260_vm0, %v7010_v31  ;;  %v2414_v41 = vadd.f32 %v2408_v55, %v2379_v48  ;;  %v5061_v55 = vsel %vm578_vm1, %v5034_v3, -inf }
 0x189   : > { %7042 = vmatmul.msk.f32.vlgmr.msra.gmra.mxu1 %vm260_vm0, %v8072_v19  ;;  %3927 = vmatpush.msra.mxu3 %v7794_v29  ;;  %v5344_v29 = vld [vmem:[#allocation2 + $0x6] sm:$0x7f] }
 0x18a   : > { %6999 = vmatmul.msk.f32.gmra.mxu0 %vm260_vm0, %v6996_v17  ;;  %4141 = vmatpush.msra.mxu1 %v7789_v16  ;;  %v5191_v16 = vld [vmem:[#allocation2 + $0x3] sm:$0x7f]  ;;  %v2449_v45 = vadd.f32 %v8011_v42, %v2414_v41  ;;  %v5359_v2 = vsel %vm578_vm1, %v5344_v29, -inf  ;;  %v5062_v17 = vrot.slane %v5061_v55, 4 }
 0x18b   : > { %v2342_v15 = vpop.f32.mrf.mxu2  ;;  %v2519_v14 = vpop.f32.mrf.mxu3  ;;  %v5206_v53 = vsel %vm578_vm1, %v5191_v16, -inf  ;;  %v5360_v11 = vrot.slane %v5359_v2, 4 }
 0x18c   : > { %v2346_v30 = vadd.f32 %v2342_v15, %v2311_v35  ;;  %v5207_v4 = vrot.slane %v5206_v53, 4  ;;  %v5035_v15 = vld [vmem:[#allocation2 + $0x30] sm:$0x7f]  ;;  %v5056_v35 = vmax.f32 %v5054_v62, %v5055_v23  ;;  %v5063_v29 = vmax.f32 %v5061_v55, %v5062_v17  ;;  %v7026_v62 = vld [vmem:[%s7421_s18 + $0xb9] sm:$0x7f] }
 0x18d   : > { %v7035_v55 = vld [vmem:[%s7421_s18 + $0x1b8] sm:$0x7f] }
 0x18e   : > { %v8085_v7 = vpop.f32.mrf.mxu1  ;;  %v2380_v61 = vadd.f32 %v2376_v20, %v2346_v30  ;;  %v5214_v20 = vrot.slane %v5213_v12, 4  ;;  %v5208_v8 = vmax.f32 %v5206_v53, %v5207_v4  ;;  %v5057_v47 = vrot.slane %v5056_v35, 2  ;;  %v7049_v4 = vld [vmem:[%s7421_s18 + $0x3b0] sm:$0xff] }
 0x18f   : > { %v8088_v43 = vpop.f32.mrf.mxu0  ;;  %v5194_v17 = vld [vmem:[#allocation2 + $0x33] sm:$0x7f] }
 0x190   : > { %7008 = vmatmul.msk.f32.vlgmr.msra.gmra.mxu2 %vm260_vm0, %v7005_v40  ;;  %7014 = vmatmul.msk.f32.gmra.mxu3 %vm260_vm0, %v7011_v18  ;;  %v2415_v42 = vadd.f32 %v2411_v10, %v2380_v61  ;;  %v5361_v10 = vmax.f32 %v5359_v2, %v5360_v11  ;;  %v7060_v18 = vld [vmem:[%s7421_s18 + $0xc8] sm:$0x7f]  ;;  %v5215_v30 = vmax.f32 %v5213_v12, %v5214_v20  ;;  %v5209_v44 = vrot.slane %v5208_v8, 2  ;;  %v8171_v20 = vld [vmem:[%s8826_s1] sm:$0xff] }
 0x191   : > { %7043 = vmatmul.msk.f32.gmra.mxu1 %vm260_vm0, %v7040_v27  ;;  %3892 = vmatpush.msra.mxu2 %v7814_v37  ;;  %v7301_v37 = vld [vmem:[%s8827_s2] ss:$0 sm:$0xff]  ;;  %v5368_v27 = vmax.f32 %v5366_v13, %v5367_v1  ;;  %v5068_v61 = vsel %vm578_vm1, %v5035_v15, -inf }
 0x192   : > { %7018 = vmatmul.msk.f32.vlgmr.msra.gmra.mxu0 %vm260_vm0, %v7015_v25  ;;  %v2525_v6 = vadd.f32 %v7301_v37, %v2519_v14  ;;  %v2450_v5 = vadd.f32 %v8026_v39, %v2415_v42  ;;  %v5050_v39 = vrot.slane %v5049_v22, 2  ;;  %v7031_v14 = vld [vmem:[%s7421_s18 + $0xb8] sm:$0x7f]  ;;  %v5362_v16 = vrot.slane %v5361_v10, 2  ;;  %v8163_v13 = vld [vmem:[%s7421_s18 + $0x1c0] sm:$0xff] }
 0x193   : > { %v2477_v51 = vpop.f32.mrf.mxu2  ;;  %v8098_v52 = vpop.f32.mrf.mxu3  ;;  %3961 = vmatpush.msra.mxu0 %v8119_v49  ;;  %v5369_v54 = vrot.slane %v5368_v27, 2  ;;  %v5069_v56 = vrot.slane %v5068_v61, 4  ;;  %v5210_v3 = vmax.f32 %v5208_v8, %v5209_v44 }
 0x194   : > { %v2483_v46 = vadd.f32 %v2477_v51, %v2449_v45  ;;  %v2559_v36 = vadd.f32 %v8088_v43, %v2525_v6  ;;  %v5051_v43 = vmax.f32 %v5049_v22, %v5050_v39  ;;  %v2526_v53 = vadd.f32 %v7301_v37, %v8098_v52 }
 0x195   : > { %v5058_v52 = vmax.f32 %v5056_v35, %v5057_v47  ;;  %v5370_v6 = vmax.f32 %v5368_v27, %v5369_v54  ;;  %v5211_v1 = vrot.slane %v5210_v3, 1  ;;  %v5195_v54 = vld [vmem:[#allocation2 + $0x43] sm:$0x7f] }
 0x196   : > { %2486 = vst.msk [vmem:[#allocation2 + $0x60] sm:$0xff] %vm260_vm0, %v2483_v46  ;;  %v8107_v58 = vpop.f32.mrf.mxu1  ;;  %v2593_v2 = vadd.f32 %v8042_v50, %v2559_v36  ;;  %v5052_v42 = vrot.slane %v5051_v43, 1  ;;  %v5036_v50 = vld [vmem:[#allocation2 + $0x40] sm:$0x7f] }
 0x197   : > { %v8112_v60 = vpop.f32.mrf.mxu0  ;;  %v5059_v39 = vrot.slane %v5058_v52, 1 }
 0x198   : > { %7009 = vmatmul.msk.f32.gmra.mxu2 %vm260_vm0, %v7006_v57  ;;  %7032 = vmatmul.msk.f32.vlgmr.msrb.gmra.mxu3 %vm260_vm0, %v7015_v25  ;;  %v5373_v25 = vsel %vm578_vm1, %v5346_v33, -inf  ;;  %v5064_v57 = vrot.slane %v5063_v29, 2  ;;  %v8180_v8 = vmax.f32 %v5051_v43, %v5052_v42  ;;  %v5075_v33 = vsel %vm578_vm1, %v5036_v50, -inf  ;;  %v7079_v42 = vld [vmem:[%s7421_s18 + $0x1c8] sm:$0x7f] }
 0x199   : > { %7062 = vmatmul.msk.f32.vlgmr.msrb.gmra.mxu1 %vm260_vm0, %v8110_v38  ;;  %4065 = vmatpush.msrb.mxu3 %v7837_v9  ;;  %v5220_v9 = vsel %vm578_vm1, %v5193_v26, -inf  ;;  %v5374_v51 = vrot.slane %v5373_v25, 4  ;;  %v5348_v50 = vld [vmem:[#allocation2 + $0x46] sm:$0x7f] }
 0x19a   : > { %7019 = vmatmul.msk.f32.gmra.mxu0 %vm260_vm0, %v7016_v59  ;;  %4279 = vmatpush.msrb.mxu1 %v8119_v49  ;;  %v5221_v45 = vrot.slane %v5220_v9, 4 }
 0x19b   : > { %v2480_v28 = vpop.f32.mrf.mxu2  ;;  %v8132_v31 = vpop.f32.mrf.mxu3  ;;  %v5375_v37 = vmax.f32 %v5373_v25, %v5374_v51  ;;  %v7044_v51 = vld [vmem:[%s7421_s18 + $0x2b0] sm:$0xff] }
 0x19c   : > { %v2484_v48 = vadd.f32 %v2480_v28, %v2450_v5  ;;  %v5222_v59 = vmax.f32 %v5220_v9, %v5221_v45  ;;  %v5070_v5 = vmax.f32 %v5068_v61, %v5069_v56  ;;  %v5065_v28 = vmax.f32 %v5063_v29, %v5064_v57 }
 0x19d   : > { %v5376_v15 = vrot.slane %v5375_v37, 2  ;;  %v5212_v29 = vmax.f32 %v5210_v3, %v5211_v1  ;;  %v5038_v47 = vld [vmem:[#allocation2 + $0x60] sm:$0x7f]  ;;  %v7054_v3 = vld [vmem:[%s7421_s18 + $0x2b1] sm:$0xff] }
 0x19e   : > { %2487 = vst.msk [vmem:[#allocation2 + $0x68] sm:$0x7f] %vm578_vm1, %v2484_v48  ;;  %v8139_v40 = vpop.f32.mrf.mxu1  ;;  %v5037_v48 = vld [vmem:[#allocation2 + $0x50] sm:$0x7f]  ;;  %v5066_v44 = vrot.slane %v5065_v28, 1 }
 0x19f   : > { %v8142_v41 = vpop.f32.mrf.mxu0 }
 0x1a0   : > { %7028 = vmatmul.msk.f32.vlgmr.msrb.gmra.mxu2 %vm260_vm0, %v8072_v19  ;;  %7033 = vmatmul.msk.f32.gmra.mxu3 %vm260_vm0, %v7031_v14  ;;  %v5216_v19 = vrot.slane %v5215_v30, 2  ;;  %v5347_v14 = vld [vmem:[#allocation2 + $0x36] sm:$0x7f] }
 0x1a1   : > { %7063 = vmatmul.msk.f32.gmra.mxu1 %vm260_vm0, %v7060_v18  ;;  %4031 = vmatpush.msrb.mxu2 %v7855_v63  ;;  %v2560_v63 = vadd.f32 %v8112_v60, %v2526_v53  ;;  %v8176_v60 = vld [vmem:[%s8826_s1 + $0x18] sm:$0xff]  ;;  %v5371_v18 = vrot.slane %v5370_v6, 1  ;;  %v5380_v45 = vsel %vm578_vm1, %v5347_v14, -inf }
 0x1a2   : > { %7037 = vmatmul.msk.f32.vlgmr.msrb.gmra.mxu0 %vm260_vm0, %v8045_v0  ;;  %v5363_v0 = vmax.f32 %v5361_v10, %v5362_v16  ;;  %v5217_v23 = vmax.f32 %v5215_v30, %v5216_v19  ;;  %v5223_v10 = vrot.slane %v5222_v59, 2  ;;  %v5071_v30 = vrot.slane %v5070_v5, 2  ;;  %v7050_v53 = vld [vmem:[%s7421_s18 + $0x3b8] sm:$0x7f] }
 0x1a3   : > { %v2622_v46 = vpop.f32.mrf.mxu2  ;;  %v8155_v34 = vpop.f32.mrf.mxu3  ;;  %v2594_v9 = vadd.f32 %v8056_v21, %v2560_v63  ;;  %4107 = vmatpush.msrb.mxu0 %v8171_v20  ;;  %v5076_v21 = vrot.slane %v5075_v33, 4  ;;  %v5082_v16 = vsel %vm578_vm1, %v5037_v48, -inf  ;;  %v8200_v19 = vmax.f32 %v5375_v37, %v5376_v15 }
 0x1a4   : > { %v2628_v11 = vadd.f32 %v2622_v46, %v2593_v2  ;;  %v5364_v26 = vrot.slane %v5363_v0, 1  ;;  %v5218_v36 = vrot.slane %v5217_v23, 1  ;;  %v8195_v43 = vmax.f32 %v5222_v59, %v5223_v10 }
 0x1a5   : > { %v5060_v2 = vmax.f32 %v5058_v52, %v5059_v39  ;;  %v8209_v59 = vmax.f32 %v5070_v5, %v5071_v30  ;;  %v5083_v63 = vrot.slane %v5082_v16, 4  ;;  %v5381_v52 = vrot.slane %v5380_v45, 4 }
 0x1a6   : > { %v8160_v12 = vpop.f32.mrf.mxu1  ;;  %v2663_v35 = vadd.f32 %v8132_v31, %v2628_v11  ;;  %v5227_v31 = vsel %vm578_vm1, %v5194_v17, -inf  ;;  %v5365_v61 = vmax.f32 %v5363_v0, %v5364_v26  ;;  %v5219_v0 = vmax.f32 %v5217_v23, %v5218_v36  ;;  %v5196_v26 = vld [vmem:[#allocation2 + $0x53] sm:$0x7f] }
 0x1a7   : > { %v8165_v22 = vpop.f32.mrf.mxu0  ;;  %v5372_v11 = vmax.f32 %v5370_v6, %v5371_v18  ;;  %v5077_v37 = vmax.f32 %v5075_v33, %v5076_v21  ;;  %v5225_v1 = vrot.slane %v8195_v43, 1  ;;  %v5234_v23 = vsel %vm578_vm1, %v5195_v54, -inf  ;;  %v5349_v18 = vld [vmem:[#allocation2 + $0x56] sm:$0x7f]  ;;  %v7098_v21 = vld [vmem:[%s7421_s18 + $0x2c1] sm:$0xff] }
 0x1a8   : > { %7029 = vmatmul.msk.f32.gmra.mxu2 %vm260_vm0, %v7026_v62  ;;  %7052 = vmatmul.msk.f32.vlgmr.msra.gmra.mxu3 %vm260_vm0, %v7049_v4  ;;  %v2697_v56 = vadd.f32 %v8142_v41, %v2663_v35  ;;  %v5228_v4 = vrot.slane %v5227_v31, 4  ;;  %v5067_v41 = vmax.f32 %v5065_v28, %v5066_v44  ;;  %v5378_v6 = vrot.slane %v8200_v19, 1  ;;  %v7045_v44 = vld [vmem:[%s7421_s18 + $0x2b8] sm:$0x7f] }
 0x1a9   : > { %7081 = vmatmul.msk.f32.vlgmr.msra.gmra.mxu1 %vm260_vm0, %v8163_v13  ;;  %4210 = vmatpush.msra.mxu3 %v8176_v60  ;;  %v5387_v5 = vsel %vm578_vm1, %v5348_v50, -inf  ;;  %v5073_v28 = vrot.slane %v8209_v59, 1  ;;  %v5084_v48 = vmax.f32 %v5082_v16, %v5083_v63  ;;  %v5382_v35 = vmax.f32 %v5380_v45, %v5381_v52  ;;  %v7055_v54 = vld [vmem:[%s7421_s18 + $0x2b9] sm:$0x7f] }
 0x1aa   : > { %7038 = vmatmul.msk.f32.gmra.mxu0 %vm260_vm0, %v7035_v55  ;;  %4425 = vmatpush.msra.mxu1 %v8171_v20  ;;  %v5089_v55 = vsel %vm578_vm1, %v5038_v47, -inf  ;;  %v2732_v17 = vadd.f32 %v8069_v32, %v2697_v56  ;;  %v5229_v33 = vmax.f32 %v5227_v31, %v5228_v4  ;;  %v5235_v36 = vrot.slane %v5234_v23, 4  ;;  %v8232_v31 = vld [vmem:[%s7421_s18 + $0xc1] sm:$0xff] }
 0x1ab   : > { %v2625_v27 = vpop.f32.mrf.mxu2  ;;  %v8190_v25 = vpop.f32.mrf.mxu3  ;;  %v5090_v39 = vrot.slane %v5089_v55, 4  ;;  %v5326_v32 = vsel %vm5167_vm2, %v5219_v0, %v5212_v29  ;;  %v5388_v30 = vrot.slane %v5387_v5, 4  ;;  %v8236_v16 = vsel %vm5167_vm2, %v5372_v11, %v5365_v61  ;;  %v5197_v47 = vld [vmem:[#allocation2 + $0x63] sm:$0x7f] }
 0x1ac   : > { %v2629_v46 = vadd.f32 %v2625_v27, %v2594_v9  ;;  %v5078_v9 = vrot.slane %v5077_v37, 2  ;;  %v5241_v27 = vsel %vm578_vm1, %v5196_v26, -inf  ;;  %v5230_v56 = vrot.slane %v5229_v33, 2  ;;  %v8250_v61 = vld [vmem:[%s8826_s1 + $0x20] sm:$0xff] }
 0x1ad   : > { %v5383_v0 = vrot.slane %v5382_v35, 2  ;;  %v5236_v50 = vmax.f32 %v5234_v23, %v5235_v36  ;;  %v5242_v63 = vrot.slane %v5241_v27, 4  ;;  %v5248_v11 = vsel %vm578_vm1, %v5197_v47, -inf }
 0x1ae   : > { %v8203_v57 = vpop.f32.mrf.mxu1  ;;  %v2664_v10 = vadd.f32 %v8155_v34, %v2629_v46  ;;  %v5085_v46 = vrot.slane %v5084_v48, 2  ;;  %v5079_v4 = vmax.f32 %v5077_v37, %v5078_v9  ;;  %v5389_v37 = vmax.f32 %v5387_v5, %v5388_v30 }
 0x1af   : > { %v8206_v62 = vpop.f32.mrf.mxu0  ;;  %v5074_v23 = vmax.f32 %v8209_v59, %v5073_v28  ;;  %v5231_v26 = vmax.f32 %v5229_v33, %v5230_v56  ;;  %v7070_v59 = vld [vmem:[%s7421_s18 + $0xc9] sm:$0x7f] }
 0x1b0   : > { %7047 = vmatmul.msk.f32.vlgmr.msra.gmra.mxu2 %vm260_vm0, %v7044_v51  ;;  %7053 = vmatmul.msk.f32.gmra.mxu3 %vm260_vm0, %v7050_v53  ;;  %v5350_v51 = vld [vmem:[#allocation2 + $0x66] sm:$0x7f]  ;;  %v2698_v53 = vadd.f32 %v8165_v22, %v2664_v10  ;;  %v8255_v22 = vld [vmem:[%s8826_s1 + $0x38] sm:$0xff]  ;;  %v5086_v10 = vmax.f32 %v5084_v48, %v5085_v46  ;;  %v5080_v36 = vrot.slane %v5079_v4, 1  ;;  %v5390_v28 = vrot.slane %v5389_v37, 2 }
 0x1b1   : > { %7082 = vmatmul.msk.f32.gmra.mxu1 %vm260_vm0, %v7079_v42  ;;  %4175 = vmatpush.msra.mxu2 %v7888_v24  ;;  %v5168_v24 = vsel %vm5167_vm2, %v5060_v2, %v8180_v8  ;;  %v5394_v42 = vsel %vm578_vm1, %v5349_v18, -inf  ;;  %v5401_v52 = vsel %vm578_vm1, %v5350_v51, -inf  ;;  %v5237_v18 = vrot.slane %v5236_v50, 2 }
 0x1b2   : > { %7057 = vmatmul.msk.f32.vlgmr.msra.gmra.mxu0 %vm260_vm0, %v7054_v3  ;;  %v5170_v45 = vsel %vm5169_vm3, %v5067_v41, %v5168_v24  ;;  %v5091_v3 = vmax.f32 %v5089_v55, %v5090_v39  ;;  %v5395_v55 = vrot.slane %v5394_v42, 4  ;;  %v8272_v41 = vld [vmem:[%s8827_s2] ss:$0 sm:$0xff]  ;;  %v5249_v39 = vrot.slane %v5248_v11, 4 }
 0x1b3   : > { %v2761_v15 = vpop.f32.mrf.mxu2  ;;  %v8224_v14 = vpop.f32.mrf.mxu3  ;;  %4245 = vmatpush.msra.mxu0 %v8250_v61  ;;  %v2843_v48 = vadd.f32 %v8272_v41, %v8206_v62  ;;  %v5087_v47 = vrot.slane %v5086_v10, 1  ;;  %v8304_v56 = vmax.f32 %v5236_v50, %v5237_v18 }
 0x1b4   : > { %v2767_v34 = vadd.f32 %v2761_v15, %v2732_v17  ;;  %v5384_v17 = vmax.f32 %v5382_v35, %v5383_v0  ;;  %v5402_v15 = vrot.slane %v5401_v52, 4  ;;  %v5396_v33 = vmax.f32 %v5394_v42, %v5395_v55  ;;  %v7099_v35 = vld [vmem:[%s7421_s18 + $0x2c9] sm:$0x7f] }
 0x1b5   : > { %v5250_v62 = vmax.f32 %v5248_v11, %v5249_v39  ;;  %v2877_v0 = vadd.f32 %v8107_v58, %v2843_v48 }
 0x1b6   : > { %v2801_v8 = vadd.f32 %v8190_v25, %v2767_v34  ;;  %v8241_v2 = vpop.f32.mrf.mxu1  ;;  %v5226_v25 = vmax.f32 %v8195_v43, %v5225_v1  ;;  %v8267_v43 = vmax.f32 %v8200_v19, %v5378_v6  ;;  %v2733_v1 = vadd.f32 %v8085_v7, %v2698_v53 }
 0x1b7   : > { %v8243_v29 = vpop.f32.mrf.mxu0  ;;  %v5092_v19 = vrot.slane %v5091_v3, 2  ;;  %v5243_v34 = vmax.f32 %v5241_v27, %v5242_v63  ;;  %v8297_v27 = vld [vmem:[%s8826_s1 + $0x30] sm:$0xff] }
 0x1b8   : > { %2804 = vst.msk [vmem:[#allocation2 + $0x70] sm:$0xff] %vm260_vm0, %v2801_v8  ;;  %7048 = vmatmul.msk.f32.gmra.mxu2 %vm260_vm0, %v7045_v44  ;;  %7072 = vmatmul.msk.f32.vlgmr.msrb.gmra.mxu3 %vm260_vm0, %v8232_v31  ;;  %v8282_v9 = vsel %vm5169_vm3, %v5226_v25, %v5326_v32  ;;  %v5232_v32 = vrot.slane %v5231_v26, 1  ;;  %v5385_v8 = vrot.slane %v5384_v17, 1  ;;  %v5397_v25 = vrot.slane %v5396_v33, 2 }
 0x1b9   : > { %7101 = vmatmul.msk.f32.vlgmr.msrb.gmra.mxu1 %vm260_vm0, %v7098_v21  ;;  %4349 = vmatpush.msrb.mxu3 %v8255_v22  ;;  %v5172_v21 = vsel %vm5171_vm4, %v5074_v23, %v5170_v45  ;;  %v5093_v51 = vmax.f32 %v5091_v3, %v5092_v19  ;;  %v5081_v45 = vmax.f32 %v5079_v4, %v5080_v36  ;;  %v5244_v46 = vrot.slane %v5243_v34, 2  ;;  %v7088_v19 = vld [vmem:[%s7421_s18 + $0x2c0] sm:$0xff]  ;;  %v8331_v36 = vld [vmem:[%s7421_s18 + $0xd0] sm:$0xff] }
 0x1ba   : > { %7058 = vmatmul.msk.f32.gmra.mxu0 %vm260_vm0, %v7055_v54  ;;  %4563 = vmatpush.msrb.mxu1 %v8250_v61  ;;  %v5403_v54 = vmax.f32 %v5401_v52, %v5402_v15  ;;  %v8309_v3 = vmax.f32 %v5389_v37, %v5390_v28  ;;  %v5088_v4 = vmax.f32 %v5086_v10, %v5087_v47  ;;  %v5251_v37 = vrot.slane %v5250_v62, 2  ;;  %v7065_v10 = vld [vmem:[%s7421_s18 + $0x1c8] sm:$0x7f]  ;;  %v8349_v47 = vld [vmem:[%s8826_s1 + $0x10] sm:$0xff] }
 0x1bb   : > { %v2764_v6 = vpop.f32.mrf.mxu2  ;;  %v8278_v5 = vpop.f32.mrf.mxu3  ;;  %v5094_v50 = vrot.slane %v5093_v51, 1  ;;  %v5174_v58 = vsel %vm5173_vm5, %v5081_v45, %v5172_v21  ;;  %v8321_v23 = vmax.f32 %v5243_v34, %v5244_v46  ;;  %v5398_v39 = vmax.f32 %v5396_v33, %v5397_v25  ;;  %v8340_v33 = vld [vmem:[%s8826_s1 + $0x40] sm:$0xff] }
 0x1bc   : > { %v2768_v7 = vadd.f32 %v2764_v6, %v2733_v1  ;;  %v5404_v55 = vrot.slane %v5403_v54, 2  ;;  %v5239_v1 = vrot.slane %v8304_v56, 1  ;;  %v5392_v6 = vrot.slane %v8309_v3, 1 }
 0x1bd   : > { %v5176_v34 = vsel %vm5175_vm6, %v5088_v4, %v5174_v58  ;;  %v5095_v28 = vmax.f32 %v5093_v51, %v5094_v50  ;;  %v5246_v51 = vrot.slane %v8321_v23, 1  ;;  %v7089_v58 = vld [vmem:[%s7421_s18 + $0x2c8] sm:$0x7f] }
 0x1be   : > { %v2802_v24 = vadd.f32 %v8224_v14, %v2768_v7  ;;  %v8288_v30 = vpop.f32.mrf.mxu1 }
 0x1bf   : > { %v8291_v44 = vpop.f32.mrf.mxu0  ;;  %v5039_v53 = vld [vmem:[#allocation2 + $0x70] sm:$0x7f]  ;;  %v5178_v46 = vsel %vm5177_vm7, %v5095_v28, %v5176_v34  ;;  %v7093_v34 = vld [vmem:[%s7421_s18 + $0x3c0] sm:$0xff]  ;;  %v5247_v28 = vmax.f32 %v8321_v23, %v5246_v51 }
 0x1c0   : > { %v5096_v14 = vsel %vm578_vm1, %v5039_v53, -inf  ;;  %2805 = vst.msk [vmem:[#allocation2 + $0x78] sm:$0x7f] %vm578_vm1, %v2802_v24  ;;  %7067 = vmatmul.msk.f32.vlgmr.msrb.gmra.mxu2 %vm260_vm0, %v8163_v13  ;;  %7073 = vmatmul.msk.f32.gmra.mxu3 %vm260_vm0, %v7070_v59  ;;  %v8313_v13 = vmax.f32 %v5231_v26, %v5232_v32  ;;  %v7075_v59 = vld [vmem:[%s7421_s18 + $0xc8] sm:$0x7f] }
 0x1c1   : > { %v5097_v42 = vrot.slane %v5096_v14, 4  ;;  %7102 = vmatmul.msk.f32.gmra.mxu1 %vm260_vm0, %v7099_v35  ;;  %4314 = vmatpush.msrb.mxu2 %v8297_v27 }
 0x1c2   : > { %7076 = vmatmul.msk.f32.vlgmr.msrb.gmra.mxu0 %vm260_vm0, %v8110_v38  ;;  %v8317_v38 = vmax.f32 %v5384_v17, %v5385_v8  ;;  %v2844_v17 = vadd.f32 %v8272_v41, %v8243_v29  ;;  %v5252_v29 = vmax.f32 %v5250_v62, %v5251_v37  ;;  %v5405_v41 = vmax.f32 %v5403_v54, %v5404_v55 }
 0x1c3   : > { %v5098_v63 = vmax.f32 %v5096_v14, %v5097_v42  ;;  %v2905_v11 = vpop.f32.mrf.mxu2  ;;  %v8315_v52 = vpop.f32.mrf.mxu3  ;;  %v5399_v62 = vrot.slane %v5398_v39, 1  ;;  %4383 = vmatpush.msrb.mxu0 %v8340_v33 }
 0x1c4   : > { %v2911_v15 = vadd.f32 %v2905_v11, %v2877_v0  ;;  %v2878_v45 = vadd.f32 %v8139_v40, %v2844_v17  ;;  %v5406_v11 = vrot.slane %v5405_v41, 1  ;;  %v5240_v40 = vmax.f32 %v8304_v56, %v5239_v1  ;;  %v7119_v1 = vld [vmem:[%s7421_s18 + $0xd8] sm:$0x7f] }
 0x1c5   : > { %v5099_v26 = vrot.slane %v5098_v63, 2 }
 0x1c6   : > { %v8328_v7 = vpop.f32.mrf.mxu1  ;;  %v2946_v54 = vadd.f32 %v8278_v5, %v2911_v15 }
 0x1c7   : > { %v8333_v18 = vpop.f32.mrf.mxu0  ;;  %v5100_v48 = vmax.f32 %v5098_v63, %v5099_v26  ;;  %v5198_v24 = vld [vmem:[#allocation2 + $0x73] sm:$0x7f]  ;;  %v5253_v63 = vrot.slane %v5252_v29, 1  ;;  %v7323_v26 = vmov 0.0  }
 0x1c8   : > { %v5351_v35 = vld [vmem:[#allocation2 + $0x76] sm:$0x7f]  ;;  %v5255_v21 = vsel %vm578_vm1, %v5198_v24, -inf  ;;  %7068 = vmatmul.msk.f32.gmra.mxu2 %vm260_vm0, %v7065_v10  ;;  %7091 = vmatmul.msk.f32.vlgmr.msra.gmra.mxu3 %vm260_vm0, %v7088_v19  ;;  %5499 = vst.msk [vmem:[#allocation4 + $0x8] sm:$0x1f] %vm5497_vm9, %v7323_v26  ;;  %v5480_v10 = vsel %vm5169_vm3, %v8267_v43, %v8236_v16  ;;  %v5393_v19 = vmax.f32 %v8309_v3, %v5392_v6  ;;  %v8379_v16 = vld [vmem:[%s8826_s1 + $0x8] sm:$0xff] }
 0x1c9   : > { %v5408_v32 = vsel %vm578_vm1, %v5351_v35, -inf  ;;  %v5101_v53 = vrot.slane %v5100_v48, 1  ;;  %v5256_v8 = vrot.slane %v5255_v21, 4  ;;  %7120 = vmatmul.msk.f32.vlgmr.msra.gmra.mxu1 %vm260_vm0, %v8331_v36  ;;  %4493 = vmatpush.msra.mxu3 %v8349_v47  ;;  %v2981_v17 = vadd.f32 %v8291_v44, %v2946_v54  ;;  %5498 = vst.msk [vmem:[#allocation4] sm:$0x1f] %vm5497_vm9, %v7323_v26 }
 0x1ca   : > { %v5409_v14 = vrot.slane %v5408_v32, 4  ;;  %7077 = vmatmul.msk.f32.gmra.mxu0 %vm260_vm0, %v7075_v59  ;;  %4701 = vmatpush.msra.mxu1 %v8340_v33  ;;  %v5328_v43 = vsel %vm5171_vm4, %v8313_v13, %v8282_v9  ;;  %v5254_v44 = vmax.f32 %v5252_v29, %v5253_v63  ;;  %v5407_v3 = vmax.f32 %v5405_v41, %v5406_v11  ;;  %v7084_v54 = vld [vmem:[%s7421_s18 + $0xc9] sm:$0x7f] }
 0x1cb   : > { %v5102_v42 = vmax.f32 %v5100_v48, %v5101_v53  ;;  %v5257_v25 = vmax.f32 %v5255_v21, %v5256_v8  ;;  %v2908_v4 = vpop.f32.mrf.mxu2  ;;  %v3079_v50 = vpop.f32.mrf.mxu3  ;;  %v5400_v48 = vmax.f32 %v5398_v39, %v5399_v62  ;;  %v5481_v23 = vsel %vm5171_vm4, %v8317_v38, %v5480_v10  ;;  %5500 = vst.msk [vmem:[#allocation4 + $0x10] sm:$0x1f] %vm5497_vm9, %v7323_v26  ;;  %v7094_v11 = vld [vmem:[%s7421_s18 + $0x3c8] sm:$0x7f] }
 0x1cc   : > { %v5410_v0 = vmax.f32 %v5408_v32, %v5409_v14  ;;  %v2912_v15 = vadd.f32 %v2908_v4, %v2878_v45  ;;  %v5329_v6 = vsel %vm5173_vm5, %v5240_v40, %v5328_v43  ;;  %v5482_v9 = vsel %vm5173_vm5, %v5393_v19, %v5481_v23  ;;  %5501 = vst.msk [vmem:[#allocation4 + $0x18] sm:$0x1f] %vm5497_vm9, %v7323_v26  ;;  %v8409_v45 = vld [vmem:[%s7421_s18 + $0x1d0] sm:$0xff]  ;;  %v7109_v19 = vld [vmem:[%s7421_s18 + $0x1d8] sm:$0x7f] }
 0x1cd   : > { %v5180_v5 = vsel %vm5179_vm8, %v5102_v42, %v5178_v46  ;;  %v5258_v37 = vrot.slane %v5257_v25, 2  ;;  %v5330_v38 = vsel %vm5175_vm6, %v5247_v28, %v5329_v6  ;;  %v5483_v29 = vsel %vm5175_vm6, %v5400_v48, %v5482_v9  ;;  %5502 = vst.msk [vmem:[#allocation4 + $0x20] sm:$0x1f] %vm5497_vm9, %v7323_v26  ;;  %v7137_v4 = vld [vmem:[%s7421_s18 + $0x3d0] sm:$0xff]  ;;  %v7303_v26 = vld [vmem:[%s8827_s2] ss:$0 sm:$0xff] }
 0x1ce   : > { %v5411_v55 = vrot.slane %v5410_v0, 2  ;;  %5189 = vst.msk [vmem:[#allocation3] sm:$0xff] %vm260_vm0, %v5180_v5  ;;  %v8371_v56 = vpop.f32.mrf.mxu1  ;;  %v2947_v13 = vadd.f32 %v8315_v52, %v2912_v15  ;;  %v5484_v52 = vsel %vm5177_vm7, %v5407_v3, %v5483_v29  ;;  %v3161_v6 = vadd.f32 %v7303_v26, %v8241_v2 }
 0x1cf   : > { %v3113_v59 = vpop.f32.mrf.mxu0  ;;  %v5259_v24 = vmax.f32 %v5257_v25, %v5258_v37 }
 0x1d0   : > { %v5412_v35 = vmax.f32 %v5410_v0, %v5411_v55  ;;  %7086 = vmatmul.msk.f32.vlgmr.msra.gmra.mxu2 %vm260_vm0, %v8232_v31  ;;  %7092 = vmatmul.msk.f32.gmra.mxu3 %vm260_vm0, %v7089_v58  ;;  %v3015_v31 = vadd.f32 %v8160_v12, %v2981_v17  ;;  %v5331_v12 = vsel %vm5177_vm7, %v5254_v44, %v5330_v38 }
 0x1d1   : > { %v5260_v39 = vrot.slane %v5259_v24, 1  ;;  %7121 = vmatmul.msk.f32.gmra.mxu1 %vm260_vm0, %v7119_v1  ;;  %4459 = vmatpush.msra.mxu2 %v8379_v16  ;;  %v2982_v42 = vadd.f32 %v8333_v18, %v2947_v13 }
 0x1d2   : > { %v5413_v21 = vrot.slane %v5412_v35, 1  ;;  %7096 = vmatmul.msk.f32.vlgmr.msra.gmra.mxu0 %vm260_vm0, %v7093_v34  ;;  %v7138_v34 = vld [vmem:[%s7421_s18 + $0x3d8] sm:$0x7f] }
 0x1d3   : > { %4528 = vmatpush.msra.mxu0 %v8176_v60  ;;  %v5261_v41 = vmax.f32 %v5259_v24, %v5260_v39  ;;  %v3044_v51 = vpop.f32.mrf.mxu2  ;;  %v3082_v53 = vpop.f32.mrf.mxu3 }
 0x1d4   : > { %v5414_v32 = vmax.f32 %v5412_v35, %v5413_v21  ;;  %v3050_v8 = vadd.f32 %v3044_v51, %v3015_v31  ;;  %v7104_v31 = vld [vmem:[%s7421_s18 + $0xd8] sm:$0x7f]  ;;  %v8451_v51 = vld [vmem:[%s7421_s18 + $0xe1] sm:$0xff] }
 0x1d5   : > { %v5332_v14 = vsel %vm5179_vm8, %v5261_v41, %v5331_v12  ;;  %v5503_v46 = vld [vmem:[#allocation3] sm:$0x7f] }
 0x1d6   : > { %v5485_v62 = vsel %vm5179_vm8, %v5414_v32, %v5484_v52  ;;  %5342 = vst.msk [vmem:[#allocation3 + $0x10] sm:$0xff] %vm260_vm0, %v5332_v14  ;;  %v3085_v25 = vadd.f32 %v3079_v50, %v3050_v8  ;;  %v8413_v0 = vpop.f32.mrf.mxu1  ;;  %v5506_v40 = vsel %vm578_vm1, %v5503_v46, -inf  ;;  %v3016_v50 = vadd.f32 %v8203_v57, %v2982_v42  ;;  %v7113_v57 = vld [vmem:[%s7421_s18 + $0xd1] sm:$0xff] }
 0x1d7   : > { %v3116_v63 = vpop.f32.mrf.mxu0  ;;  %5495 = vst.msk [vmem:[#allocation3 + $0x20] sm:$0xff] %vm260_vm0, %v5485_v62  ;;  %v5507_v5 = vrot.slane %v5506_v40, 4 }
 0x1d8   : > { %v3119_v37 = vadd.f32 %v3113_v59, %v3085_v25  ;;  %7087 = vmatmul.msk.f32.gmra.mxu2 %vm260_vm0, %v7084_v54  ;;  %7111 = vmatmul.msk.f32.vlgmr.msrb.gmra.mxu3 %vm260_vm0, %v8409_v45  ;;  %v3162_v54 = vadd.f32 %v7303_v26, %v8288_v30  ;;  %v7158_v30 = vld [vmem:[%s7421_s18 + $0xe9] sm:$0x7f] }
 0x1d9   : > { %7140 = vmatmul.msk.f32.vlgmr.msrb.gmra.mxu1 %vm260_vm0, %v7137_v4  ;;  %v5508_v18 = vmax.f32 %v5506_v40, %v5507_v5  ;;  %4632 = vmatpush.msrb.mxu3 %v8297_v27  ;;  %v7128_v40 = vld [vmem:[%s7421_s18 + $0xd9] sm:$0x7f] }
 0x1da   : > { %7097 = vmatmul.msk.f32.gmra.mxu0 %vm260_vm0, %v7094_v11  ;;  %3122 = vst.msk [vmem:[#allocation2 + $0x80] sm:$0xff] %vm260_vm0, %v3119_v37  ;;  %4846 = vmatpush.msrb.mxu1 %v8176_v60 }
 0x1db   : > { %v3047_v55 = vpop.f32.mrf.mxu2  ;;  %v3223_v58 = vpop.f32.mrf.mxu3  ;;  %v5509_v15 = vrot.slane %v5508_v18, 2 }
 0x1dc   : > { %v3051_v10 = vadd.f32 %v3047_v55, %v3016_v50 }
 0x1dd   : > { %v5504_v17 = vld [vmem:[#allocation3 + $0x10] sm:$0x7f]  ;;  %v5510_v3 = vmax.f32 %v5508_v18, %v5509_v15 }
 0x1de   : > { %v3086_v1 = vadd.f32 %v3082_v53, %v3051_v10  ;;  %v8432_v59 = vpop.f32.mrf.mxu1  ;;  %v5505_v48 = vld [vmem:[#allocation3 + $0x20] sm:$0x7f]  ;;  %v5513_v24 = vsel %vm578_vm1, %v5504_v17, -inf  ;;  %v7114_v53 = vld [vmem:[%s7421_s18 + $0xd9] sm:$0x7f]  ;;  %v7147_v17 = vld [vmem:[%s7421_s18 + $0xe0] sm:$0xff] }
 0x1df   : > { %v3258_v28 = vpop.f32.mrf.mxu0  ;;  %v5514_v60 = vrot.slane %v5513_v24, 4  ;;  %v5520_v35 = vsel %vm578_vm1, %v5505_v48, -inf  ;;  %v5511_v38 = vrot.slane %v5510_v3, 1 }
 0x1e0   : > { %v3120_v43 = vadd.f32 %v3116_v63, %v3086_v1  ;;  %7106 = vmatmul.msk.f32.vlgmr.msrb.gmra.mxu2 %vm260_vm0, %v8331_v36  ;;  %7112 = vmatmul.msk.f32.gmra.mxu3 %vm260_vm0, %v7109_v19  ;;  %v5521_v44 = vrot.slane %v5520_v35, 4  ;;  %v7123_v19 = vld [vmem:[%s7421_s18 + $0x1d8] sm:$0x7f]  ;;  %v7176_v1 = vld [vmem:[%s7421_s18 + $0x2e0] sm:$0xff] }
 0x1e1   : > { %7141 = vmatmul.msk.f32.gmra.mxu1 %vm260_vm0, %v7138_v34  ;;  %v5515_v23 = vmax.f32 %v5513_v24, %v5514_v60  ;;  %4597 = vmatpush.msrb.mxu2 %v8119_v49  ;;  %v5512_v14 = vmax.f32 %v5510_v3, %v5511_v38 }
 0x1e2   : > { %7116 = vmatmul.msk.f32.vlgmr.msrb.gmra.mxu0 %vm260_vm0, %v7113_v57  ;;  %3123 = vst.msk [vmem:[#allocation2 + $0x88] sm:$0x7f] %vm578_vm1, %v3120_v43  ;;  %v5522_v36 = vmax.f32 %v5520_v35, %v5521_v44  ;;  %v7142_v43 = vld [vmem:[%s7421_s18 + $0x2d1] sm:$0xff]  ;;  %v7148_v44 = vld [vmem:[%s7421_s18 + $0xe8] sm:$0x7f] }
 0x1e3   : > { %4667 = vmatpush.msrb.mxu0 %v8255_v22  ;;  %v3189_v39 = vpop.f32.mrf.mxu2  ;;  %v3226_v21 = vpop.f32.mrf.mxu3  ;;  %v5516_v9 = vrot.slane %v5515_v23, 2 }
 0x1e4   : > { %v5523_v13 = vrot.slane %v5522_v36, 2  ;;  %v3195_v41 = vadd.f32 %v3189_v39, %v3161_v6 }
 0x1e5   : > { %v5517_v29 = vmax.f32 %v5515_v23, %v5516_v9  ;;  %v7177_v23 = vld [vmem:[%s7421_s18 + $0x2e8] sm:$0x7f]  ;;  %v7304_v9 = vld [vmem:[%s8827_s2] ss:$0 sm:$0xff] }
 0x1e6   : > { %v8448_v32 = vpop.f32.mrf.mxu1  ;;  %v5524_v12 = vmax.f32 %v5522_v36, %v5523_v13  ;;  %v3229_v46 = vadd.f32 %v3223_v58, %v3195_v41  ;;  %v7143_v13 = vld [vmem:[%s7421_s18 + $0x2d9] sm:$0x7f] }
 0x1e7   : > { %v3261_v2 = vpop.f32.mrf.mxu0  ;;  %v5518_v52 = vrot.slane %v5517_v29, 1 }
 0x1e8   : > { %7107 = vmatmul.msk.f32.gmra.mxu2 %vm260_vm0, %v7104_v31  ;;  %7130 = vmatmul.msk.f32.vlgmr.msra.gmra.mxu3 %vm260_vm0, %v7113_v57  ;;  %v5525_v8 = vrot.slane %v5524_v12, 1  ;;  %v3264_v5 = vadd.f32 %v3258_v28, %v3229_v46  ;;  %v7133_v28 = vld [vmem:[%s7421_s18 + $0x2d8] sm:$0x7f]  ;;  %v7196_v31 = vld [vmem:[%s7421_s18 + $0x1f0] sm:$0xff] }
 0x1e9   : > { %7160 = vmatmul.msk.f32.vlgmr.msra.gmra.mxu1 %vm260_vm0, %v8451_v51  ;;  %v5519_v62 = vmax.f32 %v5517_v29, %v5518_v52  ;;  %4777 = vmatpush.msra.mxu3 %v8379_v16  ;;  %v7132_v16 = vld [vmem:[%s7421_s18 + $0x2d0] sm:$0xff]  ;;  %v7211_v57 = vld [vmem:[%s8828_s3 + $0x18] sm:$0xff] }
 0x1ea   : > { %7117 = vmatmul.msk.f32.gmra.mxu0 %vm260_vm0, %v7114_v53  ;;  %4985 = vmatpush.msra.mxu1 %v8255_v22  ;;  %v5526_v42 = vmax.f32 %v5524_v12, %v5525_v8  ;;  %v3299_v55 = vadd.f32 %v8328_v7, %v3264_v5  ;;  %v7167_v53 = vld [vmem:[%s7421_s18 + $0x1e8] sm:$0x7f]  ;;  %v7197_v52 = vld [vmem:[%s7421_s18 + $0x1f8] sm:$0x7f] }
 0x1eb   : > { %v3192_v25 = vpop.f32.mrf.mxu2  ;;  %v3362_v4 = vpop.f32.mrf.mxu3  ;;  %v5530_v63 = vsel %vm5167_vm2, %v5519_v62, %v5512_v14  ;;  %v7172_v5 = vld [vmem:[%s7421_s18 + $0xe9] sm:$0x7f] }
 0x1ec   : > { %v5531_v11 = vsel %vm5169_vm3, %v5526_v42, %v5530_v63  ;;  %v3196_v37 = vadd.f32 %v3192_v25, %v3162_v54  ;;  %v7186_v63 = vld [vmem:[%s7421_s18 + $0x2e1] sm:$0xff] }
 0x1ed   : > { %5535 = vst.msk [vmem:[#allocation4 + $0x9] sm:$0x7] %vm5534_vm10, %v5531_v11 }
 0x1ee   : > { %v8468_v50 = vpop.f32.mrf.mxu1  ;;  %v3230_v22 = vadd.f32 %v3226_v21, %v3196_v37  ;;  %v8542_v37 = vld [vmem:[%s8828_s3 + $0x8] sm:$0xff] }
 0x1ef   : > { %v3397_v18 = vpop.f32.mrf.mxu0 }
 0x1f0   : > { %7125 = vmatmul.msk.f32.vlgmr.msra.gmra.mxu2 %vm260_vm0, %v8409_v45  ;;  %7131 = vmatmul.msk.f32.gmra.mxu3 %vm260_vm0, %v7128_v40  ;;  %v3265_v45 = vadd.f32 %v3261_v2, %v3230_v22 }
 0x1f1   : > { %7161 = vmatmul.msk.f32.gmra.mxu1 %vm260_vm0, %v7158_v30  ;;  %4743 = vmatpush.msra.mxu2 %v8171_v20 }
 0x1f2   : > { %7135 = vmatmul.msk.f32.vlgmr.msra.gmra.mxu0 %vm260_vm0, %v7132_v16  ;;  %v3300_v48 = vadd.f32 %v8371_v56, %v3265_v45  ;;  %v7191_v45 = vld [vmem:[%s7421_s18 + $0xf0] sm:$0xff] }
 0x1f3   : > { %4811 = vmatpush.msra.mxu0 %v8349_v47  ;;  %v3327_v58 = vpop.f32.mrf.mxu2  ;;  %v3365_v26 = vpop.f32.mrf.mxu3 }
 0x1f4   : > { %v3333_v10 = vadd.f32 %v3327_v58, %v3299_v55  ;;  %v7181_v58 = vld [vmem:[%s7421_s18 + $0x3e0] sm:$0xff] }
 0x1f6   : > { %v3368_v15 = vadd.f32 %v3362_v4, %v3333_v10  ;;  %v8490_v47 = vpop.f32.mrf.mxu1  ;;  %v7163_v4 = vld [vmem:[%s7421_s18 + $0xe8] sm:$0x7f] }
 0x1f7   : > { %v3400_v34 = vpop.f32.mrf.mxu0 }
 0x1f8   : > { %v3403_v7 = vadd.f32 %v3397_v18, %v3368_v15  ;;  %7126 = vmatmul.msk.f32.gmra.mxu2 %vm260_vm0, %v7123_v19  ;;  %7150 = vmatmul.msk.f32.vlgmr.msrb.gmra.mxu3 %vm260_vm0, %v7147_v17  ;;  %v8564_v15 = vld [vmem:[%s8828_s3 + $0x20] sm:$0xff] }
 0x1f9   : > { %7179 = vmatmul.msk.f32.vlgmr.msrb.gmra.mxu1 %vm260_vm0, %v7176_v1  ;;  %4915 = vmatpush.msrb.mxu3 %v8119_v49 }
 0x1fa   : > { %7136 = vmatmul.msk.f32.gmra.mxu0 %vm260_vm0, %v7133_v28  ;;  %v3437_v20 = vadd.f32 %v8413_v0, %v3403_v7  ;;  %5706 = vmatpush.msrb.mxu1 %v7211_v57  ;;  %v7152_v0 = vld [vmem:[%s7421_s18 + $0x1e0] sm:$0xff] }
 0x1fb   : > { %v3330_v24 = vpop.f32.mrf.mxu2  ;;  %v3507_v60 = vpop.f32.mrf.mxu3 }
 0x1fc   : > { %3440 = vst.msk [vmem:[#allocation2 + $0x90] sm:$0xff] %vm260_vm0, %v3437_v20  ;;  %v3334_v35 = vadd.f32 %v3330_v24, %v3300_v48  ;;  %v7182_v20 = vld [vmem:[%s7421_s18 + $0x3e8] sm:$0x7f]  ;;  %v5605_v48 = vld [vmem:[#allocation4] sm:$0x7] }
 0x1fd   : > { %v7305_v24 = vld [vmem:[%s8827_s2] ss:$0 sm:$0xff] }
 0x1fe   : > { %v3369_v3 = vadd.f32 %v3365_v26, %v3334_v35  ;;  %v8507_v21 = vpop.f32.mrf.mxu1  ;;  %v7187_v26 = vld [vmem:[%s7421_s18 + $0x2e9] sm:$0x7f] }
 0x1ff   : > { %v3541_v6 = vpop.f32.mrf.mxu0 }
 0x200   : > { %v3404_v36 = vadd.f32 %v3400_v34, %v3369_v3  ;;  %7145 = vmatmul.msk.f32.vlgmr.msrb.gmra.mxu2 %vm260_vm0, %v7142_v43  ;;  %7151 = vmatmul.msk.f32.gmra.mxu3 %vm260_vm0, %v7148_v44  ;;  %v7192_v43 = vld [vmem:[%s7421_s18 + $0xf8] sm:$0x7f]  ;;  %v8580_v44 = vld [vmem:[%s8828_s3 + $0x28] sm:$0xff] }
 0x201   : > { %7180 = vmatmul.msk.f32.gmra.mxu1 %vm260_vm0, %v7177_v23  ;;  %4881 = vmatpush.msrb.mxu2 %v8250_v61  ;;  %v8518_v61 = vld [vmem:[%s8828_s3] sm:$0xff] }
 0x202   : > { %7155 = vmatmul.msk.f32.vlgmr.msrb.gmra.mxu0 %vm260_vm0, %v7152_v0  ;;  %v3438_v49 = vadd.f32 %v8432_v59, %v3404_v36  ;;  %v7153_v59 = vld [vmem:[%s7421_s18 + $0x1e8] sm:$0x7f] }
 0x203   : > { %4950 = vmatpush.msrb.mxu0 %v8297_v27  ;;  %v3473_v56 = vpop.f32.mrf.mxu2  ;;  %v3510_v39 = vpop.f32.mrf.mxu3 }
 0x204   : > { %3441 = vst.msk [vmem:[#allocation2 + $0x98] sm:$0x7f] %vm578_vm1, %v3438_v49  ;;  %v3479_v27 = vadd.f32 %v7304_v9, %v3473_v56  ;;  %v7201_v49 = vld [vmem:[%s7421_s18 + $0xf1] sm:$0xff]  ;;  %v5631_v56 = vld [vmem:[#allocation4 + $0x1] sm:$0x7] }
 0x206   : > { %v3513_v2 = vadd.f32 %v3507_v60, %v3479_v27  ;;  %v8526_v12 = vpop.f32.mrf.mxu1  ;;  %v7202_v27 = vld [vmem:[%s7421_s18 + $0xf9] sm:$0x7f] }
 0x207   : > { %v3544_v38 = vpop.f32.mrf.mxu0 }
 0x208   : > { %7146 = vmatmul.msk.f32.gmra.mxu2 %vm260_vm0, %v7143_v13  ;;  %7169 = vmatmul.msk.f32.vlgmr.msra.gmra.mxu3 %vm260_vm0, %v7152_v0  ;;  %v3547_v14 = vadd.f32 %v3541_v6, %v3513_v2  ;;  %v5658_v13 = vld [vmem:[#allocation4 + $0x2] sm:$0x7] }
 0x209   : > { %7199 = vmatmul.msk.f32.vlgmr.msra.gmra.mxu1 %vm260_vm0, %v7196_v31  ;;  %5625 = vmatpush.msra.mxu3 %v8518_v61 }
 0x20a   : > { %7156 = vmatmul.msk.f32.gmra.mxu0 %vm260_vm0, %v7153_v59  ;;  %v3582_v25 = vadd.f32 %v8448_v32, %v3547_v14  ;;  %v5685_v32 = vld [vmem:[#allocation4 + $0x8] sm:$0x7] }
 0x20b   : > { %v3476_v29 = vpop.f32.mrf.mxu2  ;;  %v3645_v41 = vpop.f32.mrf.mxu3 }
 0x20c   : > { %v3480_v62 = vadd.f32 %v7304_v9, %v3476_v29 }
 0x20e   : > { %v3514_v42 = vadd.f32 %v3510_v39, %v3480_v62  ;;  %v8549_v30 = vpop.f32.mrf.mxu1 }
 0x20f   : > { %v3680_v8 = vpop.f32.mrf.mxu0 }
 0x210   : > { %7164 = vmatmul.msk.f32.vlgmr.msra.gmra.mxu2 %vm260_vm0, %v7147_v17  ;;  %7170 = vmatmul.msk.f32.gmra.mxu3 %vm260_vm0, %v7167_v53 }
 0x211   : > { %7200 = vmatmul.msk.f32.gmra.mxu1 %vm260_vm0, %v7197_v52  ;;  %5019 = vmatpush.msra.mxu2 %v8340_v33  ;;  %v8547_v33 = vld [vmem:[%s8828_s3 + $0x10] sm:$0xff]  ;;  %v5739_v52 = vld [vmem:[#allocation4 + $0xa] sm:$0x7] }
 0x212   : > { %7174 = vmatmul.msk.f32.vlgmr.msra.gmra.mxu0 %vm260_vm0, %v8451_v51  ;;  %v3548_v51 = vadd.f32 %v3544_v38, %v3514_v42 }
 0x213   : > { %v3611_v54 = vpop.f32.mrf.mxu2  ;;  %v3648_v46 = vpop.f32.mrf.mxu3  ;;  %5679 = vmatpush.msra.mxu0 %v8547_v33 }
 0x214   : > { %v3617_v11 = vadd.f32 %v3611_v54, %v3582_v25  ;;  %v3583_v55 = vadd.f32 %v8468_v50, %v3548_v51  ;;  %v5712_v25 = vld [vmem:[#allocation4 + $0x9] sm:$0x7] }
 0x216   : > { %v3651_v18 = vadd.f32 %v3645_v41, %v3617_v11  ;;  %v3998_v50 = vpop.f32.mrf.mxu1 }
 0x217   : > { %v3683_v40 = vpop.f32.mrf.mxu0 }
 0x218   : > { %7165 = vmatmul.msk.f32.gmra.mxu2 %vm260_vm0, %v7163_v4  ;;  %7189 = vmatmul.msk.f32.vlgmr.msrb.gmra.mxu3 %vm260_vm0, %v7186_v63  ;;  %v3686_v10 = vadd.f32 %v3680_v8, %v3651_v18 }
 0x219   : > { %7212 = vmatmul.msk.f32.vlgmr.msrb.gmra.mxu1 %vm260_vm0, %v5685_v32  ;;  %5652 = vmatpush.msrb.mxu3 %v8542_v37 }
 0x21a   : > { %7175 = vmatmul.msk.f32.gmra.mxu0 %vm260_vm0, %v7172_v5  ;;  %v3721_v34 = vadd.f32 %v8490_v47, %v3686_v10 }
 0x21b   : > { %v3614_v16 = vpop.f32.mrf.mxu2  ;;  %v3791_v22 = vpop.f32.mrf.mxu3 }
 0x21c   : > { %v3618_v19 = vadd.f32 %v3614_v16, %v3583_v55  ;;  %v3797_v47 = vadd.f32 %v7305_v24, %v3791_v22  ;;  %v7306_v22 = vld [vmem:[%s8827_s2] ss:$0 sm:$0xff] }
 0x21e   : > { %v3652_v1 = vadd.f32 %v3648_v46, %v3618_v19  ;;  %v4001_v0 = vpop.f32.mrf.mxu1 }
 0x21f   : > { %v3825_v17 = vpop.f32.mrf.mxu0 }
 0x220   : > { %7184 = vmatmul.msk.f32.vlgmr.msrb.gmra.mxu2 %vm260_vm0, %v7181_v58  ;;  %7190 = vmatmul.msk.f32.gmra.mxu3 %vm260_vm0, %v7187_v26  ;;  %v3687_v60 = vadd.f32 %v3683_v40, %v3652_v1  ;;  %v3831_v39 = vadd.f32 %v3825_v17, %v3797_v47 }
 0x221   : > { %5733 = vmatpush.msrb.mxu2 %v8564_v15 }
 0x222   : > { %7194 = vmatmul.msk.f32.vlgmr.msrb.gmra.mxu0 %vm260_vm0, %v7191_v45  ;;  %v3722_v3 = vadd.f32 %v8507_v21, %v3687_v60  ;;  %v3865_v21 = vadd.f32 %v8526_v12, %v3831_v39 }
 0x223   : > { %v3749_v28 = vpop.f32.mrf.mxu2  ;;  %v3794_v57 = vpop.f32.mrf.mxu3 }
 0x224   : > { %v3755_v7 = vadd.f32 %v3749_v28, %v3721_v34  ;;  %v3798_v31 = vadd.f32 %v7305_v24, %v3794_v57 }
 0x226   : > { %3758 = vst.msk [vmem:[#allocation2 + $0xa0] sm:$0xff] %vm260_vm0, %v3755_v7  ;;  %v4143_v29 = vpop.f32.mrf.mxu1 }
 0x227   : > { %v3828_v35 = vpop.f32.mrf.mxu0 }
 0x228   : > { %7185 = vmatmul.msk.f32.gmra.mxu2 %vm260_vm0, %v7182_v20  ;;  %7206 = vmatmul.msk.f32.vlgmr.msra.gmra.mxu3 %vm260_vm0, %v5605_v48  ;;  %v3832_v41 = vadd.f32 %v3828_v35, %v3798_v31 }
 0x229   : > { %5760 = vmatpush.msra.mxu3 %v8580_v44 }
 0x22a   : > { %7195 = vmatmul.msk.f32.gmra.mxu0 %vm260_vm0, %v7192_v43  ;;  %v3866_v14 = vadd.f32 %v8549_v30, %v3832_v41  ;;  %v7307_v41 = vld [vmem:[%s8827_s2] ss:$0 sm:$0xff] }
 0x22b   : > { %v3752_v23 = vpop.f32.mrf.mxu2  ;;  %v3929_v6 = vpop.f32.mrf.mxu3 }
 0x22c   : > { %v3756_v36 = vadd.f32 %v3752_v23, %v3722_v3 }
 0x22e   : > { %3759 = vst.msk [vmem:[#allocation2 + $0xa8] sm:$0x7f] %vm578_vm1, %v3756_v36  ;;  %v4146_v4 = vpop.f32.mrf.mxu1 }
 0x22f   : > { %v3963_v9 = vpop.f32.mrf.mxu0 }
 0x230   : > { %7204 = vmatmul.msk.f32.vlgmr.msra.gmra.mxu2 %vm260_vm0, %v7201_v49  ;;  %7208 = vmatmul.msk.f32.vlgmr.msrb.gmra.mxu3 %vm260_vm0, %v5631_v56 }
 0x232   : > { %7210 = vmatmul.msk.f32.vlgmr.msra.gmra.mxu0 %vm260_vm0, %v5658_v13 }
 0x233   : > { %v3894_v38 = vpop.f32.mrf.mxu2  ;;  %v3932_v59 = vpop.f32.mrf.mxu3 }
 0x234   : > { %v3900_v2 = vadd.f32 %v3894_v38, %v3865_v21 }
 0x236   : > { %v3935_v8 = vadd.f32 %v3929_v6, %v3900_v2  ;;  %v4281_v30 = vpop.f32.mrf.mxu1 }
 0x237   : > { %v3966_v53 = vpop.f32.mrf.mxu0 }
 0x238   : > { %7205 = vmatmul.msk.f32.gmra.mxu2 %vm260_vm0, %v7202_v27  ;;  %7216 = vmatmul.msk.f32.vlgmr.msra.gmra.mxu3 %vm260_vm0, %v5739_v52  ;;  %v3969_v46 = vadd.f32 %v3963_v9, %v3935_v8 }
 0x23a   : > { %v4004_v11 = vadd.f32 %v3998_v50, %v3969_v46 }
 0x23b   : > { %v3897_v62 = vpop.f32.mrf.mxu2  ;;  %v4067_v54 = vpop.f32.mrf.mxu3 }
 0x23c   : > { %v3901_v42 = vadd.f32 %v3897_v62, %v3866_v14 }
 0x23e   : > { %v3936_v63 = vadd.f32 %v3932_v59, %v3901_v42  ;;  %v4284_v28 = vpop.f32.mrf.mxu1 }
 0x23f   : > { %v4109_v12 = vpop.f32.mrf.mxu0 }
 0x240   : > { %7214 = vmatmul.msk.f32.vlgmr.msrb.gmra.mxu2 %vm260_vm0, %v5712_v25  ;;  %v3970_v32 = vadd.f32 %v3966_v53, %v3936_v63  ;;  %v4115_v19 = vadd.f32 %v7306_v22, %v4109_v12 }
 0x242   : > { %v4005_v55 = vadd.f32 %v4001_v0, %v3970_v32  ;;  %v4149_v50 = vadd.f32 %v4143_v29, %v4115_v19 }
 0x243   : > { %v4033_v40 = vpop.f32.mrf.mxu2  ;;  %v4070_v5 = vpop.f32.mrf.mxu3 }
 0x244   : > { %v4039_v51 = vadd.f32 %v4033_v40, %v4004_v11 }
 0x246   : > { %v4073_v18 = vadd.f32 %v4067_v54, %v4039_v51  ;;  %v4427_v23 = vpop.f32.mrf.mxu1 }
 0x247   : > { %v4112_v16 = vpop.f32.mrf.mxu0  ;;  %v4433_v8 = vadd.f32 %v7307_v41, %v4427_v23  ;;  %v5199_v23 = vld [vmem:[#allocation2 + $0x83] sm:$0x7f] }
 0x248   : > { %4076 = vst.msk [vmem:[#allocation2 + $0xb0] sm:$0xff] %vm260_vm0, %v4073_v18  ;;  %v4116_v57 = vadd.f32 %v7306_v22, %v4112_v16 }
 0x24a   : > { %v4150_v24 = vadd.f32 %v4146_v4, %v4116_v57 }
 0x24b   : > { %v4036_v58 = vpop.f32.mrf.mxu2  ;;  %v4212_v26 = vpop.f32.mrf.mxu3 }
 0x24c   : > { %v4040_v10 = vadd.f32 %v4036_v58, %v4005_v55 }
 0x24e   : > { %v4074_v17 = vadd.f32 %v4070_v5, %v4040_v10  ;;  %v4430_v21 = vpop.f32.mrf.mxu1 }
 0x24f   : > { %v4247_v45 = vpop.f32.mrf.mxu0  ;;  %v4434_v12 = vadd.f32 %v7307_v41, %v4430_v21 }
 0x250   : > { %4077 = vst.msk [vmem:[#allocation2 + $0xb8] sm:$0x7f] %vm578_vm1, %v4074_v17 }
 0x253   : > { %v4177_v1 = vpop.f32.mrf.mxu2  ;;  %v4215_v34 = vpop.f32.mrf.mxu3 }
 0x254   : > { %v4183_v7 = vadd.f32 %v4177_v1, %v4149_v50 }
 0x256   : > { %v4218_v48 = vadd.f32 %v4212_v26, %v4183_v7  ;;  %v4565_v14 = vpop.f32.mrf.mxu1 }
 0x257   : > { %v4250_v20 = vpop.f32.mrf.mxu0 }
 0x258   : > { %v4253_v43 = vadd.f32 %v4247_v45, %v4218_v48 }
 0x25a   : > { %v4287_v0 = vadd.f32 %v4281_v30, %v4253_v43 }
 0x25b   : > { %v4180_v60 = vpop.f32.mrf.mxu2  ;;  %v4351_v35 = vpop.f32.mrf.mxu3 }
 0x25c   : > { %v4184_v47 = vadd.f32 %v4180_v60, %v4150_v24  ;;  %v7308_v24 = vld [vmem:[%s8827_s2] ss:$0 sm:$0xff] }
 0x25d   : > { %v5040_v60 = vld [vmem:[#allocation2 + $0x80] sm:$0x7f] }
 0x25e   : > { %v4219_v6 = vadd.f32 %v4215_v34, %v4184_v47  ;;  %v4568_v63 = vpop.f32.mrf.mxu1  ;;  %v5041_v47 = vld [vmem:[#allocation2 + $0x90] sm:$0x7f] }
 0x25f   : > { %v4385_v3 = vpop.f32.mrf.mxu0 }
 0x260   : > { %v4254_v39 = vadd.f32 %v4250_v20, %v4219_v6 }
 0x262   : > { %v4288_v38 = vadd.f32 %v4284_v28, %v4254_v39 }
 0x263   : > { %v4316_v36 = vpop.f32.mrf.mxu2  ;;  %v4354_v49 = vpop.f32.mrf.mxu3 }
 0x264   : > { %v4322_v56 = vadd.f32 %v4316_v36, %v4287_v0  ;;  %v5352_v36 = vld [vmem:[#allocation2 + $0x86] sm:$0x7f] }
 0x266   : > { %v4357_v9 = vadd.f32 %v4351_v35, %v4322_v56  ;;  %v4703_v58 = vpop.f32.mrf.mxu1 }
 0x267   : > { %v4388_v13 = vpop.f32.mrf.mxu0 }
 0x268   : > { %v4391_v31 = vadd.f32 %v4385_v3, %v4357_v9  ;;  %v5103_v3 = vsel %vm578_vm1, %v5040_v60, -inf }
 0x269   : > { %v5104_v39 = vrot.slane %v5103_v3, 4 }
 0x26a   : > { %4394 = vst.msk [vmem:[#allocation2 + $0xc0] sm:$0xff] %vm260_vm0, %v4391_v31  ;;  %v5415_v31 = vsel %vm578_vm1, %v5352_v36, -inf  ;;  %v5354_v36 = vld [vmem:[#allocation2 + $0xa6] sm:$0x7f] }
 0x26b   : > { %v4319_v59 = vpop.f32.mrf.mxu2  ;;  %v4495_v27 = vpop.f32.mrf.mxu3 }
 0x26c   : > { %v4323_v29 = vadd.f32 %v4319_v59, %v4288_v38 }
 0x26e   : > { %v4358_v2 = vadd.f32 %v4354_v49, %v4323_v29  ;;  %v4706_v57 = vpop.f32.mrf.mxu1  ;;  %v5110_v49 = vsel %vm578_vm1, %v5041_v47, -inf }
 0x26f   : > { %v4530_v53 = vpop.f32.mrf.mxu0  ;;  %v5111_v21 = vrot.slane %v5110_v49, 4 }
 0x270   : > { %v4392_v52 = vadd.f32 %v4388_v13, %v4358_v2  ;;  %v5262_v13 = vsel %vm578_vm1, %v5199_v23, -inf  ;;  %v5416_v2 = vrot.slane %v5415_v31, 4 }
 0x271   : > { %v5263_v29 = vrot.slane %v5262_v13, 4 }
 0x272   : > { %4395 = vst.msk [vmem:[#allocation2 + $0xc8] sm:$0x7f] %vm578_vm1, %v4392_v52  ;;  %v5112_v52 = vmax.f32 %v5110_v49, %v5111_v21 }
 0x273   : > { %v4461_v62 = vpop.f32.mrf.mxu2  ;;  %v4498_v54 = vpop.f32.mrf.mxu3 }
 0x274   : > { %v4467_v46 = vadd.f32 %v4461_v62, %v4433_v8 }
 0x276   : > { %v4501_v25 = vadd.f32 %v4495_v27, %v4467_v46  ;;  %v4848_v6 = vpop.f32.mrf.mxu1  ;;  %v5105_v27 = vmax.f32 %v5103_v3, %v5104_v39  ;;  %v5264_v46 = vmax.f32 %v5262_v13, %v5263_v29 }
 0x277   : > { %v4533_v42 = vpop.f32.mrf.mxu0 }
 0x278   : > { %v4536_v11 = vadd.f32 %v4530_v53, %v4501_v25  ;;  %v5042_v53 = vld [vmem:[#allocation2 + $0xa0] sm:$0x7f] }
 0x27a   : > { %v4571_v32 = vadd.f32 %v4565_v14, %v4536_v11  ;;  %v5113_v11 = vrot.slane %v5112_v52, 2 }
 0x27b   : > { %v4464_v4 = vpop.f32.mrf.mxu2  ;;  %v4634_v5 = vpop.f32.mrf.mxu3 }
 0x27c   : > { %v4468_v40 = vadd.f32 %v4464_v4, %v4434_v12  ;;  %v5117_v12 = vsel %vm578_vm1, %v5042_v53, -inf  ;;  %v5417_v4 = vmax.f32 %v5415_v31, %v5416_v2  ;;  %v5355_v2 = vld [vmem:[#allocation2 + $0xb6] sm:$0x7f]  ;;  %v5203_v53 = vld [vmem:[#allocation2 + $0xc3] sm:$0x7f] }
 0x27e   : > { %v4502_v51 = vadd.f32 %v4498_v54, %v4468_v40  ;;  %v5106_v54 = vrot.slane %v5105_v27, 2  ;;  %v4851_v25 = vpop.f32.mrf.mxu1  ;;  %v5353_v40 = vld [vmem:[#allocation2 + $0x96] sm:$0x7f] }
 0x27f   : > { %v4669_v16 = vpop.f32.mrf.mxu0 }
 0x280   : > { %v4537_v22 = vadd.f32 %v4533_v42, %v4502_v51  ;;  %v5200_v42 = vld [vmem:[#allocation2 + $0x93] sm:$0x7f] }
 0x281   : > { %v5269_v51 = vsel %vm578_vm1, %v5200_v42, -inf  ;;  %v5356_v42 = vld [vmem:[#allocation2 + $0xc6] sm:$0x7f] }
 0x282   : > { %v4572_v17 = vadd.f32 %v4568_v63, %v4537_v22  ;;  %v5043_v22 = vld [vmem:[#allocation2 + $0xb0] sm:$0x7f] }
 0x283   : > { %v4599_v18 = vpop.f32.mrf.mxu2  ;;  %v4637_v10 = vpop.f32.mrf.mxu3 }
 0x284   : > { %v4605_v30 = vadd.f32 %v4599_v18, %v4571_v32  ;;  %v5118_v32 = vrot.slane %v5117_v12, 4 }
 0x286   : > { %v4640_v55 = vadd.f32 %v4634_v5, %v4605_v30  ;;  %v5265_v30 = vrot.slane %v5264_v46, 2 }
 0x287   : > { %v4672_v1 = vpop.f32.mrf.mxu0 }
 0x288   : > { %v4675_v26 = vadd.f32 %v4669_v16, %v4640_v55  ;;  %v5107_v16 = vmax.f32 %v5105_v27, %v5106_v54  ;;  %v5418_v55 = vrot.slane %v5417_v4, 2 }
 0x28a   : > { %v4709_v19 = vadd.f32 %v4703_v58, %v4675_v26  ;;  %v5422_v58 = vsel %vm578_vm1, %v5353_v40, -inf  ;;  %v5044_v26 = vld [vmem:[#allocation2 + $0xc0] sm:$0x7f] }
 0x28b   : > { %v4602_v45 = vpop.f32.mrf.mxu2  ;;  %v4779_v20 = vpop.f32.mrf.mxu3  ;;  %v5131_v60 = vsel %vm578_vm1, %v5044_v26, -inf }
 0x28c   : > { %4712 = vst.msk [vmem:[#allocation2 + $0xd0] sm:$0xff] %vm260_vm0, %v4709_v19  ;;  %v4606_v50 = vadd.f32 %v4602_v45, %v4572_v17  ;;  %v5114_v19 = vmax.f32 %v5112_v52, %v5113_v11  ;;  %v5270_v17 = vrot.slane %v5269_v51, 4 }
 0x28e   : > { %v4641_v34 = vadd.f32 %v4637_v10, %v4606_v50  ;;  %v5115_v23 = vrot.slane %v5114_v19, 1 }
 0x28f   : > { %v4813_v35 = vpop.f32.mrf.mxu0 }
 0x290   : > { %v4676_v28 = vadd.f32 %v4672_v1, %v4641_v34  ;;  %v5119_v34 = vmax.f32 %v5117_v12, %v5118_v32  ;;  %v5436_v32 = vsel %vm578_vm1, %v5355_v2, -inf }
 0x292   : > { %v4710_v7 = vadd.f32 %v4706_v57, %v4676_v28  ;;  %v5201_v28 = vld [vmem:[#allocation2 + $0xa3] sm:$0x7f]  ;;  %v5124_v57 = vsel %vm578_vm1, %v5043_v22, -inf  ;;  %v5120_v39 = vrot.slane %v5119_v34, 2  ;;  %v8637_v22 = vld [vmem:[%s8828_s3 + $0x30] sm:$0xff] }
 0x293   : > { %v4745_v48 = vpop.f32.mrf.mxu2  ;;  %v4782_v9 = vpop.f32.mrf.mxu3  ;;  %v5045_v45 = vld [vmem:[#allocation2 + $0xd0] sm:$0x7f]  ;;  %v5125_v49 = vrot.slane %v5124_v57, 4  ;;  %5787 = vmatpush.msrb.mxu0 %v8637_v22 }
 0x294   : > { %4713 = vst.msk [vmem:[#allocation2 + $0xd8] sm:$0x7f] %vm578_vm1, %v4710_v7  ;;  %v4751_v43 = vadd.f32 %v7308_v24, %v4745_v48  ;;  %v8621_v48 = vmax.f32 %v5264_v46, %v5265_v30 }
 0x295   : > { %v5126_v46 = vmax.f32 %v5124_v57, %v5125_v49  ;;  %5927 = vmatpush.msra.mxu0 %v8518_v61  ;;  %v5437_v57 = vrot.slane %v5436_v32, 4 }
 0x296   : > { %v4785_v56 = vadd.f32 %v4779_v20, %v4751_v43  ;;  %v5108_v20 = vrot.slane %v5107_v16, 1  ;;  %v5138_v43 = vsel %vm578_vm1, %v5045_v45, -inf  ;;  %v5267_v31 = vrot.slane %v8621_v48, 1 }
 0x297   : > { %v4816_v41 = vpop.f32.mrf.mxu0  ;;  %v5127_v45 = vrot.slane %v5126_v46, 2 }
 0x298   : > { %v4819_v38 = vadd.f32 %v4813_v35, %v4785_v56  ;;  %v8624_v35 = vmax.f32 %v5417_v4, %v5418_v55  ;;  %v4987_v56 = vpop.f32.mrf.mxu1  ;;  %v5109_v13 = vmax.f32 %v5107_v16, %v5108_v20  ;;  %v8642_v55 = vld [vmem:[%s8828_s3 + $0x38] sm:$0xff] }
 0x299   : > { %5814 = vmatpush.msra.mxu1 %v8642_v55 }
 0x29a   : > { %v4854_v62 = vadd.f32 %v4848_v6, %v4819_v38  ;;  %v5271_v6 = vmax.f32 %v5269_v51, %v5270_v17  ;;  %v5202_v38 = vld [vmem:[#allocation2 + $0xb3] sm:$0x7f] }
 0x29b   : > { %v4748_v0 = vpop.f32.mrf.mxu2  ;;  %v4917_v5 = vpop.f32.mrf.mxu3  ;;  %v5283_v4 = vsel %vm578_vm1, %v5202_v38, -inf  ;;  %v5204_v11 = vld [vmem:[#allocation2 + $0xd3] sm:$0x7f]  ;;  %5953 = vmatpush.msrb.mxu1 %v8542_v37  ;;  %v5438_v38 = vmax.f32 %v5436_v32, %v5437_v57 }
 0x29c   : > { %v4752_v59 = vadd.f32 %v7308_v24, %v4748_v0  ;;  %v5423_v24 = vrot.slane %v5422_v58, 4  ;;  %v5276_v0 = vsel %vm578_vm1, %v5201_v28, -inf  ;;  %v5272_v54 = vrot.slane %v5271_v6, 2  ;;  %v5357_v40 = vld [vmem:[#allocation2 + $0xd6] sm:$0x7f] }
 0x29d   : > { %v5277_v29 = vrot.slane %v5276_v0, 4 }
 0x29e   : > { %v4786_v14 = vadd.f32 %v4782_v9, %v4752_v59  ;;  %v5132_v9 = vrot.slane %v5131_v60, 4  ;;  %v5424_v21 = vmax.f32 %v5422_v58, %v5423_v24  ;;  %v5139_v59 = vrot.slane %v5138_v43, 4  ;;  %v8647_v58 = vld [vmem:[%s8828_s3 + $0x40] sm:$0xff] }
 0x29f   : > { %v4952_v50 = vpop.f32.mrf.mxu0  ;;  %5841 = vmatpush.msra.mxu2 %v8647_v58  ;;  %v5273_v24 = vmax.f32 %v5271_v6, %v5272_v54 }
 0x2a0   : > { %v4820_v18 = vadd.f32 %v4816_v41, %v4786_v14  ;;  %v5429_v41 = vsel %vm578_vm1, %v5354_v36, -inf  ;;  %v5420_v14 = vrot.slane %v8624_v35, 1  ;;  %v5140_v16 = vmax.f32 %v5138_v43, %v5139_v59 }
 0x2a1   : > { %v5430_v51 = vrot.slane %v5429_v41, 4  ;;  %v5425_v26 = vrot.slane %v5424_v21, 2  ;;  %5979 = vmatpush.msrb.mxu2 %v8547_v33  ;;  %v5274_v2 = vrot.slane %v5273_v24, 1 }
 0x2a2   : > { %v4855_v7 = vadd.f32 %v4851_v25, %v4820_v18  ;;  %v5121_v25 = vmax.f32 %v5119_v34, %v5120_v39  ;;  %v5290_v18 = vsel %vm578_vm1, %v5203_v53, -inf  ;;  %v5450_v34 = vsel %vm578_vm1, %v5357_v40, -inf }
 0x2a3   : > { %v4883_v8 = vpop.f32.mrf.mxu2  ;;  %v4920_v27 = vpop.f32.mrf.mxu3  ;;  %v5291_v20 = vrot.slane %v5290_v18, 4  ;;  %v5451_v36 = vrot.slane %v5450_v34, 4  ;;  %v5128_v39 = vmax.f32 %v5126_v46, %v5127_v45 }
 0x2a4   : > { %v4889_v63 = vadd.f32 %v4883_v8, %v4854_v62  ;;  %v5116_v62 = vmax.f32 %v5114_v19, %v5115_v23  ;;  %v5443_v19 = vsel %vm578_vm1, %v5356_v42, -inf  ;;  %v5426_v23 = vmax.f32 %v5424_v21, %v5425_v26 }
 0x2a5   : > { %v5444_v43 = vrot.slane %v5443_v19, 4  ;;  %v5452_v21 = vmax.f32 %v5450_v34, %v5451_v36  ;;  %v5129_v42 = vrot.slane %v5128_v39, 1 }
 0x2a6   : > { %v4923_v10 = vadd.f32 %v4917_v5, %v4889_v63  ;;  %v5133_v63 = vmax.f32 %v5131_v60, %v5132_v9  ;;  %v5181_v28 = vsel %vm5167_vm2, %v5116_v62, %v5109_v13  ;;  %v5431_v60 = vmax.f32 %v5429_v41, %v5430_v51 }
 0x2a7   : > { %v4955_v30 = vpop.f32.mrf.mxu0  ;;  %v5445_v6 = vmax.f32 %v5443_v19, %v5444_v43  ;;  %v5453_v19 = vrot.slane %v5452_v21, 2 }
 0x2a8   : > { %v4958_v47 = vadd.f32 %v4952_v50, %v4923_v10  ;;  %v5278_v10 = vmax.f32 %v5276_v0, %v5277_v29  ;;  %v5284_v50 = vrot.slane %v5283_v4, 4  ;;  %v5432_v33 = vrot.slane %v5431_v60, 2 }
 0x2a9   : > { %v5446_v51 = vrot.slane %v5445_v6, 2 }
 0x2aa   : > { %v4993_v8 = vadd.f32 %v4987_v56, %v4958_v47  ;;  %v5141_v47 = vrot.slane %v5140_v16, 2  ;;  %v5122_v56 = vrot.slane %v5121_v25, 1  ;;  %v5279_v61 = vrot.slane %v5278_v10, 2 }
 0x2ab   : > { %v4886_v1 = vpop.f32.mrf.mxu2  ;;  %v5285_v9 = vmax.f32 %v5283_v4, %v5284_v50  ;;  %v5130_v50 = vmax.f32 %v5128_v39, %v5129_v42  ;;  %v5421_v42 = vmax.f32 %v8624_v35, %v5420_v14 }
 0x2ac   : > { %v4890_v3 = vadd.f32 %v4886_v1, %v4855_v7  ;;  %v5297_v1 = vsel %vm578_vm1, %v5204_v11, -inf  ;;  %v5134_v7 = vrot.slane %v5133_v63, 2  ;;  %v5142_v41 = vmax.f32 %v5140_v16, %v5141_v47 }
 0x2ad   : > { %v5298_v0 = vrot.slane %v5297_v1, 4  ;;  %v5123_v54 = vmax.f32 %v5121_v25, %v5122_v56  ;;  %v5280_v46 = vmax.f32 %v5278_v10, %v5279_v61  ;;  %v5286_v4 = vrot.slane %v5285_v9, 2 }
 0x2ae   : > { %v4924_v52 = vadd.f32 %v4920_v27, %v4890_v3  ;;  %v4990_v3 = vpop.f32.mrf.mxu1  ;;  %v5135_v59 = vmax.f32 %v5133_v63, %v5134_v7  ;;  %v5292_v27 = vmax.f32 %v5290_v18, %v5291_v20  ;;  %v5439_v63 = vrot.slane %v5438_v38, 2 }
 0x2af   : > { %v5143_v32 = vrot.slane %v5142_v41, 1  ;;  %v5275_v16 = vmax.f32 %v5273_v24, %v5274_v2  ;;  %v5281_v45 = vrot.slane %v5280_v46, 1  ;;  %v5287_v10 = vmax.f32 %v5285_v9, %v5286_v4 }
 0x2b0   : > { %v4959_v17 = vadd.f32 %v4955_v30, %v4924_v52  ;;  %v5427_v52 = vrot.slane %v5426_v23, 1  ;;  %v5136_v11 = vrot.slane %v5135_v59, 1  ;;  %v5293_v40 = vrot.slane %v5292_v27, 2 }
 0x2b1   : > { %v5447_v20 = vmax.f32 %v5445_v6, %v5446_v51  ;;  %v5144_v43 = vmax.f32 %v5142_v41, %v5143_v32  ;;  %v5454_v24 = vmax.f32 %v5452_v21, %v5453_v19  ;;  %v5288_v39 = vrot.slane %v5287_v10, 1 }
 0x2b2   : > { %v4994_v49 = vadd.f32 %v4990_v3, %v4959_v17  ;;  %v5428_v30 = vmax.f32 %v5426_v23, %v5427_v52  ;;  %v5182_v17 = vsel %vm5169_vm3, %v5123_v54, %v5181_v28  ;;  %v5137_v34 = vmax.f32 %v5135_v59, %v5136_v11 }
 0x2b3   : > { %v5021_v12 = vpop.f32.mrf.mxu2  ;;  %v5294_v57 = vmax.f32 %v5292_v27, %v5293_v40  ;;  %v5183_v28 = vsel %vm5171_vm4, %v5130_v50, %v5182_v17  ;;  %v5448_v59 = vrot.slane %v5447_v20, 1  ;;  %v5268_v54 = vmax.f32 %v8621_v48, %v5267_v31 }
 0x2b4   : > { %v5027_v5 = vadd.f32 %v5021_v12, %v4993_v8  ;;  %v5299_v8 = vmax.f32 %v5297_v1, %v5298_v0  ;;  %v5440_v1 = vmax.f32 %v5438_v38, %v5439_v63  ;;  %v5486_v51 = vsel %vm5167_vm2, %v5428_v30, %v5421_v42 }
 0x2b5   : > { %v5295_v38 = vrot.slane %v5294_v57, 1  ;;  %v5449_v63 = vmax.f32 %v5447_v20, %v5448_v59 }
 0x2b6   : > { %5030 = vst.msk [vmem:[#allocation2 + $0xe0] sm:$0xff] %vm260_vm0, %v5027_v5  ;;  %v5433_v5 = vmax.f32 %v5431_v60, %v5432_v33  ;;  %v5300_v26 = vrot.slane %v5299_v8, 2  ;;  %v5441_v9 = vrot.slane %v5440_v1, 1  ;;  %v5282_v33 = vmax.f32 %v5280_v46, %v5281_v45 }
 0x2b7   : > { %v5296_v46 = vmax.f32 %v5294_v57, %v5295_v38 }
 0x2b8   : > { %v5434_v7 = vrot.slane %v5433_v5, 1  ;;  %v5301_v0 = vmax.f32 %v5299_v8, %v5300_v26  ;;  %v5442_v4 = vmax.f32 %v5440_v1, %v5441_v9 }
 0x2ba   : > { %v5302_v41 = vrot.slane %v5301_v0, 1  ;;  %v5435_v52 = vmax.f32 %v5433_v5, %v5434_v7  ;;  %v5333_v5 = vsel %vm5167_vm2, %v5275_v16, %v5268_v54 }
 0x2bb   : > { %v5024_v13 = vpop.f32.mrf.mxu2  ;;  %v5334_v48 = vsel %vm5169_vm3, %v5282_v33, %v5333_v5 }
 0x2bc   : > { %v5028_v29 = vadd.f32 %v5024_v13, %v4994_v49  ;;  %v5184_v13 = vsel %vm5173_vm5, %v5137_v34, %v5183_v28  ;;  %v5303_v32 = vmax.f32 %v5301_v0, %v5302_v41  ;;  %v5487_v31 = vsel %vm5169_vm3, %v5435_v52, %v5486_v51 }
 0x2bd   : > { %v5046_v53 = vld [vmem:[#allocation2 + $0xe0] sm:$0x7f]  ;;  %v5185_v6 = vsel %vm5175_vm6, %v5144_v43, %v5184_v13  ;;  %v5488_v19 = vsel %vm5171_vm4, %v5442_v4, %v5487_v31 }
 0x2be   : > { %v5145_v62 = vsel %vm578_vm1, %v5046_v53, -inf  ;;  %5031 = vst.msk [vmem:[#allocation2 + $0xe8] sm:$0x7f] %vm578_vm1, %v5028_v29  ;;  %v5455_v53 = vrot.slane %v5454_v24, 1  ;;  %v5489_v45 = vsel %vm5173_vm5, %v5449_v63, %v5488_v19 }
 0x2bf   : > { %v5146_v12 = vrot.slane %v5145_v62, 4 }
 0x2c1   : > { %v5147_v18 = vmax.f32 %v5145_v62, %v5146_v12  ;;  %v5289_v12 = vmax.f32 %v5287_v10, %v5288_v39 }
 0x2c3   : > { %v5148_v25 = vrot.slane %v5147_v18, 2  ;;  %v5335_v14 = vsel %vm5171_vm4, %v5289_v12, %v5334_v48 }
 0x2c4   : > { %v5336_v17 = vsel %vm5173_vm5, %v5296_v46, %v5335_v14 }
 0x2c5   : > { %v5149_v60 = vmax.f32 %v5147_v18, %v5148_v25  ;;  %v5205_v47 = vld [vmem:[#allocation2 + $0xe3] sm:$0x7f]  ;;  %v5456_v18 = vmax.f32 %v5454_v24, %v5455_v53  ;;  %v5337_v30 = vsel %vm5175_vm6, %v5303_v32, %v5336_v17 }
 0x2c6   : > { %v5358_v3 = vld [vmem:[#allocation2 + $0xe6] sm:$0x7f]  ;;  %v5304_v23 = vsel %vm578_vm1, %v5205_v47, -inf }
 0x2c7   : > { %v5457_v36 = vsel %vm578_vm1, %v5358_v3, -inf  ;;  %v5150_v49 = vrot.slane %v5149_v60, 1  ;;  %v5305_v56 = vrot.slane %v5304_v23, 4  ;;  %v5490_v25 = vsel %vm5175_vm6, %v5456_v18, %v5489_v45 }
 0x2c8   : > { %v5458_v61 = vrot.slane %v5457_v36, 4 }
 0x2c9   : > { %v5151_v27 = vmax.f32 %v5149_v60, %v5150_v49  ;;  %v5306_v29 = vmax.f32 %v5304_v23, %v5305_v56 }
 0x2ca   : > { %v5459_v2 = vmax.f32 %v5457_v36, %v5458_v61 }
 0x2cb   : > { %v5186_v8 = vsel %vm5177_vm7, %v5151_v27, %v5185_v6  ;;  %v5307_v21 = vrot.slane %v5306_v29, 2 }
 0x2cc   : > { %v5460_v62 = vrot.slane %v5459_v2, 2  ;;  %5190 = vst.msk [vmem:[#allocation3 + $0x8] sm:$0x7f] %vm578_vm1, %v5186_v8 }
 0x2cd   : > { %v5308_v11 = vmax.f32 %v5306_v29, %v5307_v21 }
 0x2ce   : > { %v5461_v40 = vmax.f32 %v5459_v2, %v5460_v62 }
 0x2cf   : > { %v5309_v26 = vrot.slane %v5308_v11, 1 }
 0x2d0   : > { %v5462_v35 = vrot.slane %v5461_v40, 1 }
 0x2d1   : > { %v5310_v50 = vmax.f32 %v5308_v11, %v5309_v26 }
 0x2d2   : > { %v5463_v16 = vmax.f32 %v5461_v40, %v5462_v35 }
 0x2d3   : > { %v5338_v10 = vsel %vm5177_vm7, %v5310_v50, %v5337_v30  ;;  %v5536_v34 = vld [vmem:[#allocation3 + $0x3] sm:$0x7f] }
 0x2d4   : > { %v5491_v1 = vsel %vm5177_vm7, %v5463_v16, %v5490_v25  ;;  %v5568_v57 = vld [vmem:[#allocation3 + $0x6] sm:$0x7f]  ;;  %5343 = vst.msk [vmem:[#allocation3 + $0x18] sm:$0x7f] %vm578_vm1, %v5338_v10  ;;  %v5539_v7 = vsel %vm578_vm1, %v5536_v34, -inf }
 0x2d5   : > { %v5571_v20 = vsel %vm578_vm1, %v5568_v57, -inf  ;;  %5496 = vst.msk [vmem:[#allocation3 + $0x28] sm:$0x7f] %vm578_vm1, %v5491_v1  ;;  %v5540_v43 = vrot.slane %v5539_v7, 4  ;;  %v7312_v25 = vld [vmem:[%s8828_s3 + $0x18] sm:$0xff] }
 0x2d6   : > { %v5572_v60 = vrot.slane %v5571_v20, 4  ;;  %v5907_v10 = vld [vmem:[#allocation4 + $0x8] sm:$0x7] }
 0x2d7   : > { %v5541_v47 = vmax.f32 %v5539_v7, %v5540_v43  ;;  %v5933_v1 = vld [vmem:[#allocation4 + $0x9] sm:$0x7]  ;;  %v7313_v43 = vld [vmem:[%s8828_s3] sm:$0xff] }
 0x2d8   : > { %v5573_v3 = vmax.f32 %v5571_v20, %v5572_v60  ;;  %v5959_v34 = vld [vmem:[#allocation4 + $0xa] sm:$0x7]  ;;  %v7259_v60 = vld [vmem:[%s8828_s3 + $0x18] sm:$0xff] }
 0x2d9   : > { %v5542_v24 = vrot.slane %v5541_v47, 2 }
 0x2da   : > { %v5574_v36 = vrot.slane %v5573_v3, 2 }
 0x2db   : > { %v5537_v0 = vld [vmem:[#allocation3 + $0x13] sm:$0x7f]  ;;  %v5543_v27 = vmax.f32 %v5541_v47, %v5542_v24 }
 0x2dc   : > { %v5569_v23 = vld [vmem:[#allocation3 + $0x16] sm:$0x7f]  ;;  %v5538_v28 = vld [vmem:[#allocation3 + $0x23] sm:$0x7f]  ;;  %v5546_v49 = vsel %vm578_vm1, %v5537_v0, -inf  ;;  %v5575_v6 = vmax.f32 %v5573_v3, %v5574_v36 }
 0x2dd   : > { %v5570_v56 = vld [vmem:[#allocation3 + $0x26] sm:$0x7f]  ;;  %v5578_v61 = vsel %vm578_vm1, %v5569_v23, -inf  ;;  %v5547_v39 = vrot.slane %v5546_v49, 4  ;;  %v5553_v9 = vsel %vm578_vm1, %v5538_v28, -inf  ;;  %v5544_v62 = vrot.slane %v5543_v27, 1  ;;  %v5627_v28 = vpop.f32.mrf.mxu3 }
 0x2de   : > { %v5554_v13 = vrot.slane %v5553_v9, 4  ;;  %v5579_v38 = vrot.slane %v5578_v61, 4  ;;  %v5585_v59 = vsel %vm578_vm1, %v5570_v56, -inf  ;;  %v5576_v4 = vrot.slane %v5575_v6, 1 }
 0x2df   : > { %v5548_v29 = vmax.f32 %v5546_v49, %v5547_v39  ;;  %v5586_v2 = vrot.slane %v5585_v59, 4  ;;  %v5545_v51 = vmax.f32 %v5543_v27, %v5544_v62  ;;  %v5681_v39 = vpop.f32.mrf.mxu0 }
 0x2e0   : > { %v5555_v33 = vmax.f32 %v5553_v9, %v5554_v13  ;;  %v5580_v41 = vmax.f32 %v5578_v61, %v5579_v38  ;;  %v5577_v31 = vmax.f32 %v5575_v6, %v5576_v4  ;;  %v5708_v13 = vpop.f32.mrf.mxu1 }
 0x2e1   : > { %v5549_v53 = vrot.slane %v5548_v29, 2  ;;  %v5587_v52 = vmax.f32 %v5585_v59, %v5586_v2 }
 0x2e2   : > { %v5556_v8 = vrot.slane %v5555_v33, 2  ;;  %v5581_v21 = vrot.slane %v5580_v41, 2 }
 0x2e3   : > { %v5550_v54 = vmax.f32 %v5548_v29, %v5549_v53  ;;  %v5588_v42 = vrot.slane %v5587_v52, 2 }
 0x2e4   : > { %v5557_v12 = vmax.f32 %v5555_v33, %v5556_v8  ;;  %v5582_v46 = vmax.f32 %v5580_v41, %v5581_v21  ;;  %v7310_v41 = vld [vmem:[%s8829_s4] ss:$0 sm:$0xff] }
 0x2e5   : > { %v5551_v63 = vrot.slane %v5550_v54, 1  ;;  %v5589_v11 = vmax.f32 %v5587_v52, %v5588_v42  ;;  %v5654_v56 = vpop.f32.mrf.mxu3  ;;  %v8745_v21 = vld [vmem:[%s8830_s5] sm:$0xff]  ;;  %v7314_v42 = vld [vmem:[%s8828_s3 + $0x10] sm:$0xff] }
 0x2e6   : > { %v5558_v40 = vrot.slane %v5557_v12, 1  ;;  %v5583_v5 = vrot.slane %v5582_v46, 1 }
 0x2e7   : > { %v5552_v32 = vmax.f32 %v5550_v54, %v5551_v63  ;;  %v5590_v18 = vrot.slane %v5589_v11, 1 }
 0x2e8   : > { %v5559_v48 = vmax.f32 %v5557_v12, %v5558_v40  ;;  %v5584_v26 = vmax.f32 %v5582_v46, %v5583_v5 }
 0x2e9   : > { %v5563_v35 = vsel %vm5167_vm2, %v5552_v32, %v5545_v51  ;;  %v5591_v14 = vmax.f32 %v5589_v11, %v5590_v18  ;;  %v8757_v11 = vld [vmem:[%s8830_s5 + $0x8] sm:$0xff]  ;;  %v6382_v51 = vld [vmem:[#allocation4 + $0x21] sm:$0x7] }
 0x2ea   : > { %v5564_v19 = vsel %vm5169_vm3, %v5559_v48, %v5563_v35  ;;  %v5595_v17 = vsel %vm5167_vm2, %v5584_v26, %v5577_v31  ;;  %v6356_v32 = vld [vmem:[#allocation4 + $0x20] sm:$0x7]  ;;  %v5849_v26 = vld [vmem:[%s8830_s5 + $0x10] sm:$0xff] }
 0x2eb   : > { %5567 = vst.msk [vmem:[#allocation4 + $0x11] sm:$0x7] %vm5534_vm10, %v5564_v19  ;;  %v5596_v45 = vsel %vm5169_vm3, %v5591_v14, %v5595_v17 }
 0x2ec   : > { %5599 = vst.msk [vmem:[#allocation4 + $0x19] sm:$0x7] %vm5534_vm10, %v5596_v45 }
 0x2ed   : > { %v5762_v59 = vpop.f32.mrf.mxu3 }
 0x2f2   : > { %v5766_v50 = vld [vmem:[#allocation4 + $0x10] sm:$0x7] }
 0x2f3   : > { %v5793_v16 = vld [vmem:[#allocation4 + $0x11] sm:$0x7]  ;;  %7218 = vmatmul.msk.f32.vlgmr.msrb.gmra.mxu0 %vm260_vm0, %v5766_v50  ;;  %v6063_v47 = vld [vmem:[#allocation4 + $0x18] sm:$0x7] }
 0x2f4   : > { %v5820_v30 = vld [vmem:[#allocation4 + $0x12] sm:$0x7]  ;;  %7220 = vmatmul.msk.f32.vlgmr.msra.gmra.mxu1 %vm260_vm0, %v5793_v16  ;;  %6005 = vmatpush.msrb.mxu0 %v7312_v25  ;;  %v6089_v3 = vld [vmem:[#allocation4 + $0x19] sm:$0x7]  ;;  %v6408_v25 = vld [vmem:[#allocation4 + $0x22] sm:$0x7] }
 0x2f5   : > { %7222 = vmatmul.msk.f32.vlgmr.msra.gmra.mxu2 %vm260_vm0, %v5820_v30  ;;  %6031 = vmatpush.msra.mxu1 %v8564_v15  ;;  %v5985_v57 = vld [vmem:[#allocation4 + $0x10] sm:$0x7]  ;;  %v6115_v0 = vld [vmem:[#allocation4 + $0x1a] sm:$0x7] }
 0x2f6   : > { %6057 = vmatpush.msra.mxu2 %v8580_v44  ;;  %v6011_v7 = vld [vmem:[#allocation4 + $0x11] sm:$0x7]  ;;  %v6277_v23 = vld [vmem:[#allocation4 + $0x18] sm:$0x7] }
 0x2f7   : > { %v6037_v20 = vld [vmem:[#allocation4 + $0x12] sm:$0x7]  ;;  %v6303_v36 = vld [vmem:[#allocation4 + $0x19] sm:$0x7] }
 0x2f8   : > { %v6199_v24 = vld [vmem:[#allocation4 + $0x10] sm:$0x7]  ;;  %v5850_v50 = vld [vmem:[%s8830_s5 + $0x18] sm:$0xff] }
 0x2f9   : > { %v6251_v16 = vld [vmem:[#allocation4 + $0x12] sm:$0x7]  ;;  %v6329_v30 = vld [vmem:[#allocation4 + $0x1a] sm:$0x7] }
 0x2fb   : > { %7228 = vmatmul.msk.f32.vlgmr.msra.gmra.mxu0 %vm260_vm0, %v5907_v10 }
 0x2fc   : > { %7230 = vmatmul.msk.f32.vlgmr.msrb.gmra.mxu1 %vm260_vm0, %v5933_v1  ;;  %6083 = vmatpush.msra.mxu0 %v8637_v22 }
 0x2fd   : > { %7232 = vmatmul.msk.f32.vlgmr.msrb.gmra.mxu2 %vm260_vm0, %v5959_v34  ;;  %6109 = vmatpush.msrb.mxu1 %v8642_v55 }
 0x2fe   : > { %6135 = vmatpush.msrb.mxu2 %v8647_v58 }
 0x303   : > { %7234 = vmatmul.msk.f32.vlgmr.msrb.gmra.mxu0 %vm260_vm0, %v5985_v57 }
 0x304   : > { %7236 = vmatmul.msk.f32.vlgmr.msra.gmra.mxu1 %vm260_vm0, %v6011_v7  ;;  %v7311_v7 = vld [vmem:[%s8829_s4] ss:$0 sm:$0xff] }
 0x305   : > { %7238 = vmatmul.msk.f32.vlgmr.msra.gmra.mxu2 %vm260_vm0, %v6037_v20  ;;  %6219 = vmatpush.msra.mxu1 %v7313_v43 }
 0x306   : > { %6245 = vmatpush.msra.mxu2 %v8542_v37  ;;  %v6225_v37 = vld [vmem:[#allocation4 + $0x11] sm:$0x7] }
 0x30b   : > { %7240 = vmatmul.msk.f32.vlgmr.msra.gmra.mxu0 %vm260_vm0, %v6063_v47 }
 0x30c   : > { %7242 = vmatmul.msk.f32.vlgmr.msrb.gmra.mxu1 %vm260_vm0, %v6089_v3 }
 0x30d   : > { %7244 = vmatmul.msk.f32.vlgmr.msrb.gmra.mxu2 %vm260_vm0, %v6115_v0  ;;  %6297 = vmatpush.msrb.mxu1 %v7259_v60 }
 0x30e   : > { %6323 = vmatpush.msrb.mxu2 %v8564_v15  ;;  %v7309_v15 = vld [vmem:[%s8829_s4] ss:$0 sm:$0xff] }
 0x30f   : > { %v5630_v49 = vadd.f32 %v7309_v15, %v5627_v28 }
 0x311   : > { %v5657_v61 = vadd.f32 %v5654_v56, %v5630_v49 }
 0x313   : > { %v5684_v9 = vadd.f32 %v5681_v39, %v5657_v61 }
 0x314   : > { %7254 = vmatmul.msk.f32.vlgmr.msra.gmra.mxu1 %vm260_vm0, %v6199_v24 }
 0x315   : > { %7256 = vmatmul.msk.f32.vlgmr.msra.gmra.mxu2 %vm260_vm0, %v6225_v37  ;;  %6376 = vmatpush.msra.mxu1 %v8637_v22  ;;  %v5735_v22 = vpop.f32.mrf.mxu2  ;;  %v5711_v38 = vadd.f32 %v5708_v13, %v5684_v9 }
 0x316   : > { %6402 = vmatpush.msra.mxu2 %v8642_v55 }
 0x317   : > { %v5738_v55 = vadd.f32 %v5735_v22, %v5711_v38 }
 0x319   : > { %v5765_v27 = vadd.f32 %v5762_v59, %v5738_v55 }
 0x31c   : > { %7260 = vmatmul.msk.f32.vlgmr.msrb.gmra.mxu1 %vm260_vm0, %v6277_v23 }
 0x31d   : > { %7262 = vmatmul.msk.f32.vlgmr.msrb.gmra.mxu2 %vm260_vm0, %v6303_v36 }
 0x324   : > { %7266 = vmatmul.msk.f32.vlgmr.msra.gmra.mxu1 %vm260_vm0, %v6356_v32 }
 0x325   : > { %7268 = vmatmul.msk.f32.vlgmr.msra.gmra.mxu2 %vm260_vm0, %v6382_v51 }
 0x370   : > { %v5789_v29 = vpop.f32.mrf.mxu0 }
 0x371   : > { %v5816_v2 = vpop.f32.mrf.mxu1  ;;  %v5792_v33 = vadd.f32 %v5789_v29, %v5765_v27 }
 0x373   : > { %v5819_v6 = vadd.f32 %v5816_v2, %v5792_v33 }
 0x378   : > { %v5843_v53 = vpop.f32.mrf.mxu2  ;;  %v5929_v8 = vpop.f32.mrf.mxu0 }
 0x379   : > { %v5846_v52 = vadd.f32 %v5843_v53, %v5819_v6  ;;  %v5955_v62 = vpop.f32.mrf.mxu1  ;;  %v5932_v54 = vadd.f32 %v7310_v41, %v5929_v8 }
 0x37b   : > { %7223 = vmatpush.msk.msrb.mxu3 %vm5864_vm11, %v5846_v52  ;;  %v5958_v12 = vadd.f32 %v5955_v62, %v5932_v54 }
 0x37c   : > { %7224 = vmatmul.msk.f32.vlgmr.msrb.gmra.mxu3 %vm5851_vm12, %v8745_v21 }
 0x37d   : > { %6271 = vmatpush.msra.mxu3 %v7314_v42 }
 0x37f   : > { %6349 = vmatpush.msrb.mxu3 %v8580_v44 }
 0x380   : > { %v5981_v4 = vpop.f32.mrf.mxu2  ;;  %v6007_v63 = vpop.f32.mrf.mxu0 }
 0x381   : > { %v5984_v46 = vadd.f32 %v5981_v4, %v5958_v12  ;;  %v6033_v5 = vpop.f32.mrf.mxu1 }
 0x383   : > { %v6010_v40 = vadd.f32 %v6007_v63, %v5984_v46 }
 0x384   : > { %7225 = vmatmul.msk.f32.gmra.mxu3 %vm5851_vm12, %v8757_v11 }
 0x385   : > { %v6036_v44 = vadd.f32 %v6033_v5, %v6010_v40 }
 0x388   : > { %v6059_v18 = vpop.f32.mrf.mxu2  ;;  %v6085_v31 = vpop.f32.mrf.mxu0 }
 0x389   : > { %v6062_v48 = vadd.f32 %v6059_v18, %v6036_v44  ;;  %v6111_v14 = vpop.f32.mrf.mxu1 }
 0x38b   : > { %v6088_v35 = vadd.f32 %v6085_v31, %v6062_v48 }
 0x38c   : > { %7226 = vmatmul.msk.f32.gmra.mxu3 %vm5851_vm12, %v5849_v26 }
 0x38d   : > { %v6114_v19 = vadd.f32 %v6111_v14, %v6088_v35 }
 0x390   : > { %v6137_v17 = vpop.f32.mrf.mxu2 }
 0x391   : > { %v6140_v45 = vadd.f32 %v6137_v17, %v6114_v19  ;;  %v6221_v34 = vpop.f32.mrf.mxu1 }
 0x392   : > { %v6224_v43 = vadd.f32 %v7311_v7, %v6221_v34 }
 0x393   : > { %7245 = vmatpush.msk.msrb.mxu0 %vm5864_vm11, %v6140_v45 }
 0x394   : > { %7227 = vmatmul.msk.f32.gmra.mxu3 %vm5851_vm12, %v5850_v50  ;;  %7246 = vmatmul.msk.f32.vlgmr.msrb.gmra.mxu0 %vm5851_vm12, %v8745_v21 }
 0x398   : > { %v6247_v20 = vpop.f32.mrf.mxu2 }
 0x399   : > { %v6250_v60 = vadd.f32 %v6247_v20, %v6224_v43  ;;  %v6299_v47 = vpop.f32.mrf.mxu1 }
 0x39c   : > { %7258 = vmatmul.msk.f32.vlgmr.msra.gmra.mxu3 %vm260_vm0, %v6251_v16  ;;  %7247 = vmatmul.msk.f32.gmra.mxu0 %vm5851_vm12, %v8757_v11 }
 0x39d   : > { %6428 = vmatpush.msra.mxu3 %v8647_v58 }
 0x3a0   : > { %v6325_v37 = vpop.f32.mrf.mxu2 }
 0x3a1   : > { %v6378_v28 = vpop.f32.mrf.mxu1 }
 0x3a4   : > { %7264 = vmatmul.msk.f32.vlgmr.msrb.gmra.mxu3 %vm260_vm0, %v6329_v30  ;;  %7248 = vmatmul.msk.f32.gmra.mxu0 %vm5851_vm12, %v5849_v26 }
 0x3a8   : > { %v6404_v56 = vpop.f32.mrf.mxu2 }
 0x3ac   : > { %7270 = vmatmul.msk.f32.vlgmr.msra.gmra.mxu3 %vm260_vm0, %v6408_v25  ;;  %7249 = vmatmul.msk.f32.gmra.mxu0 %vm5851_vm12, %v5850_v50 }
 0x3ff   : > { %v5885_v58 = vpop.f32.mrf.mxu3 }
 0x400   : > { %5898 = vst.msk [vmem:[%s8786_s23] sm:$0xff] %vm5897_vm13, %v5885_v58 }
 0x407   : > { %v5888_v10 = vpop.f32.mrf.mxu3 }
 0x408   : > { %5899 = vst.msk [vmem:[%s8786_s23 + $0x8] sm:$0xff] %vm5897_vm13, %v5888_v10 }
 0x40f   : > { %v5891_v1 = vpop.f32.mrf.mxu3 }
 0x410   : > { %5900 = vst.msk [vmem:[%s8786_s23 + $0x10] sm:$0xff] %vm5897_vm13, %v5891_v1 }
 0x411   : > { %v6177_v61 = vpop.f32.mrf.mxu0 }
 0x412   : > { %7250 = vst.msk [vmem:[%s8786_s23 + $0x20] sm:$0xff] %vm5897_vm13, %v6177_v61 }
 0x417   : > { %v5894_v57 = vpop.f32.mrf.mxu3 }
 0x418   : > { %5901 = vst.msk [vmem:[%s8786_s23 + $0x18] sm:$0xff] %vm5897_vm13, %v5894_v57 }
 0x419   : > { %v6180_v22 = vpop.f32.mrf.mxu0 }
 0x41a   : > { %7251 = vst.msk [vmem:[%s8786_s23 + $0x28] sm:$0xff] %vm5897_vm13, %v6180_v22 }
 0x41f   : > { %v6273_v3 = vpop.f32.mrf.mxu3 }
 0x420   : > { %v6276_v0 = vadd.f32 %v6273_v3, %v6250_v60 }
 0x421   : > { %v6183_v38 = vpop.f32.mrf.mxu0 }
 0x422   : > { %v6302_v24 = vadd.f32 %v6299_v47, %v6276_v0  ;;  %7252 = vst.msk [vmem:[%s8786_s23 + $0x30] sm:$0xff] %vm5897_vm13, %v6183_v38 }
 0x424   : > { %v6328_v23 = vadd.f32 %v6325_v37, %v6302_v24 }
 0x427   : > { %v6351_v36 = vpop.f32.mrf.mxu3 }
 0x428   : > { %v6354_v15 = vadd.f32 %v6351_v36, %v6328_v23 }
 0x429   : > { %v6186_v55 = vpop.f32.mrf.mxu0 }
 0x42a   : > { %v6381_v49 = vadd.f32 %v6378_v28, %v6354_v15  ;;  %7253 = vst.msk [vmem:[%s8786_s23 + $0x38] sm:$0xff] %vm5897_vm13, %v6186_v55 }
 0x42c   : > { %v6407_v39 = vadd.f32 %v6404_v56, %v6381_v49 }
 0x42f   : > { %v6430_v9 = vpop.f32.mrf.mxu3 }
 0x430   : > { %v6433_v13 = vadd.f32 %v6430_v9, %v6407_v39 }
 0x432   : > { %7271 = vmatpush.msk.msrb.mxu1 %vm5864_vm11, %v6433_v13 }
 0x433   : > { %7272 = vmatmul.msk.f32.vlgmr.msrb.gmra.mxu1 %vm5851_vm12, %v8745_v21 }
 0x43b   : > { %7273 = vmatmul.msk.f32.gmra.mxu1 %vm5851_vm12, %v8757_v11 }
 0x443   : > { %7274 = vmatmul.msk.f32.gmra.mxu1 %vm5851_vm12, %v5849_v26 }
 0x44b   : > { %7275 = vmatmul.msk.f32.gmra.mxu1 %vm5851_vm12, %v5850_v50 }
 0x4b0   : > { %v6470_v59 = vpop.f32.mrf.mxu1 }
 0x4b1   : > { %7276 = vst.msk [vmem:[%s8786_s23 + $0x40] sm:$0xff] %vm5897_vm13, %v6470_v59 }
 0x4b8   : > { %v6473_v27 = vpop.f32.mrf.mxu1 }
 0x4b9   : > { %7277 = vst.msk [vmem:[%s8786_s23 + $0x48] sm:$0xff] %vm5897_vm13, %v6473_v27 }
 0x4c0   : > { %v6476_v29 = vpop.f32.mrf.mxu1 }
 0x4c1   : > { %7278 = vst.msk [vmem:[%s8786_s23 + $0x50] sm:$0xff] %vm5897_vm13, %v6476_v29 }
 0x4c8   : > { %v6479_v2 = vpop.f32.mrf.mxu1 }
 0x4c9   : > { %7279 = vst.msk [vmem:[%s8786_s23 + $0x58] sm:$0xff] %vm5897_vm13, %v6479_v2 }
 0x4ca PF: > { %s16_s21 = sadd.s32 1, %s7321_s21  }
 0x4cb   : > { %p13_p4 = scmp.ge.s32.totalorder %s16_s21, 4  }
 0x4cd   :  { %15 = sbr.rel (!%p13_p4) target bundleno = 1 (0x1), region = 173 }

</bundles_post_ra>
